<compile_context>
chip_gen: v7x
topology: tpu7x:2x2x1
jax: 0.10.0
libtpu: 0.0.40
codegen_flags: <defaults>
</compile_context>

<pallas_src>
import jax
import jax.numpy as jnp
from jax.experimental import pallas as pl
from jax.experimental.pallas import tpu as pltpu

NC = 3
NGF = 64
NZ = 100
EPS = 1e-5


def _pick_tile(n, cap):
    if n <= cap:
        return n
    assert n % cap == 0, (n, cap)  # TODO(synk): pad ragged row counts for odd batch sizes
    return cap


# ----------------------------------------------------------------------------
# Pallas kernels
# ----------------------------------------------------------------------------
def _mm_stats_kernel(x_ref, w_ref, y_ref, s_ref, q_ref):
    """One-shot matmul (bf16 in, f32 acc) + per-column sum / sum-of-squares."""
    acc = jnp.dot(x_ref[...], w_ref[...], preferred_element_type=jnp.float32)
    y_ref[...] = acc.astype(y_ref.dtype)
    s_ref[...] = jnp.sum(acc, axis=0, keepdims=True)
    q_ref[...] = jnp.sum(acc * acc, axis=0, keepdims=True)


def _mm_tanh_kernel(wt_ref, xt_ref, o_ref):
    """Transposed matmul with fused tanh epilogue (final layer, lane-dense)."""
    acc = jnp.dot(wt_ref[...], xt_ref[...], preferred_element_type=jnp.float32)
    o_ref[...] = jnp.tanh(acc)


def _affine_relu_kernel(y_ref, a_ref, b_ref, o_ref):
    """Per-channel BN affine + ReLU; math in f32, bf16 out for next layer."""
    z = y_ref[...].astype(jnp.float32) * a_ref[...] + b_ref[...]
    o_ref[...] = jnp.maximum(z, 0.0).astype(o_ref.dtype)


# ----------------------------------------------------------------------------
# Pallas wrappers
# ----------------------------------------------------------------------------
def matmul_stats_cols(x, w, *, tn=2048):
    """y = x @ w (lane-dense columns) + per-column BN partials; grid over cols."""
    M, K = x.shape
    Ntot = w.shape[1]
    tn = _pick_tile(Ntot, tn)
    return pl.pallas_call(
        _mm_stats_kernel,
        out_shape=(jax.ShapeDtypeStruct((M, Ntot), jnp.bfloat16),
                   jax.ShapeDtypeStruct((1, Ntot), jnp.float32),
                   jax.ShapeDtypeStruct((1, Ntot), jnp.float32)),
        grid_spec=pltpu.PrefetchScalarGridSpec(
            num_scalar_prefetch=0,
            grid=(Ntot // tn,),
            in_specs=[pl.BlockSpec((M, K), lambda j: (0, 0)),
                      pl.BlockSpec((K, tn), lambda j: (0, j))],
            out_specs=(pl.BlockSpec((M, tn), lambda j: (0, j)),
                       pl.BlockSpec((1, tn), lambda j: (0, j)),
                       pl.BlockSpec((1, tn), lambda j: (0, j)))),
        compiler_params=pltpu.CompilerParams(
            dimension_semantics=("parallel",)),
    )(x, w)


def conv_mm_stats(xcol, wm, *, tm=1024):
    """Per-parity matmul y[p] = xcol[p] @ wm[p] + per-tile BN partial stats."""
    P, M, K = xcol.shape
    C = wm.shape[2]
    tm = _pick_tile(M, tm)
    nt = M // tm
    return pl.pallas_call(
        _mm_stats_kernel,
        out_shape=(jax.ShapeDtypeStruct((P, M, C), jnp.bfloat16),
                   jax.ShapeDtypeStruct((P * nt, 1, C), jnp.float32),
                   jax.ShapeDtypeStruct((P * nt, 1, C), jnp.float32)),
        grid_spec=pltpu.PrefetchScalarGridSpec(
            num_scalar_prefetch=0,
            grid=(P, nt),
            in_specs=[pl.BlockSpec((None, tm, K), lambda p, i: (p, i, 0)),
                      pl.BlockSpec((None, K, C), lambda p, i: (p, 0, 0))],
            out_specs=(pl.BlockSpec((None, tm, C), lambda p, i: (p, i, 0)),
                       pl.BlockSpec((None, 1, C), lambda p, i: (p * nt + i, 0, 0)),
                       pl.BlockSpec((None, 1, C), lambda p, i: (p * nt + i, 0, 0)))),
        compiler_params=pltpu.CompilerParams(
            dimension_semantics=("parallel", "parallel")),
    )(xcol, wm)


def conv_mm_tanh_T(wT, xT, *, tn=4096):
    """Final layer: out[p] = tanh(wT[p] @ xT[p]) with lane-dense (Cout, M) out."""
    P, Co, K = wT.shape
    M = xT.shape[2]
    tn = _pick_tile(M, tn)
    return pl.pallas_call(
        _mm_tanh_kernel,
        out_shape=jax.ShapeDtypeStruct((P, Co, M), jnp.float32),
        grid_spec=pltpu.PrefetchScalarGridSpec(
            num_scalar_prefetch=0,
            grid=(P, M // tn),
            in_specs=[pl.BlockSpec((None, Co, K), lambda p, j: (p, 0, 0)),
                      pl.BlockSpec((None, K, tn), lambda p, j: (p, 0, j))],
            out_specs=pl.BlockSpec((None, Co, tn), lambda p, j: (p, 0, j))),
        compiler_params=pltpu.CompilerParams(
            dimension_semantics=("parallel", "parallel")),
    )(wT, xT)


def affine_relu(y, scale, shift, *, tm=2048):
    M, C = y.shape
    tm = _pick_tile(M, tm)
    return pl.pallas_call(
        _affine_relu_kernel,
        out_shape=jax.ShapeDtypeStruct((M, C), jnp.bfloat16),
        grid_spec=pltpu.PrefetchScalarGridSpec(
            num_scalar_prefetch=0,
            grid=(M // tm,),
            in_specs=[pl.BlockSpec((tm, C), lambda i: (i, 0)),
                      pl.BlockSpec((1, C), lambda i: (0, 0)),
                      pl.BlockSpec((1, C), lambda i: (0, 0))],
            out_specs=pl.BlockSpec((tm, C), lambda i: (i, 0))),
        compiler_params=pltpu.CompilerParams(
            dimension_semantics=("parallel",)),
    )(y, scale.reshape(1, C).astype(jnp.float32),
      shift.reshape(1, C).astype(jnp.float32))


# ----------------------------------------------------------------------------
# JAX glue: sub-pixel patch extraction, BN scalar finishing, weight packing
# ----------------------------------------------------------------------------
def _parity_k_indices(py, px):
    # Output row oy = 2m+py uses kernel rows kys with input rows m-1/m or m/m+1.
    kys = (3, 1) if py == 0 else (2, 0)
    kxs = (3, 1) if px == 0 else (2, 0)
    return kys, kxs


def subpixel_cols(h, py, px):
    """(N,H,W,C) NHWC -> (N*H*W, 4*C) patch matrix for output parity (py, px)."""
    N, H, W, C = h.shape
    rp = (1, 0) if py == 0 else (0, 1)
    cp = (1, 0) if px == 0 else (0, 1)
    hp = jnp.pad(h, ((0, 0), rp, cp, (0, 0)))
    pats = [hp[:, r:r + H, c:c + W, :] for r in (0, 1) for c in (0, 1)]
    return jnp.stack(pats, axis=3).reshape(N * H * W, 4 * C)


def subpixel_cols_T(h, py, px):
    """Transposed patch matrix (4*C, N*H*W) for the lane-dense final layer."""
    N, H, W, C = h.shape
    hT = jnp.transpose(h, (3, 0, 1, 2))
    rp = (1, 0) if py == 0 else (0, 1)
    cp = (1, 0) if px == 0 else (0, 1)
    hp = jnp.pad(hT, ((0, 0), (0, 0), rp, cp))
    pats = [hp[:, :, r:r + H, c:c + W] for r in (0, 1) for c in (0, 1)]
    return jnp.stack(pats, axis=0).reshape(4 * C, N * H * W)


def bn_scale_shift(s, q, count, gamma, beta):
    mean = s / count
    var = jnp.maximum(q / count - mean * mean, 0.0)   # biased var, clamp >= 0
    scale = gamma * jax.lax.rsqrt(var + EPS)
    return scale, beta - mean * scale


def init_params(key):
    chans = [NZ, NGF * 8, NGF * 4, NGF * 2, NGF, NC]
    keys = jax.random.split(key, 5)
    params = {}
    for i in range(5):
        cin, cout = chans[i], chans[i + 1]
        params[f"w{i}"] = (0.02 * jax.random.normal(
            keys[i], (cin, cout, 4, 4))).astype(jnp.float32)   # PyTorch ConvT layout
        if i < 4:
            params[f"gamma{i}"] = jnp.ones((cout,), jnp.float32)
            params[f"beta{i}"] = jnp.zeros((cout,), jnp.float32)
    return params


def prepare_params(params):
    """Pre-pack weights into matmul layout (bf16) once, outside the jitted fwd."""
    prep = {"gamma0": params["gamma0"], "beta0": params["beta0"]}
    # Layer 0: 1x1-input ConvTranspose == z @ W; output columns ordered (ky,kx,co).
    prep["w0m"] = params["w0"].transpose(0, 2, 3, 1).reshape(
        NZ, 16 * NGF * 8).astype(jnp.bfloat16)
    for i in range(1, 5):
        w = params[f"w{i}"]                        # (Cin, Cout, 4, 4)
        cin, cout = w.shape[0], w.shape[1]
        mats = []
        for py in (0, 1):
            for px in (0, 1):
                kys, kxs = _parity_k_indices(py, px)
                sub = jnp.stack([w[:, :, ky, kx] for ky in kys for kx in kxs], 0)
                mats.append(sub.reshape(4 * cin, cout))   # K ordered (patch, ci)
        wm = jnp.stack(mats, 0).astype(jnp.bfloat16)       # (4, 4*Cin, Cout)
        if i < 4:
            prep[f"wm{i}"] = wm
            prep[f"gamma{i}"] = params[f"gamma{i}"]
            prep[f"beta{i}"] = params[f"beta{i}"]
        else:
            prep["wm4T"] = jnp.transpose(wm, (0, 2, 1))    # (4, NC, 4*Cin)
    return prep


# ----------------------------------------------------------------------------
# Generator forward
# ----------------------------------------------------------------------------
def generator_forward(prep, z_nchw):
    N = z_nchw.shape[0]

    # Layer 0: ConvTranspose2d(nz, ngf*8, 4, 1, 0) on a 1x1 input == matmul.
    z = z_nchw.reshape(N, NZ).astype(jnp.bfloat16)
    y0, s0, q0 = matmul_stats_cols(z, prep["w0m"])        # y0: (N, 16*512) bf16
    s0 = s0.reshape(16, NGF * 8).sum(0)                   # columns are (ky,kx,co)
    q0 = q0.reshape(16, NGF * 8).sum(0)
    scale, shift = bn_scale_shift(s0, q0, N * 16, prep["gamma0"], prep["beta0"])
    h = affine_relu(y0.reshape(N * 16, NGF * 8), scale, shift)
    h = h.reshape(N, 4, 4, NGF * 8)                       # NHWC

    # Layers 1..3: sub-pixel ConvTranspose2d(k=4, s=2, p=1) + BN + ReLU.
    for i in (1, 2, 3):
        n, H, W, _ = h.shape
        M = n * H * W
        xcols = jnp.stack([subpixel_cols(h, py, px)
                           for py in (0, 1) for px in (0, 1)], 0)  # (4, M, 4*Cin)
        y, s, q = conv_mm_stats(xcols, prep[f"wm{i}"])             # (4, M, Cout)
        Cout = y.shape[-1]
        scale, shift = bn_scale_shift(s.sum((0, 1)), q.sum((0, 1)), 4 * M,
                                      prep[f"gamma{i}"], prep[f"beta{i}"])
        ya = affine_relu(y.reshape(4 * M, Cout), scale, shift)
        # interleave the 4 parity classes back into (N, 2H, 2W, Cout)
        h = ya.reshape(2, 2, n, H, W, Cout).transpose(
            2, 3, 0, 4, 1, 5).reshape(n, 2 * H, 2 * W, Cout)

    # Layer 4: sub-pixel ConvTranspose + fused Tanh, lane-dense transposed out.
    n, H, W, _ = h.shape
    xTs = jnp.stack([subpixel_cols_T(h, py, px)
                     for py in (0, 1) for px in (0, 1)], 0)        # (4, 4*Cin, M)
    outT = conv_mm_tanh_T(prep["wm4T"], xTs)                       # (4, 3, M) f32
    out = outT.reshape(2, 2, NC, n, H, W).transpose(
        3, 2, 4, 0, 5, 1).reshape(n, NC, 2 * H, 2 * W)             # NCHW
    return out


if __name__ == "__main__":
    key = jax.random.PRNGKey(0)
    pkey, zkey = jax.random.split(key)
    params = init_params(pkey)
    prep = prepare_params(params)          # weight packing done once, outside jit

    batch = 2
    z = jax.random.normal(zkey, (batch, NZ, 1, 1), dtype=jnp.float32)

    fwd = jax.jit(generator_forward)
    out = jax.block_until_ready(fwd(prep, z))

    assert out.shape == (batch, NC, 64, 64), out.shape
    assert bool(jnp.all(jnp.isfinite(out)))
    assert bool(jnp.all(jnp.abs(out) <= 1.0 + 1e-6))  # tanh range
    print("KERNEL_OK")
</pallas_src>

<mosaic_0001>
module attributes {stable_mosaic.version = 11 : i64} {
  func.func @_mm_stats_kernel(%arg0: i32, %arg1: memref<2x100xbf16, #tpu.memory_space<vmem>>, %arg2: memref<100x2048xbf16, #tpu.memory_space<vmem>>, %arg3: memref<2x2048xbf16, #tpu.memory_space<vmem>>, %arg4: memref<1x2048xf32, #tpu.memory_space<vmem>>, %arg5: memref<1x2048xf32, #tpu.memory_space<vmem>>) attributes {dimension_semantics = [#tpu.dimension_semantics<parallel>], iteration_bounds = array<i64: 4>, scalar_prefetch = 0 : i64, scratch_operands = 0 : i64, tpu.core_type = #tpu.core_type<tc>, window_params = [{pipeline_mode = #tpu.pipeline_mode<synchronous>, transform_indices = @transform_0, window_bounds = array<i64: 2, 100>}, {transform_indices = @transform_1, window_bounds = array<i64: 100, 2048>}, {transform_indices = @transform_2, window_bounds = array<i64: 2, 2048>}, {transform_indices = @transform_3, window_bounds = array<i64: 1, 2048>}, {transform_indices = @transform_4, window_bounds = array<i64: 1, 2048>}]} {
    %c0 = arith.constant 0 : index
    %c0_0 = arith.constant 0 : index
    %0 = vector.load %arg1[%c0, %c0_0] : memref<2x100xbf16, #tpu.memory_space<vmem>>, vector<2x100xbf16>
    %c0_1 = arith.constant 0 : index
    %c0_2 = arith.constant 0 : index
    %1 = vector.load %arg2[%c0_1, %c0_2] : memref<100x2048xbf16, #tpu.memory_space<vmem>>, vector<100x2048xbf16>
    %cst = arith.constant dense<0.000000e+00> : vector<2x2048xf32>
    %2 = tpu.matmul %0, %1, %cst {dimension_numbers = #tpu.dot_dimension_numbers<[1], [0], [0], [1], [0, 0, 1, 1], [], []>} : vector<2x100xbf16>, vector<100x2048xbf16>, vector<2x2048xf32> -> vector<2x2048xf32>
    %3 = arith.truncf %2 : vector<2x2048xf32> to vector<2x2048xbf16>
    %c0_3 = arith.constant 0 : index
    %c0_4 = arith.constant 0 : index
    %4 = vector.load %arg3[%c0_3, %c0_4] : memref<2x2048xbf16, #tpu.memory_space<vmem>>, vector<2x2048xbf16>
    tpu.vector_store %arg3[%c0_3, %c0_4], %3 {strides = array<i32>} : memref<2x2048xbf16, #tpu.memory_space<vmem>>, vector<2x2048xbf16>,
    %cst_5 = arith.constant dense<0.000000e+00> : vector<2048xf32>
    %5 = vector.multi_reduction <add>, %2, %cst_5 [0] : vector<2x2048xf32> to vector<2048xf32>
    %6 = vector.shape_cast %5 : vector<2048xf32> to vector<1x2048xf32>
    %c0_6 = arith.constant 0 : index
    %c0_7 = arith.constant 0 : index
    %7 = vector.load %arg4[%c0_6, %c0_7] : memref<1x2048xf32, #tpu.memory_space<vmem>>, vector<1x2048xf32>
    tpu.vector_store %arg4[%c0_6, %c0_7], %6 {strides = array<i32>} : memref<1x2048xf32, #tpu.memory_space<vmem>>, vector<1x2048xf32>,
    %8 = arith.mulf %2, %2 : vector<2x2048xf32>
    %cst_8 = arith.constant dense<0.000000e+00> : vector<2048xf32>
    %9 = vector.multi_reduction <add>, %8, %cst_8 [0] : vector<2x2048xf32> to vector<2048xf32>
    %10 = vector.shape_cast %9 : vector<2048xf32> to vector<1x2048xf32>
    %c0_9 = arith.constant 0 : index
    %c0_10 = arith.constant 0 : index
    %11 = vector.load %arg5[%c0_9, %c0_10] : memref<1x2048xf32, #tpu.memory_space<vmem>>, vector<1x2048xf32>
    tpu.vector_store %arg5[%c0_9, %c0_10], %10 {strides = array<i32>} : memref<1x2048xf32, #tpu.memory_space<vmem>>, vector<1x2048xf32>,
    return
  }
  func.func @transform_0(%arg0: i32) -> (i32, i32) {
    %c0_i32 = arith.constant 0 : i32
    %c0_i32_0 = arith.constant 0 : i32
    %c0_i32_1 = arith.constant 0 : i32
    return %c0_i32, %c0_i32_0 : i32, i32
  }
  func.func @transform_1(%arg0: i32) -> (i32, i32) {
    %c0_i32 = arith.constant 0 : i32
    %c0_i32_0 = arith.constant 0 : i32
    return %c0_i32, %arg0 : i32, i32
  }
  func.func @transform_2(%arg0: i32) -> (i32, i32) {
    %c0_i32 = arith.constant 0 : i32
    %c0_i32_0 = arith.constant 0 : i32
    return %c0_i32, %arg0 : i32, i32
  }
  func.func @transform_3(%arg0: i32) -> (i32, i32) {
    %c0_i32 = arith.constant 0 : i32
    %c0_i32_0 = arith.constant 0 : i32
    return %c0_i32, %arg0 : i32, i32
  }
  func.func @transform_4(%arg0: i32) -> (i32, i32) {
    %c0_i32 = arith.constant 0 : i32
    %c0_i32_0 = arith.constant 0 : i32
    return %c0_i32, %arg0 : i32, i32
  }
}

module attributes {stable_mosaic.version = 11 : i64} {
  func.func @_affine_relu_kernel(%arg0: i32, %arg1: memref<32x512xbf16, #tpu.memory_space<vmem>>, %arg2: memref<1x512xf32, #tpu.memory_space<vmem>>, %arg3: memref<1x512xf32, #tpu.memory_space<vmem>>, %arg4: memref<32x512xbf16, #tpu.memory_space<vmem>>) attributes {dimension_semantics = [#tpu.dimension_semantics<parallel>], iteration_bounds = array<i64: 1>, scalar_prefetch = 0 : i64, scratch_operands = 0 : i64, tpu.core_type = #tpu.core_type<tc>, window_params = [{transform_indices = @transform_0, window_bounds = array<i64: 32, 512>}, {pipeline_mode = #tpu.pipeline_mode<synchronous>, transform_indices = @transform_1, window_bounds = array<i64: 1, 512>}, {pipeline_mode = #tpu.pipeline_mode<synchronous>, transform_indices = @transform_2, window_bounds = array<i64: 1, 512>}, {transform_indices = @transform_3, window_bounds = array<i64: 32, 512>}]} {
    %c0 = arith.constant 0 : index
    %c0_0 = arith.constant 0 : index
    %0 = vector.load %arg1[%c0, %c0_0] : memref<32x512xbf16, #tpu.memory_space<vmem>>, vector<32x512xbf16>
    %1 = arith.extf %0 : vector<32x512xbf16> to vector<32x512xf32>
    %c0_1 = arith.constant 0 : index
    %c0_2 = arith.constant 0 : index
    %2 = vector.load %arg2[%c0_1, %c0_2] : memref<1x512xf32, #tpu.memory_space<vmem>>, vector<1x512xf32>
    %3 = vector.broadcast %2 : vector<1x512xf32> to vector<32x512xf32>
    %4 = arith.mulf %1, %3 : vector<32x512xf32>
    %c0_3 = arith.constant 0 : index
    %c0_4 = arith.constant 0 : index
    %5 = vector.load %arg3[%c0_3, %c0_4] : memref<1x512xf32, #tpu.memory_space<vmem>>, vector<1x512xf32>
    %6 = vector.broadcast %5 : vector<1x512xf32> to vector<32x512xf32>
    %7 = arith.addf %4, %6 : vector<32x512xf32>
    %cst = arith.constant 0.000000e+00 : f32
    %8 = vector.broadcast %cst : f32 to vector<32x512xf32>
    %9 = arith.maximumf %7, %8 : vector<32x512xf32>
    %10 = arith.truncf %9 : vector<32x512xf32> to vector<32x512xbf16>
    %c0_5 = arith.constant 0 : index
    %c0_6 = arith.constant 0 : index
    %11 = vector.load %arg4[%c0_5, %c0_6] : memref<32x512xbf16, #tpu.memory_space<vmem>>, vector<32x512xbf16>
    tpu.vector_store %arg4[%c0_5, %c0_6], %10 {strides = array<i32>} : memref<32x512xbf16, #tpu.memory_space<vmem>>, vector<32x512xbf16>,
    return
  }
  func.func @transform_0(%arg0: i32) -> (i32, i32) {
    %c0_i32 = arith.constant 0 : i32
    %c0_i32_0 = arith.constant 0 : i32
    return %arg0, %c0_i32 : i32, i32
  }
  func.func @transform_1(%arg0: i32) -> (i32, i32) {
    %c0_i32 = arith.constant 0 : i32
    %c0_i32_0 = arith.constant 0 : i32
    %c0_i32_1 = arith.constant 0 : i32
    return %c0_i32, %c0_i32_0 : i32, i32
  }
  func.func @transform_2(%arg0: i32) -> (i32, i32) {
    %c0_i32 = arith.constant 0 : i32
    %c0_i32_0 = arith.constant 0 : i32
    %c0_i32_1 = arith.constant 0 : i32
    return %c0_i32, %c0_i32_0 : i32, i32
  }
  func.func @transform_3(%arg0: i32) -> (i32, i32) {
    %c0_i32 = arith.constant 0 : i32
    %c0_i32_0 = arith.constant 0 : i32
    return %arg0, %c0_i32 : i32, i32
  }
}

module attributes {stable_mosaic.version = 11 : i64} {
  func.func @_mm_stats_kernel(%arg0: i32, %arg1: i32, %arg2: memref<1x32x2048xbf16, #tpu.memory_space<vmem>>, %arg3: memref<1x2048x256xbf16, #tpu.memory_space<vmem>>, %arg4: memref<1x32x256xbf16, #tpu.memory_space<vmem>>, %arg5: memref<1x1x256xf32, #tpu.memory_space<vmem>>, %arg6: memref<1x1x256xf32, #tpu.memory_space<vmem>>) attributes {dimension_semantics = [#tpu.dimension_semantics<parallel>, #tpu.dimension_semantics<parallel>], iteration_bounds = array<i64: 4, 1>, scalar_prefetch = 0 : i64, scratch_operands = 0 : i64, tpu.core_type = #tpu.core_type<tc>, window_params = [{transform_indices = @transform_0, window_bounds = array<i64: 1, 32, 2048>}, {transform_indices = @transform_1, window_bounds = array<i64: 1, 2048, 256>}, {transform_indices = @transform_2, window_bounds = array<i64: 1, 32, 256>}, {transform_indices = @transform_3, window_bounds = array<i64: 1, 1, 256>}, {transform_indices = @transform_4, window_bounds = array<i64: 1, 1, 256>}]} {
    %c0 = arith.constant 0 : index
    %c0_0 = arith.constant 0 : index
    %c0_1 = arith.constant 0 : index
    %0 = vector.load %arg2[%c0, %c0_0, %c0_1] : memref<1x32x2048xbf16, #tpu.memory_space<vmem>>, vector<1x32x2048xbf16>
    %1 = vector.shape_cast %0 : vector<1x32x2048xbf16> to vector<32x2048xbf16>
    %c0_2 = arith.constant 0 : index
    %c0_3 = arith.constant 0 : index
    %c0_4 = arith.constant 0 : index
    %2 = vector.load %arg3[%c0_2, %c0_3, %c0_4] : memref<1x2048x256xbf16, #tpu.memory_space<vmem>>, vector<1x2048x256xbf16>
    %3 = vector.shape_cast %2 : vector<1x2048x256xbf16> to vector<2048x256xbf16>
    %cst = arith.constant dense<0.000000e+00> : vector<32x256xf32>
    %4 = tpu.matmul %1, %3, %cst {dimension_numbers = #tpu.dot_dimension_numbers<[1], [0], [0], [1], [0, 0, 1, 1], [], []>} : vector<32x2048xbf16>, vector<2048x256xbf16>, vector<32x256xf32> -> vector<32x256xf32>
    %5 = arith.truncf %4 : vector<32x256xf32> to vector<32x256xbf16>
    %c0_5 = arith.constant 0 : index
    %c0_6 = arith.constant 0 : index
    %c0_7 = arith.constant 0 : index
    %6 = vector.load %arg4[%c0_5, %c0_6, %c0_7] : memref<1x32x256xbf16, #tpu.memory_space<vmem>>, vector<1x32x256xbf16>
    %7 = vector.shape_cast %6 : vector<1x32x256xbf16> to vector<32x256xbf16>
    %8 = vector.shape_cast %5 : vector<32x256xbf16> to vector<1x32x256xbf16>
    tpu.vector_store %arg4[%c0_5, %c0_6, %c0_7], %8 {strides = array<i32>} : memref<1x32x256xbf16, #tpu.memory_space<vmem>>, vector<1x32x256xbf16>,
    %cst_8 = arith.constant dense<0.000000e+00> : vector<256xf32>
    %9 = vector.multi_reduction <add>, %4, %cst_8 [0] : vector<32x256xf32> to vector<256xf32>
    %10 = vector.shape_cast %9 : vector<256xf32> to vector<1x256xf32>
    %c0_9 = arith.constant 0 : index
    %c0_10 = arith.constant 0 : index
    %c0_11 = arith.constant 0 : index
    %11 = vector.load %arg5[%c0_9, %c0_10, %c0_11] : memref<1x1x256xf32, #tpu.memory_space<vmem>>, vector<1x1x256xf32>
    %12 = vector.shape_cast %11 : vector<1x1x256xf32> to vector<1x256xf32>
    %13 = vector.shape_cast %10 : vector<1x256xf32> to vector<1x1x256xf32>
    tpu.vector_store %arg5[%c0_9, %c0_10, %c0_11], %13 {strides = array<i32>} : memref<1x1x256xf32, #tpu.memory_space<vmem>>, vector<1x1x256xf32>,
    %14 = arith.mulf %4, %4 : vector<32x256xf32>
    %cst_12 = arith.constant dense<0.000000e+00> : vector<256xf32>
    %15 = vector.multi_reduction <add>, %14, %cst_12 [0] : vector<32x256xf32> to vector<256xf32>
    %16 = vector.shape_cast %15 : vector<256xf32> to vector<1x256xf32>
    %c0_13 = arith.constant 0 : index
    %c0_14 = arith.constant 0 : index
    %c0_15 = arith.constant 0 : index
    %17 = vector.load %arg6[%c0_13, %c0_14, %c0_15] : memref<1x1x256xf32, #tpu.memory_space<vmem>>, vector<1x1x256xf32>
    %18 = vector.shape_cast %17 : vector<1x1x256xf32> to vector<1x256xf32>
    %19 = vector.shape_cast %16 : vector<1x256xf32> to vector<1x1x256xf32>
    tpu.vector_store %arg6[%c0_13, %c0_14, %c0_15], %19 {strides = array<i32>} : memref<1x1x256xf32, #tpu.memory_space<vmem>>, vector<1x1x256xf32>,
    return
  }
  func.func @transform_0(%arg0: i32, %arg1: i32) -> (i32, i32, i32) {
    %c0_i32 = arith.constant 0 : i32
    %c0_i32_0 = arith.constant 0 : i32
    return %arg0, %arg1, %c0_i32 : i32, i32, i32
  }
  func.func @transform_1(%arg0: i32, %arg1: i32) -> (i32, i32, i32) {
    %c0_i32 = arith.constant 0 : i32
    %c0_i32_0 = arith.constant 0 : i32
    %c0_i32_1 = arith.constant 0 : i32
    return %arg0, %c0_i32, %c0_i32_0 : i32, i32, i32
  }
  func.func @transform_2(%arg0: i32, %arg1: i32) -> (i32, i32, i32) {
    %c0_i32 = arith.constant 0 : i32
    %c0_i32_0 = arith.constant 0 : i32
    return %arg0, %arg1, %c0_i32 : i32, i32, i32
  }
  func.func @transform_3(%arg0: i32, %arg1: i32) -> (i32, i32, i32) {
    %c1_i32 = arith.constant 1 : i32
    %0 = arith.muli %arg0, %c1_i32 : i32
    %1 = arith.addi %0, %arg1 : i32
    %c0_i32 = arith.constant 0 : i32
    %c0_i32_0 = arith.constant 0 : i32
    %c0_i32_1 = arith.constant 0 : i32
    return %1, %c0_i32, %c0_i32_0 : i32, i32, i32
  }
  func.func @transform_4(%arg0: i32, %arg1: i32) -> (i32, i32, i32) {
    %c1_i32 = arith.constant 1 : i32
    %0 = arith.muli %arg0, %c1_i32 : i32
    %1 = arith.addi %0, %arg1 : i32
    %c0_i32 = arith.constant 0 : i32
    %c0_i32_0 = arith.constant 0 : i32
    %c0_i32_1 = arith.constant 0 : i32
    return %1, %c0_i32, %c0_i32_0 : i32, i32, i32
  }
}

module attributes {stable_mosaic.version = 11 : i64} {
  func.func @_affine_relu_kernel(%arg0: i32, %arg1: memref<128x256xbf16, #tpu.memory_space<vmem>>, %arg2: memref<1x256xf32, #tpu.memory_space<vmem>>, %arg3: memref<1x256xf32, #tpu.memory_space<vmem>>, %arg4: memref<128x256xbf16, #tpu.memory_space<vmem>>) attributes {dimension_semantics = [#tpu.dimension_semantics<parallel>], iteration_bounds = array<i64: 1>, scalar_prefetch = 0 : i64, scratch_operands = 0 : i64, tpu.core_type = #tpu.core_type<tc>, window_params = [{transform_indices = @transform_0, window_bounds = array<i64: 128, 256>}, {pipeline_mode = #tpu.pipeline_mode<synchronous>, transform_indices = @transform_1, window_bounds = array<i64: 1, 256>}, {pipeline_mode = #tpu.pipeline_mode<synchronous>, transform_indices = @transform_2, window_bounds = array<i64: 1, 256>}, {transform_indices = @transform_3, window_bounds = array<i64: 128, 256>}]} {
    %c0 = arith.constant 0 : index
    %c0_0 = arith.constant 0 : index
    %0 = vector.load %arg1[%c0, %c0_0] : memref<128x256xbf16, #tpu.memory_space<vmem>>, vector<128x256xbf16>
    %1 = arith.extf %0 : vector<128x256xbf16> to vector<128x256xf32>
    %c0_1 = arith.constant 0 : index
    %c0_2 = arith.constant 0 : index
    %2 = vector.load %arg2[%c0_1, %c0_2] : memref<1x256xf32, #tpu.memory_space<vmem>>, vector<1x256xf32>
    %3 = vector.broadcast %2 : vector<1x256xf32> to vector<128x256xf32>
    %4 = arith.mulf %1, %3 : vector<128x256xf32>
    %c0_3 = arith.constant 0 : index
    %c0_4 = arith.constant 0 : index
    %5 = vector.load %arg3[%c0_3, %c0_4] : memref<1x256xf32, #tpu.memory_space<vmem>>, vector<1x256xf32>
    %6 = vector.broadcast %5 : vector<1x256xf32> to vector<128x256xf32>
    %7 = arith.addf %4, %6 : vector<128x256xf32>
    %cst = arith.constant 0.000000e+00 : f32
    %8 = vector.broadcast %cst : f32 to vector<128x256xf32>
    %9 = arith.maximumf %7, %8 : vector<128x256xf32>
    %10 = arith.truncf %9 : vector<128x256xf32> to vector<128x256xbf16>
    %c0_5 = arith.constant 0 : index
    %c0_6 = arith.constant 0 : index
    %11 = vector.load %arg4[%c0_5, %c0_6] : memref<128x256xbf16, #tpu.memory_space<vmem>>, vector<128x256xbf16>
    tpu.vector_store %arg4[%c0_5, %c0_6], %10 {strides = array<i32>} : memref<128x256xbf16, #tpu.memory_space<vmem>>, vector<128x256xbf16>,
    return
  }
  func.func @transform_0(%arg0: i32) -> (i32, i32) {
    %c0_i32 = arith.constant 0 : i32
    %c0_i32_0 = arith.constant 0 : i32
    return %arg0, %c0_i32 : i32, i32
  }
  func.func @transform_1(%arg0: i32) -> (i32, i32) {
    %c0_i32 = arith.constant 0 : i32
    %c0_i32_0 = arith.constant 0 : i32
    %c0_i32_1 = arith.constant 0 : i32
    return %c0_i32, %c0_i32_0 : i32, i32
  }
  func.func @transform_2(%arg0: i32) -> (i32, i32) {
    %c0_i32 = arith.constant 0 : i32
    %c0_i32_0 = arith.constant 0 : i32
    %c0_i32_1 = arith.constant 0 : i32
    return %c0_i32, %c0_i32_0 : i32, i32
  }
  func.func @transform_3(%arg0: i32) -> (i32, i32) {
    %c0_i32 = arith.constant 0 : i32
    %c0_i32_0 = arith.constant 0 : i32
    return %arg0, %c0_i32 : i32, i32
  }
}

module attributes {stable_mosaic.version = 11 : i64} {
  func.func @_mm_stats_kernel(%arg0: i32, %arg1: i32, %arg2: memref<1x128x1024xbf16, #tpu.memory_space<vmem>>, %arg3: memref<1x1024x128xbf16, #tpu.memory_space<vmem>>, %arg4: memref<1x128x128xbf16, #tpu.memory_space<vmem>>, %arg5: memref<1x1x128xf32, #tpu.memory_space<vmem>>, %arg6: memref<1x1x128xf32, #tpu.memory_space<vmem>>) attributes {dimension_semantics = [#tpu.dimension_semantics<parallel>, #tpu.dimension_semantics<parallel>], iteration_bounds = array<i64: 4, 1>, scalar_prefetch = 0 : i64, scratch_operands = 0 : i64, tpu.core_type = #tpu.core_type<tc>, window_params = [{transform_indices = @transform_0, window_bounds = array<i64: 1, 128, 1024>}, {transform_indices = @transform_1, window_bounds = array<i64: 1, 1024, 128>}, {transform_indices = @transform_2, window_bounds = array<i64: 1, 128, 128>}, {transform_indices = @transform_3, window_bounds = array<i64: 1, 1, 128>}, {transform_indices = @transform_4, window_bounds = array<i64: 1, 1, 128>}]} {
    %c0 = arith.constant 0 : index
    %c0_0 = arith.constant 0 : index
    %c0_1 = arith.constant 0 : index
    %0 = vector.load %arg2[%c0, %c0_0, %c0_1] : memref<1x128x1024xbf16, #tpu.memory_space<vmem>>, vector<1x128x1024xbf16>
    %1 = vector.shape_cast %0 : vector<1x128x1024xbf16> to vector<128x1024xbf16>
    %c0_2 = arith.constant 0 : index
    %c0_3 = arith.constant 0 : index
    %c0_4 = arith.constant 0 : index
    %2 = vector.load %arg3[%c0_2, %c0_3, %c0_4] : memref<1x1024x128xbf16, #tpu.memory_space<vmem>>, vector<1x1024x128xbf16>
    %3 = vector.shape_cast %2 : vector<1x1024x128xbf16> to vector<1024x128xbf16>
    %cst = arith.constant dense<0.000000e+00> : vector<128x128xf32>
    %4 = tpu.matmul %1, %3, %cst {dimension_numbers = #tpu.dot_dimension_numbers<[1], [0], [0], [1], [0, 0, 1, 1], [], []>} : vector<128x1024xbf16>, vector<1024x128xbf16>, vector<128x128xf32> -> vector<128x128xf32>
    %5 = arith.truncf %4 : vector<128x128xf32> to vector<128x128xbf16>
    %c0_5 = arith.constant 0 : index
    %c0_6 = arith.constant 0 : index
    %c0_7 = arith.constant 0 : index
    %6 = vector.load %arg4[%c0_5, %c0_6, %c0_7] : memref<1x128x128xbf16, #tpu.memory_space<vmem>>, vector<1x128x128xbf16>
    %7 = vector.shape_cast %6 : vector<1x128x128xbf16> to vector<128x128xbf16>
    %8 = vector.shape_cast %5 : vector<128x128xbf16> to vector<1x128x128xbf16>
    tpu.vector_store %arg4[%c0_5, %c0_6, %c0_7], %8 {strides = array<i32>} : memref<1x128x128xbf16, #tpu.memory_space<vmem>>, vector<1x128x128xbf16>,
    %cst_8 = arith.constant dense<0.000000e+00> : vector<128xf32>
    %9 = vector.multi_reduction <add>, %4, %cst_8 [0] : vector<128x128xf32> to vector<128xf32>
    %10 = vector.shape_cast %9 : vector<128xf32> to vector<1x128xf32>
    %c0_9 = arith.constant 0 : index
    %c0_10 = arith.constant 0 : index
    %c0_11 = arith.constant 0 : index
    %11 = vector.load %arg5[%c0_9, %c0_10, %c0_11] : memref<1x1x128xf32, #tpu.memory_space<vmem>>, vector<1x1x128xf32>
    %12 = vector.shape_cast %11 : vector<1x1x128xf32> to vector<1x128xf32>
    %13 = vector.shape_cast %10 : vector<1x128xf32> to vector<1x1x128xf32>
    tpu.vector_store %arg5[%c0_9, %c0_10, %c0_11], %13 {strides = array<i32>} : memref<1x1x128xf32, #tpu.memory_space<vmem>>, vector<1x1x128xf32>,
    %14 = arith.mulf %4, %4 : vector<128x128xf32>
    %cst_12 = arith.constant dense<0.000000e+00> : vector<128xf32>
    %15 = vector.multi_reduction <add>, %14, %cst_12 [0] : vector<128x128xf32> to vector<128xf32>
    %16 = vector.shape_cast %15 : vector<128xf32> to vector<1x128xf32>
    %c0_13 = arith.constant 0 : index
    %c0_14 = arith.constant 0 : index
    %c0_15 = arith.constant 0 : index
    %17 = vector.load %arg6[%c0_13, %c0_14, %c0_15] : memref<1x1x128xf32, #tpu.memory_space<vmem>>, vector<1x1x128xf32>
    %18 = vector.shape_cast %17 : vector<1x1x128xf32> to vector<1x128xf32>
    %19 = vector.shape_cast %16 : vector<1x128xf32> to vector<1x1x128xf32>
    tpu.vector_store %arg6[%c0_13, %c0_14, %c0_15], %19 {strides = array<i32>} : memref<1x1x128xf32, #tpu.memory_space<vmem>>, vector<1x1x128xf32>,
    return
  }
  func.func @transform_0(%arg0: i32, %arg1: i32) -> (i32, i32, i32) {
    %c0_i32 = arith.constant 0 : i32
    %c0_i32_0 = arith.constant 0 : i32
    return %arg0, %arg1, %c0_i32 : i32, i32, i32
  }
  func.func @transform_1(%arg0: i32, %arg1: i32) -> (i32, i32, i32) {
    %c0_i32 = arith.constant 0 : i32
    %c0_i32_0 = arith.constant 0 : i32
    %c0_i32_1 = arith.constant 0 : i32
    return %arg0, %c0_i32, %c0_i32_0 : i32, i32, i32
  }
  func.func @transform_2(%arg0: i32, %arg1: i32) -> (i32, i32, i32) {
    %c0_i32 = arith.constant 0 : i32
    %c0_i32_0 = arith.constant 0 : i32
    return %arg0, %arg1, %c0_i32 : i32, i32, i32
  }
  func.func @transform_3(%arg0: i32, %arg1: i32) -> (i32, i32, i32) {
    %c1_i32 = arith.constant 1 : i32
    %0 = arith.muli %arg0, %c1_i32 : i32
    %1 = arith.addi %0, %arg1 : i32
    %c0_i32 = arith.constant 0 : i32
    %c0_i32_0 = arith.constant 0 : i32
    %c0_i32_1 = arith.constant 0 : i32
    return %1, %c0_i32, %c0_i32_0 : i32, i32, i32
  }
  func.func @transform_4(%arg0: i32, %arg1: i32) -> (i32, i32, i32) {
    %c1_i32 = arith.constant 1 : i32
    %0 = arith.muli %arg0, %c1_i32 : i32
    %1 = arith.addi %0, %arg1 : i32
    %c0_i32 = arith.constant 0 : i32
    %c0_i32_0 = arith.constant 0 : i32
    %c0_i32_1 = arith.constant 0 : i32
    return %1, %c0_i32, %c0_i32_0 : i32, i32, i32
  }
}

module attributes {stable_mosaic.version = 11 : i64} {
  func.func @_affine_relu_kernel(%arg0: i32, %arg1: memref<512x128xbf16, #tpu.memory_space<vmem>>, %arg2: memref<1x128xf32, #tpu.memory_space<vmem>>, %arg3: memref<1x128xf32, #tpu.memory_space<vmem>>, %arg4: memref<512x128xbf16, #tpu.memory_space<vmem>>) attributes {dimension_semantics = [#tpu.dimension_semantics<parallel>], iteration_bounds = array<i64: 1>, scalar_prefetch = 0 : i64, scratch_operands = 0 : i64, tpu.core_type = #tpu.core_type<tc>, window_params = [{transform_indices = @transform_0, window_bounds = array<i64: 512, 128>}, {pipeline_mode = #tpu.pipeline_mode<synchronous>, transform_indices = @transform_1, window_bounds = array<i64: 1, 128>}, {pipeline_mode = #tpu.pipeline_mode<synchronous>, transform_indices = @transform_2, window_bounds = array<i64: 1, 128>}, {transform_indices = @transform_3, window_bounds = array<i64: 512, 128>}]} {
    %c0 = arith.constant 0 : index
    %c0_0 = arith.constant 0 : index
    %0 = vector.load %arg1[%c0, %c0_0] : memref<512x128xbf16, #tpu.memory_space<vmem>>, vector<512x128xbf16>
    %1 = arith.extf %0 : vector<512x128xbf16> to vector<512x128xf32>
    %c0_1 = arith.constant 0 : index
    %c0_2 = arith.constant 0 : index
    %2 = vector.load %arg2[%c0_1, %c0_2] : memref<1x128xf32, #tpu.memory_space<vmem>>, vector<1x128xf32>
    %3 = vector.broadcast %2 : vector<1x128xf32> to vector<512x128xf32>
    %4 = arith.mulf %1, %3 : vector<512x128xf32>
    %c0_3 = arith.constant 0 : index
    %c0_4 = arith.constant 0 : index
    %5 = vector.load %arg3[%c0_3, %c0_4] : memref<1x128xf32, #tpu.memory_space<vmem>>, vector<1x128xf32>
    %6 = vector.broadcast %5 : vector<1x128xf32> to vector<512x128xf32>
    %7 = arith.addf %4, %6 : vector<512x128xf32>
    %cst = arith.constant 0.000000e+00 : f32
    %8 = vector.broadcast %cst : f32 to vector<512x128xf32>
    %9 = arith.maximumf %7, %8 : vector<512x128xf32>
    %10 = arith.truncf %9 : vector<512x128xf32> to vector<512x128xbf16>
    %c0_5 = arith.constant 0 : index
    %c0_6 = arith.constant 0 : index
    %11 = vector.load %arg4[%c0_5, %c0_6] : memref<512x128xbf16, #tpu.memory_space<vmem>>, vector<512x128xbf16>
    tpu.vector_store %arg4[%c0_5, %c0_6], %10 {strides = array<i32>} : memref<512x128xbf16, #tpu.memory_space<vmem>>, vector<512x128xbf16>,
    return
  }
  func.func @transform_0(%arg0: i32) -> (i32, i32) {
    %c0_i32 = arith.constant 0 : i32
    %c0_i32_0 = arith.constant 0 : i32
    return %arg0, %c0_i32 : i32, i32
  }
  func.func @transform_1(%arg0: i32) -> (i32, i32) {
    %c0_i32 = arith.constant 0 : i32
    %c0_i32_0 = arith.constant 0 : i32
    %c0_i32_1 = arith.constant 0 : i32
    return %c0_i32, %c0_i32_0 : i32, i32
  }
  func.func @transform_2(%arg0: i32) -> (i32, i32) {
    %c0_i32 = arith.constant 0 : i32
    %c0_i32_0 = arith.constant 0 : i32
    %c0_i32_1 = arith.constant 0 : i32
    return %c0_i32, %c0_i32_0 : i32, i32
  }
  func.func @transform_3(%arg0: i32) -> (i32, i32) {
    %c0_i32 = arith.constant 0 : i32
    %c0_i32_0 = arith.constant 0 : i32
    return %arg0, %c0_i32 : i32, i32
  }
}

module attributes {stable_mosaic.version = 11 : i64} {
  func.func @_mm_stats_kernel(%arg0: i32, %arg1: i32, %arg2: memref<1x512x512xbf16, #tpu.memory_space<vmem>>, %arg3: memref<1x512x64xbf16, #tpu.memory_space<vmem>>, %arg4: memref<1x512x64xbf16, #tpu.memory_space<vmem>>, %arg5: memref<1x1x64xf32, #tpu.memory_space<vmem>>, %arg6: memref<1x1x64xf32, #tpu.memory_space<vmem>>) attributes {dimension_semantics = [#tpu.dimension_semantics<parallel>, #tpu.dimension_semantics<parallel>], iteration_bounds = array<i64: 4, 1>, scalar_prefetch = 0 : i64, scratch_operands = 0 : i64, tpu.core_type = #tpu.core_type<tc>, window_params = [{transform_indices = @transform_0, window_bounds = array<i64: 1, 512, 512>}, {transform_indices = @transform_1, window_bounds = array<i64: 1, 512, 64>}, {transform_indices = @transform_2, window_bounds = array<i64: 1, 512, 64>}, {transform_indices = @transform_3, window_bounds = array<i64: 1, 1, 64>}, {transform_indices = @transform_4, window_bounds = array<i64: 1, 1, 64>}]} {
    %c0 = arith.constant 0 : index
    %c0_0 = arith.constant 0 : index
    %c0_1 = arith.constant 0 : index
    %0 = vector.load %arg2[%c0, %c0_0, %c0_1] : memref<1x512x512xbf16, #tpu.memory_space<vmem>>, vector<1x512x512xbf16>
    %1 = vector.shape_cast %0 : vector<1x512x512xbf16> to vector<512x512xbf16>
    %c0_2 = arith.constant 0 : index
    %c0_3 = arith.constant 0 : index
    %c0_4 = arith.constant 0 : index
    %2 = vector.load %arg3[%c0_2, %c0_3, %c0_4] : memref<1x512x64xbf16, #tpu.memory_space<vmem>>, vector<1x512x64xbf16>
    %3 = vector.shape_cast %2 : vector<1x512x64xbf16> to vector<512x64xbf16>
    %cst = arith.constant dense<0.000000e+00> : vector<512x64xf32>
    %4 = tpu.matmul %1, %3, %cst {dimension_numbers = #tpu.dot_dimension_numbers<[1], [0], [0], [1], [0, 0, 1, 1], [], []>} : vector<512x512xbf16>, vector<512x64xbf16>, vector<512x64xf32> -> vector<512x64xf32>
    %5 = arith.truncf %4 : vector<512x64xf32> to vector<512x64xbf16>
    %c0_5 = arith.constant 0 : index
    %c0_6 = arith.constant 0 : index
    %c0_7 = arith.constant 0 : index
    %6 = vector.load %arg4[%c0_5, %c0_6, %c0_7] : memref<1x512x64xbf16, #tpu.memory_space<vmem>>, vector<1x512x64xbf16>
    %7 = vector.shape_cast %6 : vector<1x512x64xbf16> to vector<512x64xbf16>
    %8 = vector.shape_cast %5 : vector<512x64xbf16> to vector<1x512x64xbf16>
    tpu.vector_store %arg4[%c0_5, %c0_6, %c0_7], %8 {strides = array<i32>} : memref<1x512x64xbf16, #tpu.memory_space<vmem>>, vector<1x512x64xbf16>,
    %cst_8 = arith.constant dense<0.000000e+00> : vector<64xf32>
    %9 = vector.multi_reduction <add>, %4, %cst_8 [0] : vector<512x64xf32> to vector<64xf32>
    %10 = vector.shape_cast %9 : vector<64xf32> to vector<1x64xf32>
    %c0_9 = arith.constant 0 : index
    %c0_10 = arith.constant 0 : index
    %c0_11 = arith.constant 0 : index
    %11 = vector.load %arg5[%c0_9, %c0_10, %c0_11] : memref<1x1x64xf32, #tpu.memory_space<vmem>>, vector<1x1x64xf32>
    %12 = vector.shape_cast %11 : vector<1x1x64xf32> to vector<1x64xf32>
    %13 = vector.shape_cast %10 : vector<1x64xf32> to vector<1x1x64xf32>
    tpu.vector_store %arg5[%c0_9, %c0_10, %c0_11], %13 {strides = array<i32>} : memref<1x1x64xf32, #tpu.memory_space<vmem>>, vector<1x1x64xf32>,
    %14 = arith.mulf %4, %4 : vector<512x64xf32>
    %cst_12 = arith.constant dense<0.000000e+00> : vector<64xf32>
    %15 = vector.multi_reduction <add>, %14, %cst_12 [0] : vector<512x64xf32> to vector<64xf32>
    %16 = vector.shape_cast %15 : vector<64xf32> to vector<1x64xf32>
    %c0_13 = arith.constant 0 : index
    %c0_14 = arith.constant 0 : index
    %c0_15 = arith.constant 0 : index
    %17 = vector.load %arg6[%c0_13, %c0_14, %c0_15] : memref<1x1x64xf32, #tpu.memory_space<vmem>>, vector<1x1x64xf32>
    %18 = vector.shape_cast %17 : vector<1x1x64xf32> to vector<1x64xf32>
    %19 = vector.shape_cast %16 : vector<1x64xf32> to vector<1x1x64xf32>
    tpu.vector_store %arg6[%c0_13, %c0_14, %c0_15], %19 {strides = array<i32>} : memref<1x1x64xf32, #tpu.memory_space<vmem>>, vector<1x1x64xf32>,
    return
  }
  func.func @transform_0(%arg0: i32, %arg1: i32) -> (i32, i32, i32) {
    %c0_i32 = arith.constant 0 : i32
    %c0_i32_0 = arith.constant 0 : i32
    return %arg0, %arg1, %c0_i32 : i32, i32, i32
  }
  func.func @transform_1(%arg0: i32, %arg1: i32) -> (i32, i32, i32) {
    %c0_i32 = arith.constant 0 : i32
    %c0_i32_0 = arith.constant 0 : i32
    %c0_i32_1 = arith.constant 0 : i32
    return %arg0, %c0_i32, %c0_i32_0 : i32, i32, i32
  }
  func.func @transform_2(%arg0: i32, %arg1: i32) -> (i32, i32, i32) {
    %c0_i32 = arith.constant 0 : i32
    %c0_i32_0 = arith.constant 0 : i32
    return %arg0, %arg1, %c0_i32 : i32, i32, i32
  }
  func.func @transform_3(%arg0: i32, %arg1: i32) -> (i32, i32, i32) {
    %c1_i32 = arith.constant 1 : i32
    %0 = arith.muli %arg0, %c1_i32 : i32
    %1 = arith.addi %0, %arg1 : i32
    %c0_i32 = arith.constant 0 : i32
    %c0_i32_0 = arith.constant 0 : i32
    %c0_i32_1 = arith.constant 0 : i32
    return %1, %c0_i32, %c0_i32_0 : i32, i32, i32
  }
  func.func @transform_4(%arg0: i32, %arg1: i32) -> (i32, i32, i32) {
    %c1_i32 = arith.constant 1 : i32
    %0 = arith.muli %arg0, %c1_i32 : i32
    %1 = arith.addi %0, %arg1 : i32
    %c0_i32 = arith.constant 0 : i32
    %c0_i32_0 = arith.constant 0 : i32
    %c0_i32_1 = arith.constant 0 : i32
    return %1, %c0_i32, %c0_i32_0 : i32, i32, i32
  }
}

module attributes {stable_mosaic.version = 11 : i64} {
  func.func @_affine_relu_kernel(%arg0: i32, %arg1: memref<2048x64xbf16, #tpu.memory_space<vmem>>, %arg2: memref<1x64xf32, #tpu.memory_space<vmem>>, %arg3: memref<1x64xf32, #tpu.memory_space<vmem>>, %arg4: memref<2048x64xbf16, #tpu.memory_space<vmem>>) attributes {dimension_semantics = [#tpu.dimension_semantics<parallel>], iteration_bounds = array<i64: 1>, scalar_prefetch = 0 : i64, scratch_operands = 0 : i64, tpu.core_type = #tpu.core_type<tc>, window_params = [{transform_indices = @transform_0, window_bounds = array<i64: 2048, 64>}, {pipeline_mode = #tpu.pipeline_mode<synchronous>, transform_indices = @transform_1, window_bounds = array<i64: 1, 64>}, {pipeline_mode = #tpu.pipeline_mode<synchronous>, transform_indices = @transform_2, window_bounds = array<i64: 1, 64>}, {transform_indices = @transform_3, window_bounds = array<i64: 2048, 64>}]} {
    %c0 = arith.constant 0 : index
    %c0_0 = arith.constant 0 : index
    %0 = vector.load %arg1[%c0, %c0_0] : memref<2048x64xbf16, #tpu.memory_space<vmem>>, vector<2048x64xbf16>
    %1 = arith.extf %0 : vector<2048x64xbf16> to vector<2048x64xf32>
    %c0_1 = arith.constant 0 : index
    %c0_2 = arith.constant 0 : index
    %2 = vector.load %arg2[%c0_1, %c0_2] : memref<1x64xf32, #tpu.memory_space<vmem>>, vector<1x64xf32>
    %3 = vector.broadcast %2 : vector<1x64xf32> to vector<2048x64xf32>
    %4 = arith.mulf %1, %3 : vector<2048x64xf32>
    %c0_3 = arith.constant 0 : index
    %c0_4 = arith.constant 0 : index
    %5 = vector.load %arg3[%c0_3, %c0_4] : memref<1x64xf32, #tpu.memory_space<vmem>>, vector<1x64xf32>
    %6 = vector.broadcast %5 : vector<1x64xf32> to vector<2048x64xf32>
    %7 = arith.addf %4, %6 : vector<2048x64xf32>
    %cst = arith.constant 0.000000e+00 : f32
    %8 = vector.broadcast %cst : f32 to vector<2048x64xf32>
    %9 = arith.maximumf %7, %8 : vector<2048x64xf32>
    %10 = arith.truncf %9 : vector<2048x64xf32> to vector<2048x64xbf16>
    %c0_5 = arith.constant 0 : index
    %c0_6 = arith.constant 0 : index
    %11 = vector.load %arg4[%c0_5, %c0_6] : memref<2048x64xbf16, #tpu.memory_space<vmem>>, vector<2048x64xbf16>
    tpu.vector_store %arg4[%c0_5, %c0_6], %10 {strides = array<i32>} : memref<2048x64xbf16, #tpu.memory_space<vmem>>, vector<2048x64xbf16>,
    return
  }
  func.func @transform_0(%arg0: i32) -> (i32, i32) {
    %c0_i32 = arith.constant 0 : i32
    %c0_i32_0 = arith.constant 0 : i32
    return %arg0, %c0_i32 : i32, i32
  }
  func.func @transform_1(%arg0: i32) -> (i32, i32) {
    %c0_i32 = arith.constant 0 : i32
    %c0_i32_0 = arith.constant 0 : i32
    %c0_i32_1 = arith.constant 0 : i32
    return %c0_i32, %c0_i32_0 : i32, i32
  }
  func.func @transform_2(%arg0: i32) -> (i32, i32) {
    %c0_i32 = arith.constant 0 : i32
    %c0_i32_0 = arith.constant 0 : i32
    %c0_i32_1 = arith.constant 0 : i32
    return %c0_i32, %c0_i32_0 : i32, i32
  }
  func.func @transform_3(%arg0: i32) -> (i32, i32) {
    %c0_i32 = arith.constant 0 : i32
    %c0_i32_0 = arith.constant 0 : i32
    return %arg0, %c0_i32 : i32, i32
  }
}

module attributes {stable_mosaic.version = 11 : i64} {
  func.func @_mm_tanh_kernel(%arg0: i32, %arg1: i32, %arg2: memref<1x3x256xbf16, #tpu.memory_space<vmem>>, %arg3: memref<1x256x2048xbf16, #tpu.memory_space<vmem>>, %arg4: memref<1x3x2048xf32, #tpu.memory_space<vmem>>) attributes {dimension_semantics = [#tpu.dimension_semantics<parallel>, #tpu.dimension_semantics<parallel>], iteration_bounds = array<i64: 4, 1>, scalar_prefetch = 0 : i64, scratch_operands = 0 : i64, tpu.core_type = #tpu.core_type<tc>, window_params = [{transform_indices = @transform_0, window_bounds = array<i64: 1, 3, 256>}, {transform_indices = @transform_1, window_bounds = array<i64: 1, 256, 2048>}, {transform_indices = @transform_2, window_bounds = array<i64: 1, 3, 2048>}]} {
    %c0 = arith.constant 0 : index
    %c0_0 = arith.constant 0 : index
    %c0_1 = arith.constant 0 : index
    %0 = vector.load %arg2[%c0, %c0_0, %c0_1] : memref<1x3x256xbf16, #tpu.memory_space<vmem>>, vector<1x3x256xbf16>
    %1 = vector.shape_cast %0 : vector<1x3x256xbf16> to vector<3x256xbf16>
    %c0_2 = arith.constant 0 : index
    %c0_3 = arith.constant 0 : index
    %c0_4 = arith.constant 0 : index
    %2 = vector.load %arg3[%c0_2, %c0_3, %c0_4] : memref<1x256x2048xbf16, #tpu.memory_space<vmem>>, vector<1x256x2048xbf16>
    %3 = vector.shape_cast %2 : vector<1x256x2048xbf16> to vector<256x2048xbf16>
    %cst = arith.constant dense<0.000000e+00> : vector<3x2048xf32>
    %4 = tpu.matmul %1, %3, %cst {dimension_numbers = #tpu.dot_dimension_numbers<[1], [0], [0], [1], [0, 0, 1, 1], [], []>} : vector<3x256xbf16>, vector<256x2048xbf16>, vector<3x2048xf32> -> vector<3x2048xf32>
    %5 = math.tanh %4 : vector<3x2048xf32>
    %c0_5 = arith.constant 0 : index
    %c0_6 = arith.constant 0 : index
    %c0_7 = arith.constant 0 : index
    %6 = vector.load %arg4[%c0_5, %c0_6, %c0_7] : memref<1x3x2048xf32, #tpu.memory_space<vmem>>, vector<1x3x2048xf32>
    %7 = vector.shape_cast %6 : vector<1x3x2048xf32> to vector<3x2048xf32>
    %8 = vector.shape_cast %5 : vector<3x2048xf32> to vector<1x3x2048xf32>
    tpu.vector_store %arg4[%c0_5, %c0_6, %c0_7], %8 {strides = array<i32>} : memref<1x3x2048xf32, #tpu.memory_space<vmem>>, vector<1x3x2048xf32>,
    return
  }
  func.func @transform_0(%arg0: i32, %arg1: i32) -> (i32, i32, i32) {
    %c0_i32 = arith.constant 0 : i32
    %c0_i32_0 = arith.constant 0 : i32
    %c0_i32_1 = arith.constant 0 : i32
    return %arg0, %c0_i32, %c0_i32_0 : i32, i32, i32
  }
  func.func @transform_1(%arg0: i32, %arg1: i32) -> (i32, i32, i32) {
    %c0_i32 = arith.constant 0 : i32
    %c0_i32_0 = arith.constant 0 : i32
    return %arg0, %c0_i32, %arg1 : i32, i32, i32
  }
  func.func @transform_2(%arg0: i32, %arg1: i32) -> (i32, i32, i32) {
    %c0_i32 = arith.constant 0 : i32
    %c0_i32_0 = arith.constant 0 : i32
    return %arg0, %c0_i32, %arg1 : i32, i32, i32
  }
}

</mosaic_0001>

<bundles_post_ra>
// kernel: generator_forward.10
= control target key start
LH: loop header
LB: loop body
LE: loop exit
PB: predicated region body
PF: predicated region fallthrough
CT: control target
= control target key end

     0   :  { %v40_v0 = vlaneseq  ;;  %s304_s0 = inlined_call_operand.vmem [shape: bf16[32,512], index: 0, kind: input, shape index: {}]   ;;  %s305_s1 = inlined_call_operand.vmem [shape: f32[1,512], index: 1, kind: input, shape index: {}]   ;;  %s306_s2 = inlined_call_operand.vmem [shape: f32[1,512], index: 2, kind: input, shape index: {}]   ;;  %s307_s3 = inlined_call_operand.vmem [shape: bf16[32,512], index: 3, kind: output, shape index: {}]  }
   0x1   :  { %v14_v1 = vld [vmem:[%s304_s0] sm:$0xff]  ;;  %v15_v5 = vld [vmem:[%s304_s0 + $0x8] sm:$0xff]  ;;  %v16_v6 = vld [vmem:[%s304_s0 + $0x10] sm:$0xff] }
   0x2   :  { %v22_v2 = vunpack.c.l.bf16 %v14_v1  ;;  %v23_v3 = vunpack.c.h.bf16 %v14_v1  ;;  %v41_v4 = vshrl.u32 %v40_v0, 7  ;;  %v17_v7 = vld [vmem:[%s304_s0 + $0x18] sm:$0xff]  ;;  %v38_v8 = vld [vmem:[%s305_s1] sm:$0xf]  ;;  %v24_v10 = vunpack.c.l.bf16 %v15_v5  ;;  %v19_v51 = vld [vmem:[%s304_s0 + $0x28] sm:$0xff] }
   0x3   :  { %v76_v9 = vld [vmem:[%s306_s2] sm:$0xf]  ;;  %v25_v11 = vunpack.c.h.bf16 %v15_v5  ;;  %v26_v12 = vunpack.c.l.bf16 %v16_v6  ;;  %v27_v13 = vunpack.c.h.bf16 %v16_v6  ;;  %v28_v19 = vunpack.c.l.bf16 %v17_v7  ;;  %v20_v56 = vld [vmem:[%s304_s0 + $0x30] sm:$0xff]  ;;  %v21_v61 = vld [vmem:[%s304_s0 + $0x38] sm:$0xff] }
   0x4   :  { %v18_v14 = vld [vmem:[%s304_s0 + $0x20] sm:$0xff]  ;;  %v42_v15 = vsub.s32 0, %v41_v4  ;;  %v46_v16 = vsub.s32 1, %v41_v4  ;;  %v50_v17 = vsub.s32 2, %v41_v4  ;;  %v54_v18 = vsub.s32 3, %v41_v4 }
   0x5   :  { %v29_v20 = vunpack.c.h.bf16 %v17_v7  ;;  %v30_v21 = vunpack.c.l.bf16 %v18_v14  ;;  %v31_v22 = vunpack.c.h.bf16 %v18_v14  ;;  %v32_v0 = vunpack.c.l.bf16 %v19_v51 }
   0x6   :  { %v43_v23 = vrot.slane %v38_v8, %v42_v15  ;;  %v47_v24 = vrot.slane %v38_v8, %v46_v16  ;;  %v247_v25 = vrot.slane %v76_v9, %v42_v15  ;;  %v249_v26 = vrot.slane %v76_v9, %v46_v16 }
   0x7   :  { %v51_v27 = vrot.slane %v38_v8, %v50_v17  ;;  %v55_v28 = vrot.slane %v38_v8, %v54_v18  ;;  %v251_v29 = vrot.slane %v76_v9, %v50_v17  ;;  %v253_v30 = vrot.slane %v76_v9, %v54_v18 }
   0x8   :  { %v60_v31 = vmul.f32 %v43_v23, %v22_v2  ;;  %v61_v32 = vmul.f32 %v47_v24, %v23_v3  ;;  %v64_v33 = vmul.f32 %v43_v23, %v26_v12  ;;  %v65_v34 = vmul.f32 %v47_v24, %v27_v13 }
   0x9   :  { %v62_v35 = vmul.f32 %v51_v27, %v24_v10  ;;  %v63_v36 = vmul.f32 %v55_v28, %v25_v11  ;;  %v66_v37 = vmul.f32 %v51_v27, %v28_v19  ;;  %v67_v38 = vmul.f32 %v55_v28, %v29_v20 }
   0xa   :  { %v98_v39 = vadd.f32 %v247_v25, %v60_v31  ;;  %v99_v40 = vadd.f32 %v249_v26, %v61_v32  ;;  %v102_v41 = vadd.f32 %v247_v25, %v64_v33  ;;  %v103_v42 = vadd.f32 %v249_v26, %v65_v34 }
   0xb   :  { %v100_v43 = vadd.f32 %v251_v29, %v62_v35  ;;  %v101_v44 = vadd.f32 %v253_v30, %v63_v36  ;;  %v104_v45 = vadd.f32 %v251_v29, %v66_v37  ;;  %v105_v46 = vadd.f32 %v253_v30, %v67_v38 }
   0xc   :  { %v114_v47 = vmax.f32 %v98_v39, 0.0  ;;  %v115_v48 = vmax.f32 %v99_v40, 0.0  ;;  %v118_v49 = vmax.f32 %v102_v41, 0.0  ;;  %v119_v50 = vmax.f32 %v103_v42, 0.0 }
   0xd   :  { %v116_v52 = vmax.f32 %v100_v43, 0.0  ;;  %v117_v53 = vmax.f32 %v101_v44, 0.0  ;;  %v120_v54 = vmax.f32 %v104_v45, 0.0  ;;  %v121_v55 = vmax.f32 %v105_v46, 0.0 }
   0xe   :  { %v198_v57 = vpack.c.bf16 %v115_v48, %v114_v47  ;;  %v200_v58 = vpack.c.bf16 %v119_v50, %v118_v49  ;;  %v68_v59 = vmul.f32 %v43_v23, %v30_v21  ;;  %v69_v60 = vmul.f32 %v47_v24, %v31_v22 }
   0xf   :  { %v199_v62 = vpack.c.bf16 %v117_v53, %v116_v52  ;;  %v201_v63 = vpack.c.bf16 %v121_v55, %v120_v54  ;;  %v33_v1 = vunpack.c.h.bf16 %v19_v51  ;;  %v34_v4 = vunpack.c.l.bf16 %v20_v56 }
  0x10   :  { %178 = vst [vmem:[%s307_s3] sm:$0xff] %v198_v57  ;;  %180 = vst [vmem:[%s307_s3 + $0x10] sm:$0xff] %v200_v58  ;;  %v106_v2 = vadd.f32 %v247_v25, %v68_v59  ;;  %v107_v3 = vadd.f32 %v249_v26, %v69_v60  ;;  %v35_v5 = vunpack.c.h.bf16 %v20_v56  ;;  %v70_v6 = vmul.f32 %v51_v27, %v32_v0 }
  0x11   :  { %179 = vst [vmem:[%s307_s3 + $0x8] sm:$0xff] %v199_v62  ;;  %181 = vst [vmem:[%s307_s3 + $0x18] sm:$0xff] %v201_v63  ;;  %v71_v7 = vmul.f32 %v55_v28, %v33_v1  ;;  %v36_v8 = vunpack.c.l.bf16 %v21_v61  ;;  %v37_v9 = vunpack.c.h.bf16 %v21_v61  ;;  %v72_v12 = vmul.f32 %v43_v23, %v34_v4 }
  0x12   :  { %v122_v10 = vmax.f32 %v106_v2, 0.0  ;;  %v123_v11 = vmax.f32 %v107_v3, 0.0  ;;  %v73_v13 = vmul.f32 %v47_v24, %v35_v5  ;;  %v108_v14 = vadd.f32 %v251_v29, %v70_v6 }
  0x13   :  { %v109_v15 = vadd.f32 %v253_v30, %v71_v7  ;;  %v74_v16 = vmul.f32 %v51_v27, %v36_v8  ;;  %v75_v17 = vmul.f32 %v55_v28, %v37_v9  ;;  %v110_v19 = vadd.f32 %v247_v25, %v72_v12 }
  0x14   :  { %v202_v18 = vpack.c.bf16 %v123_v11, %v122_v10  ;;  %v111_v20 = vadd.f32 %v249_v26, %v73_v13  ;;  %v124_v21 = vmax.f32 %v108_v14, 0.0 }
  0x15   :  { %v125_v22 = vmax.f32 %v109_v15, 0.0  ;;  %v112_v31 = vadd.f32 %v251_v29, %v74_v16  ;;  %v113_v32 = vadd.f32 %v253_v30, %v75_v17  ;;  %v126_v23 = vmax.f32 %v110_v19, 0.0 }
  0x16   :  { %182 = vst [vmem:[%s307_s3 + $0x20] sm:$0xff] %v202_v18  ;;  %v127_v24 = vmax.f32 %v111_v20, 0.0 }
  0x17   :  { %v203_v33 = vpack.c.bf16 %v125_v22, %v124_v21  ;;  %v128_v27 = vmax.f32 %v112_v31, 0.0  ;;  %v129_v28 = vmax.f32 %v113_v32, 0.0 }
  0x18   :  { %v204_v34 = vpack.c.bf16 %v127_v24, %v126_v23 }
  0x19   :  { %183 = vst [vmem:[%s307_s3 + $0x28] sm:$0xff] %v203_v33  ;;  %v205_v25 = vpack.c.bf16 %v129_v28, %v128_v27 }
  0x1a   :  { %184 = vst [vmem:[%s307_s3 + $0x30] sm:$0xff] %v204_v34 }
  0x1b   :  { %185 = vst [vmem:[%s307_s3 + $0x38] sm:$0xff] %v205_v25 }

// kernel: generator_forward.9
= control target key start
LH: loop header
LB: loop body
LE: loop exit
PB: predicated region body
PF: predicated region fallthrough
CT: control target
= control target key end

     0   :  { %10 = vsyncpa [#allocation3], 0  ;;  %s2692_s0 = inlined_call_operand.vmem [shape: bf16[2,100], index: 0, kind: input, shape index: {}]   ;;  %s2693_s1 = inlined_call_operand.hbm [shape: bf16[100,8192], index: 1, kind: input, shape index: {}]   ;;  %s2694_s2 = inlined_call_operand.vmem [shape: bf16[2,8192], index: 2, kind: output, shape index: {0}]   ;;  %s2695_s3 = inlined_call_operand.vmem [shape: f32[1,8192], index: 3, kind: output, shape index: {1}]   ;;  %s2696_s4 = inlined_call_operand.vmem [shape: f32[1,8192], index: 4, kind: output, shape index: {2}]  }
   0x1   :  { %12 = vsyncpa [#allocation3 + $0x1], 0  ;;  %s2283_s15 = smov 0   ;;  %s2285_s16 = smov 0  }
   0x2   :  { %s2287_s17 = smov 0   ;;  %s2289_s18 = smov 0  }
   0x3 LB: > { %s1975_s19 = sadd.s32 4294967295, %s2250_s18   ;;  %s2303_s20 = sadd.s32 1, %s2250_s18   ;;  %s2250_s18 = sphi %s2289_s18, %s2702_s18   ;;  %s2246_s17 = sphi %s2287_s17, %s2701_s17   ;;  %s2242_s16 = sphi %s2285_s16, %s2700_s16   ;;  %s2238_s15 = sphi %s2283_s15, %s2699_s15  }
   0x4   : > { %s43_s21 = ssub.s32 %s2250_s18, %s2303_s20  ;;  %s46_s22 = sadd.s32 1, %s2246_s17 }
   0x5   : > { %p44_p0 = scmp.eq.s32.totalorder %s43_s21, 0  ;;  %p53_p1 = scmp.ne.s32.totalorder %s2246_s17, %s2242_s16 }
   0x6   : > { %p54_p2 = scmp.eq.s32.totalorder %s2250_s18, 0  ;;  %p59_p3 = scmp.ne.s32.totalorder %s2242_s16, %s2238_s15 }
   0x7   : > { %s2313_s23 = scalar_select %p44_p0, %s2246_s17, %s46_s22  }
   0x8   : > { %p55_p4 = por %p54_p2, %p53_p1  ;;  %p60_p5 = scmp.eq.s32.totalorder %s1975_s19, 0 }
   0x9   : > { %p2132_p6 = scmp.lt.s32.totalorder %s2250_s18, 4  ;;  %s164_s25 = sand.u32 1, %s2246_s17  }
   0xa   : > { %p2318_p7 = por %p60_p5, %p59_p3  ;;  %s2124_s26 = smul.u32 832, %s164_s25 }
   0xb   : > { %s2123_s27 = sshll.u32 %s2250_s18, 10  ;;  %p2324_p8 = pnand %p2132_p6, %p55_p4 }
   0xc   : > { %s2331_s5 = scalar_lea.hbm %s2693_s1, %s2123_s27  ;;  %s168_s6 = scalar_lea.vmem [#allocation2], %s2124_s26 }
   0xd   : > { %s175_s7 = sshll.u32 %s168_s6, 4  ;;  %s2335_s8 = scalar_lea.sflag [#allocation3], %s164_s25  ;;  %s2333_s7 = int_to_ptr.vmem [resolvable:$true] %s175_s7 }
   0xe   : > { %s2186_s9 = scalar_lea.hbm %s2331_s5, 13312  ;;  %p2188_p10 = pneg %p2324_p8 }
   0xf   : > { %p2187_p9 = scmp.ne.s32.totalorder %s2331_s5, %s2186_s9  ;;  %s2191_s12 = scalar_lea.hbm %s2693_s1, 53248 }
  0x10   : > { %p2192_p13 = scmp.lt.u32.totalorder %s2331_s5, %s2693_s1  ;;  %p2193_p0 = scmp.lt.u32.totalorder %s2191_s12, %s2186_s9 }
  0x11   : > { %p2189_p11 = pnand %p2188_p10, %p2187_p9  ;;  %p2195_p2 = scmp.lt.u32.totalorder %s2186_s9, %s2331_s5 }
  0x12   : > { %p2194_p1 = por %p2193_p0, %p2192_p13 }
  0x13   : > { %p2190_p12 = pneg %p2189_p11 }
  0x14   : > { %p2196_p3 = por %p2195_p2, %p2194_p1 }
  0x16   : > { %p2197_p4 = pnand %p2196_p3, %p2190_p12 }
  0x18   : > { %2200 = shalt.err (!%p2197_p4)
}
  0x19   : > { %s2201_s15 = scalar_lea.vmem %s2333_s7, 13312  ;;  %s2252_s21 = smov [#allocation2]  }
  0x1a   : > { %p2202_p5 = scmp.ne.s32.totalorder %s2333_s7, %s2201_s15  ;;  %s2206_s22 = sshll.u32 %s2252_s21, 4  ;;  %s2207_s22 = int_to_ptr.vmem [resolvable:$false] %s2206_s22 }
  0x1b   : > { %s2208_s25 = scalar_lea.vmem %s2207_s22, 26624  ;;  %p2209_p11 = scmp.lt.s32.totalorder %s2333_s7, %s2207_s22 }
  0x1c   : > { %p2204_p6 = pnand %p2202_p5, %p2188_p10  ;;  %p2210_p13 = scmp.lt.s32.totalorder %s2208_s25, %s2201_s15 }
  0x1e   : > { %p2205_p9 = pneg %p2204_p6  ;;  %p2211_p0 = por %p2210_p13, %p2209_p11 }
  0x20   : > { %p2212_p1 = pnand %p2211_p0, %p2205_p9 }
  0x22   : > { %2215 = shalt.err (!%p2212_p1)
}
  0x23   : > { %s2253_s26 = smov 4096   ;;  %s2254_s27 = smov 1024  }
  0x24   : > { %s2255_s29 = smov 64   ;;  %p1981_p10 = scmp.ge.s32.totalorder %s2250_s18, 1 }
  0x25   : > { %2131 = dma.hbm_to_vmem [thread:$0]  (!%p2324_p8), %s2331_s5, 13312, %s2333_s7, %s2335_s8, %s2253_s26, %s2254_s27, %s2255_s29  }
  0x26   : > { %p183_p12 = scmp.lt.s32.totalorder %s2250_s18, 5 }
  0x28   : > { %p184_p2 = pnand %p1981_p10, %p183_p12 }
  0x29   : > { %s189_s30 = sand.u32 (!%p184_p2), 1, %s2242_s16  }
  0x2a   : > { %187 = sbr.rel (%p184_p2) target bundleno = 414 (0x19e), region = 28  ;;  %s190_s9 = scalar_lea.sflag (!%p184_p2), [#allocation3], %s189_s30 }
  0x2b   : > { %s2125_s6 = smul.u32 (!%p184_p2), 832, %s189_s30 }
  0x2d   : > { %s2366_s10 = scalar_lea.vmem (!%p184_p2), [#allocation2], %s2125_s6 }
  0x31   : > { %2233 = dma.done.wait (%p2318_p7), %s190_s9, 13312  }
  0x32   : > { %2235 = vsyncadd (%p2318_p7), %s190_s9, 4294953984  ;;  %v2256_v0 = vmov 0   ;;  %v243_v1 = vld [vmem:[%s2366_s10] sm:$0xff]  ;;  %v244_v3 = vld [vmem:[%s2366_s10 + $0x8] sm:$0xff]  ;;  %vm871_vm0 = vcmask 1041408   ;;  %vm867_vm1 = vcmask 818176  }
  0x33   : > { %952 = vmatprep.mubr.bf16.mxu0 %v2256_v0  ;;  %993 = vmatprep.mubr.bf16.mxu1 %v2256_v0  ;;  %v251_v2 = vld [vmem:[%s2366_s10 + $0x40] sm:$0xff]  ;;  %v252_v5 = vld [vmem:[%s2366_s10 + $0x48] sm:$0xff]  ;;  %v245_v55 = vld [vmem:[%s2366_s10 + $0x10] sm:$0xff]  ;;  %s2554_s5 = sshll.u32 %s1975_s19, 4 }
  0x34   : > { %v1986_v4 = vcombine.high %v243_v1, %v251_v2  ;;  %v1985_v6 = vcombine.low %v243_v1, %v251_v2  ;;  %v259_v7 = vld [vmem:[%s2366_s10 + $0x80] sm:$0xff]  ;;  %v1988_v9 = vcombine.high %v244_v3, %v252_v5  ;;  %v1987_v10 = vcombine.low %v244_v3, %v252_v5  ;;  %v260_v12 = vld [vmem:[%s2366_s10 + $0x88] sm:$0xff]  ;;  %v253_v56 = vld [vmem:[%s2366_s10 + $0x50] sm:$0xff]  ;;  %p227_p7 = scmp.lt.s32.totalorder %s2554_s5, 63 }
  0x35   : > { %v267_v8 = vld [vmem:[%s2366_s10 + $0xc0] sm:$0xff]  ;;  %v268_v13 = vld [vmem:[%s2366_s10 + $0xc8] sm:$0xff]  ;;  %v246_v57 = vld [vmem:[%s2366_s10 + $0x18] sm:$0xff]  ;;  %v1990_v60 = vcombine.high %v245_v55, %v253_v56  ;;  %v1989_v5 = vcombine.low %v245_v55, %v253_v56 }
  0x36   : > { %v2002_v11 = vcombine.high %v259_v7, %v267_v8  ;;  %v275_v14 = vld [vmem:[%s2366_s10 + $0x100] sm:$0xff]  ;;  %920 = vmatprep.subr.bf16.mxu0 %v1986_v4  ;;  %v2004_v15 = vcombine.high %v260_v12, %v268_v13  ;;  %v276_v17 = vld [vmem:[%s2366_s10 + $0x108] sm:$0xff]  ;;  %961 = vmatprep.subr.bf16.mxu1 %v1988_v9  ;;  %v2001_v19 = vcombine.low %v259_v7, %v267_v8  ;;  %v254_v58 = vld [vmem:[%s2366_s10 + $0x58] sm:$0xff]  ;;  %s2704_s5 = smov (!%p227_p7, %s2554_s5), 63 }
  0x37   : > { %v283_v16 = vld [vmem:[%s2366_s10 + $0x140] sm:$0xff]  ;;  %v284_v18 = vld [vmem:[%s2366_s10 + $0x148] sm:$0xff]  ;;  %921 = vmatpush1.bf16.msra.mxu0 %v1985_v6  ;;  %962 = vmatpush1.bf16.msra.mxu1 %v1987_v10  ;;  %v2003_v20 = vcombine.low %v260_v12, %v268_v13  ;;  %v1992_v62 = vcombine.high %v246_v57, %v254_v58  ;;  %v261_v63 = vld [vmem:[%s2366_s10 + $0x90] sm:$0xff]  ;;  %v1991_v6 = vcombine.low %v246_v57, %v254_v58  ;;  %s2583_s7 = scalar_lea.vmem %s2694_s2, %s2704_s5  ;;  %s2601_s12 = scalar_lea.vmem %s2695_s3, %s2704_s5 }
  0x38   : > { %922 = vmatprep.subr.bf16.mxu0 %v2002_v11  ;;  %v2018_v21 = vcombine.high %v275_v14, %v283_v16  ;;  %963 = vmatprep.subr.bf16.mxu1 %v2004_v15  ;;  %v2020_v22 = vcombine.high %v276_v17, %v284_v18  ;;  %v291_v23 = vld [vmem:[%s2366_s10 + $0x180] sm:$0xff]  ;;  %v292_v25 = vld [vmem:[%s2366_s10 + $0x188] sm:$0xff]  ;;  %v2017_v27 = vcombine.low %v275_v14, %v283_v16  ;;  %v269_v1 = vld [vmem:[%s2366_s10 + $0xd0] sm:$0xff]  ;;  %s2620_s15 = scalar_lea.vmem %s2696_s4, %s2704_s5 }
  0x39   : > { %v299_v24 = vld [vmem:[%s2366_s10 + $0x1c0] sm:$0xff]  ;;  %v300_v26 = vld [vmem:[%s2366_s10 + $0x1c8] sm:$0xff]  ;;  %v2019_v28 = vcombine.low %v276_v17, %v284_v18  ;;  %v262_v2 = vld [vmem:[%s2366_s10 + $0x98] sm:$0xff]  ;;  %v2006_v7 = vcombine.high %v261_v63, %v269_v1  ;;  %v2005_v13 = vcombine.low %v261_v63, %v269_v1 }
  0x3a   : > { %v2034_v29 = vcombine.high %v291_v23, %v299_v24  ;;  %v2036_v30 = vcombine.high %v292_v25, %v300_v26  ;;  %v307_v31 = vld [vmem:[%s2366_s10 + $0x200] sm:$0xff]  ;;  %v308_v33 = vld [vmem:[%s2366_s10 + $0x208] sm:$0xff]  ;;  %v2033_v35 = vcombine.low %v291_v23, %v299_v24  ;;  %v2035_v36 = vcombine.low %v292_v25, %v300_v26  ;;  %v270_v3 = vld [vmem:[%s2366_s10 + $0xd8] sm:$0xff] }
  0x3b   : > { %923 = vmatpush1.bf16.msra.mxu0 %v2001_v19  ;;  %964 = vmatpush1.bf16.msra.mxu1 %v2003_v20  ;;  %v315_v32 = vld [vmem:[%s2366_s10 + $0x240] sm:$0xff]  ;;  %v316_v34 = vld [vmem:[%s2366_s10 + $0x248] sm:$0xff]  ;;  %v2008_v8 = vcombine.high %v262_v2, %v270_v3  ;;  %v277_v9 = vld [vmem:[%s2366_s10 + $0x110] sm:$0xff]  ;;  %v2007_v14 = vcombine.low %v262_v2, %v270_v3 }
  0x3c   : > { %924 = vmatprep.subr.bf16.mxu0 %v2018_v21  ;;  %965 = vmatprep.subr.bf16.mxu1 %v2020_v22  ;;  %v2050_v37 = vcombine.high %v307_v31, %v315_v32  ;;  %v2052_v38 = vcombine.high %v308_v33, %v316_v34  ;;  %v323_v39 = vld [vmem:[%s2366_s10 + $0x280] sm:$0xff]  ;;  %v324_v41 = vld [vmem:[%s2366_s10 + $0x288] sm:$0xff]  ;;  %v2049_v43 = vcombine.low %v307_v31, %v315_v32  ;;  %v285_v10 = vld [vmem:[%s2366_s10 + $0x150] sm:$0xff] }
  0x3d   : > { %v331_v40 = vld [vmem:[%s2366_s10 + $0x2c0] sm:$0xff]  ;;  %v332_v42 = vld [vmem:[%s2366_s10 + $0x2c8] sm:$0xff]  ;;  %v2051_v44 = vcombine.low %v308_v33, %v316_v34  ;;  %v278_v11 = vld [vmem:[%s2366_s10 + $0x118] sm:$0xff]  ;;  %v2022_v15 = vcombine.high %v277_v9, %v285_v10  ;;  %v2021_v21 = vcombine.low %v277_v9, %v285_v10 }
  0x3e   : > { %v2066_v45 = vcombine.high %v323_v39, %v331_v40  ;;  %v2068_v46 = vcombine.high %v324_v41, %v332_v42  ;;  %v339_v47 = vld [vmem:[%s2366_s10 + $0x300] sm:$0x33]  ;;  %v340_v48 = vld [vmem:[%s2366_s10 + $0x308] sm:$0x33]  ;;  %v2065_v49 = vcombine.low %v323_v39, %v331_v40  ;;  %v2067_v50 = vcombine.low %v324_v41, %v332_v42  ;;  %v286_v12 = vld [vmem:[%s2366_s10 + $0x158] sm:$0xff] }
  0x3f   : > { %925 = vmatpush1.bf16.msra.mxu0 %v2017_v27  ;;  %966 = vmatpush1.bf16.msra.mxu1 %v2019_v28  ;;  %v2082_v51 = vcombine.high %v339_v47, %v339_v47  ;;  %v2081_v52 = vcombine.low %v339_v47, %v339_v47  ;;  %v2084_v53 = vcombine.high %v340_v48, %v340_v48  ;;  %v2415_v4 = vld [vmem:[%s2692_s0] sm:$0x1]  ;;  %v293_v17 = vld [vmem:[%s2366_s10 + $0x190] sm:$0xff]  ;;  %v294_v19 = vld [vmem:[%s2366_s10 + $0x198] sm:$0xff] }
  0x40   : > { %926 = vmatprep.subr.bf16.mxu0 %v2034_v29  ;;  %967 = vmatprep.subr.bf16.mxu1 %v2036_v30  ;;  %v2083_v54 = vcombine.low %v340_v48, %v340_v48  ;;  %v2024_v16 = vcombine.high %v278_v11, %v286_v12  ;;  %v301_v18 = vld [vmem:[%s2366_s10 + $0x1d0] sm:$0xff]  ;;  %v302_v20 = vld [vmem:[%s2366_s10 + $0x1d8] sm:$0xff]  ;;  %v2023_v22 = vcombine.low %v278_v11, %v286_v12  ;;  %v263_v57 = vld [vmem:[%s2366_s10 + $0xa0] sm:$0xff] }
  0x41   : > { %v873_v59 = vsel %vm871_vm0, %v2081_v52, 0  ;;  %v2038_v23 = vcombine.high %v293_v17, %v301_v18  ;;  %v2040_v24 = vcombine.high %v294_v19, %v302_v20  ;;  %v309_v25 = vld [vmem:[%s2366_s10 + $0x210] sm:$0xff]  ;;  %v310_v27 = vld [vmem:[%s2366_s10 + $0x218] sm:$0xff]  ;;  %v2037_v29 = vcombine.low %v293_v17, %v301_v18  ;;  %v256_v52 = vld [vmem:[%s2366_s10 + $0x68] sm:$0xff] }
  0x42   : > { %v879_v61 = vsel %vm871_vm0, %v2083_v54, 0  ;;  %v317_v26 = vld [vmem:[%s2366_s10 + $0x250] sm:$0xff]  ;;  %v318_v28 = vld [vmem:[%s2366_s10 + $0x258] sm:$0xff]  ;;  %v2039_v30 = vcombine.low %v294_v19, %v302_v20  ;;  %v271_v58 = vld [vmem:[%s2366_s10 + $0xe0] sm:$0xff] }
  0x43   : > { %927 = vmatpush1.bf16.msra.mxu0 %v2033_v35  ;;  %968 = vmatpush1.bf16.msra.mxu1 %v2035_v36  ;;  %v2054_v31 = vcombine.high %v309_v25, %v317_v26  ;;  %v2056_v32 = vcombine.high %v310_v27, %v318_v28  ;;  %v325_v33 = vld [vmem:[%s2366_s10 + $0x290] sm:$0xff]  ;;  %v326_v35 = vld [vmem:[%s2366_s10 + $0x298] sm:$0xff]  ;;  %v2010_v63 = vcombine.high %v263_v57, %v271_v58  ;;  %v279_v2 = vld [vmem:[%s2366_s10 + $0x120] sm:$0xff] }
  0x44   : > { %928 = vmatprep.subr.bf16.mxu0 %v2050_v37  ;;  %969 = vmatprep.subr.bf16.mxu1 %v2052_v38  ;;  %v333_v34 = vld [vmem:[%s2366_s10 + $0x2d0] sm:$0xff]  ;;  %v334_v36 = vld [vmem:[%s2366_s10 + $0x2d8] sm:$0xff]  ;;  %v2053_v37 = vcombine.low %v309_v25, %v317_v26  ;;  %v2055_v38 = vcombine.low %v310_v27, %v318_v28  ;;  %v287_v3 = vld [vmem:[%s2366_s10 + $0x160] sm:$0xff] }
  0x45   : > { %v2070_v39 = vcombine.high %v325_v33, %v333_v34  ;;  %v2072_v40 = vcombine.high %v326_v35, %v334_v36  ;;  %v341_v41 = vld [vmem:[%s2366_s10 + $0x310] sm:$0x33]  ;;  %v342_v42 = vld [vmem:[%s2366_s10 + $0x318] sm:$0x33]  ;;  %v2026_v9 = vcombine.high %v279_v2, %v287_v3  ;;  %v295_v11 = vld [vmem:[%s2366_s10 + $0x1a0] sm:$0xff] }
  0x46   : > { %v2088_v47 = vcombine.high %v342_v42, %v342_v42  ;;  %v2087_v48 = vcombine.low %v342_v42, %v342_v42  ;;  %v303_v12 = vld [vmem:[%s2366_s10 + $0x1e0] sm:$0xff] }
  0x47   : > { %929 = vmatpush1.bf16.msra.mxu0 %v2049_v43  ;;  %970 = vmatpush1.bf16.msra.mxu1 %v2051_v44  ;;  %v2069_v43 = vcombine.low %v325_v33, %v333_v34  ;;  %v2071_v44 = vcombine.low %v326_v35, %v334_v36  ;;  %v2042_v17 = vcombine.high %v295_v11, %v303_v12  ;;  %v311_v19 = vld [vmem:[%s2366_s10 + $0x220] sm:$0xff]  ;;  %v344_v36 = vld [vmem:[%s2366_s10 + $0x328] sm:$0x33] }
  0x48   : > { %930 = vmatprep.subr.bf16.mxu0 %v2066_v45  ;;  %971 = vmatprep.subr.bf16.mxu1 %v2068_v46  ;;  %v2086_v45 = vcombine.high %v341_v41, %v341_v41  ;;  %v2085_v46 = vcombine.low %v341_v41, %v341_v41  ;;  %v891_v55 = vsel %vm871_vm0, %v2087_v48, 0  ;;  %v319_v20 = vld [vmem:[%s2366_s10 + $0x260] sm:$0xff]  ;;  %v2092_v41 = vcombine.high %v344_v36, %v344_v36 }
  0x49   : > { %v2058_v25 = vcombine.high %v311_v19, %v319_v20  ;;  %v327_v27 = vld [vmem:[%s2366_s10 + $0x2a0] sm:$0xff]  ;;  %v2091_v42 = vcombine.low %v344_v36, %v344_v36 }
  0x4a   : > { %v335_v28 = vld [vmem:[%s2366_s10 + $0x2e0] sm:$0xff] }
  0x4b   : > { %931 = vmatpush1.bf16.msra.mxu0 %v2065_v49  ;;  %972 = vmatpush1.bf16.msra.mxu1 %v2067_v50  ;;  %v247_v49 = vld [vmem:[%s2366_s10 + $0x20] sm:$0xff]  ;;  %v2074_v33 = vcombine.high %v327_v27, %v335_v28 }
  0x4c   : > { %2097 = vmatprep.subr.msk.bf16.mxu0 %vm871_vm0, %v2082_v51  ;;  %2099 = vmatprep.subr.msk.bf16.mxu1 %vm871_vm0, %v2084_v53  ;;  %v255_v50 = vld [vmem:[%s2366_s10 + $0x60] sm:$0xff]  ;;  %v248_v51 = vld [vmem:[%s2366_s10 + $0x28] sm:$0xff]  ;;  %v885_v53 = vsel %vm871_vm0, %v2085_v46, 0  ;;  %v258_v46 = vld [vmem:[%s2366_s10 + $0x78] sm:$0xff] }
  0x4d   : > { %v1994_v54 = vcombine.high %v247_v49, %v255_v50  ;;  %v1996_v56 = vcombine.high %v248_v51, %v256_v52  ;;  %v343_v35 = vld [vmem:[%s2366_s10 + $0x320] sm:$0x33] }
  0x4f   : > { %933 = vmatpush1.bf16.msra.mxu0 %v873_v59  ;;  %974 = vmatpush1.bf16.msra.mxu1 %v879_v61  ;;  %v264_v59 = vld [vmem:[%s2366_s10 + $0xa8] sm:$0xff]  ;;  %v1993_v61 = vcombine.low %v247_v49, %v255_v50  ;;  %v903_v49 = vsel %vm871_vm0, %v2091_v42, 0 }
  0x50   : > { %1002 = vmatprep.subr.bf16.mxu0 %v1990_v60  ;;  %1043 = vmatprep.subr.bf16.mxu1 %v1992_v62  ;;  %v272_v60 = vld [vmem:[%s2366_s10 + $0xe8] sm:$0xff]  ;;  %v1995_v62 = vcombine.low %v248_v51, %v256_v52  ;;  %v265_v51 = vld [vmem:[%s2366_s10 + $0xb0] sm:$0xff] }
  0x51   : > { %v2012_v1 = vcombine.high %v264_v59, %v272_v60  ;;  %v273_v52 = vld [vmem:[%s2366_s10 + $0xf0] sm:$0xff] }
  0x52   : > { %2098 = vmatmul.mubr.msk.bf16.vlgmr.msra.gmra.mrb[0].mxu0 %vm867_vm1, %v2415_v4  ;;  %2100 = vmatmul.mubr.msk.bf16.vlgmr.msra.gmra.mrb[0].mxu1 %vm867_vm1, %v2415_v4 }
  0x53   : > { %1003 = vmatpush1.bf16.msra.mxu0 %v1989_v5  ;;  %1044 = vmatpush1.bf16.msra.mxu1 %v1991_v6  ;;  %v280_v5 = vld [vmem:[%s2366_s10 + $0x128] sm:$0xff] }
  0x54   : > { %1004 = vmatprep.subr.bf16.mxu0 %v2006_v7  ;;  %1045 = vmatprep.subr.bf16.mxu1 %v2008_v8  ;;  %v288_v6 = vld [vmem:[%s2366_s10 + $0x168] sm:$0xff]  ;;  %v2009_v7 = vcombine.low %v263_v57, %v271_v58  ;;  %v2011_v8 = vcombine.low %v264_v59, %v272_v60  ;;  %v2014_v57 = vcombine.high %v265_v51, %v273_v52  ;;  %v281_v59 = vld [vmem:[%s2366_s10 + $0x130] sm:$0xff] }
  0x55   : > { %1034 = vmatprep.mubr.bf16.mxu0 %v2256_v0  ;;  %1075 = vmatprep.mubr.bf16.mxu1 %v2256_v0  ;;  %v2028_v10 = vcombine.high %v280_v5, %v288_v6  ;;  %v289_v60 = vld [vmem:[%s2366_s10 + $0x170] sm:$0xff] }
  0x57   : > { %1005 = vmatpush1.bf16.msra.mxu0 %v2005_v13  ;;  %1046 = vmatpush1.bf16.msra.mxu1 %v2007_v14  ;;  %v296_v13 = vld [vmem:[%s2366_s10 + $0x1a8] sm:$0xff] }
  0x58   : > { %1006 = vmatprep.subr.bf16.mxu0 %v2022_v15  ;;  %1047 = vmatprep.subr.bf16.mxu1 %v2024_v16  ;;  %v304_v14 = vld [vmem:[%s2366_s10 + $0x1e8] sm:$0xff]  ;;  %v2025_v15 = vcombine.low %v279_v2, %v287_v3  ;;  %v2027_v16 = vcombine.low %v280_v5, %v288_v6  ;;  %v2030_v2 = vcombine.high %v281_v59, %v289_v60  ;;  %v297_v5 = vld [vmem:[%s2366_s10 + $0x1b0] sm:$0xff] }
  0x59   : > { %v2044_v18 = vcombine.high %v296_v13, %v304_v14  ;;  %v305_v6 = vld [vmem:[%s2366_s10 + $0x1f0] sm:$0xff] }
  0x5b   : > { %1007 = vmatpush1.bf16.msra.mxu0 %v2021_v21  ;;  %1048 = vmatpush1.bf16.msra.mxu1 %v2023_v22  ;;  %v312_v21 = vld [vmem:[%s2366_s10 + $0x228] sm:$0xff] }
  0x5c   : > { %1008 = vmatprep.subr.bf16.mxu0 %v2038_v23  ;;  %1049 = vmatprep.subr.bf16.mxu1 %v2040_v24  ;;  %v320_v22 = vld [vmem:[%s2366_s10 + $0x268] sm:$0xff]  ;;  %v2041_v23 = vcombine.low %v295_v11, %v303_v12  ;;  %v2043_v24 = vcombine.low %v296_v13, %v304_v14  ;;  %v2046_v11 = vcombine.high %v297_v5, %v305_v6  ;;  %v313_v13 = vld [vmem:[%s2366_s10 + $0x230] sm:$0xff] }
  0x5d   : > { %v2060_v26 = vcombine.high %v312_v21, %v320_v22  ;;  %v321_v14 = vld [vmem:[%s2366_s10 + $0x270] sm:$0xff] }
  0x5f   : > { %1009 = vmatpush1.bf16.msra.mxu0 %v2037_v29  ;;  %1050 = vmatpush1.bf16.msra.mxu1 %v2039_v30  ;;  %v328_v29 = vld [vmem:[%s2366_s10 + $0x2a8] sm:$0xff] }
  0x60   : > { %1010 = vmatprep.subr.bf16.mxu0 %v2054_v31  ;;  %1051 = vmatprep.subr.bf16.mxu1 %v2056_v32  ;;  %v336_v30 = vld [vmem:[%s2366_s10 + $0x2e8] sm:$0xff]  ;;  %v2057_v31 = vcombine.low %v311_v19, %v319_v20  ;;  %v2059_v32 = vcombine.low %v312_v21, %v320_v22  ;;  %v329_v20 = vld [vmem:[%s2366_s10 + $0x2b0] sm:$0xff]  ;;  %v330_v22 = vld [vmem:[%s2366_s10 + $0x2b8] sm:$0xff] }
  0x61   : > { %v2076_v34 = vcombine.high %v328_v29, %v336_v30  ;;  %v337_v21 = vld [vmem:[%s2366_s10 + $0x2f0] sm:$0xff] }
  0x63   : > { %1011 = vmatpush1.bf16.msra.mxu0 %v2053_v37  ;;  %1052 = vmatpush1.bf16.msra.mxu1 %v2055_v38  ;;  %v2073_v37 = vcombine.low %v327_v27, %v335_v28  ;;  %v2075_v38 = vcombine.low %v328_v29, %v336_v30  ;;  %v345_v28 = vld [vmem:[%s2366_s10 + $0x330] sm:$0x33]  ;;  %v346_v29 = vld [vmem:[%s2366_s10 + $0x338] sm:$0x33]  ;;  %v2077_v30 = vcombine.low %v329_v20, %v337_v21 }
  0x64   : > { %1012 = vmatprep.subr.bf16.mxu0 %v2070_v39  ;;  %1053 = vmatprep.subr.bf16.mxu1 %v2072_v40  ;;  %v2090_v39 = vcombine.high %v343_v35, %v343_v35  ;;  %v2089_v40 = vcombine.low %v343_v35, %v343_v35  ;;  %v2095_v35 = vcombine.low %v346_v29, %v346_v29 }
  0x67   : > { %1013 = vmatpush1.bf16.msra.mxu0 %v2069_v43  ;;  %1054 = vmatpush1.bf16.msra.mxu1 %v2071_v44  ;;  %v249_v43 = vld [vmem:[%s2366_s10 + $0x30] sm:$0xff] }
  0x68   : > { %2101 = vmatprep.subr.msk.bf16.mxu0 %vm871_vm0, %v2086_v45  ;;  %2103 = vmatprep.subr.msk.bf16.mxu1 %vm871_vm0, %v2088_v47  ;;  %v257_v44 = vld [vmem:[%s2366_s10 + $0x70] sm:$0xff]  ;;  %v250_v45 = vld [vmem:[%s2366_s10 + $0x38] sm:$0xff]  ;;  %v897_v47 = vsel %vm871_vm0, %v2089_v40, 0  ;;  %v1287_v40 = vlaneseq }
  0x69   : > { %v1998_v48 = vcombine.high %v249_v43, %v257_v44  ;;  %v2000_v50 = vcombine.high %v250_v45, %v258_v46 }
  0x6a   : > { %v1288_v42 = vshrl.u32 %v1287_v40, 7 }
  0x6b   : > { %1015 = vmatpush1.bf16.msra.mxu0 %v885_v53  ;;  %1056 = vmatpush1.bf16.msra.mxu1 %v891_v55  ;;  %v266_v53 = vld [vmem:[%s2366_s10 + $0xb8] sm:$0xff]  ;;  %v1997_v55 = vcombine.low %v249_v43, %v257_v44 }
  0x6c   : > { %1084 = vmatprep.subr.bf16.mxu0 %v1994_v54  ;;  %1125 = vmatprep.subr.bf16.mxu1 %v1996_v56  ;;  %v274_v54 = vld [vmem:[%s2366_s10 + $0xf8] sm:$0xff]  ;;  %v1999_v56 = vcombine.low %v250_v45, %v258_v46 }
  0x6d   : > { %v2016_v58 = vcombine.high %v266_v53, %v274_v54 }
  0x6e   : > { %2102 = vmatmul.mubr.msk.bf16.vlgmr.msra.gmra.mrb[4].mxu0 %vm867_vm1, %v2415_v4  ;;  %2104 = vmatmul.mubr.msk.bf16.vlgmr.msra.gmra.mrb[4].mxu1 %vm867_vm1, %v2415_v4 }
  0x6f   : > { %1085 = vmatpush1.bf16.msra.mxu0 %v1993_v61  ;;  %1126 = vmatpush1.bf16.msra.mxu1 %v1995_v62  ;;  %v282_v61 = vld [vmem:[%s2366_s10 + $0x138] sm:$0xff] }
  0x70   : > { %1086 = vmatprep.subr.bf16.mxu0 %v2010_v63  ;;  %1127 = vmatprep.subr.bf16.mxu1 %v2012_v1  ;;  %v290_v62 = vld [vmem:[%s2366_s10 + $0x178] sm:$0xff]  ;;  %v2013_v63 = vcombine.low %v265_v51, %v273_v52  ;;  %v2015_v1 = vcombine.low %v266_v53, %v274_v54 }
  0x71   : > { %1116 = vmatprep.mubr.bf16.mxu0 %v2256_v0  ;;  %1157 = vmatprep.mubr.bf16.mxu1 %v2256_v0  ;;  %v2032_v3 = vcombine.high %v282_v61, %v290_v62 }
  0x73   : > { %1087 = vmatpush1.bf16.msra.mxu0 %v2009_v7  ;;  %1128 = vmatpush1.bf16.msra.mxu1 %v2011_v8  ;;  %v298_v7 = vld [vmem:[%s2366_s10 + $0x1b8] sm:$0xff] }
  0x74   : > { %1088 = vmatprep.subr.bf16.mxu0 %v2026_v9  ;;  %1129 = vmatprep.subr.bf16.mxu1 %v2028_v10  ;;  %v306_v8 = vld [vmem:[%s2366_s10 + $0x1f8] sm:$0xff]  ;;  %v2029_v9 = vcombine.low %v281_v59, %v289_v60  ;;  %v2031_v10 = vcombine.low %v282_v61, %v290_v62 }
  0x75   : > { %v2048_v12 = vcombine.high %v298_v7, %v306_v8 }
  0x77   : > { %1089 = vmatpush1.bf16.msra.mxu0 %v2025_v15  ;;  %1130 = vmatpush1.bf16.msra.mxu1 %v2027_v16  ;;  %v314_v15 = vld [vmem:[%s2366_s10 + $0x238] sm:$0xff] }
  0x78   : > { %1090 = vmatprep.subr.bf16.mxu0 %v2042_v17  ;;  %1131 = vmatprep.subr.bf16.mxu1 %v2044_v18  ;;  %v322_v16 = vld [vmem:[%s2366_s10 + $0x278] sm:$0xff]  ;;  %v2045_v17 = vcombine.low %v297_v5, %v305_v6  ;;  %v2062_v18 = vcombine.high %v313_v13, %v321_v14 }
  0x79   : > { %v2064_v19 = vcombine.high %v314_v15, %v322_v16 }
  0x7b   : > { %1091 = vmatpush1.bf16.msra.mxu0 %v2041_v23  ;;  %1132 = vmatpush1.bf16.msra.mxu1 %v2043_v24  ;;  %v338_v23 = vld [vmem:[%s2366_s10 + $0x2f8] sm:$0xff]  ;;  %v2061_v24 = vcombine.low %v313_v13, %v321_v14 }
  0x7c   : > { %1092 = vmatprep.subr.bf16.mxu0 %v2058_v25  ;;  %1133 = vmatprep.subr.bf16.mxu1 %v2060_v26  ;;  %v2063_v25 = vcombine.low %v314_v15, %v322_v16  ;;  %v2078_v26 = vcombine.high %v329_v20, %v337_v21  ;;  %v2080_v27 = vcombine.high %v330_v22, %v338_v23 }
  0x7f   : > { %1093 = vmatpush1.bf16.msra.mxu0 %v2057_v31  ;;  %1134 = vmatpush1.bf16.msra.mxu1 %v2059_v32  ;;  %v2079_v31 = vcombine.low %v330_v22, %v338_v23  ;;  %v2094_v32 = vcombine.high %v345_v28, %v345_v28 }
  0x80   : > { %1094 = vmatprep.subr.bf16.mxu0 %v2074_v33  ;;  %1135 = vmatprep.subr.bf16.mxu1 %v2076_v34  ;;  %v2093_v33 = vcombine.low %v345_v28, %v345_v28  ;;  %v2096_v34 = vcombine.high %v346_v29, %v346_v29 }
  0x82   : > { %v909_v36 = vsel %vm871_vm0, %v2093_v33, 0 }
  0x83   : > { %1095 = vmatpush1.bf16.msra.mxu0 %v2073_v37  ;;  %1136 = vmatpush1.bf16.msra.mxu1 %v2075_v38  ;;  %v915_v37 = vsel %vm871_vm0, %v2095_v35, 0  ;;  %v2257_v38 = vmov 1966171168  }
  0x84   : > { %2105 = vmatprep.subr.msk.bf16.mxu0 %vm871_vm0, %v2090_v39  ;;  %2107 = vmatprep.subr.msk.bf16.mxu1 %vm871_vm0, %v2092_v41  ;;  %v1285_v39 = vunpack.c.l.s4 %v2257_v38 }
  0x86   : > { %v1286_v41 = vunpack.c.0.s8 %v1285_v39 }
  0x87   : > { %1097 = vmatpush1.bf16.msra.mxu0 %v897_v47  ;;  %1138 = vmatpush1.bf16.msra.mxu1 %v903_v49 }
  0x88   : > { %1166 = vmatprep.subr.bf16.mxu0 %v1998_v48  ;;  %1207 = vmatprep.subr.bf16.mxu1 %v2000_v50  ;;  %v2521_v44 = vsub.s32 %v1286_v41, %v1288_v42 }
  0x8a   : > { %2106 = vmatmul.mubr.msk.bf16.vlgmr.msra.gmra.mrb[8].mxu0 %vm867_vm1, %v2415_v4  ;;  %2108 = vmatmul.mubr.msk.bf16.vlgmr.msra.gmra.mrb[8].mxu1 %vm867_vm1, %v2415_v4 }
  0x8b   : > { %1167 = vmatpush1.bf16.msra.mxu0 %v1997_v55  ;;  %1208 = vmatpush1.bf16.msra.mxu1 %v1999_v56 }
  0x8c   : > { %1168 = vmatprep.subr.bf16.mxu0 %v2014_v57  ;;  %1209 = vmatprep.subr.bf16.mxu1 %v2016_v58 }
  0x8d   : > { %1198 = vmatprep.mubr.bf16.mxu0 %v2256_v0  ;;  %1239 = vmatprep.mubr.bf16.mxu1 %v2256_v0  ;;  %v2047_v0 = vcombine.low %v298_v7, %v306_v8 }
  0x8f   : > { %1169 = vmatpush1.bf16.msra.mxu0 %v2013_v63  ;;  %1210 = vmatpush1.bf16.msra.mxu1 %v2015_v1 }
  0x90   : > { %1170 = vmatprep.subr.bf16.mxu0 %v2030_v2  ;;  %1211 = vmatprep.subr.bf16.mxu1 %v2032_v3 }
  0x93   : > { %1171 = vmatpush1.bf16.msra.mxu0 %v2029_v9  ;;  %1212 = vmatpush1.bf16.msra.mxu1 %v2031_v10 }
  0x94   : > { %1172 = vmatprep.subr.bf16.mxu0 %v2046_v11  ;;  %1213 = vmatprep.subr.bf16.mxu1 %v2048_v12 }
  0x97   : > { %1173 = vmatpush1.bf16.msra.mxu0 %v2045_v17  ;;  %1214 = vmatpush1.bf16.msra.mxu1 %v2047_v0 }
  0x98   : > { %1174 = vmatprep.subr.bf16.mxu0 %v2062_v18  ;;  %1215 = vmatprep.subr.bf16.mxu1 %v2064_v19 }
  0x9b   : > { %1175 = vmatpush1.bf16.msra.mxu0 %v2061_v24  ;;  %1216 = vmatpush1.bf16.msra.mxu1 %v2063_v25 }
  0x9c   : > { %1176 = vmatprep.subr.bf16.mxu0 %v2078_v26  ;;  %1217 = vmatprep.subr.bf16.mxu1 %v2080_v27 }
  0x9f   : > { %1177 = vmatpush1.bf16.msra.mxu0 %v2077_v30  ;;  %1218 = vmatpush1.bf16.msra.mxu1 %v2079_v31 }
  0xa0   : > { %2109 = vmatprep.subr.msk.bf16.mxu0 %vm871_vm0, %v2094_v32  ;;  %2111 = vmatprep.subr.msk.bf16.mxu1 %vm871_vm0, %v2096_v34 }
  0xa3   : > { %1179 = vmatpush1.bf16.msra.mxu0 %v909_v36  ;;  %1220 = vmatpush1.bf16.msra.mxu1 %v915_v37 }
  0xa6   : > { %2110 = vmatmul.mubr.msk.bf16.vlgmr.msra.gmra.mrb[12].mxu0 %vm867_vm1, %v2415_v4  ;;  %2112 = vmatmul.mubr.msk.bf16.vlgmr.msra.gmra.mrb[12].mxu1 %vm867_vm1, %v2415_v4 }
 0x125   : > { %v954_v43 = vpop.f32.mrb[0].mxu0  ;;  %v995_v47 = vpop.f32.mrb[0].mxu1 }
 0x126   : > { %v1382_v45 = vsel %vm871_vm0, %v954_v43, 0.0  ;;  %v1612_v46 = vmul.f32 %v954_v43, %v954_v43  ;;  %v956_v48 = vpop.f32.mrb[1].mxu0  ;;  %v1396_v50 = vsel %vm871_vm0, %v995_v47, 0.0  ;;  %v1614_v51 = vmul.f32 %v995_v47, %v995_v47  ;;  %v997_v53 = vpop.f32.mrb[1].mxu1 }
 0x127   : > { %v1383_v49 = vrot.slane %v1382_v45, 4  ;;  %v2113_v52 = vpack.c.bf16 %v956_v48, %v954_v43  ;;  %v958_v4 = vpop.f32.mrb[2].mxu0  ;;  %v1397_v55 = vrot.slane %v1396_v50, 4  ;;  %v1389_v56 = vsel %vm871_vm0, %v956_v48, 0.0  ;;  %v999_v58 = vpop.f32.mrb[2].mxu1 }
 0x128   : > { %v1628_v54 = vsel %vm871_vm0, %v1612_v46, 0.0  ;;  %v1613_v57 = vmul.f32 %v956_v48, %v956_v48  ;;  %v959_v59 = vpop.f32.mrb[3].mxu0  ;;  %v1642_v62 = vsel %vm871_vm0, %v1614_v51, 0.0  ;;  %v1000_v1 = vpop.f32.mrb[3].mxu1  ;;  %v1390_v5 = vrot.slane %v1389_v56, 4 }
 0x129   : > { %v1384_v60 = vadd.f32 %v1383_v49, %v1382_v45  ;;  %v1629_v61 = vrot.slane %v1628_v54, 4  ;;  %v2529_v63 = vrot.slane %v2113_v52, %v2521_v44  ;;  %v1398_v2 = vadd.f32 %v1397_v55, %v1396_v50 }
 0x12a   : > { %v1643_v3 = vrot.slane %v1642_v62, 4  ;;  %v1635_v6 = vsel %vm871_vm0, %v1613_v57, 0.0  ;;  %v2114_v10 = vpack.c.bf16 %v997_v53, %v995_v47  ;;  %v1391_v13 = vadd.f32 %v1390_v5, %v1389_v56 }
 0x12b   : > { %v1385_v7 = vrot.slane %v1384_v60, 2  ;;  %v1630_v8 = vadd.f32 %v1629_v61, %v1628_v54  ;;  %v1636_v9 = vrot.slane %v1635_v6, 4  ;;  %v1399_v11 = vrot.slane %v1398_v2, 2 }
 0x12c   : > { %v1644_v12 = vadd.f32 %v1643_v3, %v1642_v62  ;;  %v1403_v14 = vsel %vm871_vm0, %v997_v53, 0.0  ;;  %v2534_v0 = vrot.slane %v2114_v10, %v2521_v44  ;;  %v1392_v19 = vrot.slane %v1391_v13, 2 }
 0x12d   : > { %v1386_v15 = vadd.f32 %v1385_v7, %v1384_v60  ;;  %v1631_v16 = vrot.slane %v1630_v8, 2  ;;  %v1637_v17 = vadd.f32 %v1636_v9, %v1635_v6  ;;  %v1400_v18 = vadd.f32 %v1399_v11, %v1398_v2 }
 0x12e   : > { %v1404_v20 = vrot.slane %v1403_v14, 4  ;;  %v1312_v24 = vcombine.low %v2529_v63, %v2534_v0  ;;  %v1393_v25 = vadd.f32 %v1392_v19, %v1391_v13  ;;  %v1645_v28 = vrot.slane %v1644_v12, 2 }
 0x12f   : > { %v1387_v21 = vrot.slane %v1386_v15, 1  ;;  %v1632_v22 = vadd.f32 %v1631_v16, %v1630_v8  ;;  %v1638_v23 = vrot.slane %v1637_v17, 2  ;;  %v1401_v31 = vrot.slane %v1400_v18, 1 }
 0x130   : > { %v1405_v26 = vadd.f32 %v1404_v20, %v1403_v14  ;;  %v1394_v32 = vrot.slane %v1393_v25, 1  ;;  %v1615_v36 = vmul.f32 %v997_v53, %v997_v53  ;;  %v1646_v39 = vadd.f32 %v1645_v28, %v1644_v12 }
 0x131   : > { %v1633_v27 = vrot.slane %v1632_v22, 1  ;;  %v1639_v29 = vadd.f32 %v1638_v23, %v1637_v17  ;;  %v1388_v30 = vadd.f32 %v1387_v21, %v1386_v15  ;;  %v1402_v42 = vadd.f32 %v1401_v31, %v1400_v18 }
 0x132   : > { %v1406_v33 = vrot.slane %v1405_v26, 2  ;;  %v1395_v37 = vadd.f32 %v1394_v32, %v1393_v25  ;;  %v1649_v41 = vsel %vm871_vm0, %v1615_v36, 0.0  ;;  %v1647_v50 = vrot.slane %v1646_v39, 1 }
 0x133   : > { %v1634_v34 = vadd.f32 %v1633_v27, %v1632_v22  ;;  %v1640_v35 = vrot.slane %v1639_v29, 1  ;;  %v1650_v46 = vrot.slane %v1649_v41, 4 }
 0x134   : > { %v1407_v38 = vadd.f32 %v1406_v33, %v1405_v26  ;;  %v1510_v43 = vcombine.low %v1388_v30, %v1395_v37  ;;  %v1648_v55 = vadd.f32 %v1647_v50, %v1646_v39 }
 0x135   : > { %v1641_v40 = vadd.f32 %v1640_v35, %v1639_v29  ;;  %v1651_v49 = vadd.f32 %v1650_v46, %v1649_v41 }
 0x136   : > { %v1408_v45 = vrot.slane %v1407_v38, 1  ;;  %v2540_v51 = vrot.slane %v1510_v43, %v2521_v44 }
 0x137   : > { %v1756_v47 = vcombine.low %v1634_v34, %v1641_v40  ;;  %v1652_v4 = vrot.slane %v1651_v49, 2 }
 0x138   : > { %v1409_v48 = vadd.f32 %v1408_v45, %v1407_v38  ;;  %v1320_v45 = vrot.slane %v1312_v24, %v2521_v44 }
 0x139   : > { %v1653_v54 = vadd.f32 %v1652_v4, %v1651_v49  ;;  %v2548_v60 = vrot.slane %v1756_v47, %v2521_v44 }
 0x13a   : > { %v1511_v52 = vcombine.low %v1402_v42, %v1409_v48 }
 0x13b   : > { %v1654_v57 = vrot.slane %v1653_v54, 1 }
 0x13c   : > { %v2543_v53 = vrot.slane %v1511_v52, %v2521_v44 }
 0x13d   : > { %v1655_v58 = vadd.f32 %v1654_v57, %v1653_v54 }
 0x13e   : > { %v1542_v56 = vcombine.low %v2540_v51, %v2543_v53 }
 0x13f   : > { %v1757_v61 = vcombine.low %v1648_v55, %v1655_v58 }
 0x141   : > { %v1036_v59 = vpop.f32.mrb[4].mxu0  ;;  %v1077_v2 = vpop.f32.mrb[4].mxu1  ;;  %v2557_v11 = vrot.slane %v1757_v61, %v2521_v44 }
 0x142   : > { %v1410_v62 = vsel %vm871_vm0, %v1036_v59, 0.0  ;;  %v1616_v1 = vmul.f32 %v1036_v59, %v1036_v59  ;;  %v1038_v3 = vpop.f32.mrb[5].mxu0  ;;  %v1424_v6 = vsel %vm871_vm0, %v1077_v2, 0.0  ;;  %v1618_v7 = vmul.f32 %v1077_v2, %v1077_v2  ;;  %v1079_v9 = vpop.f32.mrb[5].mxu1 }
 0x143   : > { %v1411_v5 = vrot.slane %v1410_v62, 4  ;;  %v2115_v8 = vpack.c.bf16 %v1038_v3, %v1036_v59  ;;  %v1040_v10 = vpop.f32.mrb[6].mxu0  ;;  %v1425_v13 = vrot.slane %v1424_v6, 4  ;;  %v1417_v14 = vsel %vm871_vm0, %v1038_v3, 0.0  ;;  %v1081_v15 = vpop.f32.mrb[6].mxu1 }
 0x144   : > { %v1656_v12 = vsel %vm871_vm0, %v1616_v1, 0.0  ;;  %v1041_v16 = vpop.f32.mrb[7].mxu0  ;;  %v1670_v19 = vsel %vm871_vm0, %v1618_v7, 0.0  ;;  %v1082_v21 = vpop.f32.mrb[7].mxu1  ;;  %v1788_v22 = vcombine.low %v2548_v60, %v2557_v11  ;;  %v1418_v26 = vrot.slane %v1417_v14, 4 }
 0x145   : > { %v1412_v17 = vadd.f32 %v1411_v5, %v1410_v62  ;;  %v1657_v18 = vrot.slane %v1656_v12, 4  ;;  %v1304_v20 = vrot.slane %v2115_v8, %v2521_v44  ;;  %v1426_v23 = vadd.f32 %v1425_v13, %v1424_v6 }
 0x146   : > { %v1671_v25 = vrot.slane %v1670_v19, 4  ;;  %v1617_v29 = vmul.f32 %v1038_v3, %v1038_v3  ;;  %v2116_v30 = vpack.c.bf16 %v1079_v9, %v1077_v2  ;;  %v1419_v33 = vadd.f32 %v1418_v26, %v1417_v14 }
 0x147   : > { %v1413_v27 = vrot.slane %v1412_v17, 2  ;;  %v1658_v28 = vadd.f32 %v1657_v18, %v1656_v12  ;;  %v1427_v31 = vrot.slane %v1426_v23, 2  ;;  %v1431_v43 = vsel %vm871_vm0, %v1079_v9, 0.0 }
 0x148   : > { %v1672_v32 = vadd.f32 %v1671_v25, %v1670_v19  ;;  %v1663_v36 = vsel %vm871_vm0, %v1617_v29, 0.0  ;;  %v1311_v37 = vrot.slane %v2116_v30, %v2521_v44  ;;  %v1420_v38 = vrot.slane %v1419_v33, 2 }
 0x149   : > { %v1414_v34 = vadd.f32 %v1413_v27, %v1412_v17  ;;  %v1659_v35 = vrot.slane %v1658_v28, 2  ;;  %v1664_v39 = vrot.slane %v1663_v36, 4  ;;  %v1428_v48 = vadd.f32 %v1427_v31, %v1426_v23 }
 0x14a   : > { %v1313_v42 = vcombine.low %v1304_v20, %v1311_v37  ;;  %v1421_v46 = vadd.f32 %v1420_v38, %v1419_v33  ;;  %v1673_v49 = vrot.slane %v1672_v32, 2  ;;  %v1432_v52 = vrot.slane %v1431_v43, 4 }
 0x14b   : > { %v1415_v40 = vrot.slane %v1414_v34, 1  ;;  %v1660_v41 = vadd.f32 %v1659_v35, %v1658_v28  ;;  %v1665_v47 = vadd.f32 %v1664_v39, %v1663_v36  ;;  %v1619_v0 = vmul.f32 %v1079_v9, %v1079_v9 }
 0x14c   : > { %v1327_v50 = vrot.slane %v1313_v42, %v2521_v44  ;;  %v1422_v55 = vrot.slane %v1421_v46, 1  ;;  %v1433_v63 = vadd.f32 %v1432_v52, %v1431_v43  ;;  %v1429_v61 = vrot.slane %v1428_v48, 1 }
 0x14d   : > { %v1416_v4 = vadd.f32 %v1415_v40, %v1414_v34  ;;  %v1661_v54 = vrot.slane %v1660_v41, 1  ;;  %v1666_v57 = vrot.slane %v1665_v47, 2  ;;  %v1674_v62 = vadd.f32 %v1673_v49, %v1672_v32 }
 0x14e   : > { %v1328_v58 = vcombine.low %v1320_v45, %v1327_v50  ;;  %v1423_v24 = vadd.f32 %v1422_v55, %v1421_v46  ;;  %v1434_v1 = vrot.slane %v1433_v63, 2  ;;  %v1677_v2 = vsel %vm871_vm0, %v1619_v0, 0.0 }
 0x14f   : > { %v1667_v59 = vadd.f32 %v1666_v57, %v1665_v47  ;;  %v1662_v3 = vadd.f32 %v1661_v54, %v1660_v41  ;;  %v1678_v7 = vrot.slane %v1677_v2, 4  ;;  %v1430_v13 = vadd.f32 %v1429_v61, %v1428_v48 }
 0x150   : > { %1380 = vst [vmem:[%s2583_s7] sm:$0xff] %v1328_v58  ;;  %v1512_v5 = vcombine.low %v1416_v4, %v1423_v24  ;;  %v1435_v8 = vadd.f32 %v1434_v1, %v1433_v63  ;;  %v1675_v15 = vrot.slane %v1674_v62, 1  ;;  %v1550_v27 = vrot.slane %v1542_v56, %v2521_v44 }
 0x151   : > { %v1668_v6 = vrot.slane %v1667_v59, 1  ;;  %v1679_v12 = vadd.f32 %v1678_v7, %v1677_v2  ;;  %v1796_v52 = vrot.slane %v1788_v22, %v2521_v44 }
 0x152   : > { %v1436_v14 = vrot.slane %v1435_v8, 1  ;;  %v1534_v19 = vrot.slane %v1512_v5, %v2521_v44  ;;  %v1676_v21 = vadd.f32 %v1675_v15, %v1674_v62 }
 0x153   : > { %v1669_v10 = vadd.f32 %v1668_v6, %v1667_v59  ;;  %v1680_v9 = vrot.slane %v1679_v12, 2 }
 0x154   : > { %v1437_v17 = vadd.f32 %v1436_v14, %v1435_v8 }
 0x155   : > { %v1758_v16 = vcombine.low %v1662_v3, %v1669_v10  ;;  %v1681_v18 = vadd.f32 %v1680_v9, %v1679_v12 }
 0x156   : > { %v1513_v20 = vcombine.low %v1430_v13, %v1437_v17 }
 0x157   : > { %v1682_v23 = vrot.slane %v1681_v18, 1  ;;  %v1780_v30 = vrot.slane %v1758_v16, %v2521_v44 }
 0x158   : > { %v1541_v25 = vrot.slane %v1513_v20, %v2521_v44 }
 0x159   : > { %v1683_v26 = vadd.f32 %v1682_v23, %v1681_v18 }
 0x15a   : > { %v1543_v28 = vcombine.low %v1534_v19, %v1541_v25 }
 0x15b   : > { %v1759_v31 = vcombine.low %v1676_v21, %v1683_v26 }
 0x15c   : > { %v1557_v36 = vrot.slane %v1543_v28, %v2521_v44 }
 0x15d   : > { %v1118_v29 = vpop.f32.mrb[8].mxu0  ;;  %v1159_v34 = vpop.f32.mrb[8].mxu1  ;;  %v1787_v53 = vrot.slane %v1759_v31, %v2521_v44 }
 0x15e   : > { %v1438_v32 = vsel %vm871_vm0, %v1118_v29, 0.0  ;;  %v1620_v33 = vmul.f32 %v1118_v29, %v1118_v29  ;;  %v1120_v35 = vpop.f32.mrb[9].mxu0  ;;  %v1452_v38 = vsel %vm871_vm0, %v1159_v34, 0.0  ;;  %v1622_v39 = vmul.f32 %v1159_v34, %v1159_v34  ;;  %v1161_v40 = vpop.f32.mrb[9].mxu1 }
 0x15f   : > { %v1439_v37 = vrot.slane %v1438_v32, 4  ;;  %v1122_v51 = vpop.f32.mrb[10].mxu0  ;;  %v1453_v41 = vrot.slane %v1452_v38, 4  ;;  %v2117_v42 = vpack.c.bf16 %v1120_v35, %v1118_v29  ;;  %v1163_v43 = vpop.f32.mrb[10].mxu1  ;;  %v1558_v46 = vcombine.low %v1550_v27, %v1557_v36 }
 0x160   : > { %v1684_v56 = vsel %vm871_vm0, %v1620_v33, 0.0  ;;  %v1123_v45 = vpop.f32.mrb[11].mxu0  ;;  %v1698_v49 = vsel %vm871_vm0, %v1622_v39, 0.0  ;;  %v1164_v50 = vpop.f32.mrb[11].mxu1  ;;  %v1789_v4 = vcombine.low %v1780_v30, %v1787_v53  ;;  %v1445_v63 = vsel %vm871_vm0, %v1120_v35, 0.0 }
 0x161   : > { %v1440_v47 = vadd.f32 %v1439_v37, %v1438_v32  ;;  %v1685_v48 = vrot.slane %v1684_v56, 4  ;;  %v1454_v54 = vadd.f32 %v1453_v41, %v1452_v38  ;;  %v1699_v55 = vrot.slane %v1698_v49, 4  ;;  %1610 = vst [vmem:[%s2601_s12] sm:$0xff] %v1558_v46 }
 0x162   : > { %v1621_v0 = vmul.f32 %v1120_v35, %v1120_v35  ;;  %v1803_v24 = vrot.slane %v1789_v4, %v2521_v44  ;;  %v2614_v61 = vrot.slane %v2117_v42, %v2521_v44  ;;  %v1446_v62 = vrot.slane %v1445_v63, 4 }
 0x163   : > { %v1441_v57 = vrot.slane %v1440_v47, 2  ;;  %v1686_v58 = vadd.f32 %v1685_v48, %v1684_v56  ;;  %v1455_v59 = vrot.slane %v1454_v54, 2  ;;  %v2118_v1 = vpack.c.bf16 %v1161_v40, %v1159_v34 }
 0x164   : > { %v1691_v22 = vsel %vm871_vm0, %v1621_v0, 0.0  ;;  %v1804_v2 = vcombine.low %v1796_v52, %v1803_v24  ;;  %v1700_v3 = vadd.f32 %v1699_v55, %v1698_v49  ;;  %v1447_v5 = vadd.f32 %v1446_v62, %v1445_v63 }
 0x165   : > { %v1442_v60 = vadd.f32 %v1441_v57, %v1440_v47  ;;  %v1687_v11 = vrot.slane %v1686_v58, 2  ;;  %v1692_v7 = vrot.slane %v1691_v22, 4  ;;  %v2624_v8 = vrot.slane %v2118_v1, %v2521_v44 }
 0x166   : > { %1856 = vst [vmem:[%s2620_s15] sm:$0xff] %v1804_v2  ;;  %v1448_v12 = vrot.slane %v1447_v5, 2  ;;  %v1459_v13 = vsel %vm871_vm0, %v1161_v40, 0.0  ;;  %v1456_v14 = vadd.f32 %v1455_v59, %v1454_v54  ;;  %v1701_v9 = vrot.slane %v1700_v3, 2 }
 0x167   : > { %v1688_v6 = vadd.f32 %v1687_v11, %v1686_v58  ;;  %v1443_v10 = vrot.slane %v1442_v60, 1  ;;  %v1693_v15 = vadd.f32 %v1692_v7, %v1691_v22  ;;  %v1361_v16 = vcombine.low %v2614_v61, %v2624_v8 }
 0x168   : > { %v1449_v17 = vadd.f32 %v1448_v12, %v1447_v5  ;;  %v1460_v18 = vrot.slane %v1459_v13, 4  ;;  %v1623_v21 = vmul.f32 %v1161_v40, %v1161_v40  ;;  %v1457_v27 = vrot.slane %v1456_v14, 1 }
 0x169   : > { %v1689_v19 = vrot.slane %v1688_v6, 1  ;;  %v1694_v20 = vrot.slane %v1693_v15, 2  ;;  %v1444_v23 = vadd.f32 %v1443_v10, %v1442_v60  ;;  %v1702_v30 = vadd.f32 %v1701_v9, %v1700_v3 }
 0x16a   : > { %v1450_v25 = vrot.slane %v1449_v17, 1  ;;  %v1461_v26 = vadd.f32 %v1460_v18, %v1459_v13  ;;  %v1705_v29 = vsel %vm871_vm0, %v1623_v21, 0.0  ;;  %v1458_v51 = vadd.f32 %v1457_v27, %v1456_v14 }
 0x16b   : > { %v1695_v28 = vadd.f32 %v1694_v20, %v1693_v15  ;;  %v1706_v33 = vrot.slane %v1705_v29, 4  ;;  %v1690_v34 = vadd.f32 %v1689_v19, %v1688_v6  ;;  %v1703_v53 = vrot.slane %v1702_v30, 1 }
 0x16c   : > { %v1451_v31 = vadd.f32 %v1450_v25, %v1449_v17  ;;  %v1462_v32 = vrot.slane %v1461_v26, 2 }
 0x16d   : > { %v1696_v35 = vrot.slane %v1695_v28, 1  ;;  %v1707_v38 = vadd.f32 %v1706_v33, %v1705_v29  ;;  %v1704_v45 = vadd.f32 %v1703_v53, %v1702_v30 }
 0x16e   : > { %v1559_v36 = vcombine.low %v1444_v23, %v1451_v31  ;;  %v1463_v37 = vadd.f32 %v1462_v32, %v1461_v26 }
 0x16f   : > { %v1697_v39 = vadd.f32 %v1696_v35, %v1695_v28  ;;  %v1708_v56 = vrot.slane %v1707_v38, 2 }
 0x170   : > { %v1464_v40 = vrot.slane %v1463_v37, 1  ;;  %v2632_v46 = vrot.slane %v1559_v36, %v2521_v44 }
 0x171   : > { %v1805_v41 = vcombine.low %v1690_v34, %v1697_v39  ;;  %v1709_v43 = vadd.f32 %v1708_v56, %v1707_v38 }
 0x172   : > { %v1465_v42 = vadd.f32 %v1464_v40, %v1463_v37 }
 0x173   : > { %v1710_v48 = vrot.slane %v1709_v43, 1  ;;  %v2638_v52 = vrot.slane %v1805_v41, %v2521_v44 }
 0x174   : > { %v1560_v47 = vcombine.low %v1458_v51, %v1465_v42  ;;  %v1369_v51 = vrot.slane %v1361_v16, %v2521_v44 }
 0x175   : > { %v1711_v50 = vadd.f32 %v1710_v48, %v1709_v43 }
 0x176   : > { %v2635_v49 = vrot.slane %v1560_v47, %v2521_v44 }
 0x177   : > { %v1806_v55 = vcombine.low %v1704_v45, %v1711_v50 }
 0x178   : > { %v1591_v54 = vcombine.low %v2632_v46, %v2635_v49 }
 0x179   : > { %v1200_v4 = vpop.f32.mrb[12].mxu0  ;;  %v1241_v63 = vpop.f32.mrb[12].mxu1  ;;  %v2645_v1 = vrot.slane %v1806_v55, %v2521_v44 }
 0x17a   : > { %v1466_v57 = vsel %vm871_vm0, %v1200_v4, 0.0  ;;  %v1624_v58 = vmul.f32 %v1200_v4, %v1200_v4  ;;  %v1202_v0 = vpop.f32.mrb[13].mxu0  ;;  %v1480_v59 = vsel %vm871_vm0, %v1241_v63, 0.0  ;;  %v1626_v62 = vmul.f32 %v1241_v63, %v1241_v63  ;;  %v1243_v11 = vpop.f32.mrb[13].mxu1 }
 0x17b   : > { %v1467_v24 = vrot.slane %v1466_v57, 4  ;;  %v2119_v60 = vpack.c.bf16 %v1202_v0, %v1200_v4  ;;  %v1204_v22 = vpop.f32.mrb[14].mxu0  ;;  %v1481_v3 = vrot.slane %v1480_v59, 4  ;;  %v1245_v5 = vpop.f32.mrb[14].mxu1  ;;  %v1837_v14 = vcombine.low %v2638_v52, %v2645_v1 }
 0x17c   : > { %v1712_v2 = vsel %vm871_vm0, %v1624_v58, 0.0  ;;  %v1205_v6 = vpop.f32.mrb[15].mxu0  ;;  %v1726_v12 = vsel %vm871_vm0, %v1626_v62, 0.0  ;;  %v1246_v13 = vpop.f32.mrb[15].mxu1  ;;  %v1473_v17 = vsel %vm871_vm0, %v1202_v0, 0.0  ;;  %v1625_v21 = vmul.f32 %v1202_v0, %v1202_v0 }
 0x17d   : > { %v1468_v7 = vadd.f32 %v1467_v24, %v1466_v57  ;;  %v1713_v10 = vrot.slane %v1712_v2, 4  ;;  %v1482_v15 = vadd.f32 %v1481_v3, %v1480_v59  ;;  %v1727_v9 = vrot.slane %v1726_v12, 4 }
 0x17e   : > { %v1474_v20 = vrot.slane %v1473_v17, 4  ;;  %v1353_v25 = vrot.slane %v2119_v60, %v2521_v44  ;;  %v2120_v26 = vpack.c.bf16 %v1243_v11, %v1241_v63  ;;  %v1719_v30 = vsel %vm871_vm0, %v1625_v21, 0.0 }
 0x17f   : > { %v1469_v18 = vrot.slane %v1468_v7, 2  ;;  %v1714_v19 = vadd.f32 %v1713_v10, %v1712_v2  ;;  %v1483_v23 = vrot.slane %v1482_v15, 2  ;;  %v1728_v31 = vadd.f32 %v1727_v9, %v1726_v12 }
 0x180   : > { %v1475_v29 = vadd.f32 %v1474_v20, %v1473_v17  ;;  %v1720_v32 = vrot.slane %v1719_v30, 4  ;;  %v1360_v33 = vrot.slane %v2120_v26, %v2521_v44  ;;  %v1487_v37 = vsel %vm871_vm0, %v1243_v11, 0.0 }
 0x181   : > { %v1470_v27 = vadd.f32 %v1469_v18, %v1468_v7  ;;  %v1715_v28 = vrot.slane %v1714_v19, 2  ;;  %v1484_v53 = vadd.f32 %v1483_v23, %v1482_v15  ;;  %v1488_v56 = vrot.slane %v1487_v37, 4 }
 0x182   : > { %v1476_v36 = vrot.slane %v1475_v29, 2  ;;  %v1721_v38 = vadd.f32 %v1720_v32, %v1719_v30  ;;  %v1362_v39 = vcombine.low %v1353_v25, %v1360_v33  ;;  %v1729_v42 = vrot.slane %v1728_v31, 2 }
 0x183   : > { %v1471_v34 = vrot.slane %v1470_v27, 1  ;;  %v1716_v35 = vadd.f32 %v1715_v28, %v1714_v19  ;;  %v1489_v50 = vadd.f32 %v1488_v56, %v1487_v37  ;;  %v1627_v4 = vmul.f32 %v1243_v11, %v1243_v11 }
 0x184   : > { %v1477_v40 = vadd.f32 %v1476_v36, %v1475_v29  ;;  %v1722_v43 = vrot.slane %v1721_v38, 2  ;;  %v1376_v45 = vrot.slane %v1362_v39, %v2521_v44  ;;  %v1485_v58 = vrot.slane %v1484_v53, 1 }
 0x185   : > { %v1717_v41 = vrot.slane %v1716_v35, 1  ;;  %v1472_v47 = vadd.f32 %v1471_v34, %v1470_v27  ;;  %v1490_v0 = vrot.slane %v1489_v50, 2  ;;  %v1733_v61 = vsel %vm871_vm0, %v1627_v4, 0.0 }
 0x186   : > { %v1478_v48 = vrot.slane %v1477_v40, 1  ;;  %v1723_v55 = vadd.f32 %v1722_v43, %v1721_v38  ;;  %v1377_v57 = vcombine.low %v1369_v51, %v1376_v45  ;;  %v1730_v16 = vadd.f32 %v1729_v42, %v1728_v31 }
 0x187   : > { %v1718_v8 = vadd.f32 %v1717_v41, %v1716_v35  ;;  %v1734_v59 = vrot.slane %v1733_v61, 4  ;;  %v1491_v60 = vadd.f32 %v1490_v0, %v1489_v50  ;;  %v1486_v3 = vadd.f32 %v1485_v58, %v1484_v53 }
 0x188   : > { %v1479_v63 = vadd.f32 %v1478_v48, %v1477_v40  ;;  %v1724_v24 = vrot.slane %v1723_v55, 1  ;;  %1381 = vst [vmem:[%s2583_s7 + $0x8] sm:$0xff] %v1377_v57  ;;  %v1731_v6 = vrot.slane %v1730_v16, 1  ;;  %v1599_v25 = vrot.slane %v1591_v54, %v2521_v44 }
 0x189   : > { %v1735_v2 = vadd.f32 %v1734_v59, %v1733_v61  ;;  %v1492_v5 = vrot.slane %v1491_v60, 1  ;;  %v1845_v30 = vrot.slane %v1837_v14, %v2521_v44 }
 0x18a   : > { %v1561_v62 = vcombine.low %v1472_v47, %v1479_v63  ;;  %v1725_v22 = vadd.f32 %v1724_v24, %v1723_v55  ;;  %v1732_v9 = vadd.f32 %v1731_v6, %v1730_v16 }
 0x18b   : > { %v1736_v7 = vrot.slane %v1735_v2, 2  ;;  %v1493_v10 = vadd.f32 %v1492_v5, %v1491_v60 }
 0x18c   : > { %v1807_v11 = vcombine.low %v1718_v8, %v1725_v22  ;;  %v1583_v13 = vrot.slane %v1561_v62, %v2521_v44 }
 0x18d   : > { %v1737_v12 = vadd.f32 %v1736_v7, %v1735_v2  ;;  %v1562_v15 = vcombine.low %v1486_v3, %v1493_v10 }
 0x18e   : > { %v1829_v21 = vrot.slane %v1807_v11, %v2521_v44 }
 0x18f   : > { %v1738_v17 = vrot.slane %v1737_v12, 1  ;;  %v1590_v18 = vrot.slane %v1562_v15, %v2521_v44 }
 0x191   : > { %v1739_v19 = vadd.f32 %v1738_v17, %v1737_v12  ;;  %v1592_v20 = vcombine.low %v1583_v13, %v1590_v18 }
 0x193   : > { %v1808_v23 = vcombine.low %v1732_v9, %v1739_v19  ;;  %v1606_v26 = vrot.slane %v1592_v20, %v2521_v44 }
 0x195   : > { %v1836_v27 = vrot.slane %v1808_v23, %v2521_v44  ;;  %v1607_v28 = vcombine.low %v1599_v25, %v1606_v26 }
 0x197   : > { %v1838_v29 = vcombine.low %v1829_v21, %v1836_v27  ;;  %1611 = vst [vmem:[%s2601_s12 + $0x8] sm:$0xff] %v1607_v28 }
 0x199   : > { %v1852_v31 = vrot.slane %v1838_v29, %v2521_v44 }
 0x19b   : > { %v1853_v32 = vcombine.low %v1845_v30, %v1852_v31 }
 0x19d   : > { %1857 = vst [vmem:[%s2620_s15 + $0x8] sm:$0xff] %v1853_v32 }
 0x19e PF: > { %p15_p8 = scmp.ge.s32.totalorder %s2303_s20, 6   ;;  %s2699_s15 = smov %s2242_s16 }
 0x19f   : > { %s2700_s16 = smov %s2246_s17  ;;  %s2701_s17 = smov %s2313_s23 }
 0x1a0   : > { %s2702_s18 = smov %s2303_s20  ;;  %17 = sbr.rel (!%p15_p8) target bundleno = 3 (0x3), region = 92 }
 0x1a7   :  { %1908 = vsyncpa [#allocation3], 1 }
 0x1a8   :  { %1910 = vsyncpa [#allocation3 + $0x1], 1 }

// kernel: generator_forward.12
= control target key start
LH: loop header
LB: loop body
LE: loop exit
PB: predicated region body
PF: predicated region fallthrough
CT: control target
= control target key end

     0   :  { %v64_v0 = vlaneseq  ;;  %s524_s0 = inlined_call_operand.vmem [shape: bf16[128,256], index: 0, kind: input, shape index: {}]   ;;  %s525_s1 = inlined_call_operand.vmem [shape: f32[1,256], index: 1, kind: input, shape index: {}]   ;;  %s526_s2 = inlined_call_operand.vmem [shape: f32[1,256], index: 2, kind: input, shape index: {}]   ;;  %s527_s3 = inlined_call_operand.vmem [shape: bf16[128,256], index: 3, kind: output, shape index: {}]  }
   0x1   :  { %v14_v1 = vld [vmem:[%s524_s0] sm:$0xff]  ;;  %v15_v6 = vld [vmem:[%s524_s0 + $0x8] sm:$0xff]  ;;  %v16_v7 = vld [vmem:[%s524_s0 + $0x10] sm:$0xff] }
   0x2   :  { %v62_v2 = vld [vmem:[%s525_s1] sm:$0x3]  ;;  %v30_v3 = vunpack.c.l.bf16 %v14_v1  ;;  %v31_v4 = vunpack.c.h.bf16 %v14_v1  ;;  %v65_v5 = vshrl.u32 %v64_v0, 7  ;;  %v17_v8 = vld [vmem:[%s524_s0 + $0x18] sm:$0xff]  ;;  %v32_v10 = vunpack.c.l.bf16 %v15_v6  ;;  %v19_v15 = vld [vmem:[%s524_s0 + $0x28] sm:$0xff] }
   0x3   :  { %v106_v9 = vld [vmem:[%s526_s2] sm:$0x3]  ;;  %v33_v11 = vunpack.c.h.bf16 %v15_v6  ;;  %v34_v12 = vunpack.c.l.bf16 %v16_v7  ;;  %v35_v13 = vunpack.c.h.bf16 %v16_v7  ;;  %v36_v18 = vunpack.c.l.bf16 %v17_v8  ;;  %v20_v20 = vld [vmem:[%s524_s0 + $0x30] sm:$0xff]  ;;  %v21_v21 = vld [vmem:[%s524_s0 + $0x38] sm:$0xff] }
   0x4   :  { %v18_v14 = vld [vmem:[%s524_s0 + $0x20] sm:$0xff]  ;;  %v66_v16 = vsub.s32 0, %v65_v5  ;;  %v70_v17 = vsub.s32 1, %v65_v5  ;;  %v37_v19 = vunpack.c.h.bf16 %v17_v8  ;;  %v40_v24 = vunpack.c.l.bf16 %v19_v15 }
   0x5   :  { %v38_v22 = vunpack.c.l.bf16 %v18_v14  ;;  %v39_v23 = vunpack.c.h.bf16 %v18_v14  ;;  %v41_v25 = vunpack.c.h.bf16 %v19_v15  ;;  %v42_v30 = vunpack.c.l.bf16 %v20_v20 }
   0x6   :  { %v380_v26 = vrot.slane %v62_v2, %v66_v16  ;;  %v382_v27 = vrot.slane %v62_v2, %v70_v17  ;;  %v384_v28 = vrot.slane %v106_v9, %v66_v16  ;;  %v386_v29 = vrot.slane %v106_v9, %v70_v17 }
   0x7   :  { %v43_v31 = vunpack.c.h.bf16 %v20_v20  ;;  %v44_v32 = vunpack.c.l.bf16 %v21_v21  ;;  %v45_v33 = vunpack.c.h.bf16 %v21_v21 }
   0x8   :  { %v74_v34 = vmul.f32 %v380_v26, %v30_v3  ;;  %v75_v35 = vmul.f32 %v382_v27, %v31_v4  ;;  %v76_v36 = vmul.f32 %v380_v26, %v32_v10  ;;  %v77_v37 = vmul.f32 %v382_v27, %v33_v11  ;;  %v22_v10 = vld [vmem:[%s524_s0 + $0x40] sm:$0xff] }
   0x9   :  { %v78_v38 = vmul.f32 %v380_v26, %v34_v12  ;;  %v79_v39 = vmul.f32 %v382_v27, %v35_v13  ;;  %v80_v40 = vmul.f32 %v380_v26, %v36_v18  ;;  %v81_v41 = vmul.f32 %v382_v27, %v37_v19  ;;  %v23_v19 = vld [vmem:[%s524_s0 + $0x48] sm:$0xff] }
   0xa   :  { %v118_v42 = vadd.f32 %v384_v28, %v74_v34  ;;  %v119_v43 = vadd.f32 %v386_v29, %v75_v35  ;;  %v120_v44 = vadd.f32 %v384_v28, %v76_v36  ;;  %v121_v45 = vadd.f32 %v386_v29, %v77_v37 }
   0xb   :  { %v122_v46 = vadd.f32 %v384_v28, %v78_v38  ;;  %v123_v47 = vadd.f32 %v386_v29, %v79_v39  ;;  %v124_v48 = vadd.f32 %v384_v28, %v80_v40  ;;  %v125_v49 = vadd.f32 %v386_v29, %v81_v41 }
   0xc   :  { %v150_v50 = vmax.f32 %v118_v42, 0.0  ;;  %v151_v51 = vmax.f32 %v119_v43, 0.0  ;;  %v152_v52 = vmax.f32 %v120_v44, 0.0  ;;  %v153_v53 = vmax.f32 %v121_v45, 0.0 }
   0xd   :  { %v154_v54 = vmax.f32 %v122_v46, 0.0  ;;  %v155_v55 = vmax.f32 %v123_v47, 0.0  ;;  %v156_v56 = vmax.f32 %v124_v48, 0.0  ;;  %v157_v57 = vmax.f32 %v125_v49, 0.0 }
   0xe   :  { %v314_v58 = vpack.c.bf16 %v151_v51, %v150_v50  ;;  %v315_v59 = vpack.c.bf16 %v153_v53, %v152_v52  ;;  %v82_v60 = vmul.f32 %v380_v26, %v38_v22  ;;  %v83_v61 = vmul.f32 %v382_v27, %v39_v23  ;;  %v26_v50 = vld [vmem:[%s524_s0 + $0x60] sm:$0xff] }
   0xf   :  { %v316_v62 = vpack.c.bf16 %v155_v55, %v154_v54  ;;  %v317_v63 = vpack.c.bf16 %v157_v57, %v156_v56  ;;  %v84_v0 = vmul.f32 %v380_v26, %v40_v24  ;;  %v85_v1 = vmul.f32 %v382_v27, %v41_v25  ;;  %v24_v24 = vld [vmem:[%s524_s0 + $0x50] sm:$0xff] }
  0x10   :  { %278 = vst [vmem:[%s527_s3] sm:$0xff] %v314_v58  ;;  %279 = vst [vmem:[%s527_s3 + $0x8] sm:$0xff] %v315_v59  ;;  %v126_v2 = vadd.f32 %v384_v28, %v82_v60  ;;  %v127_v3 = vadd.f32 %v386_v29, %v83_v61  ;;  %v86_v4 = vmul.f32 %v380_v26, %v42_v30  ;;  %v46_v23 = vunpack.c.l.bf16 %v22_v10 }
  0x11   :  { %v87_v5 = vmul.f32 %v382_v27, %v43_v31  ;;  %280 = vst [vmem:[%s527_s3 + $0x10] sm:$0xff] %v316_v62  ;;  %281 = vst [vmem:[%s527_s3 + $0x18] sm:$0xff] %v317_v63  ;;  %v128_v6 = vadd.f32 %v384_v28, %v84_v0  ;;  %v129_v7 = vadd.f32 %v386_v29, %v85_v1  ;;  %v48_v36 = vunpack.c.l.bf16 %v23_v19  ;;  %v27_v63 = vld [vmem:[%s524_s0 + $0x68] sm:$0xff] }
  0x12   :  { %v88_v8 = vmul.f32 %v380_v26, %v44_v32  ;;  %v89_v9 = vmul.f32 %v382_v27, %v45_v33  ;;  %v158_v11 = vmax.f32 %v126_v2, 0.0  ;;  %v159_v12 = vmax.f32 %v127_v3, 0.0  ;;  %v25_v33 = vld [vmem:[%s524_s0 + $0x58] sm:$0xff] }
  0x13   :  { %v130_v13 = vadd.f32 %v384_v28, %v86_v4  ;;  %v131_v14 = vadd.f32 %v386_v29, %v87_v5  ;;  %v160_v15 = vmax.f32 %v128_v6, 0.0  ;;  %v161_v16 = vmax.f32 %v129_v7, 0.0  ;;  %v28_v4 = vld [vmem:[%s524_s0 + $0x70] sm:$0xff] }
  0x14   :  { %v132_v17 = vadd.f32 %v384_v28, %v88_v8  ;;  %v133_v18 = vadd.f32 %v386_v29, %v89_v9  ;;  %v318_v20 = vpack.c.bf16 %v159_v12, %v158_v11  ;;  %v47_v32 = vunpack.c.h.bf16 %v22_v10  ;;  %v29_v9 = vld [vmem:[%s524_s0 + $0x78] sm:$0xff] }
  0x15   :  { %v162_v21 = vmax.f32 %v130_v13, 0.0  ;;  %v163_v22 = vmax.f32 %v131_v14, 0.0  ;;  %v319_v25 = vpack.c.bf16 %v161_v16, %v160_v15  ;;  %v90_v35 = vmul.f32 %v380_v26, %v46_v23 }
  0x16   :  { %v164_v30 = vmax.f32 %v132_v17, 0.0  ;;  %v165_v31 = vmax.f32 %v133_v18, 0.0  ;;  %282 = vst [vmem:[%s527_s3 + $0x20] sm:$0xff] %v318_v20  ;;  %v49_v37 = vunpack.c.h.bf16 %v23_v19  ;;  %v91_v39 = vmul.f32 %v382_v27, %v47_v32 }
  0x17   :  { %v320_v34 = vpack.c.bf16 %v163_v22, %v162_v21  ;;  %283 = vst [vmem:[%s527_s3 + $0x28] sm:$0xff] %v319_v25  ;;  %v50_v40 = vunpack.c.l.bf16 %v24_v24  ;;  %v51_v41 = vunpack.c.h.bf16 %v24_v24  ;;  %v134_v42 = vadd.f32 %v384_v28, %v90_v35 }
  0x18   :  { %v321_v38 = vpack.c.bf16 %v165_v31, %v164_v30  ;;  %v92_v43 = vmul.f32 %v380_v26, %v48_v36  ;;  %v93_v44 = vmul.f32 %v382_v27, %v49_v37  ;;  %v52_v45 = vunpack.c.l.bf16 %v25_v33 }
  0x19   :  { %284 = vst [vmem:[%s527_s3 + $0x30] sm:$0xff] %v320_v34  ;;  %v135_v46 = vadd.f32 %v386_v29, %v91_v39  ;;  %v94_v47 = vmul.f32 %v380_v26, %v50_v40  ;;  %v95_v48 = vmul.f32 %v382_v27, %v51_v41  ;;  %v53_v49 = vunpack.c.h.bf16 %v25_v33 }
  0x1a   :  { %285 = vst [vmem:[%s527_s3 + $0x38] sm:$0xff] %v321_v38  ;;  %v166_v51 = vmax.f32 %v134_v42, 0.0  ;;  %v136_v52 = vadd.f32 %v384_v28, %v92_v43  ;;  %v137_v53 = vadd.f32 %v386_v29, %v93_v44  ;;  %v96_v54 = vmul.f32 %v380_v26, %v52_v45 }
  0x1b   :  { %v167_v55 = vmax.f32 %v135_v46, 0.0  ;;  %v138_v56 = vadd.f32 %v384_v28, %v94_v47  ;;  %v139_v57 = vadd.f32 %v386_v29, %v95_v48  ;;  %v97_v58 = vmul.f32 %v382_v27, %v53_v49 }
  0x1c   :  { %v168_v59 = vmax.f32 %v136_v52, 0.0  ;;  %v169_v60 = vmax.f32 %v137_v53, 0.0  ;;  %v140_v61 = vadd.f32 %v384_v28, %v96_v54  ;;  %v54_v62 = vunpack.c.l.bf16 %v26_v50 }
  0x1d   :  { %v322_v0 = vpack.c.bf16 %v167_v55, %v166_v51  ;;  %v170_v1 = vmax.f32 %v138_v56, 0.0  ;;  %v171_v2 = vmax.f32 %v139_v57, 0.0  ;;  %v141_v3 = vadd.f32 %v386_v29, %v97_v58 }
  0x1e   :  { %v323_v5 = vpack.c.bf16 %v169_v60, %v168_v59  ;;  %v172_v6 = vmax.f32 %v140_v61, 0.0  ;;  %v55_v7 = vunpack.c.h.bf16 %v26_v50  ;;  %v98_v8 = vmul.f32 %v380_v26, %v54_v62 }
  0x1f   :  { %286 = vst [vmem:[%s527_s3 + $0x40] sm:$0xff] %v322_v0  ;;  %v324_v10 = vpack.c.bf16 %v171_v2, %v170_v1  ;;  %v173_v11 = vmax.f32 %v141_v3, 0.0  ;;  %v56_v12 = vunpack.c.l.bf16 %v27_v63  ;;  %v57_v13 = vunpack.c.h.bf16 %v27_v63 }
  0x20   :  { %287 = vst [vmem:[%s527_s3 + $0x48] sm:$0xff] %v323_v5  ;;  %v99_v14 = vmul.f32 %v382_v27, %v55_v7  ;;  %v142_v15 = vadd.f32 %v384_v28, %v98_v8  ;;  %v58_v16 = vunpack.c.l.bf16 %v28_v4  ;;  %v59_v17 = vunpack.c.h.bf16 %v28_v4 }
  0x21   :  { %288 = vst [vmem:[%s527_s3 + $0x50] sm:$0xff] %v324_v10  ;;  %v325_v18 = vpack.c.bf16 %v173_v11, %v172_v6  ;;  %v100_v19 = vmul.f32 %v380_v26, %v56_v12  ;;  %v101_v20 = vmul.f32 %v382_v27, %v57_v13  ;;  %v60_v21 = vunpack.c.l.bf16 %v29_v9 }
  0x22   :  { %v143_v22 = vadd.f32 %v386_v29, %v99_v14  ;;  %v174_v23 = vmax.f32 %v142_v15, 0.0  ;;  %v102_v24 = vmul.f32 %v380_v26, %v58_v16  ;;  %v103_v25 = vmul.f32 %v382_v27, %v59_v17 }
  0x23   :  { %289 = vst [vmem:[%s527_s3 + $0x58] sm:$0xff] %v325_v18  ;;  %v144_v30 = vadd.f32 %v384_v28, %v100_v19  ;;  %v145_v31 = vadd.f32 %v386_v29, %v101_v20  ;;  %v61_v32 = vunpack.c.h.bf16 %v29_v9  ;;  %v104_v33 = vmul.f32 %v380_v26, %v60_v21 }
  0x24   :  { %v175_v34 = vmax.f32 %v143_v22, 0.0  ;;  %v146_v35 = vadd.f32 %v384_v28, %v102_v24  ;;  %v147_v36 = vadd.f32 %v386_v29, %v103_v25 }
  0x25   :  { %v176_v37 = vmax.f32 %v144_v30, 0.0  ;;  %v177_v38 = vmax.f32 %v145_v31, 0.0  ;;  %v105_v39 = vmul.f32 %v382_v27, %v61_v32  ;;  %v148_v40 = vadd.f32 %v384_v28, %v104_v33 }
  0x26   :  { %v326_v41 = vpack.c.bf16 %v175_v34, %v174_v23  ;;  %v178_v42 = vmax.f32 %v146_v35, 0.0  ;;  %v179_v43 = vmax.f32 %v147_v36, 0.0 }
  0x27   :  { %v327_v44 = vpack.c.bf16 %v177_v38, %v176_v37  ;;  %v149_v45 = vadd.f32 %v386_v29, %v105_v39  ;;  %v180_v46 = vmax.f32 %v148_v40, 0.0 }
  0x28   :  { %290 = vst [vmem:[%s527_s3 + $0x60] sm:$0xff] %v326_v41  ;;  %v328_v26 = vpack.c.bf16 %v179_v43, %v178_v42 }
  0x29   :  { %291 = vst [vmem:[%s527_s3 + $0x68] sm:$0xff] %v327_v44  ;;  %v181_v47 = vmax.f32 %v149_v45, 0.0 }
  0x2a   :  { %292 = vst [vmem:[%s527_s3 + $0x70] sm:$0xff] %v328_v26 }
  0x2b   :  { %v329_v27 = vpack.c.bf16 %v181_v47, %v180_v46 }
  0x2d   :  { %293 = vst [vmem:[%s527_s3 + $0x78] sm:$0xff] %v329_v27 }

// kernel: generator_forward.11
= control target key start
LH: loop header
LB: loop body
LE: loop exit
PB: predicated region body
PF: predicated region fallthrough
CT: control target
= control target key end

     0   :  { %s3564_s15 = smov 0   ;;  %s3566_s16 = smov 0   ;;  %s3958_s0 = inlined_call_operand.vmem [shape: bf16[4,32,2048], index: 0, kind: input, shape index: {}]   ;;  %s3959_s1 = inlined_call_operand.vmem [shape: bf16[4,2048,256], index: 1, kind: input, shape index: {}]   ;;  %s3960_s2 = inlined_call_operand.vmem [shape: bf16[4,32,256], index: 2, kind: output, shape index: {0}]   ;;  %s3961_s3 = inlined_call_operand.vmem [shape: f32[4,1,256], index: 3, kind: output, shape index: {1}]   ;;  %s3962_s4 = inlined_call_operand.vmem [shape: f32[4,1,256], index: 4, kind: output, shape index: {2}]  }
   0x1   :  { %s3568_s17 = smov 0  }
   0x2 LB: > { %s27_s18 = sadd.s32 1, %s3532_s16  ;;  %p2739_p0 = scmp.ge.s32.totalorder %s3536_s17, 1  ;;  %s3536_s17 = sphi %s3568_s17, %s15_s17   ;;  %s3532_s16 = sphi %s3566_s16, %s3964_s16   ;;  %s3528_s15 = sphi %s3564_s15, %s3963_s15  }
   0x3   : > { %p29_p1 = scmp.ge.s32.totalorder %s27_s18, 4  ;;  %p203_p2 = scmp.lt.s32.totalorder %s3536_s17, 5 }
   0x5   : > { %s3966_s18 = smov (%p29_p1, %s27_s18), 0  ;;  %p204_p3 = pnand %p2739_p0, %p203_p2 }
   0x6   : > { %p255_p4 = scmp.lt.s32.totalorder (!%p204_p3), %s3528_s15, 3 }
   0x7   : > { %207 = sbr.rel (%p204_p3) target bundleno = 523 (0x20b), region = 28 }
   0xe   : > { %s3968_s15 = smov (!%p255_p4, %s3528_s15), 3 }
   0xf   : > { %s3043_s19 = sshll.u32 %s3968_s15, 11  ;;  %s3042_s23 = sshll.u32 %s3968_s15, 8 }
  0x10   : > { %s3588_s22 = scalar_lea.vmem %s3959_s1, %s3043_s19  ;;  %s3638_s26 = scalar_lea.vmem %s3958_s0, %s3042_s23 }
  0x11   : > { %v3130_v0 = vld [vmem:[%s3588_s22 + $0x4] ss:$8 sps:$4 sm:$0xff]   ;;  %v3134_v2 = vld [vmem:[%s3588_s22] ss:$8 sps:$4 sm:$0xff]   ;;  %v3136_v4 = vld [vmem:[%s3588_s22 + $0x14] ss:$8 sps:$4 sm:$0xff]  }
  0x12   : > { %v3132_v1 = vld [vmem:[%s3588_s22 + $0x404] ss:$8 sps:$4 sm:$0xff]   ;;  %2021 = vmatprep.subr.bf16.mxu1 %v3130_v0  ;;  %v3135_v3 = vld [vmem:[%s3588_s22 + $0x400] ss:$8 sps:$4 sm:$0xff]   ;;  %v3138_v5 = vld [vmem:[%s3588_s22 + $0x414] ss:$8 sps:$4 sm:$0xff]  }
  0x13   : > { %2233 = vmatprep.subr.bf16.mxu0 %v3132_v1  ;;  %2022 = vmatpush1.bf16.msra.mxu1 %v3134_v2  ;;  %v3140_v6 = vld [vmem:[%s3588_s22 + $0x10] ss:$8 sps:$4 sm:$0xff]   ;;  %v3142_v8 = vld [vmem:[%s3588_s22 + $0x24] ss:$8 sps:$4 sm:$0xff]   ;;  %v3146_v10 = vld [vmem:[%s3588_s22 + $0x20] ss:$8 sps:$4 sm:$0xff]  }
  0x14   : > { %2234 = vmatpush1.bf16.msra.mxu0 %v3135_v3  ;;  %2023 = vmatprep.subr.bf16.mxu1 %v3136_v4  ;;  %v3141_v7 = vld [vmem:[%s3588_s22 + $0x410] ss:$8 sps:$4 sm:$0xff]   ;;  %v3144_v9 = vld [vmem:[%s3588_s22 + $0x424] ss:$8 sps:$4 sm:$0xff]   ;;  %v3147_v11 = vld [vmem:[%s3588_s22 + $0x420] ss:$8 sps:$4 sm:$0xff]  }
  0x15   : > { %2235 = vmatprep.subr.bf16.mxu0 %v3138_v5  ;;  %v3148_v12 = vld [vmem:[%s3588_s22 + $0x34] ss:$8 sps:$4 sm:$0xff]   ;;  %v3152_v14 = vld [vmem:[%s3588_s22 + $0x30] ss:$8 sps:$4 sm:$0xff]   ;;  %v3154_v16 = vld [vmem:[%s3588_s22 + $0x44] ss:$8 sps:$4 sm:$0xff]  }
  0x16   : > { %v3150_v13 = vld [vmem:[%s3588_s22 + $0x434] ss:$8 sps:$4 sm:$0xff]   ;;  %v3153_v15 = vld [vmem:[%s3588_s22 + $0x430] ss:$8 sps:$4 sm:$0xff]   ;;  %v3156_v17 = vld [vmem:[%s3588_s22 + $0x444] ss:$8 sps:$4 sm:$0xff]  }
  0x17   : > { %2024 = vmatpush1.bf16.msra.mxu1 %v3140_v6  ;;  %v3158_v18 = vld [vmem:[%s3588_s22 + $0x40] ss:$8 sps:$4 sm:$0xff]   ;;  %v3160_v20 = vld [vmem:[%s3588_s22 + $0x54] ss:$8 sps:$4 sm:$0xff]   ;;  %v3164_v22 = vld [vmem:[%s3588_s22 + $0x50] ss:$8 sps:$4 sm:$0xff]  }
  0x18   : > { %2236 = vmatpush1.bf16.msra.mxu0 %v3141_v7  ;;  %2025 = vmatprep.subr.bf16.mxu1 %v3142_v8  ;;  %v3159_v19 = vld [vmem:[%s3588_s22 + $0x440] ss:$8 sps:$4 sm:$0xff]   ;;  %v3162_v21 = vld [vmem:[%s3588_s22 + $0x454] ss:$8 sps:$4 sm:$0xff]   ;;  %v3165_v23 = vld [vmem:[%s3588_s22 + $0x450] ss:$8 sps:$4 sm:$0xff]  }
  0x19   : > { %2237 = vmatprep.subr.bf16.mxu0 %v3144_v9  ;;  %v3166_v24 = vld [vmem:[%s3588_s22 + $0x64] ss:$8 sps:$4 sm:$0xff]   ;;  %v3170_v26 = vld [vmem:[%s3588_s22 + $0x60] ss:$8 sps:$4 sm:$0xff]   ;;  %v3172_v28 = vld [vmem:[%s3588_s22 + $0x74] ss:$8 sps:$4 sm:$0xff]  }
  0x1a   : > { %v3168_v25 = vld [vmem:[%s3588_s22 + $0x464] ss:$8 sps:$4 sm:$0xff]   ;;  %v3171_v27 = vld [vmem:[%s3588_s22 + $0x460] ss:$8 sps:$4 sm:$0xff]   ;;  %v3174_v29 = vld [vmem:[%s3588_s22 + $0x474] ss:$8 sps:$4 sm:$0xff]  }
  0x1b   : > { %2026 = vmatpush1.bf16.msra.mxu1 %v3146_v10  ;;  %v3176_v30 = vld [vmem:[%s3588_s22 + $0x70] ss:$8 sps:$4 sm:$0xff]   ;;  %v3178_v32 = vld [vmem:[%s3588_s22 + $0x84] ss:$8 sps:$4 sm:$0xff]   ;;  %v3182_v34 = vld [vmem:[%s3588_s22 + $0x80] ss:$8 sps:$4 sm:$0xff]  }
  0x1c   : > { %2238 = vmatpush1.bf16.msra.mxu0 %v3147_v11  ;;  %2027 = vmatprep.subr.bf16.mxu1 %v3148_v12  ;;  %v3177_v31 = vld [vmem:[%s3588_s22 + $0x470] ss:$8 sps:$4 sm:$0xff]   ;;  %v3180_v33 = vld [vmem:[%s3588_s22 + $0x484] ss:$8 sps:$4 sm:$0xff]   ;;  %v3183_v35 = vld [vmem:[%s3588_s22 + $0x480] ss:$8 sps:$4 sm:$0xff]  }
  0x1d   : > { %2239 = vmatprep.subr.bf16.mxu0 %v3150_v13  ;;  %v3184_v36 = vld [vmem:[%s3588_s22 + $0x94] ss:$8 sps:$4 sm:$0xff]   ;;  %v3188_v38 = vld [vmem:[%s3588_s22 + $0x90] ss:$8 sps:$4 sm:$0xff]   ;;  %v3190_v40 = vld [vmem:[%s3588_s22 + $0xa4] ss:$8 sps:$4 sm:$0xff]  }
  0x1e   : > { %v3186_v37 = vld [vmem:[%s3588_s22 + $0x494] ss:$8 sps:$4 sm:$0xff]   ;;  %v3189_v39 = vld [vmem:[%s3588_s22 + $0x490] ss:$8 sps:$4 sm:$0xff]   ;;  %v3192_v41 = vld [vmem:[%s3588_s22 + $0x4a4] ss:$8 sps:$4 sm:$0xff]  }
  0x1f   : > { %2028 = vmatpush1.bf16.msra.mxu1 %v3152_v14  ;;  %v3194_v42 = vld [vmem:[%s3588_s22 + $0xa0] ss:$8 sps:$4 sm:$0xff]   ;;  %v3196_v44 = vld [vmem:[%s3588_s22 + $0xb4] ss:$8 sps:$4 sm:$0xff]   ;;  %v3200_v46 = vld [vmem:[%s3588_s22 + $0xb0] ss:$8 sps:$4 sm:$0xff]  }
  0x20   : > { %2240 = vmatpush1.bf16.msra.mxu0 %v3153_v15  ;;  %2029 = vmatprep.subr.bf16.mxu1 %v3154_v16  ;;  %v3195_v43 = vld [vmem:[%s3588_s22 + $0x4a0] ss:$8 sps:$4 sm:$0xff]   ;;  %v3198_v45 = vld [vmem:[%s3588_s22 + $0x4b4] ss:$8 sps:$4 sm:$0xff]   ;;  %v3201_v47 = vld [vmem:[%s3588_s22 + $0x4b0] ss:$8 sps:$4 sm:$0xff]  }
  0x21   : > { %2241 = vmatprep.subr.bf16.mxu0 %v3156_v17  ;;  %v293_v48 = vld [vmem:[%s3638_s26] sm:$0xff]  ;;  %v3208_v58 = vld [vmem:[%s3588_s22 + $0xd4] ss:$8 sps:$4 sm:$0xff]   ;;  %v3212_v60 = vld [vmem:[%s3588_s22 + $0xd0] ss:$8 sps:$4 sm:$0xff]   ;;  %s3044_s27 = sshll.u32 %s3968_s15, 5 }
  0x22   : > { %v301_v49 = vld [vmem:[%s3638_s26 + $0x40] sm:$0xff]  ;;  %v3210_v59 = vld [vmem:[%s3588_s22 + $0x4d4] ss:$8 sps:$4 sm:$0xff]   ;;  %v3213_v61 = vld [vmem:[%s3588_s22 + $0x4d0] ss:$8 sps:$4 sm:$0xff]   ;;  %s3936_s30 = scalar_lea.vmem %s3960_s2, %s3044_s27  ;;  %s2746_s5 = sshll.u32 %s3968_s15, 1 }
  0x23   : > { %2030 = vmatpush1.bf16.msra.mxu1 %v3158_v18  ;;  %v3202_v50 = vld [vmem:[%s3588_s22 + $0xc4] ss:$8 sps:$4 sm:$0xff]   ;;  %v2749_v52 = vcombine.high %v293_v48, %v301_v49  ;;  %v3206_v56 = vld [vmem:[%s3588_s22 + $0xc0] ss:$8 sps:$4 sm:$0xff]   ;;  %v3220_v2 = vld [vmem:[%s3588_s22 + $0xf4] ss:$8 sps:$4 sm:$0xff]   ;;  %v2748_v8 = vcombine.low %v293_v48, %v301_v49  ;;  %s285_s8 = scalar_lea.vmem %s3961_s3, %s2746_s5  ;;  %s291_s11 = scalar_lea.vmem %s3962_s4, %s2746_s5 }
  0x24   : > { %2242 = vmatpush1.bf16.msra.mxu0 %v3159_v19  ;;  %2031 = vmatprep.subr.bf16.mxu1 %v3160_v20  ;;  %v3204_v51 = vld [vmem:[%s3588_s22 + $0x4c4] ss:$8 sps:$4 sm:$0xff]   ;;  %v3207_v57 = vld [vmem:[%s3588_s22 + $0x4c0] ss:$8 sps:$4 sm:$0xff]   ;;  %v3222_v3 = vld [vmem:[%s3588_s22 + $0x4f4] ss:$8 sps:$4 sm:$0xff]  }
  0x25   : > { %2243 = vmatprep.subr.bf16.mxu0 %v3162_v21  ;;  %v297_v53 = vld [vmem:[%s3638_s26 + $0x20] sm:$0xff]  ;;  %2053 = vmatprep.mubr.bf16.mxu1 %v2749_v52  ;;  %v3224_v4 = vld [vmem:[%s3588_s22 + $0xf0] ss:$8 sps:$4 sm:$0xff]   ;;  %v3234_v12 = vld [vmem:[%s3588_s22 + $0x114] ss:$8 sps:$4 sm:$0xff]  }
  0x26   : > { %v305_v54 = vld [vmem:[%s3638_s26 + $0x60] sm:$0xff]  ;;  %v3225_v5 = vld [vmem:[%s3588_s22 + $0x4f0] ss:$8 sps:$4 sm:$0xff]   ;;  %v3237_v13 = vld [vmem:[%s3588_s22 + $0x514] ss:$8 sps:$4 sm:$0xff]  }
  0x27   : > { %2032 = vmatpush1.bf16.msra.mxu1 %v3164_v22  ;;  %v2757_v55 = vcombine.high %v297_v53, %v305_v54  ;;  %v3214_v62 = vld [vmem:[%s3588_s22 + $0xe4] ss:$8 sps:$4 sm:$0xff]   ;;  %v3218_v0 = vld [vmem:[%s3588_s22 + $0xe0] ss:$8 sps:$4 sm:$0xff]   ;;  %v2756_v10 = vcombine.low %v297_v53, %v305_v54  ;;  %v3232_v14 = vld [vmem:[%s3588_s22 + $0x110] ss:$8 sps:$4 sm:$0xff]  }
  0x28   : > { %2244 = vmatpush1.bf16.msra.mxu0 %v3165_v23  ;;  %2033 = vmatprep.subr.bf16.mxu1 %v3166_v24  ;;  %v3216_v63 = vld [vmem:[%s3588_s22 + $0x4e4] ss:$8 sps:$4 sm:$0xff]   ;;  %v3219_v1 = vld [vmem:[%s3588_s22 + $0x4e0] ss:$8 sps:$4 sm:$0xff]   ;;  %v3235_v15 = vld [vmem:[%s3588_s22 + $0x510] ss:$8 sps:$4 sm:$0xff]  }
  0x29   : > { %2245 = vmatprep.subr.bf16.mxu0 %v3168_v25  ;;  %2265 = vmatprep.mubr.bf16.mxu0 %v2757_v55  ;;  %v3228_v6 = vld [vmem:[%s3588_s22 + $0x104] ss:$8 sps:$4 sm:$0xff]   ;;  %v3226_v9 = vld [vmem:[%s3588_s22 + $0x100] ss:$8 sps:$4 sm:$0xff]   ;;  %v3246_v20 = vld [vmem:[%s3588_s22 + $0x134] ss:$8 sps:$4 sm:$0xff]  }
  0x2a   : > { %v3231_v7 = vld [vmem:[%s3588_s22 + $0x504] ss:$8 sps:$4 sm:$0xff]   ;;  %v3229_v11 = vld [vmem:[%s3588_s22 + $0x500] ss:$8 sps:$4 sm:$0xff]   ;;  %v3249_v21 = vld [vmem:[%s3588_s22 + $0x534] ss:$8 sps:$4 sm:$0xff]  }
  0x2b   : > { %2034 = vmatpush1.bf16.msra.mxu1 %v3170_v26  ;;  %v3240_v16 = vld [vmem:[%s3588_s22 + $0x124] ss:$8 sps:$4 sm:$0xff]   ;;  %v3238_v18 = vld [vmem:[%s3588_s22 + $0x120] ss:$8 sps:$4 sm:$0xff]   ;;  %v3244_v22 = vld [vmem:[%s3588_s22 + $0x130] ss:$8 sps:$4 sm:$0xff]  }
  0x2c   : > { %2246 = vmatpush1.bf16.msra.mxu0 %v3171_v27  ;;  %2035 = vmatprep.subr.bf16.mxu1 %v3172_v28  ;;  %v3243_v17 = vld [vmem:[%s3588_s22 + $0x524] ss:$8 sps:$4 sm:$0xff]   ;;  %v3241_v19 = vld [vmem:[%s3588_s22 + $0x520] ss:$8 sps:$4 sm:$0xff]   ;;  %v3247_v23 = vld [vmem:[%s3588_s22 + $0x530] ss:$8 sps:$4 sm:$0xff]  }
  0x2d   : > { %2247 = vmatprep.subr.bf16.mxu0 %v3174_v29  ;;  %v3252_v24 = vld [vmem:[%s3588_s22 + $0x144] ss:$8 sps:$4 sm:$0xff]   ;;  %v3250_v26 = vld [vmem:[%s3588_s22 + $0x140] ss:$8 sps:$4 sm:$0xff]   ;;  %v3258_v28 = vld [vmem:[%s3588_s22 + $0x154] ss:$8 sps:$4 sm:$0xff]  }
  0x2e   : > { %v3255_v25 = vld [vmem:[%s3588_s22 + $0x544] ss:$8 sps:$4 sm:$0xff]   ;;  %v3253_v27 = vld [vmem:[%s3588_s22 + $0x540] ss:$8 sps:$4 sm:$0xff]   ;;  %v3261_v29 = vld [vmem:[%s3588_s22 + $0x554] ss:$8 sps:$4 sm:$0xff]  }
  0x2f   : > { %2036 = vmatpush1.bf16.msra.mxu1 %v3176_v30  ;;  %v309_v30 = vld [vmem:[%s3638_s26 + $0x80] sm:$0xff]  ;;  %v3707_v49 = vld [vmem:[%s3638_s26 + $0x28] sm:$0xff]  ;;  %v3271_v52 = vld [vmem:[%s3588_s22 + $0x570] ss:$8 sps:$4 sm:$0xff]  }
  0x30   : > { %2248 = vmatpush1.bf16.msra.mxu0 %v3177_v31  ;;  %2037 = vmatprep.subr.bf16.mxu1 %v3178_v32  ;;  %v317_v31 = vld [vmem:[%s3638_s26 + $0xc0] sm:$0xff]  ;;  %v3256_v32 = vld [vmem:[%s3588_s22 + $0x150] ss:$8 sps:$4 sm:$0xff]  }
  0x31   : > { %2249 = vmatprep.subr.bf16.mxu0 %v3180_v33  ;;  %v2765_v33 = vcombine.high %v309_v30, %v317_v31  ;;  %v3276_v54 = vld [vmem:[%s3588_s22 + $0x184] ss:$8 sps:$4 sm:$0xff]  }
  0x32   : > { %v3279_v55 = vld [vmem:[%s3588_s22 + $0x584] ss:$8 sps:$4 sm:$0xff]  }
  0x33   : > { %2038 = vmatpush1.bf16.msra.mxu1 %v3182_v34  ;;  %v3259_v34 = vld [vmem:[%s3588_s22 + $0x550] ss:$8 sps:$4 sm:$0xff]  }
  0x34   : > { %2250 = vmatpush1.bf16.msra.mxu0 %v3183_v35  ;;  %2039 = vmatprep.subr.bf16.mxu1 %v3184_v36  ;;  %v313_v35 = vld [vmem:[%s3638_s26 + $0xa0] sm:$0xff] }
  0x35   : > { %2251 = vmatprep.subr.bf16.mxu0 %v3186_v37  ;;  %v321_v36 = vld [vmem:[%s3638_s26 + $0xe0] sm:$0xff]  ;;  %v2764_v37 = vcombine.low %v309_v30, %v317_v31  ;;  %v3330_v30 = vld [vmem:[%s3588_s22 + $0x214] ss:$8 sps:$4 sm:$0xff]  }
  0x36   : > { %v3333_v31 = vld [vmem:[%s3588_s22 + $0x614] ss:$8 sps:$4 sm:$0xff]  }
  0x37   : > { %2040 = vmatpush1.bf16.msra.mxu1 %v3188_v38  ;;  %v3264_v38 = vld [vmem:[%s3588_s22 + $0x164] ss:$8 sps:$4 sm:$0xff]  }
  0x38   : > { %2252 = vmatpush1.bf16.msra.mxu0 %v3189_v39  ;;  %2041 = vmatprep.subr.bf16.mxu1 %v3190_v40  ;;  %v2773_v39 = vcombine.high %v313_v35, %v321_v36  ;;  %v2772_v40 = vcombine.low %v313_v35, %v321_v36  ;;  %v3328_v36 = vld [vmem:[%s3588_s22 + $0x210] ss:$8 sps:$4 sm:$0xff]  }
  0x39   : > { %2253 = vmatprep.subr.bf16.mxu0 %v3192_v41  ;;  %v3267_v41 = vld [vmem:[%s3588_s22 + $0x564] ss:$8 sps:$4 sm:$0xff]  }
  0x3b   : > { %2042 = vmatpush1.bf16.msra.mxu1 %v3194_v42  ;;  %v3262_v42 = vld [vmem:[%s3588_s22 + $0x160] ss:$8 sps:$4 sm:$0xff]  }
  0x3c   : > { %2254 = vmatpush1.bf16.msra.mxu0 %v3195_v43  ;;  %2043 = vmatprep.subr.bf16.mxu1 %v3196_v44  ;;  %v3265_v43 = vld [vmem:[%s3588_s22 + $0x560] ss:$8 sps:$4 sm:$0xff]  }
  0x3d   : > { %2255 = vmatprep.subr.bf16.mxu0 %v3198_v45  ;;  %v3697_v44 = vld [vmem:[%s3638_s26 + $0x8] sm:$0xff] }
  0x3e   : > { %v3700_v45 = vld [vmem:[%s3638_s26 + $0x48] sm:$0xff] }
  0x3f   : > { %2044 = vmatpush1.bf16.msra.mxu1 %v3200_v46  ;;  %v3270_v46 = vld [vmem:[%s3588_s22 + $0x174] ss:$8 sps:$4 sm:$0xff]   ;;  %v2751_v48 = vcombine.high %v3697_v44, %v3700_v45 }
  0x40   : > { %2256 = vmatpush1.bf16.msra.mxu0 %v3201_v47  ;;  %2045 = vmatprep.subr.bf16.mxu1 %v3202_v50  ;;  %v3273_v47 = vld [vmem:[%s3588_s22 + $0x574] ss:$8 sps:$4 sm:$0xff]   ;;  %v3710_v50 = vld [vmem:[%s3638_s26 + $0x68] sm:$0xff] }
  0x41   : > { %2257 = vmatprep.subr.bf16.mxu0 %v3204_v51  ;;  %v3268_v51 = vld [vmem:[%s3588_s22 + $0x170] ss:$8 sps:$4 sm:$0xff]   ;;  %v2759_v53 = vcombine.high %v3707_v49, %v3710_v50 }
  0x43   : > { %2046 = vmatpush1.bf16.msra.mxu1 %v3206_v56  ;;  %v3274_v56 = vld [vmem:[%s3588_s22 + $0x180] ss:$8 sps:$4 sm:$0xff]  }
  0x44   : > { %2258 = vmatpush1.bf16.msra.mxu0 %v3207_v57  ;;  %2047 = vmatprep.subr.bf16.mxu1 %v3208_v58  ;;  %v3277_v57 = vld [vmem:[%s3588_s22 + $0x580] ss:$8 sps:$4 sm:$0xff]   ;;  %v3282_v58 = vld [vmem:[%s3588_s22 + $0x194] ss:$8 sps:$4 sm:$0xff]  }
  0x45   : > { %2259 = vmatprep.subr.bf16.mxu0 %v3210_v59  ;;  %v3285_v59 = vld [vmem:[%s3588_s22 + $0x594] ss:$8 sps:$4 sm:$0xff]  }
  0x47   : > { %2048 = vmatpush1.bf16.msra.mxu1 %v3212_v60  ;;  %v3280_v60 = vld [vmem:[%s3588_s22 + $0x190] ss:$8 sps:$4 sm:$0xff]  }
  0x48   : > { %2260 = vmatpush1.bf16.msra.mxu0 %v3213_v61  ;;  %2049 = vmatprep.subr.bf16.mxu1 %v3214_v62  ;;  %v3283_v61 = vld [vmem:[%s3588_s22 + $0x590] ss:$8 sps:$4 sm:$0xff]   ;;  %v3288_v62 = vld [vmem:[%s3588_s22 + $0x1a4] ss:$8 sps:$4 sm:$0xff]  }
  0x49   : > { %2261 = vmatprep.subr.bf16.mxu0 %v3216_v63  ;;  %v3291_v63 = vld [vmem:[%s3588_s22 + $0x5a4] ss:$8 sps:$4 sm:$0xff]  }
  0x4b   : > { %2050 = vmatpush1.bf16.msra.mxu1 %v3218_v0  ;;  %v3286_v0 = vld [vmem:[%s3588_s22 + $0x1a0] ss:$8 sps:$4 sm:$0xff]  }
  0x4c   : > { %2262 = vmatpush1.bf16.msra.mxu0 %v3219_v1  ;;  %2051 = vmatprep.subr.bf16.mxu1 %v3220_v2  ;;  %v3289_v1 = vld [vmem:[%s3588_s22 + $0x5a0] ss:$8 sps:$4 sm:$0xff]   ;;  %v3294_v2 = vld [vmem:[%s3588_s22 + $0x1b4] ss:$8 sps:$4 sm:$0xff]  }
  0x4d   : > { %2263 = vmatprep.subr.bf16.mxu0 %v3222_v3  ;;  %v3297_v3 = vld [vmem:[%s3588_s22 + $0x5b4] ss:$8 sps:$4 sm:$0xff]  }
  0x4f   : > { %2052 = vmatpush1.bf16.msra.mxu1 %v3224_v4  ;;  %v3292_v4 = vld [vmem:[%s3588_s22 + $0x1b0] ss:$8 sps:$4 sm:$0xff]  }
  0x50   : > { %2264 = vmatpush1.bf16.msra.mxu0 %v3225_v5  ;;  %2074 = vmatprep.subr.bf16.mxu1 %v3228_v6  ;;  %v3295_v5 = vld [vmem:[%s3588_s22 + $0x5b0] ss:$8 sps:$4 sm:$0xff]   ;;  %v3300_v6 = vld [vmem:[%s3588_s22 + $0x1c4] ss:$8 sps:$4 sm:$0xff]  }
  0x51   : > { %2286 = vmatprep.subr.bf16.mxu0 %v3231_v7  ;;  %v3303_v7 = vld [vmem:[%s3588_s22 + $0x5c4] ss:$8 sps:$4 sm:$0xff]  }
  0x52   : > { %2054 = vmatmul.mubr.bf16.vlgmr.msra.gmra.mrb[0].mxu1 %v2748_v8  ;;  %v3298_v8 = vld [vmem:[%s3588_s22 + $0x1c0] ss:$8 sps:$4 sm:$0xff]  }
  0x53   : > { %2266 = vmatmul.mubr.bf16.vlgmr.msra.gmra.mrb[0].mxu0 %v2756_v10  ;;  %2075 = vmatpush1.bf16.msra.mxu1 %v3226_v9  ;;  %v3301_v9 = vld [vmem:[%s3588_s22 + $0x5c0] ss:$8 sps:$4 sm:$0xff]   ;;  %v3306_v10 = vld [vmem:[%s3588_s22 + $0x1d4] ss:$8 sps:$4 sm:$0xff]  }
  0x54   : > { %2287 = vmatpush1.bf16.msra.mxu0 %v3229_v11  ;;  %2076 = vmatprep.subr.bf16.mxu1 %v3234_v12  ;;  %v3309_v11 = vld [vmem:[%s3588_s22 + $0x5d4] ss:$8 sps:$4 sm:$0xff]   ;;  %v3304_v12 = vld [vmem:[%s3588_s22 + $0x1d0] ss:$8 sps:$4 sm:$0xff]  }
  0x55   : > { %2288 = vmatprep.subr.bf16.mxu0 %v3237_v13  ;;  %2063 = vmatprep.mubr.bf16.mxu1 %v2765_v33  ;;  %v3307_v13 = vld [vmem:[%s3588_s22 + $0x5d0] ss:$8 sps:$4 sm:$0xff]   ;;  %v322_v33 = vld [vmem:[%s3638_s26 + $0xe8] sm:$0xff] }
  0x56   : > { %2275 = vmatprep.mubr.bf16.mxu0 %v2773_v39  ;;  %v3339_v39 = vld [vmem:[%s3588_s22 + $0x624] ss:$8 sps:$4 sm:$0xff]  }
  0x57   : > { %2077 = vmatpush1.bf16.msra.mxu1 %v3232_v14  ;;  %v3312_v14 = vld [vmem:[%s3588_s22 + $0x1e4] ss:$8 sps:$4 sm:$0xff]  }
  0x58   : > { %2289 = vmatpush1.bf16.msra.mxu0 %v3235_v15  ;;  %2078 = vmatprep.subr.bf16.mxu1 %v3240_v16  ;;  %v3315_v15 = vld [vmem:[%s3588_s22 + $0x5e4] ss:$8 sps:$4 sm:$0xff]   ;;  %v3310_v16 = vld [vmem:[%s3588_s22 + $0x1e0] ss:$8 sps:$4 sm:$0xff]  }
  0x59   : > { %2290 = vmatprep.subr.bf16.mxu0 %v3243_v17  ;;  %v3313_v17 = vld [vmem:[%s3588_s22 + $0x5e0] ss:$8 sps:$4 sm:$0xff]  }
  0x5a   : > { %2064 = vmatmul.mubr.bf16.gmra.mrb[4].mxu1 %v2764_v37  ;;  %v3331_v37 = vld [vmem:[%s3588_s22 + $0x610] ss:$8 sps:$4 sm:$0xff]  }
  0x5b   : > { %2079 = vmatpush1.bf16.msra.mxu1 %v3238_v18  ;;  %2276 = vmatmul.mubr.bf16.gmra.mrb[4].mxu0 %v2772_v40  ;;  %v3318_v18 = vld [vmem:[%s3588_s22 + $0x1f4] ss:$8 sps:$4 sm:$0xff]   ;;  %v3334_v40 = vld [vmem:[%s3588_s22 + $0x220] ss:$8 sps:$4 sm:$0xff]  }
  0x5c   : > { %2291 = vmatpush1.bf16.msra.mxu0 %v3241_v19  ;;  %2080 = vmatprep.subr.bf16.mxu1 %v3246_v20  ;;  %v3321_v19 = vld [vmem:[%s3588_s22 + $0x5f4] ss:$8 sps:$4 sm:$0xff]   ;;  %v3316_v20 = vld [vmem:[%s3588_s22 + $0x1f0] ss:$8 sps:$4 sm:$0xff]  }
  0x5d   : > { %2292 = vmatprep.subr.bf16.mxu0 %v3249_v21  ;;  %2106 = vmatprep.mubr.bf16.mxu1 %v2751_v48  ;;  %v3319_v21 = vld [vmem:[%s3588_s22 + $0x5f0] ss:$8 sps:$4 sm:$0xff]   ;;  %v3342_v48 = vld [vmem:[%s3588_s22 + $0x234] ss:$8 sps:$4 sm:$0xff]  }
  0x5e   : > { %2318 = vmatprep.mubr.bf16.mxu0 %v2759_v53  ;;  %v3343_v53 = vld [vmem:[%s3588_s22 + $0x630] ss:$8 sps:$4 sm:$0xff]  }
  0x5f   : > { %2081 = vmatpush1.bf16.msra.mxu1 %v3244_v22  ;;  %v3324_v22 = vld [vmem:[%s3588_s22 + $0x204] ss:$8 sps:$4 sm:$0xff]  }
  0x60   : > { %2293 = vmatpush1.bf16.msra.mxu0 %v3247_v23  ;;  %2082 = vmatprep.subr.bf16.mxu1 %v3252_v24  ;;  %v3327_v23 = vld [vmem:[%s3588_s22 + $0x604] ss:$8 sps:$4 sm:$0xff]   ;;  %v3322_v24 = vld [vmem:[%s3588_s22 + $0x200] ss:$8 sps:$4 sm:$0xff]  }
  0x61   : > { %2294 = vmatprep.subr.bf16.mxu0 %v3255_v25  ;;  %v3325_v25 = vld [vmem:[%s3588_s22 + $0x600] ss:$8 sps:$4 sm:$0xff]  }
  0x63   : > { %2083 = vmatpush1.bf16.msra.mxu1 %v3250_v26  ;;  %v310_v26 = vld [vmem:[%s3638_s26 + $0x88] sm:$0xff] }
  0x64   : > { %2295 = vmatpush1.bf16.msra.mxu0 %v3253_v27  ;;  %2084 = vmatprep.subr.bf16.mxu1 %v3258_v28  ;;  %v2750_v27 = vcombine.low %v3697_v44, %v3700_v45  ;;  %v2758_v28 = vcombine.low %v3707_v49, %v3710_v50  ;;  %v3772_v45 = vld [vmem:[%s3638_s26 + $0x50] sm:$0xff] }
  0x65   : > { %2296 = vmatprep.subr.bf16.mxu0 %v3261_v29  ;;  %v318_v29 = vld [vmem:[%s3638_s26 + $0xc8] sm:$0xff]  ;;  %v3345_v49 = vld [vmem:[%s3588_s22 + $0x634] ss:$8 sps:$4 sm:$0xff]  }
  0x67   : > { %2085 = vmatpush1.bf16.msra.mxu1 %v3256_v32  ;;  %v314_v32 = vld [vmem:[%s3638_s26 + $0xa8] sm:$0xff] }
  0x68   : > { %2297 = vmatpush1.bf16.msra.mxu0 %v3259_v34  ;;  %2086 = vmatprep.subr.bf16.mxu1 %v3264_v38  ;;  %v2767_v34 = vcombine.high %v310_v26, %v318_v29  ;;  %v2775_v35 = vcombine.high %v314_v32, %v322_v33  ;;  %v3336_v38 = vld [vmem:[%s3588_s22 + $0x224] ss:$8 sps:$4 sm:$0xff]   ;;  %v2774_v44 = vcombine.low %v314_v32, %v322_v33  ;;  %v3406_v32 = vld [vmem:[%s3588_s22 + $0x2e0] ss:$8 sps:$4 sm:$0xff]  }
  0x69   : > { %2298 = vmatprep.subr.bf16.mxu0 %v3267_v41  ;;  %v3337_v41 = vld [vmem:[%s3588_s22 + $0x620] ss:$8 sps:$4 sm:$0xff]  }
  0x6a   : > { %v3409_v33 = vld [vmem:[%s3588_s22 + $0x6e0] ss:$8 sps:$4 sm:$0xff]  }
  0x6b   : > { %2087 = vmatpush1.bf16.msra.mxu1 %v3262_v42  ;;  %v3769_v42 = vld [vmem:[%s3638_s26 + $0x10] sm:$0xff] }
  0x6c   : > { %2299 = vmatpush1.bf16.msra.mxu0 %v3265_v43  ;;  %2088 = vmatprep.subr.bf16.mxu1 %v3270_v46  ;;  %v2766_v43 = vcombine.low %v310_v26, %v318_v29  ;;  %v3775_v46 = vld [vmem:[%s3638_s26 + $0x30] sm:$0xff]  ;;  %v2753_v50 = vcombine.high %v3769_v42, %v3772_v45 }
  0x6d   : > { %2300 = vmatprep.subr.bf16.mxu0 %v3273_v47  ;;  %v3778_v47 = vld [vmem:[%s3638_s26 + $0x70] sm:$0xff] }
  0x6e   : > { %v3402_v26 = vld [vmem:[%s3588_s22 + $0x2d4] ss:$8 sps:$4 sm:$0xff]   ;;  %v3403_v29 = vld [vmem:[%s3588_s22 + $0x6d0] ss:$8 sps:$4 sm:$0xff]  }
  0x6f   : > { %2089 = vmatpush1.bf16.msra.mxu1 %v3268_v51  ;;  %v2761_v51 = vcombine.high %v3775_v46, %v3778_v47 }
  0x70   : > { %2301 = vmatpush1.bf16.msra.mxu0 %v3271_v52  ;;  %2090 = vmatprep.subr.bf16.mxu1 %v3276_v54  ;;  %v3340_v52 = vld [vmem:[%s3588_s22 + $0x230] ss:$8 sps:$4 sm:$0xff]   ;;  %v3348_v54 = vld [vmem:[%s3588_s22 + $0x244] ss:$8 sps:$4 sm:$0xff]  }
  0x71   : > { %2302 = vmatprep.subr.bf16.mxu0 %v3279_v55  ;;  %v3351_v55 = vld [vmem:[%s3588_s22 + $0x644] ss:$8 sps:$4 sm:$0xff]  }
  0x73   : > { %2091 = vmatpush1.bf16.msra.mxu1 %v3274_v56  ;;  %v3346_v56 = vld [vmem:[%s3588_s22 + $0x240] ss:$8 sps:$4 sm:$0xff]  }
  0x74   : > { %2303 = vmatpush1.bf16.msra.mxu0 %v3277_v57  ;;  %2092 = vmatprep.subr.bf16.mxu1 %v3282_v58  ;;  %v3349_v57 = vld [vmem:[%s3588_s22 + $0x640] ss:$8 sps:$4 sm:$0xff]   ;;  %v3354_v58 = vld [vmem:[%s3588_s22 + $0x254] ss:$8 sps:$4 sm:$0xff]  }
  0x75   : > { %2304 = vmatprep.subr.bf16.mxu0 %v3285_v59  ;;  %v3357_v59 = vld [vmem:[%s3588_s22 + $0x654] ss:$8 sps:$4 sm:$0xff]  }
  0x77   : > { %2093 = vmatpush1.bf16.msra.mxu1 %v3280_v60  ;;  %v3352_v60 = vld [vmem:[%s3588_s22 + $0x250] ss:$8 sps:$4 sm:$0xff]  }
  0x78   : > { %2305 = vmatpush1.bf16.msra.mxu0 %v3283_v61  ;;  %2094 = vmatprep.subr.bf16.mxu1 %v3288_v62  ;;  %v3355_v61 = vld [vmem:[%s3588_s22 + $0x650] ss:$8 sps:$4 sm:$0xff]   ;;  %v3360_v62 = vld [vmem:[%s3588_s22 + $0x264] ss:$8 sps:$4 sm:$0xff]  }
  0x79   : > { %2306 = vmatprep.subr.bf16.mxu0 %v3291_v63  ;;  %v3363_v63 = vld [vmem:[%s3588_s22 + $0x664] ss:$8 sps:$4 sm:$0xff]  }
  0x7b   : > { %2095 = vmatpush1.bf16.msra.mxu1 %v3286_v0  ;;  %v3358_v0 = vld [vmem:[%s3588_s22 + $0x260] ss:$8 sps:$4 sm:$0xff]  }
  0x7c   : > { %2307 = vmatpush1.bf16.msra.mxu0 %v3289_v1  ;;  %2096 = vmatprep.subr.bf16.mxu1 %v3294_v2  ;;  %v3361_v1 = vld [vmem:[%s3588_s22 + $0x660] ss:$8 sps:$4 sm:$0xff]   ;;  %v3366_v2 = vld [vmem:[%s3588_s22 + $0x274] ss:$8 sps:$4 sm:$0xff]  }
  0x7d   : > { %2308 = vmatprep.subr.bf16.mxu0 %v3297_v3  ;;  %v3369_v3 = vld [vmem:[%s3588_s22 + $0x674] ss:$8 sps:$4 sm:$0xff]  }
  0x7f   : > { %2097 = vmatpush1.bf16.msra.mxu1 %v3292_v4  ;;  %v3364_v4 = vld [vmem:[%s3588_s22 + $0x270] ss:$8 sps:$4 sm:$0xff]  }
  0x80   : > { %2309 = vmatpush1.bf16.msra.mxu0 %v3295_v5  ;;  %2098 = vmatprep.subr.bf16.mxu1 %v3300_v6  ;;  %v3367_v5 = vld [vmem:[%s3588_s22 + $0x670] ss:$8 sps:$4 sm:$0xff]   ;;  %v3372_v6 = vld [vmem:[%s3588_s22 + $0x284] ss:$8 sps:$4 sm:$0xff]  }
  0x81   : > { %2310 = vmatprep.subr.bf16.mxu0 %v3303_v7  ;;  %v3375_v7 = vld [vmem:[%s3588_s22 + $0x684] ss:$8 sps:$4 sm:$0xff]  }
  0x83   : > { %2099 = vmatpush1.bf16.msra.mxu1 %v3298_v8  ;;  %v3370_v8 = vld [vmem:[%s3588_s22 + $0x280] ss:$8 sps:$4 sm:$0xff]  }
  0x84   : > { %2311 = vmatpush1.bf16.msra.mxu0 %v3301_v9  ;;  %2100 = vmatprep.subr.bf16.mxu1 %v3306_v10  ;;  %v3373_v9 = vld [vmem:[%s3588_s22 + $0x680] ss:$8 sps:$4 sm:$0xff]   ;;  %v3378_v10 = vld [vmem:[%s3588_s22 + $0x294] ss:$8 sps:$4 sm:$0xff]  }
  0x85   : > { %2312 = vmatprep.subr.bf16.mxu0 %v3309_v11  ;;  %v3381_v11 = vld [vmem:[%s3588_s22 + $0x694] ss:$8 sps:$4 sm:$0xff]  }
  0x87   : > { %2101 = vmatpush1.bf16.msra.mxu1 %v3304_v12  ;;  %v3376_v12 = vld [vmem:[%s3588_s22 + $0x290] ss:$8 sps:$4 sm:$0xff]  }
  0x88   : > { %2313 = vmatpush1.bf16.msra.mxu0 %v3307_v13  ;;  %2102 = vmatprep.subr.bf16.mxu1 %v3312_v14  ;;  %v3379_v13 = vld [vmem:[%s3588_s22 + $0x690] ss:$8 sps:$4 sm:$0xff]   ;;  %v3384_v14 = vld [vmem:[%s3588_s22 + $0x2a4] ss:$8 sps:$4 sm:$0xff]  }
  0x89   : > { %2314 = vmatprep.subr.bf16.mxu0 %v3315_v15  ;;  %v3387_v15 = vld [vmem:[%s3588_s22 + $0x6a4] ss:$8 sps:$4 sm:$0xff]  }
  0x8b   : > { %2103 = vmatpush1.bf16.msra.mxu1 %v3310_v16  ;;  %v3382_v16 = vld [vmem:[%s3588_s22 + $0x2a0] ss:$8 sps:$4 sm:$0xff]  }
  0x8c   : > { %2315 = vmatpush1.bf16.msra.mxu0 %v3313_v17  ;;  %2104 = vmatprep.subr.bf16.mxu1 %v3318_v18  ;;  %v3385_v17 = vld [vmem:[%s3588_s22 + $0x6a0] ss:$8 sps:$4 sm:$0xff]   ;;  %v3390_v18 = vld [vmem:[%s3588_s22 + $0x2b4] ss:$8 sps:$4 sm:$0xff]  }
  0x8d   : > { %2316 = vmatprep.subr.bf16.mxu0 %v3321_v19  ;;  %v3393_v19 = vld [vmem:[%s3588_s22 + $0x6b4] ss:$8 sps:$4 sm:$0xff]  }
  0x8f   : > { %2105 = vmatpush1.bf16.msra.mxu1 %v3316_v20  ;;  %v3388_v20 = vld [vmem:[%s3588_s22 + $0x2b0] ss:$8 sps:$4 sm:$0xff]  }
  0x90   : > { %2317 = vmatpush1.bf16.msra.mxu0 %v3319_v21  ;;  %2127 = vmatprep.subr.bf16.mxu1 %v3324_v22  ;;  %v3391_v21 = vld [vmem:[%s3588_s22 + $0x6b0] ss:$8 sps:$4 sm:$0xff]   ;;  %v3396_v22 = vld [vmem:[%s3588_s22 + $0x2c4] ss:$8 sps:$4 sm:$0xff]  }
  0x91   : > { %2339 = vmatprep.subr.bf16.mxu0 %v3327_v23  ;;  %v3399_v23 = vld [vmem:[%s3588_s22 + $0x6c4] ss:$8 sps:$4 sm:$0xff]  }
  0x92   : > { %2107 = vmatmul.mubr.bf16.vlgmr.msra.gmra.mrb[0].mxu1 %v2750_v27  ;;  %v3405_v27 = vld [vmem:[%s3588_s22 + $0x6d4] ss:$8 sps:$4 sm:$0xff]  }
  0x93   : > { %2319 = vmatmul.mubr.bf16.vlgmr.msra.gmra.mrb[0].mxu0 %v2758_v28  ;;  %2128 = vmatpush1.bf16.msra.mxu1 %v3322_v24  ;;  %v3394_v24 = vld [vmem:[%s3588_s22 + $0x2c0] ss:$8 sps:$4 sm:$0xff]   ;;  %v3400_v28 = vld [vmem:[%s3588_s22 + $0x2d0] ss:$8 sps:$4 sm:$0xff]  }
  0x94   : > { %2340 = vmatpush1.bf16.msra.mxu0 %v3325_v25  ;;  %2129 = vmatprep.subr.bf16.mxu1 %v3330_v30  ;;  %v3397_v25 = vld [vmem:[%s3588_s22 + $0x6c0] ss:$8 sps:$4 sm:$0xff]   ;;  %v3408_v30 = vld [vmem:[%s3588_s22 + $0x2e4] ss:$8 sps:$4 sm:$0xff]  }
  0x95   : > { %2341 = vmatprep.subr.bf16.mxu0 %v3333_v31  ;;  %2116 = vmatprep.mubr.bf16.mxu1 %v2767_v34  ;;  %v3411_v31 = vld [vmem:[%s3588_s22 + $0x6e4] ss:$8 sps:$4 sm:$0xff]   ;;  %v3414_v34 = vld [vmem:[%s3588_s22 + $0x2f4] ss:$8 sps:$4 sm:$0xff]  }
  0x96   : > { %2328 = vmatprep.mubr.bf16.mxu0 %v2775_v35  ;;  %v3417_v35 = vld [vmem:[%s3588_s22 + $0x6f4] ss:$8 sps:$4 sm:$0xff]  }
  0x97   : > { %2130 = vmatpush1.bf16.msra.mxu1 %v3328_v36  ;;  %v3412_v36 = vld [vmem:[%s3588_s22 + $0x2f0] ss:$8 sps:$4 sm:$0xff]  }
  0x98   : > { %2342 = vmatpush1.bf16.msra.mxu0 %v3331_v37  ;;  %2131 = vmatprep.subr.bf16.mxu1 %v3336_v38  ;;  %v3415_v37 = vld [vmem:[%s3588_s22 + $0x6f0] ss:$8 sps:$4 sm:$0xff]   ;;  %v3420_v38 = vld [vmem:[%s3588_s22 + $0x304] ss:$8 sps:$4 sm:$0xff]  }
  0x99   : > { %2343 = vmatprep.subr.bf16.mxu0 %v3339_v39  ;;  %v3423_v39 = vld [vmem:[%s3588_s22 + $0x704] ss:$8 sps:$4 sm:$0xff]  }
  0x9a   : > { %2117 = vmatmul.mubr.bf16.gmra.mrb[4].mxu1 %v2766_v43  ;;  %v2760_v43 = vcombine.low %v3775_v46, %v3778_v47  ;;  %v3424_v46 = vld [vmem:[%s3588_s22 + $0x310] ss:$8 sps:$4 sm:$0xff]  }
  0x9b   : > { %2329 = vmatmul.mubr.bf16.gmra.mrb[4].mxu0 %v2774_v44  ;;  %2132 = vmatpush1.bf16.msra.mxu1 %v3334_v40  ;;  %v311_v40 = vld [vmem:[%s3638_s26 + $0x90] sm:$0xff] }
  0x9c   : > { %2344 = vmatpush1.bf16.msra.mxu0 %v3337_v41  ;;  %2133 = vmatprep.subr.bf16.mxu1 %v3342_v48  ;;  %v2752_v41 = vcombine.low %v3769_v42, %v3772_v45  ;;  %v319_v44 = vld [vmem:[%s3638_s26 + $0xd0] sm:$0xff] }
  0x9d   : > { %2345 = vmatprep.subr.bf16.mxu0 %v3345_v49  ;;  %2159 = vmatprep.mubr.bf16.mxu1 %v2753_v50  ;;  %v315_v48 = vld [vmem:[%s3638_s26 + $0xb0] sm:$0xff]  ;;  %v3418_v50 = vld [vmem:[%s3588_s22 + $0x300] ss:$8 sps:$4 sm:$0xff]   ;;  %v2769_v42 = vcombine.high %v311_v40, %v319_v44 }
  0x9e   : > { %2371 = vmatprep.mubr.bf16.mxu0 %v2761_v51  ;;  %v323_v49 = vld [vmem:[%s3638_s26 + $0xf0] sm:$0xff]  ;;  %v3421_v51 = vld [vmem:[%s3588_s22 + $0x700] ss:$8 sps:$4 sm:$0xff]  }
  0x9f   : > { %2134 = vmatpush1.bf16.msra.mxu1 %v3340_v52  ;;  %v3426_v52 = vld [vmem:[%s3588_s22 + $0x314] ss:$8 sps:$4 sm:$0xff]   ;;  %v2777_v45 = vcombine.high %v315_v48, %v323_v49  ;;  %v3427_v47 = vld [vmem:[%s3588_s22 + $0x710] ss:$8 sps:$4 sm:$0xff]  }
  0xa0   : > { %2346 = vmatpush1.bf16.msra.mxu0 %v3343_v53  ;;  %2135 = vmatprep.subr.bf16.mxu1 %v3348_v54  ;;  %v3429_v53 = vld [vmem:[%s3588_s22 + $0x714] ss:$8 sps:$4 sm:$0xff]   ;;  %v3432_v54 = vld [vmem:[%s3588_s22 + $0x324] ss:$8 sps:$4 sm:$0xff]  }
  0xa1   : > { %2347 = vmatprep.subr.bf16.mxu0 %v3351_v55  ;;  %v3435_v55 = vld [vmem:[%s3588_s22 + $0x724] ss:$8 sps:$4 sm:$0xff]  }
  0xa3   : > { %2136 = vmatpush1.bf16.msra.mxu1 %v3346_v56  ;;  %v3855_v56 = vld [vmem:[%s3638_s26 + $0x18] sm:$0xff] }
  0xa4   : > { %2348 = vmatpush1.bf16.msra.mxu0 %v3349_v57  ;;  %2137 = vmatprep.subr.bf16.mxu1 %v3354_v58  ;;  %v2768_v57 = vcombine.low %v311_v40, %v319_v44  ;;  %v2776_v58 = vcombine.low %v315_v48, %v323_v49  ;;  %v3490_v40 = vld [vmem:[%s3588_s22 + $0x3c0] ss:$8 sps:$4 sm:$0xff]   ;;  %v3501_v44 = vld [vmem:[%s3588_s22 + $0x7d4] ss:$8 sps:$4 sm:$0xff]   ;;  %v3496_v48 = vld [vmem:[%s3588_s22 + $0x3d0] ss:$8 sps:$4 sm:$0xff]  }
  0xa5   : > { %2349 = vmatprep.subr.bf16.mxu0 %v3357_v59  ;;  %v3858_v59 = vld [vmem:[%s3638_s26 + $0x58] sm:$0xff] }
  0xa6   : > { %v3499_v49 = vld [vmem:[%s3588_s22 + $0x7d0] ss:$8 sps:$4 sm:$0xff]  }
  0xa7   : > { %2138 = vmatpush1.bf16.msra.mxu1 %v3352_v60  ;;  %v3861_v60 = vld [vmem:[%s3638_s26 + $0x38] sm:$0xff] }
  0xa8   : > { %2350 = vmatpush1.bf16.msra.mxu0 %v3355_v61  ;;  %2139 = vmatprep.subr.bf16.mxu1 %v3360_v62  ;;  %v3864_v61 = vld [vmem:[%s3638_s26 + $0x78] sm:$0xff]  ;;  %v3430_v62 = vld [vmem:[%s3588_s22 + $0x320] ss:$8 sps:$4 sm:$0xff]  }
  0xa9   : > { %2351 = vmatprep.subr.bf16.mxu0 %v3363_v63  ;;  %v3433_v63 = vld [vmem:[%s3588_s22 + $0x720] ss:$8 sps:$4 sm:$0xff]  }
  0xab   : > { %2140 = vmatpush1.bf16.msra.mxu1 %v3358_v0  ;;  %v3438_v0 = vld [vmem:[%s3588_s22 + $0x334] ss:$8 sps:$4 sm:$0xff]  }
  0xac   : > { %2352 = vmatpush1.bf16.msra.mxu0 %v3361_v1  ;;  %2141 = vmatprep.subr.bf16.mxu1 %v3366_v2  ;;  %v3441_v1 = vld [vmem:[%s3588_s22 + $0x734] ss:$8 sps:$4 sm:$0xff]   ;;  %v2755_v2 = vcombine.high %v3855_v56, %v3858_v59 }
  0xad   : > { %2353 = vmatprep.subr.bf16.mxu0 %v3369_v3  ;;  %v2763_v3 = vcombine.high %v3861_v60, %v3864_v61 }
  0xaf   : > { %2142 = vmatpush1.bf16.msra.mxu1 %v3364_v4  ;;  %v3436_v4 = vld [vmem:[%s3588_s22 + $0x330] ss:$8 sps:$4 sm:$0xff]  }
  0xb0   : > { %2354 = vmatpush1.bf16.msra.mxu0 %v3367_v5  ;;  %2143 = vmatprep.subr.bf16.mxu1 %v3372_v6  ;;  %v3439_v5 = vld [vmem:[%s3588_s22 + $0x730] ss:$8 sps:$4 sm:$0xff]   ;;  %v3444_v6 = vld [vmem:[%s3588_s22 + $0x344] ss:$8 sps:$4 sm:$0xff]  }
  0xb1   : > { %2355 = vmatprep.subr.bf16.mxu0 %v3375_v7  ;;  %v3447_v7 = vld [vmem:[%s3588_s22 + $0x744] ss:$8 sps:$4 sm:$0xff]  }
  0xb3   : > { %2144 = vmatpush1.bf16.msra.mxu1 %v3370_v8  ;;  %v3442_v8 = vld [vmem:[%s3588_s22 + $0x340] ss:$8 sps:$4 sm:$0xff]  }
  0xb4   : > { %2356 = vmatpush1.bf16.msra.mxu0 %v3373_v9  ;;  %2145 = vmatprep.subr.bf16.mxu1 %v3378_v10  ;;  %v3445_v9 = vld [vmem:[%s3588_s22 + $0x740] ss:$8 sps:$4 sm:$0xff]   ;;  %v3450_v10 = vld [vmem:[%s3588_s22 + $0x354] ss:$8 sps:$4 sm:$0xff]  }
  0xb5   : > { %2357 = vmatprep.subr.bf16.mxu0 %v3381_v11  ;;  %v3453_v11 = vld [vmem:[%s3588_s22 + $0x754] ss:$8 sps:$4 sm:$0xff]  }
  0xb7   : > { %2146 = vmatpush1.bf16.msra.mxu1 %v3376_v12  ;;  %v3448_v12 = vld [vmem:[%s3588_s22 + $0x350] ss:$8 sps:$4 sm:$0xff]  }
  0xb8   : > { %2358 = vmatpush1.bf16.msra.mxu0 %v3379_v13  ;;  %2147 = vmatprep.subr.bf16.mxu1 %v3384_v14  ;;  %v3451_v13 = vld [vmem:[%s3588_s22 + $0x750] ss:$8 sps:$4 sm:$0xff]   ;;  %v3456_v14 = vld [vmem:[%s3588_s22 + $0x364] ss:$8 sps:$4 sm:$0xff]  }
  0xb9   : > { %2359 = vmatprep.subr.bf16.mxu0 %v3387_v15  ;;  %v3459_v15 = vld [vmem:[%s3588_s22 + $0x764] ss:$8 sps:$4 sm:$0xff]  }
  0xbb   : > { %2148 = vmatpush1.bf16.msra.mxu1 %v3382_v16  ;;  %v3454_v16 = vld [vmem:[%s3588_s22 + $0x360] ss:$8 sps:$4 sm:$0xff]  }
  0xbc   : > { %2360 = vmatpush1.bf16.msra.mxu0 %v3385_v17  ;;  %2149 = vmatprep.subr.bf16.mxu1 %v3390_v18  ;;  %v3457_v17 = vld [vmem:[%s3588_s22 + $0x760] ss:$8 sps:$4 sm:$0xff]   ;;  %v3462_v18 = vld [vmem:[%s3588_s22 + $0x374] ss:$8 sps:$4 sm:$0xff]  }
  0xbd   : > { %2361 = vmatprep.subr.bf16.mxu0 %v3393_v19  ;;  %v3465_v19 = vld [vmem:[%s3588_s22 + $0x774] ss:$8 sps:$4 sm:$0xff]  }
  0xbf   : > { %2150 = vmatpush1.bf16.msra.mxu1 %v3388_v20  ;;  %v3460_v20 = vld [vmem:[%s3588_s22 + $0x370] ss:$8 sps:$4 sm:$0xff]  }
  0xc0   : > { %2362 = vmatpush1.bf16.msra.mxu0 %v3391_v21  ;;  %2151 = vmatprep.subr.bf16.mxu1 %v3396_v22  ;;  %v3463_v21 = vld [vmem:[%s3588_s22 + $0x770] ss:$8 sps:$4 sm:$0xff]   ;;  %v3468_v22 = vld [vmem:[%s3588_s22 + $0x384] ss:$8 sps:$4 sm:$0xff]  }
  0xc1   : > { %2363 = vmatprep.subr.bf16.mxu0 %v3399_v23  ;;  %v3471_v23 = vld [vmem:[%s3588_s22 + $0x784] ss:$8 sps:$4 sm:$0xff]  }
  0xc3   : > { %2152 = vmatpush1.bf16.msra.mxu1 %v3394_v24  ;;  %v3466_v24 = vld [vmem:[%s3588_s22 + $0x380] ss:$8 sps:$4 sm:$0xff]  }
  0xc4   : > { %2364 = vmatpush1.bf16.msra.mxu0 %v3397_v25  ;;  %2153 = vmatprep.subr.bf16.mxu1 %v3402_v26  ;;  %v3469_v25 = vld [vmem:[%s3588_s22 + $0x780] ss:$8 sps:$4 sm:$0xff]   ;;  %v3474_v26 = vld [vmem:[%s3588_s22 + $0x394] ss:$8 sps:$4 sm:$0xff]  }
  0xc5   : > { %2365 = vmatprep.subr.bf16.mxu0 %v3405_v27  ;;  %v3477_v27 = vld [vmem:[%s3588_s22 + $0x794] ss:$8 sps:$4 sm:$0xff]  }
  0xc7   : > { %2154 = vmatpush1.bf16.msra.mxu1 %v3400_v28  ;;  %v3472_v28 = vld [vmem:[%s3588_s22 + $0x390] ss:$8 sps:$4 sm:$0xff]  }
  0xc8   : > { %2366 = vmatpush1.bf16.msra.mxu0 %v3403_v29  ;;  %2155 = vmatprep.subr.bf16.mxu1 %v3408_v30  ;;  %v3475_v29 = vld [vmem:[%s3588_s22 + $0x790] ss:$8 sps:$4 sm:$0xff]   ;;  %v3480_v30 = vld [vmem:[%s3588_s22 + $0x3a4] ss:$8 sps:$4 sm:$0xff]  }
  0xc9   : > { %2367 = vmatprep.subr.bf16.mxu0 %v3411_v31  ;;  %v3483_v31 = vld [vmem:[%s3588_s22 + $0x7a4] ss:$8 sps:$4 sm:$0xff]  }
  0xcb   : > { %2156 = vmatpush1.bf16.msra.mxu1 %v3406_v32  ;;  %v3478_v32 = vld [vmem:[%s3588_s22 + $0x3a0] ss:$8 sps:$4 sm:$0xff]  }
  0xcc   : > { %2368 = vmatpush1.bf16.msra.mxu0 %v3409_v33  ;;  %2157 = vmatprep.subr.bf16.mxu1 %v3414_v34  ;;  %v3481_v33 = vld [vmem:[%s3588_s22 + $0x7a0] ss:$8 sps:$4 sm:$0xff]   ;;  %v3486_v34 = vld [vmem:[%s3588_s22 + $0x3b4] ss:$8 sps:$4 sm:$0xff]  }
  0xcd   : > { %2369 = vmatprep.subr.bf16.mxu0 %v3417_v35  ;;  %v3489_v35 = vld [vmem:[%s3588_s22 + $0x7b4] ss:$8 sps:$4 sm:$0xff]  }
  0xcf   : > { %2158 = vmatpush1.bf16.msra.mxu1 %v3412_v36  ;;  %v3484_v36 = vld [vmem:[%s3588_s22 + $0x3b0] ss:$8 sps:$4 sm:$0xff]  }
  0xd0   : > { %2370 = vmatpush1.bf16.msra.mxu0 %v3415_v37  ;;  %2180 = vmatprep.subr.bf16.mxu1 %v3420_v38  ;;  %v3487_v37 = vld [vmem:[%s3588_s22 + $0x7b0] ss:$8 sps:$4 sm:$0xff]   ;;  %v3492_v38 = vld [vmem:[%s3588_s22 + $0x3c4] ss:$8 sps:$4 sm:$0xff]  }
  0xd1   : > { %2392 = vmatprep.subr.bf16.mxu0 %v3423_v39  ;;  %v3495_v39 = vld [vmem:[%s3588_s22 + $0x7c4] ss:$8 sps:$4 sm:$0xff]  }
  0xd2   : > { %2160 = vmatmul.mubr.bf16.vlgmr.msra.gmra.mrb[0].mxu1 %v2752_v41  ;;  %v3493_v41 = vld [vmem:[%s3588_s22 + $0x7c0] ss:$8 sps:$4 sm:$0xff]  }
  0xd3   : > { %2372 = vmatmul.mubr.bf16.vlgmr.msra.gmra.mrb[0].mxu0 %v2760_v43  ;;  %2181 = vmatpush1.bf16.msra.mxu1 %v3418_v50  ;;  %v3498_v43 = vld [vmem:[%s3588_s22 + $0x3d4] ss:$8 sps:$4 sm:$0xff]   ;;  %v3504_v50 = vld [vmem:[%s3588_s22 + $0x3e4] ss:$8 sps:$4 sm:$0xff]  }
  0xd4   : > { %2393 = vmatpush1.bf16.msra.mxu0 %v3421_v51  ;;  %2182 = vmatprep.subr.bf16.mxu1 %v3426_v52  ;;  %v3507_v51 = vld [vmem:[%s3588_s22 + $0x7e4] ss:$8 sps:$4 sm:$0xff]   ;;  %v3502_v52 = vld [vmem:[%s3588_s22 + $0x3e0] ss:$8 sps:$4 sm:$0xff]  }
  0xd5   : > { %2394 = vmatprep.subr.bf16.mxu0 %v3429_v53  ;;  %2169 = vmatprep.mubr.bf16.mxu1 %v2769_v42  ;;  %v3505_v53 = vld [vmem:[%s3588_s22 + $0x7e0] ss:$8 sps:$4 sm:$0xff]   ;;  %v3510_v42 = vld [vmem:[%s3588_s22 + $0x3f4] ss:$8 sps:$4 sm:$0xff]  }
  0xd6   : > { %2381 = vmatprep.mubr.bf16.mxu0 %v2777_v45  ;;  %v3513_v45 = vld [vmem:[%s3588_s22 + $0x7f4] ss:$8 sps:$4 sm:$0xff]  }
  0xd7   : > { %2183 = vmatpush1.bf16.msra.mxu1 %v3424_v46  ;;  %v3508_v46 = vld [vmem:[%s3588_s22 + $0x3f0] ss:$8 sps:$4 sm:$0xff]  }
  0xd8   : > { %2395 = vmatpush1.bf16.msra.mxu0 %v3427_v47  ;;  %2184 = vmatprep.subr.bf16.mxu1 %v3432_v54  ;;  %v3511_v47 = vld [vmem:[%s3588_s22 + $0x7f0] ss:$8 sps:$4 sm:$0xff]  }
  0xd9   : > { %2396 = vmatprep.subr.bf16.mxu0 %v3435_v55  ;;  %v312_v54 = vld [vmem:[%s3638_s26 + $0x98] sm:$0xff] }
  0xda   : > { %2170 = vmatmul.mubr.bf16.gmra.mrb[4].mxu1 %v2768_v57  ;;  %v320_v55 = vld [vmem:[%s3638_s26 + $0xd8] sm:$0xff] }
  0xdb   : > { %2382 = vmatmul.mubr.bf16.gmra.mrb[4].mxu0 %v2776_v58  ;;  %2185 = vmatpush1.bf16.msra.mxu1 %v3430_v62  ;;  %v316_v57 = vld [vmem:[%s3638_s26 + $0xb8] sm:$0xff]  ;;  %v2754_v62 = vcombine.low %v3855_v56, %v3858_v59 }
  0xdc   : > { %2397 = vmatpush1.bf16.msra.mxu0 %v3433_v63  ;;  %2186 = vmatprep.subr.bf16.mxu1 %v3438_v0  ;;  %v324_v58 = vld [vmem:[%s3638_s26 + $0xf8] sm:$0xff]  ;;  %v2762_v63 = vcombine.low %v3861_v60, %v3864_v61  ;;  %v2771_v0 = vcombine.high %v312_v54, %v320_v55 }
  0xdd   : > { %2398 = vmatprep.subr.bf16.mxu0 %v3441_v1  ;;  %2212 = vmatprep.mubr.bf16.mxu1 %v2755_v2  ;;  %v2779_v1 = vcombine.high %v316_v57, %v324_v58  ;;  %v2770_v2 = vcombine.low %v312_v54, %v320_v55  ;;  %v2497_v55 = vlaneseq }
  0xde   : > { %2424 = vmatprep.mubr.bf16.mxu0 %v2763_v3  ;;  %v2778_v3 = vcombine.low %v316_v57, %v324_v58 }
  0xdf   : > { %2187 = vmatpush1.bf16.msra.mxu1 %v3436_v4  ;;  %vm2511_vm0 = vcmp.lt.s32.totalorder %v2497_v55, 256 }
  0xe0   : > { %2399 = vmatpush1.bf16.msra.mxu0 %v3439_v5  ;;  %2188 = vmatprep.subr.bf16.mxu1 %v3444_v6 }
  0xe1   : > { %2400 = vmatprep.subr.bf16.mxu0 %v3447_v7 }
  0xe3   : > { %2189 = vmatpush1.bf16.msra.mxu1 %v3442_v8 }
  0xe4   : > { %2401 = vmatpush1.bf16.msra.mxu0 %v3445_v9  ;;  %2190 = vmatprep.subr.bf16.mxu1 %v3450_v10 }
  0xe5   : > { %2402 = vmatprep.subr.bf16.mxu0 %v3453_v11 }
  0xe7   : > { %2191 = vmatpush1.bf16.msra.mxu1 %v3448_v12 }
  0xe8   : > { %2403 = vmatpush1.bf16.msra.mxu0 %v3451_v13  ;;  %2192 = vmatprep.subr.bf16.mxu1 %v3456_v14 }
  0xe9   : > { %2404 = vmatprep.subr.bf16.mxu0 %v3459_v15 }
  0xeb   : > { %2193 = vmatpush1.bf16.msra.mxu1 %v3454_v16 }
  0xec   : > { %2405 = vmatpush1.bf16.msra.mxu0 %v3457_v17  ;;  %2194 = vmatprep.subr.bf16.mxu1 %v3462_v18 }
  0xed   : > { %2406 = vmatprep.subr.bf16.mxu0 %v3465_v19 }
  0xef   : > { %2195 = vmatpush1.bf16.msra.mxu1 %v3460_v20 }
  0xf0   : > { %2407 = vmatpush1.bf16.msra.mxu0 %v3463_v21  ;;  %2196 = vmatprep.subr.bf16.mxu1 %v3468_v22 }
  0xf1   : > { %2408 = vmatprep.subr.bf16.mxu0 %v3471_v23 }
  0xf3   : > { %2197 = vmatpush1.bf16.msra.mxu1 %v3466_v24 }
  0xf4   : > { %2409 = vmatpush1.bf16.msra.mxu0 %v3469_v25  ;;  %2198 = vmatprep.subr.bf16.mxu1 %v3474_v26 }
  0xf5   : > { %2410 = vmatprep.subr.bf16.mxu0 %v3477_v27 }
  0xf7   : > { %2199 = vmatpush1.bf16.msra.mxu1 %v3472_v28 }
  0xf8   : > { %2411 = vmatpush1.bf16.msra.mxu0 %v3475_v29  ;;  %2200 = vmatprep.subr.bf16.mxu1 %v3480_v30 }
  0xf9   : > { %2412 = vmatprep.subr.bf16.mxu0 %v3483_v31 }
  0xfb   : > { %2201 = vmatpush1.bf16.msra.mxu1 %v3478_v32 }
  0xfc   : > { %2413 = vmatpush1.bf16.msra.mxu0 %v3481_v33  ;;  %2202 = vmatprep.subr.bf16.mxu1 %v3486_v34 }
  0xfd   : > { %2414 = vmatprep.subr.bf16.mxu0 %v3489_v35 }
  0xff   : > { %2203 = vmatpush1.bf16.msra.mxu1 %v3484_v36 }
 0x100   : > { %2415 = vmatpush1.bf16.msra.mxu0 %v3487_v37  ;;  %2204 = vmatprep.subr.bf16.mxu1 %v3492_v38 }
 0x101   : > { %2416 = vmatprep.subr.bf16.mxu0 %v3495_v39 }
 0x103   : > { %2205 = vmatpush1.bf16.msra.mxu1 %v3490_v40 }
 0x104   : > { %2417 = vmatpush1.bf16.msra.mxu0 %v3493_v41  ;;  %2206 = vmatprep.subr.bf16.mxu1 %v3498_v43 }
 0x105   : > { %2418 = vmatprep.subr.bf16.mxu0 %v3501_v44 }
 0x107   : > { %2207 = vmatpush1.bf16.msra.mxu1 %v3496_v48 }
 0x108   : > { %2419 = vmatpush1.bf16.msra.mxu0 %v3499_v49  ;;  %2208 = vmatprep.subr.bf16.mxu1 %v3504_v50 }
 0x109   : > { %2420 = vmatprep.subr.bf16.mxu0 %v3507_v51 }
 0x10b   : > { %2209 = vmatpush1.bf16.msra.mxu1 %v3502_v52 }
 0x10c   : > { %2421 = vmatpush1.bf16.msra.mxu0 %v3505_v53  ;;  %2210 = vmatprep.subr.bf16.mxu1 %v3510_v42 }
 0x10d   : > { %2422 = vmatprep.subr.bf16.mxu0 %v3513_v45 }
 0x10f   : > { %2211 = vmatpush1.bf16.msra.mxu1 %v3508_v46 }
 0x110   : > { %2423 = vmatpush1.bf16.msra.mxu0 %v3511_v47  ;;  %v3538_v47 = vmov 1966171168  }
 0x111   : > { %v2495_v54 = vunpack.c.l.s4 %v3538_v47 }
 0x112   : > { %2213 = vmatmul.mubr.bf16.vlgmr.msra.gmra.mrb[0].mxu1 %v2754_v62 }
 0x113   : > { %2425 = vmatmul.mubr.bf16.vlgmr.msra.gmra.mrb[0].mxu0 %v2762_v63  ;;  %2222 = vmatprep.mubr.bf16.mxu1 %v2771_v0 }
 0x114   : > { %2434 = vmatprep.mubr.bf16.mxu0 %v2779_v1 }
 0x11a   : > { %2223 = vmatmul.mubr.bf16.gmra.mrb[4].mxu1 %v2770_v2 }
 0x11b   : > { %2435 = vmatmul.mubr.bf16.gmra.mrb[4].mxu0 %v2778_v3 }
 0x1e5   : > { %v2214_v4 = vpop.f32.mrb[0].mxu1 }
 0x1e6   : > { %v2426_v5 = vpop.f32.mrb[0].mxu0  ;;  %v2216_v59 = vpop.f32.mrb[1].mxu1 }
 0x1e7   : > { %v3049_v56 = vadd.f32 %v2426_v5, %v2214_v4  ;;  %v2428_v6 = vpop.f32.mrb[1].mxu0  ;;  %v2218_v60 = vpop.f32.mrb[2].mxu1  ;;  %v2496_v4 = vunpack.c.0.s8 %v2495_v54  ;;  %v2498_v5 = vshrl.u32 %v2497_v55, 7 }
 0x1e8   : > { %v3050_v7 = vadd.f32 %v2428_v6, %v2216_v59  ;;  %v2430_v61 = vpop.f32.mrb[2].mxu0  ;;  %v2220_v9 = vpop.f32.mrb[3].mxu1 }
 0x1e9   : > { %v3051_v8 = vadd.f32 %v2430_v61, %v2218_v60  ;;  %v2432_v10 = vpop.f32.mrb[3].mxu0  ;;  %v2514_v13 = vmul.f32 %v3049_v56, %v3049_v56 }
 0x1ea   : > { %v3045_v11 = vpack.c.bf16 %v3050_v7, %v3049_v56  ;;  %v3052_v12 = vadd.f32 %v2432_v10, %v2220_v9  ;;  %v2515_v16 = vmul.f32 %v3050_v7, %v3050_v7  ;;  %v2499_v10 = vsub.s32 %v2496_v4, %v2498_v5 }
 0x1eb   : > { %v2473_v14 = vadd.f32 %v3051_v8, %v3049_v56  ;;  %v2516_v15 = vmul.f32 %v3051_v8, %v3051_v8 }
 0x1ec   : > { %2469 = vst [vmem:[%s3936_s30] sm:$0xff] %v3045_v11  ;;  %v3046_v17 = vpack.c.bf16 %v3052_v12, %v3051_v8  ;;  %v2482_v18 = vadd.f32 %v3052_v12, %v3050_v7  ;;  %v2517_v19 = vmul.f32 %v3052_v12, %v3052_v12 }
 0x1ed   : > { %v2522_v20 = vadd.f32 %v2516_v15, %v2514_v13  ;;  %v2224_v22 = vpop.f32.mrb[4].mxu1 }
 0x1ee   : > { %2470 = vst [vmem:[%s3936_s30 + $0x8] sm:$0xff] %v3046_v17  ;;  %v2531_v21 = vadd.f32 %v2517_v19, %v2515_v16  ;;  %v2436_v23 = vpop.f32.mrb[4].mxu0  ;;  %v2226_v25 = vpop.f32.mrb[5].mxu1 }
 0x1ef   : > { %v3053_v24 = vadd.f32 %v2436_v23, %v2224_v22  ;;  %v2438_v26 = vpop.f32.mrb[5].mxu0  ;;  %v2228_v28 = vpop.f32.mrb[6].mxu1 }
 0x1f0   : > { %v3054_v27 = vadd.f32 %v2438_v26, %v2226_v25  ;;  %v2440_v29 = vpop.f32.mrb[6].mxu0  ;;  %v2230_v33 = vpop.f32.mrb[7].mxu1 }
 0x1f1   : > { %v2474_v30 = vadd.f32 %v3053_v24, %v2473_v14  ;;  %v2518_v31 = vmul.f32 %v3053_v24, %v3053_v24  ;;  %v3055_v32 = vadd.f32 %v2440_v29, %v2228_v28  ;;  %v2442_v34 = vpop.f32.mrb[7].mxu0 }
 0x1f2   : > { %v3047_v35 = vpack.c.bf16 %v3054_v27, %v3053_v24  ;;  %v2483_v36 = vadd.f32 %v3054_v27, %v2482_v18  ;;  %v2519_v37 = vmul.f32 %v3054_v27, %v3054_v27  ;;  %v3056_v38 = vadd.f32 %v2442_v34, %v2230_v33 }
 0x1f3   : > { %v2523_v39 = vadd.f32 %v2522_v20, %v2518_v31  ;;  %v2475_v40 = vadd.f32 %v3055_v32, %v2474_v30  ;;  %v2520_v41 = vmul.f32 %v3055_v32, %v3055_v32 }
 0x1f4   : > { %2471 = vst [vmem:[%s3936_s30 + $0x10] sm:$0xff] %v3047_v35  ;;  %v2532_v43 = vadd.f32 %v2531_v21, %v2519_v37  ;;  %v3048_v44 = vpack.c.bf16 %v3056_v38, %v3055_v32  ;;  %v2484_v48 = vadd.f32 %v3056_v38, %v2483_v36  ;;  %v2521_v49 = vmul.f32 %v3056_v38, %v3056_v38 }
 0x1f5   : > { %v2476_v50 = vrot.slane %v2475_v40, 4  ;;  %v2524_v51 = vadd.f32 %v2523_v39, %v2520_v41 }
 0x1f6   : > { %2472 = vst [vmem:[%s3936_s30 + $0x18] sm:$0xff] %v3048_v44  ;;  %v2485_v52 = vrot.slane %v2484_v48, 4  ;;  %v2533_v53 = vadd.f32 %v2532_v43, %v2521_v49 }
 0x1f7   : > { %v2477_v42 = vadd.f32 %v2476_v50, %v2475_v40  ;;  %v2525_v45 = vrot.slane %v2524_v51, 4 }
 0x1f8   : > { %v2486_v46 = vadd.f32 %v2485_v52, %v2484_v48  ;;  %v2534_v57 = vrot.slane %v2533_v53, 4 }
 0x1f9   : > { %v2478_v58 = vrot.slane %v2477_v42, 2  ;;  %v2526_v62 = vadd.f32 %v2525_v45, %v2524_v51 }
 0x1fa   : > { %v2487_v63 = vrot.slane %v2486_v46, 2  ;;  %v2535_v0 = vadd.f32 %v2534_v57, %v2533_v53 }
 0x1fb   : > { %v2479_v1 = vadd.f32 %v2478_v58, %v2477_v42  ;;  %v2527_v2 = vrot.slane %v2526_v62, 2 }
 0x1fc   : > { %v2488_v3 = vadd.f32 %v2487_v63, %v2486_v46  ;;  %v2536_v56 = vrot.slane %v2535_v0, 2 }
 0x1fd   : > { %v2480_v59 = vrot.slane %v2479_v1, 1  ;;  %v2528_v6 = vadd.f32 %v2527_v2, %v2526_v62 }
 0x1fe   : > { %v2489_v7 = vrot.slane %v2488_v3, 1  ;;  %v2537_v60 = vadd.f32 %v2536_v56, %v2535_v0 }
 0x1ff   : > { %v2481_v61 = vadd.f32 %v2480_v59, %v2479_v1  ;;  %v2529_v8 = vrot.slane %v2528_v6, 1 }
 0x200   : > { %v2490_v9 = vadd.f32 %v2489_v7, %v2488_v3  ;;  %v2538_v11 = vrot.slane %v2537_v60, 1 }
 0x201   : > { %v2530_v12 = vadd.f32 %v2529_v8, %v2528_v6 }
 0x202   : > { %v2493_v13 = vcombine.low %v2481_v61, %v2490_v9  ;;  %v2539_v14 = vadd.f32 %v2538_v11, %v2537_v60 }
 0x204   : > { %v2500_v15 = vrot.slane %v2493_v13, %v2499_v10  ;;  %v2542_v16 = vcombine.low %v2530_v12, %v2539_v14 }
 0x206   : > { %v2507_v17 = vrot.slane %v2500_v15, %v2499_v10  ;;  %v2549_v18 = vrot.slane %v2542_v16, %v2499_v10 }
 0x208   : > { %2513 = vst.msk [vmem:[%s285_s8] sm:$0x3] %vm2511_vm0, %v2507_v17  ;;  %v2556_v19 = vrot.slane %v2549_v18, %v2499_v10 }
 0x20a   : > { %2558 = vst.msk [vmem:[%s291_s11] sm:$0x3] %vm2511_vm0, %v2556_v19 }
 0x20b PF: > { %s15_s17 = sadd.s32 1, %s3536_s17   ;;  %s3963_s15 = smov %s3532_s16 }
 0x20c   : > { %p12_p5 = scmp.ge.s32.totalorder %s15_s17, 6   ;;  %s3964_s16 = smov %s3966_s18 }
 0x20e   :  { %14 = sbr.rel (!%p12_p5) target bundleno = 2 (0x2), region = 85 }

// kernel: generator_forward.14
= control target key start
LH: loop header
LB: loop body
LE: loop exit
PB: predicated region body
PF: predicated region fallthrough
CT: control target
= control target key end

     0   :  { %s1502_s0 = inlined_call_operand.vmem [shape: bf16[512,128], index: 0, kind: input, shape index: {}]   ;;  %s1503_s1 = inlined_call_operand.vmem [shape: f32[1,128], index: 1, kind: input, shape index: {}]   ;;  %s1504_s2 = inlined_call_operand.vmem [shape: f32[1,128], index: 2, kind: input, shape index: {}]   ;;  %s1505_s3 = inlined_call_operand.vmem [shape: bf16[512,128], index: 3, kind: output, shape index: {}]  }
   0x1   :  { %v803_v0 = vld [vmem:[%s1502_s0] sm:$0xff]   ;;  %v1090_v4 = vld [vmem:[%s1502_s0 + $0x8] sm:$0xff]   ;;  %v1091_v5 = vld [vmem:[%s1502_s0 + $0x10] sm:$0xff]  }
   0x2   :  { %v1178_v1 = vld [vmem:[%s1503_s1] ss:$0 sm:$0xff]  ;;  %v804_v2 = vunpack.c.l.bf16 %v803_v0  ;;  %v805_v3 = vunpack.c.h.bf16 %v803_v0  ;;  %v1092_v6 = vld [vmem:[%s1502_s0 + $0x18] sm:$0xff]   ;;  %v808_v8 = vunpack.c.l.bf16 %v1090_v4  ;;  %v809_v9 = vunpack.c.h.bf16 %v1090_v4  ;;  %v1094_v33 = vld [vmem:[%s1502_s0 + $0x28] sm:$0xff]  }
   0x3   :  { %v1192_v7 = vld [vmem:[%s1504_s2] ss:$0 sm:$0xff]  ;;  %v812_v10 = vunpack.c.l.bf16 %v1091_v5  ;;  %v813_v11 = vunpack.c.h.bf16 %v1091_v5  ;;  %v816_v14 = vunpack.c.l.bf16 %v1092_v6  ;;  %v817_v15 = vunpack.c.h.bf16 %v1092_v6  ;;  %v1095_v38 = vld [vmem:[%s1502_s0 + $0x30] sm:$0xff]   ;;  %v1096_v43 = vld [vmem:[%s1502_s0 + $0x38] sm:$0xff]  }
   0x4   :  { %v149_v12 = vmul.f32 %v804_v2, %v1178_v1  ;;  %v150_v13 = vmul.f32 %v805_v3, %v1178_v1  ;;  %v151_v16 = vmul.f32 %v808_v8, %v1178_v1  ;;  %v152_v17 = vmul.f32 %v809_v9, %v1178_v1  ;;  %v1093_v28 = vld [vmem:[%s1502_s0 + $0x20] sm:$0xff]  }
   0x5   :  { %v153_v18 = vmul.f32 %v812_v10, %v1178_v1  ;;  %v154_v19 = vmul.f32 %v813_v11, %v1178_v1  ;;  %v155_v22 = vmul.f32 %v816_v14, %v1178_v1  ;;  %v156_v23 = vmul.f32 %v817_v15, %v1178_v1  ;;  %v1097_v0 = vld [vmem:[%s1502_s0 + $0x40] sm:$0xff]   ;;  %v1098_v11 = vld [vmem:[%s1502_s0 + $0x48] sm:$0xff]  }
   0x6   :  { %v220_v20 = vadd.f32 %v1192_v7, %v149_v12  ;;  %v221_v21 = vadd.f32 %v1192_v7, %v150_v13  ;;  %v222_v24 = vadd.f32 %v1192_v7, %v151_v16  ;;  %v223_v25 = vadd.f32 %v1192_v7, %v152_v17  ;;  %v1099_v16 = vld [vmem:[%s1502_s0 + $0x50] sm:$0xff]  }
   0x7   :  { %v224_v26 = vadd.f32 %v1192_v7, %v153_v18  ;;  %v225_v27 = vadd.f32 %v1192_v7, %v154_v19  ;;  %v226_v31 = vadd.f32 %v1192_v7, %v155_v22  ;;  %v227_v32 = vadd.f32 %v1192_v7, %v156_v23 }
   0x8   :  { %v284_v29 = vmax.f32 %v220_v20, 0.0  ;;  %v285_v30 = vmax.f32 %v221_v21, 0.0  ;;  %v286_v34 = vmax.f32 %v222_v24, 0.0  ;;  %v287_v35 = vmax.f32 %v223_v25, 0.0  ;;  %v1100_v25 = vld [vmem:[%s1502_s0 + $0x58] sm:$0xff]  }
   0x9   :  { %v288_v36 = vmax.f32 %v224_v26, 0.0  ;;  %v289_v37 = vmax.f32 %v225_v27, 0.0  ;;  %v290_v40 = vmax.f32 %v226_v31, 0.0  ;;  %v291_v41 = vmax.f32 %v227_v32, 0.0 }
   0xa   :  { %v933_v39 = vpack.c.bf16 %v285_v30, %v284_v29  ;;  %v820_v42 = vunpack.c.l.bf16 %v1093_v28  ;;  %v938_v44 = vpack.c.bf16 %v287_v35, %v286_v34  ;;  %v821_v46 = vunpack.c.h.bf16 %v1093_v28 }
   0xb   :  { %v943_v45 = vpack.c.bf16 %v289_v37, %v288_v36  ;;  %v824_v47 = vunpack.c.l.bf16 %v1094_v33  ;;  %v948_v48 = vpack.c.bf16 %v291_v41, %v290_v40  ;;  %v825_v50 = vunpack.c.h.bf16 %v1094_v33 }
   0xc   :  { %934 = vst [vmem:[%s1505_s3] sm:$0xff] %v933_v39   ;;  %v157_v49 = vmul.f32 %v820_v42, %v1178_v1  ;;  %v828_v51 = vunpack.c.l.bf16 %v1095_v38  ;;  %1121 = vst [vmem:[%s1505_s3 + $0x8] sm:$0xff] %v938_v44   ;;  %v158_v52 = vmul.f32 %v821_v46, %v1178_v1  ;;  %v829_v54 = vunpack.c.h.bf16 %v1095_v38  ;;  %v1101_v38 = vld [vmem:[%s1502_s0 + $0x60] sm:$0xff]  }
   0xd   :  { %1122 = vst [vmem:[%s1505_s3 + $0x10] sm:$0xff] %v943_v45   ;;  %v159_v53 = vmul.f32 %v824_v47, %v1178_v1  ;;  %v832_v55 = vunpack.c.l.bf16 %v1096_v43  ;;  %1123 = vst [vmem:[%s1505_s3 + $0x18] sm:$0xff] %v948_v48   ;;  %v160_v57 = vmul.f32 %v825_v50, %v1178_v1  ;;  %v833_v59 = vunpack.c.h.bf16 %v1096_v43 }
   0xe   :  { %v228_v56 = vadd.f32 %v1192_v7, %v157_v49  ;;  %v161_v58 = vmul.f32 %v828_v51, %v1178_v1  ;;  %v229_v60 = vadd.f32 %v1192_v7, %v158_v52  ;;  %v162_v62 = vmul.f32 %v829_v54, %v1178_v1  ;;  %v1102_v51 = vld [vmem:[%s1502_s0 + $0x68] sm:$0xff]  }
   0xf   :  { %v230_v61 = vadd.f32 %v1192_v7, %v159_v53  ;;  %v163_v63 = vmul.f32 %v832_v55, %v1178_v1  ;;  %v231_v3 = vadd.f32 %v1192_v7, %v160_v57  ;;  %v164_v5 = vmul.f32 %v833_v59, %v1178_v1 }
  0x10   :  { %v292_v2 = vmax.f32 %v228_v56, 0.0  ;;  %v232_v4 = vadd.f32 %v1192_v7, %v161_v58  ;;  %v293_v6 = vmax.f32 %v229_v60, 0.0  ;;  %v233_v9 = vadd.f32 %v1192_v7, %v162_v62  ;;  %v1103_v60 = vld [vmem:[%s1502_s0 + $0x70] sm:$0xff]  }
  0x11   :  { %v294_v8 = vmax.f32 %v230_v61, 0.0  ;;  %v234_v10 = vadd.f32 %v1192_v7, %v163_v63  ;;  %v295_v12 = vmax.f32 %v231_v3, 0.0  ;;  %v235_v14 = vadd.f32 %v1192_v7, %v164_v5 }
  0x12   :  { %v296_v13 = vmax.f32 %v232_v4, 0.0  ;;  %v836_v15 = vunpack.c.l.bf16 %v1097_v0  ;;  %v953_v17 = vpack.c.bf16 %v293_v6, %v292_v2  ;;  %v297_v18 = vmax.f32 %v233_v9, 0.0  ;;  %v1104_v2 = vld [vmem:[%s1502_s0 + $0x78] sm:$0xff]  }
  0x13   :  { %v298_v19 = vmax.f32 %v234_v10, 0.0  ;;  %v837_v20 = vunpack.c.h.bf16 %v1097_v0  ;;  %v958_v21 = vpack.c.bf16 %v295_v12, %v294_v8  ;;  %v299_v22 = vmax.f32 %v235_v14, 0.0  ;;  %v1105_v12 = vld [vmem:[%s1502_s0 + $0x80] sm:$0xff]  }
  0x14   :  { %v165_v23 = vmul.f32 %v836_v15, %v1178_v1  ;;  %v840_v24 = vunpack.c.l.bf16 %v1098_v11  ;;  %1124 = vst [vmem:[%s1505_s3 + $0x20] sm:$0xff] %v953_v17   ;;  %v963_v26 = vpack.c.bf16 %v297_v18, %v296_v13  ;;  %v841_v28 = vunpack.c.h.bf16 %v1098_v11 }
  0x15   :  { %v166_v27 = vmul.f32 %v837_v20, %v1178_v1  ;;  %v844_v29 = vunpack.c.l.bf16 %v1099_v16  ;;  %1125 = vst [vmem:[%s1505_s3 + $0x28] sm:$0xff] %v958_v21   ;;  %v968_v30 = vpack.c.bf16 %v299_v22, %v298_v19  ;;  %v845_v33 = vunpack.c.h.bf16 %v1099_v16 }
  0x16   :  { %v236_v31 = vadd.f32 %v1192_v7, %v165_v23  ;;  %v167_v32 = vmul.f32 %v840_v24, %v1178_v1  ;;  %1126 = vst [vmem:[%s1505_s3 + $0x30] sm:$0xff] %v963_v26   ;;  %v168_v35 = vmul.f32 %v841_v28, %v1178_v1  ;;  %v848_v37 = vunpack.c.l.bf16 %v1100_v25 }
  0x17   :  { %v237_v34 = vadd.f32 %v1192_v7, %v166_v27  ;;  %v169_v36 = vmul.f32 %v844_v29, %v1178_v1  ;;  %1127 = vst [vmem:[%s1505_s3 + $0x38] sm:$0xff] %v968_v30   ;;  %v170_v41 = vmul.f32 %v845_v33, %v1178_v1  ;;  %v849_v42 = vunpack.c.h.bf16 %v1100_v25  ;;  %v1106_v29 = vld [vmem:[%s1502_s0 + $0x88] sm:$0xff]  }
  0x18   :  { %v300_v39 = vmax.f32 %v236_v31, 0.0  ;;  %v238_v40 = vadd.f32 %v1192_v7, %v167_v32  ;;  %v239_v44 = vadd.f32 %v1192_v7, %v168_v35  ;;  %v171_v46 = vmul.f32 %v848_v37, %v1178_v1 }
  0x19   :  { %v301_v43 = vmax.f32 %v237_v34, 0.0  ;;  %v240_v45 = vadd.f32 %v1192_v7, %v169_v36  ;;  %v241_v48 = vadd.f32 %v1192_v7, %v170_v41  ;;  %v172_v49 = vmul.f32 %v849_v42, %v1178_v1  ;;  %v1107_v34 = vld [vmem:[%s1502_s0 + $0x90] sm:$0xff]  }
  0x1a   :  { %v302_v47 = vmax.f32 %v238_v40, 0.0  ;;  %v852_v50 = vunpack.c.l.bf16 %v1101_v38  ;;  %v303_v53 = vmax.f32 %v239_v44, 0.0  ;;  %v242_v55 = vadd.f32 %v1192_v7, %v171_v46 }
  0x1b   :  { %v973_v52 = vpack.c.bf16 %v301_v43, %v300_v39  ;;  %v304_v54 = vmax.f32 %v240_v45, 0.0  ;;  %v305_v56 = vmax.f32 %v241_v48, 0.0  ;;  %v243_v57 = vadd.f32 %v1192_v7, %v172_v49  ;;  %v1108_v43 = vld [vmem:[%s1502_s0 + $0x98] sm:$0xff]  }
  0x1c   :  { %v853_v58 = vunpack.c.h.bf16 %v1101_v38  ;;  %v173_v59 = vmul.f32 %v852_v50, %v1178_v1  ;;  %v978_v61 = vpack.c.bf16 %v303_v53, %v302_v47  ;;  %v306_v62 = vmax.f32 %v242_v55, 0.0 }
  0x1d   :  { %1128 = vst [vmem:[%s1505_s3 + $0x40] sm:$0xff] %v973_v52   ;;  %v856_v63 = vunpack.c.l.bf16 %v1102_v51  ;;  %v857_v0 = vunpack.c.h.bf16 %v1102_v51  ;;  %v983_v3 = vpack.c.bf16 %v305_v56, %v304_v54  ;;  %v307_v4 = vmax.f32 %v243_v57, 0.0  ;;  %v1109_v56 = vld [vmem:[%s1502_s0 + $0xa0] sm:$0xff]  }
  0x1e   :  { %v174_v5 = vmul.f32 %v853_v58, %v1178_v1  ;;  %v244_v6 = vadd.f32 %v1192_v7, %v173_v59  ;;  %1129 = vst [vmem:[%s1505_s3 + $0x48] sm:$0xff] %v978_v61   ;;  %v860_v10 = vunpack.c.l.bf16 %v1103_v60  ;;  %v861_v11 = vunpack.c.h.bf16 %v1103_v60 }
  0x1f   :  { %v175_v8 = vmul.f32 %v856_v63, %v1178_v1  ;;  %v176_v9 = vmul.f32 %v857_v0, %v1178_v1  ;;  %1130 = vst [vmem:[%s1505_s3 + $0x50] sm:$0xff] %v983_v3   ;;  %v988_v13 = vpack.c.bf16 %v307_v4, %v306_v62  ;;  %v864_v16 = vunpack.c.l.bf16 %v1104_v2 }
  0x20   :  { %v245_v14 = vadd.f32 %v1192_v7, %v174_v5  ;;  %v308_v15 = vmax.f32 %v244_v6, 0.0  ;;  %v177_v19 = vmul.f32 %v860_v10, %v1178_v1  ;;  %v178_v20 = vmul.f32 %v861_v11, %v1178_v1 }
  0x21   :  { %v246_v17 = vadd.f32 %v1192_v7, %v175_v8  ;;  %v247_v18 = vadd.f32 %v1192_v7, %v176_v9  ;;  %1131 = vst [vmem:[%s1505_s3 + $0x58] sm:$0xff] %v988_v13   ;;  %v865_v22 = vunpack.c.h.bf16 %v1104_v2  ;;  %v179_v23 = vmul.f32 %v864_v16, %v1178_v1  ;;  %v1110_v2 = vld [vmem:[%s1502_s0 + $0xa8] sm:$0xff]   ;;  %v1111_v16 = vld [vmem:[%s1502_s0 + $0xb0] sm:$0xff]  }
  0x22   :  { %v309_v21 = vmax.f32 %v245_v14, 0.0  ;;  %v868_v24 = vunpack.c.l.bf16 %v1105_v12  ;;  %v248_v27 = vadd.f32 %v1192_v7, %v177_v19  ;;  %v249_v28 = vadd.f32 %v1192_v7, %v178_v20 }
  0x23   :  { %v310_v25 = vmax.f32 %v246_v17, 0.0  ;;  %v311_v26 = vmax.f32 %v247_v18, 0.0  ;;  %v180_v31 = vmul.f32 %v865_v22, %v1178_v1  ;;  %v250_v32 = vadd.f32 %v1192_v7, %v179_v23 }
  0x24   :  { %v993_v30 = vpack.c.bf16 %v309_v21, %v308_v15  ;;  %v869_v33 = vunpack.c.h.bf16 %v1105_v12  ;;  %v312_v36 = vmax.f32 %v248_v27, 0.0  ;;  %v313_v37 = vmax.f32 %v249_v28, 0.0  ;;  %v1112_v21 = vld [vmem:[%s1502_s0 + $0xb8] sm:$0xff]  }
  0x25   :  { %v998_v35 = vpack.c.bf16 %v311_v26, %v310_v25  ;;  %v181_v38 = vmul.f32 %v868_v24, %v1178_v1  ;;  %v251_v39 = vadd.f32 %v1192_v7, %v180_v31  ;;  %v314_v40 = vmax.f32 %v250_v32, 0.0 }
  0x26   :  { %1132 = vst [vmem:[%s1505_s3 + $0x60] sm:$0xff] %v993_v30   ;;  %v182_v41 = vmul.f32 %v869_v33, %v1178_v1  ;;  %v872_v42 = vunpack.c.l.bf16 %v1106_v29  ;;  %v1003_v44 = vpack.c.bf16 %v313_v37, %v312_v36  ;;  %v873_v46 = vunpack.c.h.bf16 %v1106_v29 }
  0x27   :  { %1133 = vst [vmem:[%s1505_s3 + $0x68] sm:$0xff] %v998_v35   ;;  %v252_v45 = vadd.f32 %v1192_v7, %v181_v38  ;;  %v876_v47 = vunpack.c.l.bf16 %v1107_v34  ;;  %v315_v48 = vmax.f32 %v251_v39, 0.0  ;;  %v877_v51 = vunpack.c.h.bf16 %v1107_v34  ;;  %v1113_v34 = vld [vmem:[%s1502_s0 + $0xc0] sm:$0xff]  }
  0x28   :  { %v253_v49 = vadd.f32 %v1192_v7, %v182_v41  ;;  %v183_v50 = vmul.f32 %v872_v42, %v1178_v1  ;;  %1134 = vst [vmem:[%s1505_s3 + $0x70] sm:$0xff] %v1003_v44   ;;  %v184_v53 = vmul.f32 %v873_v46, %v1178_v1  ;;  %v880_v55 = vunpack.c.l.bf16 %v1108_v43 }
  0x29   :  { %v316_v52 = vmax.f32 %v252_v45, 0.0  ;;  %v185_v54 = vmul.f32 %v876_v47, %v1178_v1  ;;  %v1008_v57 = vpack.c.bf16 %v315_v48, %v314_v40  ;;  %v186_v60 = vmul.f32 %v877_v51, %v1178_v1  ;;  %v1114_v47 = vld [vmem:[%s1502_s0 + $0xc8] sm:$0xff]  }
  0x2a   :  { %v317_v58 = vmax.f32 %v253_v49, 0.0  ;;  %v254_v59 = vadd.f32 %v1192_v7, %v183_v50  ;;  %v255_v61 = vadd.f32 %v1192_v7, %v184_v53  ;;  %v881_v63 = vunpack.c.h.bf16 %v1108_v43 }
  0x2b   :  { %v256_v62 = vadd.f32 %v1192_v7, %v185_v54  ;;  %v187_v0 = vmul.f32 %v880_v55, %v1178_v1  ;;  %1135 = vst [vmem:[%s1505_s3 + $0x78] sm:$0xff] %v1008_v57   ;;  %v257_v5 = vadd.f32 %v1192_v7, %v186_v60  ;;  %v884_v6 = vunpack.c.l.bf16 %v1109_v56 }
  0x2c   :  { %v1013_v3 = vpack.c.bf16 %v317_v58, %v316_v52  ;;  %v318_v4 = vmax.f32 %v254_v59, 0.0  ;;  %v319_v8 = vmax.f32 %v255_v61, 0.0  ;;  %v188_v10 = vmul.f32 %v881_v63, %v1178_v1  ;;  %v1115_v52 = vld [vmem:[%s1502_s0 + $0xd0] sm:$0xff]   ;;  %v1116_v61 = vld [vmem:[%s1502_s0 + $0xd8] sm:$0xff]  }
  0x2d   :  { %v320_v9 = vmax.f32 %v256_v62, 0.0  ;;  %v258_v11 = vadd.f32 %v1192_v7, %v187_v0  ;;  %v321_v12 = vmax.f32 %v257_v5, 0.0  ;;  %v885_v13 = vunpack.c.h.bf16 %v1109_v56 }
  0x2e   :  { %1136 = vst [vmem:[%s1505_s3 + $0x80] sm:$0xff] %v1013_v3   ;;  %v189_v14 = vmul.f32 %v884_v6, %v1178_v1  ;;  %v888_v15 = vunpack.c.l.bf16 %v1110_v2  ;;  %v1018_v17 = vpack.c.bf16 %v319_v8, %v318_v4  ;;  %v259_v18 = vadd.f32 %v1192_v7, %v188_v10 }
  0x2f   :  { %v322_v19 = vmax.f32 %v258_v11, 0.0  ;;  %v889_v20 = vunpack.c.h.bf16 %v1110_v2  ;;  %v1023_v22 = vpack.c.bf16 %v321_v12, %v320_v9  ;;  %v190_v23 = vmul.f32 %v885_v13, %v1178_v1  ;;  %v1117_v12 = vld [vmem:[%s1502_s0 + $0xe0] sm:$0xff]  }
  0x30   :  { %v260_v24 = vadd.f32 %v1192_v7, %v189_v14  ;;  %v191_v25 = vmul.f32 %v888_v15, %v1178_v1  ;;  %1137 = vst [vmem:[%s1505_s3 + $0x88] sm:$0xff] %v1018_v17   ;;  %v323_v26 = vmax.f32 %v259_v18, 0.0  ;;  %v892_v28 = vunpack.c.l.bf16 %v1111_v16 }
  0x31   :  { %v192_v27 = vmul.f32 %v889_v20, %v1178_v1  ;;  %v893_v29 = vunpack.c.h.bf16 %v1111_v16  ;;  %1138 = vst [vmem:[%s1505_s3 + $0x90] sm:$0xff] %v1023_v22   ;;  %v261_v30 = vadd.f32 %v1192_v7, %v190_v23  ;;  %v896_v33 = vunpack.c.l.bf16 %v1112_v21 }
  0x32   :  { %v324_v31 = vmax.f32 %v260_v24, 0.0  ;;  %v262_v32 = vadd.f32 %v1192_v7, %v191_v25  ;;  %v1028_v35 = vpack.c.bf16 %v323_v26, %v322_v19  ;;  %v193_v37 = vmul.f32 %v892_v28, %v1178_v1 }
  0x33   :  { %v263_v36 = vadd.f32 %v1192_v7, %v192_v27  ;;  %v194_v38 = vmul.f32 %v893_v29, %v1178_v1  ;;  %v325_v39 = vmax.f32 %v261_v30, 0.0  ;;  %v897_v41 = vunpack.c.h.bf16 %v1112_v21  ;;  %v1118_v21 = vld [vmem:[%s1502_s0 + $0xe8] sm:$0xff]  }
  0x34   :  { %v326_v40 = vmax.f32 %v262_v32, 0.0  ;;  %v195_v42 = vmul.f32 %v896_v33, %v1178_v1  ;;  %1139 = vst [vmem:[%s1505_s3 + $0x98] sm:$0xff] %v1028_v35   ;;  %v264_v44 = vadd.f32 %v1192_v7, %v193_v37  ;;  %v900_v46 = vunpack.c.l.bf16 %v1113_v34 }
  0x35   :  { %v327_v43 = vmax.f32 %v263_v36, 0.0  ;;  %v265_v45 = vadd.f32 %v1192_v7, %v194_v38  ;;  %v1033_v48 = vpack.c.bf16 %v325_v39, %v324_v31  ;;  %v196_v49 = vmul.f32 %v897_v41, %v1178_v1  ;;  %v1120_v39 = vld [vmem:[%s1502_s0 + $0xf8] sm:$0xff]  }
  0x36   :  { %v266_v50 = vadd.f32 %v1192_v7, %v195_v42  ;;  %v901_v51 = vunpack.c.h.bf16 %v1113_v34  ;;  %v328_v54 = vmax.f32 %v264_v44, 0.0  ;;  %v197_v56 = vmul.f32 %v900_v46, %v1178_v1  ;;  %v1119_v34 = vld [vmem:[%s1502_s0 + $0xf0] sm:$0xff]  }
  0x37   :  { %v1038_v53 = vpack.c.bf16 %v327_v43, %v326_v40  ;;  %v329_v55 = vmax.f32 %v265_v45, 0.0  ;;  %1140 = vst [vmem:[%s1505_s3 + $0xa0] sm:$0xff] %v1033_v48   ;;  %v267_v57 = vadd.f32 %v1192_v7, %v196_v49  ;;  %v904_v60 = vunpack.c.l.bf16 %v1114_v47 }
  0x38   :  { %v330_v58 = vmax.f32 %v266_v50, 0.0  ;;  %v198_v59 = vmul.f32 %v901_v51, %v1178_v1  ;;  %v268_v63 = vadd.f32 %v1192_v7, %v197_v56  ;;  %v905_v0 = vunpack.c.h.bf16 %v1114_v47 }
  0x39   :  { %1141 = vst [vmem:[%s1505_s3 + $0xa8] sm:$0xff] %v1038_v53   ;;  %v1043_v62 = vpack.c.bf16 %v329_v55, %v328_v54  ;;  %v908_v2 = vunpack.c.l.bf16 %v1115_v52  ;;  %v331_v3 = vmax.f32 %v267_v57, 0.0  ;;  %v199_v5 = vmul.f32 %v904_v60, %v1178_v1 }
  0x3a   :  { %v269_v4 = vadd.f32 %v1192_v7, %v198_v59  ;;  %v909_v6 = vunpack.c.h.bf16 %v1115_v52  ;;  %v332_v8 = vmax.f32 %v268_v63, 0.0  ;;  %v200_v9 = vmul.f32 %v905_v0, %v1178_v1 }
  0x3b   :  { %1142 = vst [vmem:[%s1505_s3 + $0xb0] sm:$0xff] %v1043_v62   ;;  %v201_v10 = vmul.f32 %v908_v2, %v1178_v1  ;;  %v912_v11 = vunpack.c.l.bf16 %v1116_v61  ;;  %v1048_v13 = vpack.c.bf16 %v331_v3, %v330_v58  ;;  %v270_v15 = vadd.f32 %v1192_v7, %v199_v5 }
  0x3c   :  { %v333_v14 = vmax.f32 %v269_v4, 0.0  ;;  %v202_v16 = vmul.f32 %v909_v6, %v1178_v1  ;;  %v271_v17 = vadd.f32 %v1192_v7, %v200_v9  ;;  %v913_v19 = vunpack.c.h.bf16 %v1116_v61 }
  0x3d   :  { %v272_v18 = vadd.f32 %v1192_v7, %v201_v10  ;;  %v203_v20 = vmul.f32 %v912_v11, %v1178_v1  ;;  %1143 = vst [vmem:[%s1505_s3 + $0xb8] sm:$0xff] %v1048_v13   ;;  %v334_v23 = vmax.f32 %v270_v15, 0.0  ;;  %v916_v25 = vunpack.c.l.bf16 %v1117_v12 }
  0x3e   :  { %v1053_v22 = vpack.c.bf16 %v333_v14, %v332_v8  ;;  %v273_v24 = vadd.f32 %v1192_v7, %v202_v16  ;;  %v335_v26 = vmax.f32 %v271_v17, 0.0  ;;  %v204_v28 = vmul.f32 %v913_v19, %v1178_v1 }
  0x3f   :  { %v336_v27 = vmax.f32 %v272_v18, 0.0  ;;  %v274_v29 = vadd.f32 %v1192_v7, %v203_v20  ;;  %v917_v31 = vunpack.c.h.bf16 %v1117_v12  ;;  %v205_v32 = vmul.f32 %v916_v25, %v1178_v1 }
  0x40   :  { %1144 = vst [vmem:[%s1505_s3 + $0xc0] sm:$0xff] %v1053_v22   ;;  %v337_v30 = vmax.f32 %v273_v24, 0.0  ;;  %v920_v33 = vunpack.c.l.bf16 %v1118_v21  ;;  %v1058_v35 = vpack.c.bf16 %v335_v26, %v334_v23  ;;  %v275_v36 = vadd.f32 %v1192_v7, %v204_v28 }
  0x41   :  { %v338_v37 = vmax.f32 %v274_v29, 0.0  ;;  %v921_v38 = vunpack.c.h.bf16 %v1118_v21  ;;  %v206_v41 = vmul.f32 %v917_v31, %v1178_v1  ;;  %v276_v42 = vadd.f32 %v1192_v7, %v205_v32 }
  0x42   :  { %v1063_v40 = vpack.c.bf16 %v337_v30, %v336_v27  ;;  %v207_v43 = vmul.f32 %v920_v33, %v1178_v1  ;;  %1145 = vst [vmem:[%s1505_s3 + $0xc8] sm:$0xff] %v1058_v35   ;;  %v339_v44 = vmax.f32 %v275_v36, 0.0  ;;  %v924_v46 = vunpack.c.l.bf16 %v1119_v34 }
  0x43   :  { %v208_v45 = vmul.f32 %v921_v38, %v1178_v1  ;;  %v925_v47 = vunpack.c.h.bf16 %v1119_v34  ;;  %v277_v48 = vadd.f32 %v1192_v7, %v206_v41  ;;  %v340_v49 = vmax.f32 %v276_v42, 0.0 }
  0x44   :  { %1146 = vst [vmem:[%s1505_s3 + $0xd0] sm:$0xff] %v1063_v40   ;;  %v278_v50 = vadd.f32 %v1192_v7, %v207_v43  ;;  %v928_v51 = vunpack.c.l.bf16 %v1120_v39  ;;  %v1068_v52 = vpack.c.bf16 %v339_v44, %v338_v37  ;;  %v209_v54 = vmul.f32 %v924_v46, %v1178_v1 }
  0x45   :  { %v279_v53 = vadd.f32 %v1192_v7, %v208_v45  ;;  %v210_v55 = vmul.f32 %v925_v47, %v1178_v1  ;;  %v341_v56 = vmax.f32 %v277_v48, 0.0  ;;  %v929_v58 = vunpack.c.h.bf16 %v1120_v39 }
  0x46   :  { %v342_v57 = vmax.f32 %v278_v50, 0.0  ;;  %v211_v59 = vmul.f32 %v928_v51, %v1178_v1  ;;  %1147 = vst [vmem:[%s1505_s3 + $0xd8] sm:$0xff] %v1068_v52   ;;  %v280_v61 = vadd.f32 %v1192_v7, %v209_v54 }
  0x47   :  { %v343_v60 = vmax.f32 %v279_v53, 0.0  ;;  %v281_v62 = vadd.f32 %v1192_v7, %v210_v55  ;;  %v1073_v63 = vpack.c.bf16 %v341_v56, %v340_v49  ;;  %v212_v0 = vmul.f32 %v929_v58, %v1178_v1 }
  0x48   :  { %v282_v2 = vadd.f32 %v1192_v7, %v211_v59  ;;  %v344_v4 = vmax.f32 %v280_v61, 0.0 }
  0x49   :  { %v1078_v3 = vpack.c.bf16 %v343_v60, %v342_v57  ;;  %v345_v5 = vmax.f32 %v281_v62, 0.0  ;;  %1148 = vst [vmem:[%s1505_s3 + $0xe0] sm:$0xff] %v1073_v63   ;;  %v283_v6 = vadd.f32 %v1192_v7, %v212_v0 }
  0x4a   :  { %v346_v8 = vmax.f32 %v282_v2, 0.0 }
  0x4b   :  { %1149 = vst [vmem:[%s1505_s3 + $0xe8] sm:$0xff] %v1078_v3   ;;  %v1083_v9 = vpack.c.bf16 %v345_v5, %v344_v4  ;;  %v347_v10 = vmax.f32 %v283_v6, 0.0 }
  0x4d   :  { %1150 = vst [vmem:[%s1505_s3 + $0xf0] sm:$0xff] %v1083_v9   ;;  %v1088_v1 = vpack.c.bf16 %v347_v10, %v346_v8 }
  0x4f   :  { %1151 = vst [vmem:[%s1505_s3 + $0xf8] sm:$0xff] %v1088_v1  }

// kernel: generator_forward.13
= control target key start
LH: loop header
LB: loop body
LE: loop exit
PB: predicated region body
PF: predicated region fallthrough
CT: control target
= control target key end

     0   :  { %s2486_s15 = smov 0   ;;  %s2488_s16 = smov 0   ;;  %s2728_s0 = inlined_call_operand.vmem [shape: bf16[4,128,1024], index: 0, kind: input, shape index: {}]   ;;  %s2729_s1 = inlined_call_operand.vmem [shape: bf16[4,1024,128], index: 1, kind: input, shape index: {}]   ;;  %s2730_s2 = inlined_call_operand.vmem [shape: bf16[4,128,128], index: 2, kind: output, shape index: {0}]   ;;  %s2731_s3 = inlined_call_operand.vmem [shape: f32[4,1,128], index: 3, kind: output, shape index: {1}]   ;;  %s2732_s4 = inlined_call_operand.vmem [shape: f32[4,1,128], index: 4, kind: output, shape index: {2}]  }
   0x1   :  { %s2490_s17 = smov 0  }
   0x2 LB: > { %s27_s18 = sadd.s32 1, %s2455_s16  ;;  %p1874_p0 = scmp.ge.s32.totalorder %s2459_s17, 1  ;;  %s2459_s17 = sphi %s2490_s17, %s15_s17   ;;  %s2455_s16 = sphi %s2488_s16, %s2734_s16   ;;  %s2451_s15 = sphi %s2486_s15, %s2733_s15  }
   0x3   : > { %p29_p1 = scmp.ge.s32.totalorder %s27_s18, 4  ;;  %p203_p2 = scmp.lt.s32.totalorder %s2459_s17, 5 }
   0x5   : > { %s2736_s18 = smov (%p29_p1, %s27_s18), 0  ;;  %p204_p3 = pnand %p1874_p0, %p203_p2 }
   0x6   : > { %p252_p4 = scmp.lt.s32.totalorder (!%p204_p3), %s2451_s15, 3 }
   0x7   : > { %207 = sbr.rel (%p204_p3) target bundleno = 409 (0x199), region = 28 }
   0xe   : > { %s2738_s15 = smov (!%p252_p4, %s2451_s15), 3 }
   0xf   : > { %s2027_s19 = sshll.u32 %s2738_s15, 9  ;;  %s2029_s26 = sshll.u32 %s2738_s15, 6 }
  0x10   : > { %s2512_s22 = scalar_lea.vmem %s2729_s1, %s2027_s19  ;;  %s2549_s25 = scalar_lea.vmem %s2728_s0, %s2027_s19 }
  0x11   : > { %v2373_v0 = vld [vmem:[%s2512_s22 + $0x40] sm:$0xff]   ;;  %v2377_v4 = vld [vmem:[%s2512_s22 + $0x48] sm:$0xff]   ;;  %v2381_v8 = vld [vmem:[%s2512_s22 + $0x50] sm:$0xff]   ;;  %s2687_s29 = scalar_lea.vmem %s2730_s2, %s2029_s26  ;;  %s280_s6 = scalar_lea.vmem %s2731_s3, %s2738_s15 }
  0x12   : > { %v2374_v1 = vld [vmem:[%s2512_s22 + $0xc0] sm:$0xff]   ;;  %2093 = vmatprep.subr.bf16.mxu0 %v2373_v0  ;;  %v2378_v5 = vld [vmem:[%s2512_s22 + $0xc8] sm:$0xff]   ;;  %v2382_v9 = vld [vmem:[%s2512_s22 + $0xd0] sm:$0xff]   ;;  %s285_s9 = scalar_lea.vmem %s2732_s4, %s2738_s15 }
  0x13   : > { %v2375_v2 = vld [vmem:[%s2512_s22] sm:$0xff]   ;;  %2157 = vmatprep.subr.bf16.mxu1 %v2374_v1  ;;  %v2379_v6 = vld [vmem:[%s2512_s22 + $0x8] sm:$0xff]   ;;  %v2383_v10 = vld [vmem:[%s2512_s22 + $0x10] sm:$0xff]  }
  0x14   : > { %v2376_v3 = vld [vmem:[%s2512_s22 + $0x80] sm:$0xff]   ;;  %2094 = vmatpush3.bf16.msra.mxu0 %v2375_v2  ;;  %v2380_v7 = vld [vmem:[%s2512_s22 + $0x88] sm:$0xff]   ;;  %v2384_v11 = vld [vmem:[%s2512_s22 + $0x90] sm:$0xff]  }
  0x15   : > { %2158 = vmatpush3.bf16.msra.mxu1 %v2376_v3  ;;  %2095 = vmatprep.subr.bf16.mxu0 %v2377_v4  ;;  %v2385_v12 = vld [vmem:[%s2512_s22 + $0x58] sm:$0xff]   ;;  %v2389_v16 = vld [vmem:[%s2512_s22 + $0x60] sm:$0xff]   ;;  %v2393_v20 = vld [vmem:[%s2512_s22 + $0x68] sm:$0xff]  }
  0x16   : > { %2159 = vmatprep.subr.bf16.mxu1 %v2378_v5  ;;  %v2386_v13 = vld [vmem:[%s2512_s22 + $0xd8] sm:$0xff]   ;;  %v2390_v17 = vld [vmem:[%s2512_s22 + $0xe0] sm:$0xff]   ;;  %v2394_v21 = vld [vmem:[%s2512_s22 + $0xe8] sm:$0xff]  }
  0x17   : > { %v2387_v14 = vld [vmem:[%s2512_s22 + $0x18] sm:$0xff]   ;;  %v2391_v18 = vld [vmem:[%s2512_s22 + $0x20] sm:$0xff]   ;;  %v2395_v22 = vld [vmem:[%s2512_s22 + $0x28] sm:$0xff]  }
  0x18   : > { %2096 = vmatpush3.bf16.msra.mxu0 %v2379_v6  ;;  %v2388_v15 = vld [vmem:[%s2512_s22 + $0x98] sm:$0xff]   ;;  %v2392_v19 = vld [vmem:[%s2512_s22 + $0xa0] sm:$0xff]   ;;  %v2396_v23 = vld [vmem:[%s2512_s22 + $0xa8] sm:$0xff]  }
  0x19   : > { %2160 = vmatpush3.bf16.msra.mxu1 %v2380_v7  ;;  %2097 = vmatprep.subr.bf16.mxu0 %v2381_v8  ;;  %v2397_v24 = vld [vmem:[%s2512_s22 + $0x70] sm:$0xff]   ;;  %v2401_v28 = vld [vmem:[%s2512_s22 + $0x78] sm:$0xff]   ;;  %v288_v32 = vld [vmem:[%s2549_s25] sm:$0xff] }
  0x1a   : > { %2161 = vmatprep.subr.bf16.mxu1 %v2382_v9  ;;  %v2398_v25 = vld [vmem:[%s2512_s22 + $0xf0] sm:$0xff]   ;;  %v2402_v29 = vld [vmem:[%s2512_s22 + $0xf8] sm:$0xff]   ;;  %v292_v33 = vld [vmem:[%s2549_s25 + $0x20] sm:$0xff] }
  0x1b   : > { %v2399_v26 = vld [vmem:[%s2512_s22 + $0x30] sm:$0xff]   ;;  %v2403_v30 = vld [vmem:[%s2512_s22 + $0x38] sm:$0xff]   ;;  %v289_v34 = vld [vmem:[%s2549_s25 + $0x8] sm:$0xff]  ;;  %v1881_v35 = vcombine.low %v288_v32, %v292_v33  ;;  %v1882_v36 = vcombine.high %v288_v32, %v292_v33 }
  0x1c   : > { %2098 = vmatpush3.bf16.msra.mxu0 %v2383_v10  ;;  %v2400_v27 = vld [vmem:[%s2512_s22 + $0xb0] sm:$0xff]   ;;  %v2404_v31 = vld [vmem:[%s2512_s22 + $0xb8] sm:$0xff]   ;;  %v293_v37 = vld [vmem:[%s2549_s25 + $0x28] sm:$0xff] }
  0x1d   : > { %2162 = vmatpush3.bf16.msra.mxu1 %v2384_v11  ;;  %2099 = vmatprep.subr.bf16.mxu0 %v2385_v12  ;;  %v1883_v38 = vcombine.low %v289_v34, %v293_v37  ;;  %v1884_v39 = vcombine.high %v289_v34, %v293_v37  ;;  %v2405_v40 = vld [vmem:[%s2512_s22 + $0x140] sm:$0xff]   ;;  %v297_v47 = vld [vmem:[%s2549_s25 + $0x48] sm:$0xff]  ;;  %v2413_v62 = vld [vmem:[%s2512_s22 + $0x150] sm:$0xff]  }
  0x1e   : > { %2163 = vmatprep.subr.bf16.mxu1 %v2386_v13  ;;  %1216 = vmatprep.mubr.bf16.mxu0 %v1882_v36  ;;  %v2406_v41 = vld [vmem:[%s2512_s22 + $0x100] sm:$0xff]   ;;  %v301_v48 = vld [vmem:[%s2549_s25 + $0x68] sm:$0xff]  ;;  %v2414_v63 = vld [vmem:[%s2512_s22 + $0x110] sm:$0xff]  }
  0x1f   : > { %1313 = vmatprep.mubr.bf16.mxu1 %v1884_v39  ;;  %v2407_v42 = vld [vmem:[%s2512_s22 + $0x1c0] sm:$0xff]   ;;  %v1892_v49 = vcombine.high %v297_v47, %v301_v48  ;;  %v2409_v50 = vld [vmem:[%s2512_s22 + $0x148] sm:$0xff]   ;;  %v1891_v53 = vcombine.low %v297_v47, %v301_v48  ;;  %v2415_v0 = vld [vmem:[%s2512_s22 + $0x1d0] sm:$0xff]  }
  0x20   : > { %2100 = vmatpush3.bf16.msra.mxu0 %v2387_v14  ;;  %v2408_v43 = vld [vmem:[%s2512_s22 + $0x180] sm:$0xff]   ;;  %v2410_v52 = vld [vmem:[%s2512_s22 + $0x108] sm:$0xff]   ;;  %v2416_v1 = vld [vmem:[%s2512_s22 + $0x190] sm:$0xff]  }
  0x21   : > { %2164 = vmatpush3.bf16.msra.mxu1 %v2388_v15  ;;  %2101 = vmatprep.subr.bf16.mxu0 %v2389_v16  ;;  %v296_v44 = vld [vmem:[%s2549_s25 + $0x40] sm:$0xff]  ;;  %v2411_v54 = vld [vmem:[%s2512_s22 + $0x1c8] sm:$0xff]   ;;  %v2417_v10 = vld [vmem:[%s2512_s22 + $0x158] sm:$0xff]  }
  0x22   : > { %2165 = vmatprep.subr.bf16.mxu1 %v2390_v17  ;;  %v300_v45 = vld [vmem:[%s2549_s25 + $0x60] sm:$0xff]  ;;  %v2412_v55 = vld [vmem:[%s2512_s22 + $0x188] sm:$0xff]   ;;  %v2418_v11 = vld [vmem:[%s2512_s22 + $0x118] sm:$0xff]  }
  0x23   : > { %v1890_v46 = vcombine.high %v296_v44, %v300_v45  ;;  %v1889_v51 = vcombine.low %v296_v44, %v300_v45  ;;  %v304_v56 = vld [vmem:[%s2549_s25 + $0x80] sm:$0xff]  ;;  %v305_v58 = vld [vmem:[%s2549_s25 + $0x88] sm:$0xff]  ;;  %v2419_v12 = vld [vmem:[%s2512_s22 + $0x1d8] sm:$0xff]  }
  0x24   : > { %2102 = vmatpush3.bf16.msra.mxu0 %v2391_v18  ;;  %v308_v57 = vld [vmem:[%s2549_s25 + $0xa0] sm:$0xff]  ;;  %v309_v59 = vld [vmem:[%s2549_s25 + $0xa8] sm:$0xff]  ;;  %v2420_v13 = vld [vmem:[%s2512_s22 + $0x198] sm:$0xff]  }
  0x25   : > { %2166 = vmatpush3.bf16.msra.mxu1 %v2392_v19  ;;  %2103 = vmatprep.subr.bf16.mxu0 %v2393_v20  ;;  %v1898_v60 = vcombine.high %v304_v56, %v308_v57  ;;  %v1900_v61 = vcombine.high %v305_v58, %v309_v59  ;;  %v1897_v2 = vcombine.low %v304_v56, %v308_v57  ;;  %v312_v3 = vld [vmem:[%s2549_s25 + $0xc0] sm:$0xff]  ;;  %v313_v5 = vld [vmem:[%s2549_s25 + $0xc8] sm:$0xff]  ;;  %v2430_v39 = vld [vmem:[%s2512_s22 + $0x130] sm:$0xff]  }
  0x26   : > { %2167 = vmatprep.subr.bf16.mxu1 %v2394_v21  ;;  %v316_v4 = vld [vmem:[%s2549_s25 + $0xe0] sm:$0xff]  ;;  %v1899_v6 = vcombine.low %v305_v58, %v309_v59  ;;  %v317_v8 = vld [vmem:[%s2549_s25 + $0xe8] sm:$0xff]  ;;  %v2434_v48 = vld [vmem:[%s2512_s22 + $0x138] sm:$0xff]  }
  0x27   : > { %v1906_v7 = vcombine.high %v312_v3, %v316_v4  ;;  %v1908_v9 = vcombine.high %v313_v5, %v317_v8  ;;  %v320_v14 = vld [vmem:[%s2549_s25 + $0x100] sm:$0xff]  ;;  %v321_v16 = vld [vmem:[%s2549_s25 + $0x108] sm:$0xff]  ;;  %v1905_v19 = vcombine.low %v312_v3, %v316_v4  ;;  %v1907_v21 = vcombine.low %v313_v5, %v317_v8  ;;  %v299_v8 = vld [vmem:[%s2549_s25 + $0x58] sm:$0xff] }
  0x28   : > { %2104 = vmatpush3.bf16.msra.mxu0 %v2395_v22  ;;  %v324_v15 = vld [vmem:[%s2549_s25 + $0x120] sm:$0xff]  ;;  %v325_v17 = vld [vmem:[%s2549_s25 + $0x128] sm:$0xff] }
  0x29   : > { %2168 = vmatpush3.bf16.msra.mxu1 %v2396_v23  ;;  %2105 = vmatprep.subr.bf16.mxu0 %v2397_v24  ;;  %v2421_v18 = vld [vmem:[%s2512_s22 + $0x160] sm:$0xff]   ;;  %v1914_v22 = vcombine.high %v320_v14, %v324_v15  ;;  %v1916_v24 = vcombine.high %v321_v16, %v325_v17  ;;  %v2427_v32 = vld [vmem:[%s2512_s22 + $0x1e8] sm:$0xff]   ;;  %v1913_v34 = vcombine.low %v320_v14, %v324_v15  ;;  %v306_v14 = vld [vmem:[%s2549_s25 + $0x90] sm:$0xff] }
  0x2a   : > { %2169 = vmatprep.subr.bf16.mxu1 %v2398_v25  ;;  %v2422_v20 = vld [vmem:[%s2512_s22 + $0x120] sm:$0xff]   ;;  %v2428_v33 = vld [vmem:[%s2512_s22 + $0x1a8] sm:$0xff]   ;;  %v310_v15 = vld [vmem:[%s2549_s25 + $0xb0] sm:$0xff] }
  0x2b   : > { %v2423_v23 = vld [vmem:[%s2512_s22 + $0x1e0] sm:$0xff]   ;;  %v337_v44 = vld [vmem:[%s2549_s25 + $0x188] sm:$0xff] }
  0x2c   : > { %2106 = vmatpush3.bf16.msra.mxu0 %v2399_v26  ;;  %v2424_v25 = vld [vmem:[%s2512_s22 + $0x1a0] sm:$0xff]   ;;  %v341_v45 = vld [vmem:[%s2549_s25 + $0x1a8] sm:$0xff] }
  0x2d   : > { %2170 = vmatpush3.bf16.msra.mxu1 %v2400_v27  ;;  %2107 = vmatprep.subr.bf16.mxu0 %v2401_v28  ;;  %v328_v26 = vld [vmem:[%s2549_s25 + $0x140] sm:$0xff]  ;;  %v2425_v28 = vld [vmem:[%s2512_s22 + $0x168] sm:$0xff]   ;;  %v1931_v59 = vcombine.low %v337_v44, %v341_v45 }
  0x2e   : > { %2171 = vmatprep.subr.bf16.mxu1 %v2402_v29  ;;  %v332_v27 = vld [vmem:[%s2549_s25 + $0x160] sm:$0xff]  ;;  %v329_v29 = vld [vmem:[%s2549_s25 + $0x148] sm:$0xff] }
  0x2f   : > { %v1922_v36 = vcombine.high %v328_v26, %v332_v27  ;;  %v1921_v47 = vcombine.low %v328_v26, %v332_v27  ;;  %v345_v56 = vld [vmem:[%s2549_s25 + $0x1c8] sm:$0xff]  ;;  %v1901_v26 = vcombine.low %v306_v14, %v310_v15 }
  0x30   : > { %2108 = vmatpush3.bf16.msra.mxu0 %v2403_v30  ;;  %v333_v30 = vld [vmem:[%s2549_s25 + $0x168] sm:$0xff] }
  0x31   : > { %2172 = vmatpush3.bf16.msra.mxu1 %v2404_v31  ;;  %2221 = vmatprep.subr.bf16.mxu0 %v2405_v40  ;;  %v2426_v31 = vld [vmem:[%s2512_s22 + $0x128] sm:$0xff]   ;;  %v1924_v37 = vcombine.high %v329_v29, %v333_v30  ;;  %v2431_v40 = vld [vmem:[%s2512_s22 + $0x1f0] sm:$0xff]  }
  0x32   : > { %2285 = vmatprep.subr.bf16.mxu1 %v2407_v42  ;;  %v340_v42 = vld [vmem:[%s2549_s25 + $0x1a0] sm:$0xff]  ;;  %v349_v57 = vld [vmem:[%s2549_s25 + $0x1e8] sm:$0xff] }
  0x33   : > { %1217 = vmatmul.mubr.bf16.vlgmr.msra.gmra.mrb[0].mxu0 %v1881_v35  ;;  %v1915_v35 = vcombine.low %v321_v16, %v325_v17  ;;  %v1939_v3 = vcombine.low %v345_v56, %v349_v57  ;;  %v307_v16 = vld [vmem:[%s2549_s25 + $0x98] sm:$0xff] }
  0x34   : > { %1314 = vmatmul.mubr.bf16.vlgmr.msra.gmra.mrb[0].mxu1 %v1883_v38  ;;  %2222 = vmatpush3.bf16.msra.mxu0 %v2406_v41  ;;  %v2429_v38 = vld [vmem:[%s2512_s22 + $0x170] sm:$0xff]   ;;  %v336_v41 = vld [vmem:[%s2549_s25 + $0x180] sm:$0xff]  ;;  %v311_v17 = vld [vmem:[%s2549_s25 + $0xb8] sm:$0xff] }
  0x35   : > { %2286 = vmatpush3.bf16.msra.mxu1 %v2408_v43  ;;  %1224 = vmatprep.mubr.bf16.mxu0 %v1890_v46  ;;  %v2432_v43 = vld [vmem:[%s2512_s22 + $0x1b0] sm:$0xff]   ;;  %v2433_v46 = vld [vmem:[%s2512_s22 + $0x178] sm:$0xff]   ;;  %v1929_v58 = vcombine.low %v336_v41, %v340_v42  ;;  %v1903_v27 = vcombine.low %v307_v16, %v311_v17 }
  0x36   : > { %1321 = vmatprep.mubr.bf16.mxu1 %v1892_v49  ;;  %2223 = vmatprep.subr.bf16.mxu0 %v2409_v50  ;;  %v1923_v49 = vcombine.low %v329_v29, %v333_v30  ;;  %v1930_v50 = vcombine.high %v336_v41, %v340_v42  ;;  %v322_v30 = vld [vmem:[%s2549_s25 + $0x110] sm:$0xff]  ;;  %v335_v41 = vld [vmem:[%s2549_s25 + $0x178] sm:$0xff] }
  0x37   : > { %2287 = vmatprep.subr.bf16.mxu1 %v2411_v54  ;;  %v344_v54 = vld [vmem:[%s2549_s25 + $0x1c0] sm:$0xff] }
  0x38   : > { %2224 = vmatpush3.bf16.msra.mxu0 %v2410_v52  ;;  %v1932_v52 = vcombine.high %v337_v44, %v341_v45 }
  0x39   : > { %2288 = vmatpush3.bf16.msra.mxu1 %v2412_v55  ;;  %2225 = vmatprep.subr.bf16.mxu0 %v2413_v62  ;;  %v348_v55 = vld [vmem:[%s2549_s25 + $0x1e0] sm:$0xff]  ;;  %v290_v62 = vld [vmem:[%s2549_s25 + $0x10] sm:$0xff] }
  0x3a   : > { %2289 = vmatprep.subr.bf16.mxu1 %v2415_v0  ;;  %v291_v0 = vld [vmem:[%s2549_s25 + $0x18] sm:$0xff] }
  0x3b   : > { %1225 = vmatmul.mubr.bf16.gmra.mrb[4].mxu0 %v1889_v51  ;;  %v2435_v51 = vld [vmem:[%s2512_s22 + $0x1f8] sm:$0xff]  }
  0x3c   : > { %1322 = vmatmul.mubr.bf16.gmra.mrb[4].mxu1 %v1891_v53  ;;  %1232 = vmatprep.mubr.bf16.mxu0 %v1898_v60  ;;  %v2436_v53 = vld [vmem:[%s2512_s22 + $0x1b8] sm:$0xff]   ;;  %v1938_v60 = vcombine.high %v344_v54, %v348_v55 }
  0x3d   : > { %1329 = vmatprep.mubr.bf16.mxu1 %v1900_v61  ;;  %2226 = vmatpush3.bf16.msra.mxu0 %v2414_v63  ;;  %v1940_v61 = vcombine.high %v345_v56, %v349_v57  ;;  %v294_v63 = vld [vmem:[%s2549_s25 + $0x30] sm:$0xff]  ;;  %v347_v56 = vld [vmem:[%s2549_s25 + $0x1d8] sm:$0xff] }
  0x3e   : > { %2290 = vmatpush3.bf16.msra.mxu1 %v2416_v1  ;;  %2227 = vmatprep.subr.bf16.mxu0 %v2417_v10  ;;  %v295_v1 = vld [vmem:[%s2549_s25 + $0x38] sm:$0xff]  ;;  %v1886_v4 = vcombine.high %v290_v62, %v294_v63  ;;  %v1885_v10 = vcombine.low %v290_v62, %v294_v63 }
  0x3f   : > { %2291 = vmatprep.subr.bf16.mxu1 %v2419_v12  ;;  %v1888_v5 = vcombine.high %v291_v0, %v295_v1  ;;  %v351_v57 = vld [vmem:[%s2549_s25 + $0x1f8] sm:$0xff] }
  0x40   : > { %v1943_v63 = vcombine.low %v347_v56, %v351_v57 }
  0x41   : > { %2228 = vmatpush3.bf16.msra.mxu0 %v2418_v11  ;;  %v1887_v11 = vcombine.low %v291_v0, %v295_v1 }
  0x42   : > { %2292 = vmatpush3.bf16.msra.mxu1 %v2420_v13  ;;  %2229 = vmatprep.subr.bf16.mxu0 %v2421_v18 }
  0x43   : > { %1233 = vmatmul.mubr.bf16.gmra.mrb[8].mxu0 %v1897_v2  ;;  %2293 = vmatprep.subr.bf16.mxu1 %v2423_v23  ;;  %v1937_v2 = vcombine.low %v344_v54, %v348_v55  ;;  %v318_v23 = vld [vmem:[%s2549_s25 + $0xf0] sm:$0xff] }
  0x44   : > { %1330 = vmatmul.mubr.bf16.gmra.mrb[8].mxu1 %v1899_v6  ;;  %1240 = vmatprep.mubr.bf16.mxu0 %v1906_v7  ;;  %v298_v6 = vld [vmem:[%s2549_s25 + $0x50] sm:$0xff] }
  0x45   : > { %1337 = vmatprep.mubr.bf16.mxu1 %v1908_v9  ;;  %2230 = vmatpush3.bf16.msra.mxu0 %v2422_v20  ;;  %v302_v7 = vld [vmem:[%s2549_s25 + $0x70] sm:$0xff]  ;;  %v303_v9 = vld [vmem:[%s2549_s25 + $0x78] sm:$0xff]  ;;  %v1902_v20 = vcombine.high %v306_v14, %v310_v15 }
  0x46   : > { %2294 = vmatpush3.bf16.msra.mxu1 %v2424_v25  ;;  %2231 = vmatprep.subr.bf16.mxu0 %v2425_v28  ;;  %v1894_v12 = vcombine.high %v298_v6, %v302_v7  ;;  %v1896_v13 = vcombine.high %v299_v8, %v303_v9  ;;  %v1893_v18 = vcombine.low %v298_v6, %v302_v7  ;;  %v319_v25 = vld [vmem:[%s2549_s25 + $0xf8] sm:$0xff]  ;;  %v346_v54 = vld [vmem:[%s2549_s25 + $0x1d0] sm:$0xff] }
  0x47   : > { %2295 = vmatprep.subr.bf16.mxu1 %v2427_v32  ;;  %v323_v32 = vld [vmem:[%s2549_s25 + $0x118] sm:$0xff]  ;;  %v350_v55 = vld [vmem:[%s2549_s25 + $0x1f0] sm:$0xff] }
  0x48   : > { %v1941_v62 = vcombine.low %v346_v54, %v350_v55 }
  0x49   : > { %2232 = vmatpush3.bf16.msra.mxu0 %v2426_v31  ;;  %v326_v31 = vld [vmem:[%s2549_s25 + $0x130] sm:$0xff] }
  0x4a   : > { %2296 = vmatpush3.bf16.msra.mxu1 %v2428_v33  ;;  %2233 = vmatprep.subr.bf16.mxu0 %v2429_v38  ;;  %v327_v33 = vld [vmem:[%s2549_s25 + $0x138] sm:$0xff]  ;;  %v330_v38 = vld [vmem:[%s2549_s25 + $0x150] sm:$0xff]  ;;  %v1917_v42 = vcombine.low %v322_v30, %v326_v31 }
  0x4b   : > { %1241 = vmatmul.mubr.bf16.gmra.mrb[12].mxu0 %v1905_v19  ;;  %2297 = vmatprep.subr.bf16.mxu1 %v2431_v40  ;;  %v1895_v19 = vcombine.low %v299_v8, %v303_v9  ;;  %v331_v40 = vld [vmem:[%s2549_s25 + $0x158] sm:$0xff] }
  0x4c   : > { %1338 = vmatmul.mubr.bf16.gmra.mrb[12].mxu1 %v1907_v21  ;;  %1248 = vmatprep.mubr.bf16.mxu0 %v1914_v22  ;;  %v1904_v21 = vcombine.high %v307_v16, %v311_v17  ;;  %v314_v22 = vld [vmem:[%s2549_s25 + $0xd0] sm:$0xff]  ;;  %v1928_v45 = vcombine.high %v331_v40, %v335_v41 }
  0x4d   : > { %1345 = vmatprep.mubr.bf16.mxu1 %v1916_v24  ;;  %2234 = vmatpush3.bf16.msra.mxu0 %v2430_v39  ;;  %v315_v24 = vld [vmem:[%s2549_s25 + $0xd8] sm:$0xff]  ;;  %v1910_v28 = vcombine.high %v314_v22, %v318_v23  ;;  %v334_v39 = vld [vmem:[%s2549_s25 + $0x170] sm:$0xff] }
  0x4e   : > { %2298 = vmatpush3.bf16.msra.mxu1 %v2432_v43  ;;  %2235 = vmatprep.subr.bf16.mxu0 %v2433_v46  ;;  %v1912_v29 = vcombine.high %v315_v24, %v319_v25  ;;  %v1919_v43 = vcombine.low %v323_v32, %v327_v33  ;;  %v1926_v44 = vcombine.high %v330_v38, %v334_v39  ;;  %v338_v46 = vld [vmem:[%s2549_s25 + $0x190] sm:$0xff] }
  0x4f   : > { %2299 = vmatprep.subr.bf16.mxu1 %v2435_v51  ;;  %v1927_v51 = vcombine.low %v331_v40, %v335_v41 }
  0x51   : > { %2236 = vmatpush3.bf16.msra.mxu0 %v2434_v48  ;;  %v339_v48 = vld [vmem:[%s2549_s25 + $0x198] sm:$0xff] }
  0x52   : > { %2300 = vmatpush3.bf16.msra.mxu1 %v2436_v53 }
  0x53   : > { %1249 = vmatmul.mubr.bf16.gmra.mrb[16].mxu0 %v1913_v34  ;;  %v1909_v34 = vcombine.low %v314_v22, %v318_v23 }
  0x54   : > { %1346 = vmatmul.mubr.bf16.gmra.mrb[16].mxu1 %v1915_v35  ;;  %1256 = vmatprep.mubr.bf16.mxu0 %v1922_v36  ;;  %v1911_v35 = vcombine.low %v315_v24, %v319_v25  ;;  %v1918_v36 = vcombine.high %v322_v30, %v326_v31 }
  0x55   : > { %1353 = vmatprep.mubr.bf16.mxu1 %v1924_v37  ;;  %v1920_v37 = vcombine.high %v323_v32, %v327_v33 }
  0x5b   : > { %1257 = vmatmul.mubr.bf16.gmra.mrb[20].mxu0 %v1921_v47  ;;  %v342_v47 = vld [vmem:[%s2549_s25 + $0x1b0] sm:$0xff] }
  0x5c   : > { %1354 = vmatmul.mubr.bf16.gmra.mrb[20].mxu1 %v1923_v49  ;;  %1264 = vmatprep.mubr.bf16.mxu0 %v1930_v50  ;;  %v343_v49 = vld [vmem:[%s2549_s25 + $0x1b8] sm:$0xff]  ;;  %v1925_v50 = vcombine.low %v330_v38, %v334_v39 }
  0x5d   : > { %1361 = vmatprep.mubr.bf16.mxu1 %v1932_v52  ;;  %v1934_v52 = vcombine.high %v338_v46, %v342_v47  ;;  %v1936_v53 = vcombine.high %v339_v48, %v343_v49 }
  0x63   : > { %1265 = vmatmul.mubr.bf16.gmra.mrb[24].mxu0 %v1929_v58  ;;  %v1933_v58 = vcombine.low %v338_v46, %v342_v47 }
  0x64   : > { %1362 = vmatmul.mubr.bf16.gmra.mrb[24].mxu1 %v1931_v59  ;;  %1272 = vmatprep.mubr.bf16.mxu0 %v1938_v60  ;;  %v1935_v59 = vcombine.low %v339_v48, %v343_v49  ;;  %v1942_v60 = vcombine.high %v346_v54, %v350_v55 }
  0x65   : > { %1369 = vmatprep.mubr.bf16.mxu1 %v1940_v61  ;;  %v1944_v61 = vcombine.high %v347_v56, %v351_v57 }
  0x6b   : > { %1273 = vmatmul.mubr.bf16.gmra.mrb[28].mxu0 %v1937_v2 }
  0x6c   : > { %1370 = vmatmul.mubr.bf16.gmra.mrb[28].mxu1 %v1939_v3  ;;  %1410 = vmatprep.mubr.bf16.mxu0 %v1886_v4 }
  0x6d   : > { %1507 = vmatprep.mubr.bf16.mxu1 %v1888_v5 }
  0x73   : > { %1411 = vmatmul.mubr.bf16.vlgmr.msra.gmra.mrb[32].mxu0 %v1885_v10 }
  0x74   : > { %1508 = vmatmul.mubr.bf16.vlgmr.msra.gmra.mrb[32].mxu1 %v1887_v11  ;;  %1418 = vmatprep.mubr.bf16.mxu0 %v1894_v12 }
  0x75   : > { %1515 = vmatprep.mubr.bf16.mxu1 %v1896_v13 }
  0x7b   : > { %1419 = vmatmul.mubr.bf16.gmra.mrb[36].mxu0 %v1893_v18 }
  0x7c   : > { %1516 = vmatmul.mubr.bf16.gmra.mrb[36].mxu1 %v1895_v19  ;;  %1426 = vmatprep.mubr.bf16.mxu0 %v1902_v20 }
  0x7d   : > { %1523 = vmatprep.mubr.bf16.mxu1 %v1904_v21 }
  0x83   : > { %1427 = vmatmul.mubr.bf16.gmra.mrb[40].mxu0 %v1901_v26 }
  0x84   : > { %1524 = vmatmul.mubr.bf16.gmra.mrb[40].mxu1 %v1903_v27  ;;  %1434 = vmatprep.mubr.bf16.mxu0 %v1910_v28 }
  0x85   : > { %1531 = vmatprep.mubr.bf16.mxu1 %v1912_v29 }
  0x8b   : > { %1435 = vmatmul.mubr.bf16.gmra.mrb[44].mxu0 %v1909_v34 }
  0x8c   : > { %1532 = vmatmul.mubr.bf16.gmra.mrb[44].mxu1 %v1911_v35  ;;  %1442 = vmatprep.mubr.bf16.mxu0 %v1918_v36 }
  0x8d   : > { %1539 = vmatprep.mubr.bf16.mxu1 %v1920_v37 }
  0x93   : > { %1443 = vmatmul.mubr.bf16.gmra.mrb[48].mxu0 %v1917_v42 }
  0x94   : > { %1540 = vmatmul.mubr.bf16.gmra.mrb[48].mxu1 %v1919_v43  ;;  %1450 = vmatprep.mubr.bf16.mxu0 %v1926_v44 }
  0x95   : > { %1547 = vmatprep.mubr.bf16.mxu1 %v1928_v45 }
  0x9b   : > { %1451 = vmatmul.mubr.bf16.gmra.mrb[52].mxu0 %v1925_v50 }
  0x9c   : > { %1548 = vmatmul.mubr.bf16.gmra.mrb[52].mxu1 %v1927_v51  ;;  %1458 = vmatprep.mubr.bf16.mxu0 %v1934_v52 }
  0x9d   : > { %1555 = vmatprep.mubr.bf16.mxu1 %v1936_v53 }
  0xa3   : > { %1459 = vmatmul.mubr.bf16.gmra.mrb[56].mxu0 %v1933_v58 }
  0xa4   : > { %1556 = vmatmul.mubr.bf16.gmra.mrb[56].mxu1 %v1935_v59  ;;  %1466 = vmatprep.mubr.bf16.mxu0 %v1942_v60 }
  0xa5   : > { %1563 = vmatprep.mubr.bf16.mxu1 %v1944_v61 }
  0xab   : > { %1467 = vmatmul.mubr.bf16.gmra.mrb[60].mxu0 %v1941_v62 }
  0xac   : > { %1564 = vmatmul.mubr.bf16.gmra.mrb[60].mxu1 %v1943_v63 }
 0x106   : > { %v2109_v0 = vpop.f32.mrb[0].mxu0 }
 0x107   : > { %v2173_v1 = vpop.f32.mrb[0].mxu1  ;;  %v2110_v2 = vpop.f32.mrb[1].mxu0 }
 0x108   : > { %v2111_v3 = vadd.f32 %v2110_v2, %v2109_v0  ;;  %v2174_v4 = vpop.f32.mrb[1].mxu1  ;;  %v2112_v5 = vpop.f32.mrb[2].mxu0 }
 0x109   : > { %v2175_v6 = vadd.f32 %v2174_v4, %v2173_v1  ;;  %v2176_v7 = vpop.f32.mrb[2].mxu1  ;;  %v2113_v8 = vpop.f32.mrb[3].mxu0 }
 0x10a   : > { %v2114_v9 = vadd.f32 %v2113_v8, %v2112_v5  ;;  %v2177_v10 = vpop.f32.mrb[3].mxu1 }
 0x10b   : > { %v2649_v11 = vadd.f32 %v2175_v6, %v2111_v3  ;;  %v2178_v12 = vadd.f32 %v2177_v10, %v2176_v7 }
 0x10d   : > { %v2651_v13 = vadd.f32 %v2178_v12, %v2114_v9 }
 0x10e   : > { %v2115_v14 = vpop.f32.mrb[4].mxu0 }
 0x10f   : > { %v2179_v15 = vpop.f32.mrb[4].mxu1  ;;  %v2116_v16 = vpop.f32.mrb[5].mxu0 }
 0x110   : > { %v2117_v17 = vadd.f32 %v2116_v16, %v2115_v14  ;;  %v2180_v18 = vpop.f32.mrb[5].mxu1  ;;  %v2118_v19 = vpop.f32.mrb[6].mxu0 }
 0x111   : > { %v2181_v20 = vadd.f32 %v2180_v18, %v2179_v15  ;;  %v2182_v21 = vpop.f32.mrb[6].mxu1  ;;  %v2119_v22 = vpop.f32.mrb[7].mxu0 }
 0x112   : > { %v2120_v23 = vadd.f32 %v2119_v22, %v2118_v19  ;;  %v2183_v24 = vpop.f32.mrb[7].mxu1 }
 0x113   : > { %v2653_v25 = vadd.f32 %v2181_v20, %v2117_v17  ;;  %v2184_v26 = vadd.f32 %v2183_v24, %v2182_v21 }
 0x115   : > { %v2655_v27 = vadd.f32 %v2184_v26, %v2120_v23 }
 0x116   : > { %v2121_v28 = vpop.f32.mrb[8].mxu0 }
 0x117   : > { %v2185_v29 = vpop.f32.mrb[8].mxu1  ;;  %v2122_v30 = vpop.f32.mrb[9].mxu0 }
 0x118   : > { %v2123_v31 = vadd.f32 %v2122_v30, %v2121_v28  ;;  %v2186_v32 = vpop.f32.mrb[9].mxu1  ;;  %v2124_v33 = vpop.f32.mrb[10].mxu0 }
 0x119   : > { %v2187_v34 = vadd.f32 %v2186_v32, %v2185_v29  ;;  %v2188_v35 = vpop.f32.mrb[10].mxu1  ;;  %v2125_v36 = vpop.f32.mrb[11].mxu0 }
 0x11a   : > { %v2126_v37 = vadd.f32 %v2125_v36, %v2124_v33  ;;  %v2189_v38 = vpop.f32.mrb[11].mxu1 }
 0x11b   : > { %v2657_v39 = vadd.f32 %v2187_v34, %v2123_v31  ;;  %v2190_v40 = vadd.f32 %v2189_v38, %v2188_v35 }
 0x11d   : > { %v2659_v41 = vadd.f32 %v2190_v40, %v2126_v37 }
 0x11e   : > { %v2127_v42 = vpop.f32.mrb[12].mxu0 }
 0x11f   : > { %v2191_v43 = vpop.f32.mrb[12].mxu1  ;;  %v2128_v44 = vpop.f32.mrb[13].mxu0 }
 0x120   : > { %v2129_v45 = vadd.f32 %v2128_v44, %v2127_v42  ;;  %v2192_v46 = vpop.f32.mrb[13].mxu1  ;;  %v2130_v47 = vpop.f32.mrb[14].mxu0 }
 0x121   : > { %v2193_v48 = vadd.f32 %v2192_v46, %v2191_v43  ;;  %v2194_v49 = vpop.f32.mrb[14].mxu1  ;;  %v2131_v50 = vpop.f32.mrb[15].mxu0 }
 0x122   : > { %v2132_v51 = vadd.f32 %v2131_v50, %v2130_v47  ;;  %v2195_v52 = vpop.f32.mrb[15].mxu1 }
 0x123   : > { %v2661_v53 = vadd.f32 %v2193_v48, %v2129_v45  ;;  %v2196_v54 = vadd.f32 %v2195_v52, %v2194_v49 }
 0x125   : > { %v2663_v55 = vadd.f32 %v2196_v54, %v2132_v51 }
 0x126   : > { %v2133_v56 = vpop.f32.mrb[16].mxu0 }
 0x127   : > { %v2197_v57 = vpop.f32.mrb[16].mxu1  ;;  %v2134_v58 = vpop.f32.mrb[17].mxu0 }
 0x128   : > { %v2135_v59 = vadd.f32 %v2134_v58, %v2133_v56  ;;  %v2198_v60 = vpop.f32.mrb[17].mxu1  ;;  %v2136_v61 = vpop.f32.mrb[18].mxu0 }
 0x129   : > { %v2199_v62 = vadd.f32 %v2198_v60, %v2197_v57  ;;  %v2200_v63 = vpop.f32.mrb[18].mxu1  ;;  %v2137_v0 = vpop.f32.mrb[19].mxu0 }
 0x12a   : > { %v2138_v1 = vadd.f32 %v2137_v0, %v2136_v61  ;;  %v2201_v2 = vpop.f32.mrb[19].mxu1 }
 0x12b   : > { %v2665_v3 = vadd.f32 %v2199_v62, %v2135_v59  ;;  %v2202_v4 = vadd.f32 %v2201_v2, %v2200_v63 }
 0x12d   : > { %v2667_v5 = vadd.f32 %v2202_v4, %v2138_v1 }
 0x12e   : > { %v2139_v6 = vpop.f32.mrb[20].mxu0 }
 0x12f   : > { %v2203_v7 = vpop.f32.mrb[20].mxu1  ;;  %v2140_v8 = vpop.f32.mrb[21].mxu0 }
 0x130   : > { %v2141_v9 = vadd.f32 %v2140_v8, %v2139_v6  ;;  %v2204_v10 = vpop.f32.mrb[21].mxu1  ;;  %v2142_v12 = vpop.f32.mrb[22].mxu0 }
 0x131   : > { %v2205_v14 = vadd.f32 %v2204_v10, %v2203_v7  ;;  %v2206_v15 = vpop.f32.mrb[22].mxu1  ;;  %v2143_v16 = vpop.f32.mrb[23].mxu0 }
 0x132   : > { %v2144_v17 = vadd.f32 %v2143_v16, %v2142_v12  ;;  %v2207_v18 = vpop.f32.mrb[23].mxu1 }
 0x133   : > { %v2669_v19 = vadd.f32 %v2205_v14, %v2141_v9  ;;  %v2208_v20 = vadd.f32 %v2207_v18, %v2206_v15 }
 0x135   : > { %v2671_v21 = vadd.f32 %v2208_v20, %v2144_v17 }
 0x136   : > { %v2145_v22 = vpop.f32.mrb[24].mxu0 }
 0x137   : > { %v2209_v23 = vpop.f32.mrb[24].mxu1  ;;  %v2146_v24 = vpop.f32.mrb[25].mxu0 }
 0x138   : > { %v2147_v26 = vadd.f32 %v2146_v24, %v2145_v22  ;;  %v2210_v28 = vpop.f32.mrb[25].mxu1  ;;  %v2148_v29 = vpop.f32.mrb[26].mxu0 }
 0x139   : > { %v2211_v30 = vadd.f32 %v2210_v28, %v2209_v23  ;;  %v2212_v31 = vpop.f32.mrb[26].mxu1  ;;  %v2149_v32 = vpop.f32.mrb[27].mxu0 }
 0x13a   : > { %v2150_v33 = vadd.f32 %v2149_v32, %v2148_v29  ;;  %v2213_v34 = vpop.f32.mrb[27].mxu1 }
 0x13b   : > { %v2673_v35 = vadd.f32 %v2211_v30, %v2147_v26  ;;  %v2214_v36 = vadd.f32 %v2213_v34, %v2212_v31 }
 0x13d   : > { %v2675_v37 = vadd.f32 %v2214_v36, %v2150_v33 }
 0x13e   : > { %v2151_v38 = vpop.f32.mrb[28].mxu0 }
 0x13f   : > { %v2215_v40 = vpop.f32.mrb[28].mxu1  ;;  %v2152_v42 = vpop.f32.mrb[29].mxu0 }
 0x140   : > { %v2153_v43 = vadd.f32 %v2152_v42, %v2151_v38  ;;  %v2216_v44 = vpop.f32.mrb[29].mxu1  ;;  %v2154_v45 = vpop.f32.mrb[30].mxu0 }
 0x141   : > { %v2217_v46 = vadd.f32 %v2216_v44, %v2215_v40  ;;  %v2218_v47 = vpop.f32.mrb[30].mxu1  ;;  %v2155_v48 = vpop.f32.mrb[31].mxu0 }
 0x142   : > { %v2156_v49 = vadd.f32 %v2155_v48, %v2154_v45  ;;  %v2219_v50 = vpop.f32.mrb[31].mxu1 }
 0x143   : > { %v2677_v51 = vadd.f32 %v2217_v46, %v2153_v43  ;;  %v2220_v52 = vadd.f32 %v2219_v50, %v2218_v47 }
 0x145   : > { %v2679_v54 = vadd.f32 %v2220_v52, %v2156_v49 }
 0x146   : > { %v2237_v56 = vpop.f32.mrb[32].mxu0 }
 0x147   : > { %v2301_v57 = vpop.f32.mrb[32].mxu1  ;;  %v2238_v58 = vpop.f32.mrb[33].mxu0 }
 0x148   : > { %v2239_v59 = vadd.f32 %v2238_v58, %v2237_v56  ;;  %v2302_v60 = vpop.f32.mrb[33].mxu1  ;;  %v2240_v61 = vpop.f32.mrb[34].mxu0 }
 0x149   : > { %v2303_v62 = vadd.f32 %v2302_v60, %v2301_v57  ;;  %v2304_v63 = vpop.f32.mrb[34].mxu1  ;;  %v2241_v0 = vpop.f32.mrb[35].mxu0 }
 0x14a   : > { %v1413_v1 = vadd.f32 %v2239_v59, %v2649_v11  ;;  %v2242_v2 = vadd.f32 %v2241_v0, %v2240_v61  ;;  %v2305_v4 = vpop.f32.mrb[35].mxu1 }
 0x14b   : > { %v2306_v6 = vadd.f32 %v2305_v4, %v2304_v63 }
 0x14c   : > { %v1510_v7 = vadd.f32 %v2303_v62, %v1413_v1  ;;  %v1416_v8 = vadd.f32 %v2242_v2, %v2651_v13 }
 0x14e   : > { %v1513_v9 = vadd.f32 %v2306_v6, %v1416_v8  ;;  %v2243_v10 = vpop.f32.mrb[36].mxu0  ;;  %v1674_v12 = vmul.f32 %v1510_v7, %v1510_v7 }
 0x14f   : > { %v2307_v14 = vpop.f32.mrb[36].mxu1  ;;  %v2244_v15 = vpop.f32.mrb[37].mxu0 }
 0x150   : > { %v2049_v16 = vpack.c.bf16 %v1513_v9, %v1510_v7  ;;  %v1652_v11 = vadd.f32 %v1513_v9, %v1510_v7  ;;  %v1675_v17 = vmul.f32 %v1513_v9, %v1513_v9  ;;  %v2245_v18 = vadd.f32 %v2244_v15, %v2243_v10  ;;  %v2308_v20 = vpop.f32.mrb[37].mxu1  ;;  %v2246_v22 = vpop.f32.mrb[38].mxu0 }
 0x151   : > { %v2309_v23 = vadd.f32 %v2308_v20, %v2307_v14  ;;  %v2310_v13 = vpop.f32.mrb[38].mxu1  ;;  %v2247_v24 = vpop.f32.mrb[39].mxu0 }
 0x152   : > { %2050 = vst [vmem:[%s2687_s29] sm:$0xff] %v2049_v16   ;;  %v1690_v26 = vadd.f32 %v1675_v17, %v1674_v12  ;;  %v1421_v28 = vadd.f32 %v2245_v18, %v2653_v25  ;;  %v2248_v29 = vadd.f32 %v2247_v24, %v2246_v22  ;;  %v2311_v30 = vpop.f32.mrb[39].mxu1 }
 0x153   : > { %v2312_v31 = vadd.f32 %v2311_v30, %v2310_v13 }
 0x154   : > { %v1518_v32 = vadd.f32 %v2309_v23, %v1421_v28  ;;  %v1424_v33 = vadd.f32 %v2248_v29, %v2655_v27 }
 0x156   : > { %v1653_v34 = vadd.f32 %v1652_v11, %v1518_v32  ;;  %v1676_v36 = vmul.f32 %v1518_v32, %v1518_v32  ;;  %v1521_v38 = vadd.f32 %v2312_v31, %v1424_v33  ;;  %v2249_v40 = vpop.f32.mrb[40].mxu0 }
 0x157   : > { %v2313_v42 = vpop.f32.mrb[40].mxu1  ;;  %v2250_v43 = vpop.f32.mrb[41].mxu0 }
 0x158   : > { %v1691_v44 = vadd.f32 %v1690_v26, %v1676_v36  ;;  %v2054_v45 = vpack.c.bf16 %v1521_v38, %v1518_v32  ;;  %v1654_v46 = vadd.f32 %v1653_v34, %v1521_v38  ;;  %v1677_v47 = vmul.f32 %v1521_v38, %v1521_v38  ;;  %v2314_v48 = vpop.f32.mrb[41].mxu1  ;;  %v2252_v49 = vpop.f32.mrb[42].mxu0 }
 0x159   : > { %v2251_v25 = vadd.f32 %v2250_v43, %v2249_v40  ;;  %v2315_v50 = vadd.f32 %v2314_v48, %v2313_v42  ;;  %v2316_v52 = vpop.f32.mrb[42].mxu1  ;;  %v2253_v56 = vpop.f32.mrb[43].mxu0 }
 0x15a   : > { %2086 = vst [vmem:[%s2687_s29 + $0x8] sm:$0xff] %v2054_v45   ;;  %v1692_v57 = vadd.f32 %v1691_v44, %v1677_v47  ;;  %v2254_v27 = vadd.f32 %v2253_v56, %v2252_v49  ;;  %v2317_v58 = vpop.f32.mrb[43].mxu1 }
 0x15b   : > { %v1429_v59 = vadd.f32 %v2251_v25, %v2657_v39  ;;  %v2318_v60 = vadd.f32 %v2317_v58, %v2316_v52 }
 0x15c   : > { %v1432_v61 = vadd.f32 %v2254_v27, %v2659_v41 }
 0x15d   : > { %v1526_v62 = vadd.f32 %v2315_v50, %v1429_v59 }
 0x15e   : > { %v1529_v63 = vadd.f32 %v2318_v60, %v1432_v61  ;;  %v2255_v0 = vpop.f32.mrb[44].mxu0 }
 0x15f   : > { %v1655_v1 = vadd.f32 %v1654_v46, %v1526_v62  ;;  %v1678_v2 = vmul.f32 %v1526_v62, %v1526_v62  ;;  %v2319_v4 = vpop.f32.mrb[44].mxu1  ;;  %v2256_v6 = vpop.f32.mrb[45].mxu0 }
 0x160   : > { %v2059_v7 = vpack.c.bf16 %v1529_v63, %v1526_v62  ;;  %v1679_v8 = vmul.f32 %v1529_v63, %v1529_v63  ;;  %v2257_v9 = vadd.f32 %v2256_v6, %v2255_v0  ;;  %v2320_v10 = vpop.f32.mrb[45].mxu1  ;;  %v2258_v12 = vpop.f32.mrb[46].mxu0 }
 0x161   : > { %v1693_v14 = vadd.f32 %v1692_v57, %v1678_v2  ;;  %v1656_v15 = vadd.f32 %v1655_v1, %v1529_v63  ;;  %v2321_v16 = vadd.f32 %v2320_v10, %v2319_v4  ;;  %v2322_v39 = vpop.f32.mrb[46].mxu1  ;;  %v2259_v11 = vpop.f32.mrb[47].mxu0 }
 0x162   : > { %2087 = vst [vmem:[%s2687_s29 + $0x10] sm:$0xff] %v2059_v7   ;;  %v1437_v41 = vadd.f32 %v2257_v9, %v2661_v53  ;;  %v2260_v17 = vadd.f32 %v2259_v11, %v2258_v12  ;;  %v2323_v18 = vpop.f32.mrb[47].mxu1 }
 0x163   : > { %v1694_v20 = vadd.f32 %v1693_v14, %v1679_v8  ;;  %v2324_v22 = vadd.f32 %v2323_v18, %v2322_v39 }
 0x164   : > { %v1534_v23 = vadd.f32 %v2321_v16, %v1437_v41  ;;  %v1440_v13 = vadd.f32 %v2260_v17, %v2663_v55 }
 0x166   : > { %v1657_v24 = vadd.f32 %v1656_v15, %v1534_v23  ;;  %v1680_v26 = vmul.f32 %v1534_v23, %v1534_v23  ;;  %v1537_v28 = vadd.f32 %v2324_v22, %v1440_v13  ;;  %v2261_v29 = vpop.f32.mrb[48].mxu0 }
 0x167   : > { %v2325_v30 = vpop.f32.mrb[48].mxu1  ;;  %v2262_v31 = vpop.f32.mrb[49].mxu0 }
 0x168   : > { %v1695_v32 = vadd.f32 %v1694_v20, %v1680_v26  ;;  %v2064_v33 = vpack.c.bf16 %v1537_v28, %v1534_v23  ;;  %v1658_v34 = vadd.f32 %v1657_v24, %v1537_v28  ;;  %v1681_v36 = vmul.f32 %v1537_v28, %v1537_v28  ;;  %v2326_v38 = vpop.f32.mrb[49].mxu1  ;;  %v2264_v53 = vpop.f32.mrb[50].mxu0 }
 0x169   : > { %v2263_v40 = vadd.f32 %v2262_v31, %v2261_v29  ;;  %v2327_v42 = vadd.f32 %v2326_v38, %v2325_v30  ;;  %v2328_v43 = vpop.f32.mrb[50].mxu1  ;;  %v2265_v44 = vpop.f32.mrb[51].mxu0 }
 0x16a   : > { %2088 = vst [vmem:[%s2687_s29 + $0x18] sm:$0xff] %v2064_v33   ;;  %v1696_v45 = vadd.f32 %v1695_v32, %v1681_v36  ;;  %v2266_v55 = vadd.f32 %v2265_v44, %v2264_v53  ;;  %v2329_v46 = vpop.f32.mrb[51].mxu1 }
 0x16b   : > { %v1445_v47 = vadd.f32 %v2263_v40, %v2665_v3  ;;  %v2330_v48 = vadd.f32 %v2329_v46, %v2328_v43 }
 0x16c   : > { %v1448_v49 = vadd.f32 %v2266_v55, %v2667_v5 }
 0x16d   : > { %v1542_v25 = vadd.f32 %v2327_v42, %v1445_v47 }
 0x16e   : > { %v1545_v50 = vadd.f32 %v2330_v48, %v1448_v49  ;;  %v2267_v52 = vpop.f32.mrb[52].mxu0 }
 0x16f   : > { %v1659_v56 = vadd.f32 %v1658_v34, %v1542_v25  ;;  %v1682_v57 = vmul.f32 %v1542_v25, %v1542_v25  ;;  %v2331_v27 = vpop.f32.mrb[52].mxu1  ;;  %v2268_v58 = vpop.f32.mrb[53].mxu0 }
 0x170   : > { %v2069_v59 = vpack.c.bf16 %v1545_v50, %v1542_v25  ;;  %v1683_v60 = vmul.f32 %v1545_v50, %v1545_v50  ;;  %v2269_v61 = vadd.f32 %v2268_v58, %v2267_v52  ;;  %v2332_v62 = vpop.f32.mrb[53].mxu1  ;;  %v2270_v63 = vpop.f32.mrb[54].mxu0 }
 0x171   : > { %v1697_v0 = vadd.f32 %v1696_v45, %v1682_v57  ;;  %v1660_v1 = vadd.f32 %v1659_v56, %v1545_v50  ;;  %v2333_v2 = vadd.f32 %v2332_v62, %v2331_v27  ;;  %v2334_v3 = vpop.f32.mrb[54].mxu1  ;;  %v2271_v4 = vpop.f32.mrb[55].mxu0 }
 0x172   : > { %2089 = vst [vmem:[%s2687_s29 + $0x20] sm:$0xff] %v2069_v59   ;;  %v1453_v5 = vadd.f32 %v2269_v61, %v2669_v19  ;;  %v2272_v6 = vadd.f32 %v2271_v4, %v2270_v63  ;;  %v2335_v7 = vpop.f32.mrb[55].mxu1 }
 0x173   : > { %v1698_v8 = vadd.f32 %v1697_v0, %v1683_v60  ;;  %v2336_v9 = vadd.f32 %v2335_v7, %v2334_v3 }
 0x174   : > { %v1550_v10 = vadd.f32 %v2333_v2, %v1453_v5  ;;  %v1456_v12 = vadd.f32 %v2272_v6, %v2671_v21 }
 0x176   : > { %v1661_v14 = vadd.f32 %v1660_v1, %v1550_v10  ;;  %v1684_v15 = vmul.f32 %v1550_v10, %v1550_v10  ;;  %v1553_v16 = vadd.f32 %v2336_v9, %v1456_v12  ;;  %v2273_v39 = vpop.f32.mrb[56].mxu0 }
 0x177   : > { %v2337_v11 = vpop.f32.mrb[56].mxu1  ;;  %v2274_v41 = vpop.f32.mrb[57].mxu0 }
 0x178   : > { %v1699_v17 = vadd.f32 %v1698_v8, %v1684_v15  ;;  %v2074_v18 = vpack.c.bf16 %v1553_v16, %v1550_v10  ;;  %v1662_v20 = vadd.f32 %v1661_v14, %v1553_v16  ;;  %v1685_v22 = vmul.f32 %v1553_v16, %v1553_v16  ;;  %v2338_v23 = vpop.f32.mrb[57].mxu1  ;;  %v2276_v19 = vpop.f32.mrb[58].mxu0 }
 0x179   : > { %v2275_v13 = vadd.f32 %v2274_v41, %v2273_v39  ;;  %v2339_v24 = vadd.f32 %v2338_v23, %v2337_v11  ;;  %v2340_v26 = vpop.f32.mrb[58].mxu1  ;;  %v2277_v28 = vpop.f32.mrb[59].mxu0 }
 0x17a   : > { %2090 = vst [vmem:[%s2687_s29 + $0x28] sm:$0xff] %v2074_v18   ;;  %v1700_v29 = vadd.f32 %v1699_v17, %v1685_v22  ;;  %v2278_v21 = vadd.f32 %v2277_v28, %v2276_v19  ;;  %v2341_v30 = vpop.f32.mrb[59].mxu1 }
 0x17b   : > { %v1461_v31 = vadd.f32 %v2275_v13, %v2673_v35  ;;  %v2342_v32 = vadd.f32 %v2341_v30, %v2340_v26 }
 0x17c   : > { %v1464_v33 = vadd.f32 %v2278_v21, %v2675_v37 }
 0x17d   : > { %v1558_v34 = vadd.f32 %v2339_v24, %v1461_v31 }
 0x17e   : > { %v1561_v36 = vadd.f32 %v2342_v32, %v1464_v33  ;;  %v2279_v38 = vpop.f32.mrb[60].mxu0 }
 0x17f   : > { %v1663_v53 = vadd.f32 %v1662_v20, %v1558_v34  ;;  %v1686_v40 = vmul.f32 %v1558_v34, %v1558_v34  ;;  %v2343_v42 = vpop.f32.mrb[60].mxu1  ;;  %v2280_v43 = vpop.f32.mrb[61].mxu0 }
 0x180   : > { %v2079_v44 = vpack.c.bf16 %v1561_v36, %v1558_v34  ;;  %v1687_v45 = vmul.f32 %v1561_v36, %v1561_v36  ;;  %v2281_v55 = vadd.f32 %v2280_v43, %v2279_v38  ;;  %v2344_v46 = vpop.f32.mrb[61].mxu1  ;;  %v2282_v47 = vpop.f32.mrb[62].mxu0 }
 0x181   : > { %v1701_v48 = vadd.f32 %v1700_v29, %v1686_v40  ;;  %v1664_v49 = vadd.f32 %v1663_v53, %v1561_v36  ;;  %v2345_v25 = vadd.f32 %v2344_v46, %v2343_v42  ;;  %v2346_v35 = vpop.f32.mrb[62].mxu1  ;;  %v2283_v50 = vpop.f32.mrb[63].mxu0 }
 0x182   : > { %2091 = vst [vmem:[%s2687_s29 + $0x30] sm:$0xff] %v2079_v44   ;;  %v1469_v37 = vadd.f32 %v2281_v55, %v2677_v51  ;;  %v2284_v52 = vadd.f32 %v2283_v50, %v2282_v47  ;;  %v2347_v56 = vpop.f32.mrb[63].mxu1 }
 0x183   : > { %v1702_v57 = vadd.f32 %v1701_v48, %v1687_v45  ;;  %v2348_v27 = vadd.f32 %v2347_v56, %v2346_v35 }
 0x184   : > { %v1566_v58 = vadd.f32 %v2345_v25, %v1469_v37  ;;  %v1472_v59 = vadd.f32 %v2284_v52, %v2679_v54 }
 0x186   : > { %v1665_v60 = vadd.f32 %v1664_v49, %v1566_v58  ;;  %v1688_v61 = vmul.f32 %v1566_v58, %v1566_v58  ;;  %v1569_v62 = vadd.f32 %v2348_v27, %v1472_v59 }
 0x188   : > { %v1703_v63 = vadd.f32 %v1702_v57, %v1688_v61  ;;  %v2084_v0 = vpack.c.bf16 %v1569_v62, %v1566_v58  ;;  %v1666_v1 = vadd.f32 %v1665_v60, %v1569_v62  ;;  %v1689_v2 = vmul.f32 %v1569_v62, %v1569_v62 }
 0x18a   : > { %2092 = vst [vmem:[%s2687_s29 + $0x38] sm:$0xff] %v2084_v0   ;;  %v1667_v3 = vrot.slane %v1666_v1, 4  ;;  %v1704_v4 = vadd.f32 %v1703_v63, %v1689_v2 }
 0x18c   : > { %v1668_v51 = vadd.f32 %v1667_v3, %v1666_v1  ;;  %v1705_v5 = vrot.slane %v1704_v4, 4 }
 0x18e   : > { %v1669_v6 = vrot.slane %v1668_v51, 2  ;;  %v1706_v7 = vadd.f32 %v1705_v5, %v1704_v4 }
 0x190   : > { %v1670_v8 = vadd.f32 %v1669_v6, %v1668_v51  ;;  %v1707_v9 = vrot.slane %v1706_v7, 2 }
 0x192   : > { %v1671_v10 = vrot.slane %v1670_v8, 1  ;;  %v1708_v54 = vadd.f32 %v1707_v9, %v1706_v7 }
 0x194   : > { %v1672_v12 = vadd.f32 %v1671_v10, %v1670_v8  ;;  %v1709_v14 = vrot.slane %v1708_v54, 1 }
 0x196   : > { %1673 = vst [vmem:[%s280_s6] sm:$0x1] %v1672_v12  ;;  %v1710_v15 = vadd.f32 %v1709_v14, %v1708_v54 }
 0x198   : > { %1711 = vst [vmem:[%s285_s9] sm:$0x1] %v1710_v15 }
 0x199 PF: > { %s15_s17 = sadd.s32 1, %s2459_s17   ;;  %s2733_s15 = smov %s2455_s16 }
 0x19a   : > { %p12_p5 = scmp.ge.s32.totalorder %s15_s17, 6   ;;  %s2734_s16 = smov %s2736_s18 }
 0x19c   :  { %14 = sbr.rel (!%p12_p5) target bundleno = 2 (0x2), region = 85 }

// kernel: generator_forward.15
= control target key start
LH: loop header
LB: loop body
LE: loop exit
PB: predicated region body
PF: predicated region fallthrough
CT: control target
= control target key end

     0   :  { %s3370_s15 = smov 0   ;;  %s3372_s16 = smov 0   ;;  %s3876_s0 = inlined_call_operand.vmem [shape: bf16[4,512,512], index: 0, kind: input, shape index: {}]   ;;  %s3877_s1 = inlined_call_operand.vmem [shape: bf16[4,512,64], index: 1, kind: input, shape index: {}]   ;;  %s3878_s2 = inlined_call_operand.vmem [shape: bf16[4,512,64], index: 2, kind: output, shape index: {0}]   ;;  %s3879_s3 = inlined_call_operand.vmem [shape: f32[4,1,64], index: 3, kind: output, shape index: {1}]   ;;  %s3880_s4 = inlined_call_operand.vmem [shape: f32[4,1,64], index: 4, kind: output, shape index: {2}]  }
   0x1   :  { %s3374_s17 = smov 0  }
   0x2 LB: > { %s27_s18 = sadd.s32 1, %s3338_s16  ;;  %p2707_p0 = scmp.ge.s32.totalorder %s3342_s17, 1  ;;  %s3342_s17 = sphi %s3374_s17, %s15_s17   ;;  %s3338_s16 = sphi %s3372_s16, %s3882_s16   ;;  %s3334_s15 = sphi %s3370_s15, %s3881_s15  }
   0x3   : > { %p29_p1 = scmp.ge.s32.totalorder %s27_s18, 4  ;;  %p203_p2 = scmp.lt.s32.totalorder %s3342_s17, 5 }
   0x5   : > { %s3884_s18 = smov (%p29_p1, %s27_s18), 0  ;;  %p204_p3 = pnand %p2707_p0, %p203_p2 }
   0x6   : > { %p252_p4 = scmp.lt.s32.totalorder (!%p204_p3), %s3334_s15, 3  ;;  %v3344_v0 = vmov (!%p204_p3), 0   ;;  %vm2146_vm0 = vcmask (!%p204_p3), 519168   ;;  %vm2211_vm1 = vcmask (!%p204_p3), 523264   ;;  %vm2345_vm2 = vcmask (!%p204_p3), 516096  }
   0x7   : > { %207 = sbr.rel (%p204_p3) target bundleno = 564 (0x234), region = 28  ;;  %1312 = vmatprep.subr.bf16.mxu1 (!%p204_p3), %v3344_v0  ;;  %1601 = vmatprep.subr.bf16.mxu0 (!%p204_p3), %v3344_v0 }
   0xe   : > { %s3886_s15 = smov (!%p252_p4, %s3334_s15), 3 }
   0xf   : > { %s2941_s19 = sshll.u32 %s3886_s15, 8  ;;  %s2940_s23 = sshll.u32 %s3886_s15, 10 }
  0x10   : > { %s3398_s22 = scalar_lea.vmem %s3877_s1, %s2941_s19  ;;  %s3434_s26 = scalar_lea.vmem %s3876_s0, %s2940_s23 }
  0x11   : > { %v3096_v1 = vld [vmem:[%s3398_s22] sm:$0xff]   ;;  %v3098_v3 = vld [vmem:[%s3398_s22 + $0x8] sm:$0xff]   ;;  %v3100_v5 = vld [vmem:[%s3398_s22 + $0x10] sm:$0xff]   ;;  %s3586_s29 = scalar_lea.vmem %s3878_s2, %s2941_s19  ;;  %s280_s6 = scalar_lea.vmem %s3879_s3, %s3886_s15 }
  0x12   : > { %v3097_v2 = vld [vmem:[%s3398_s22 + $0x80] sm:$0xff]   ;;  %1313 = vmatpush1.bf16.msra.mxu1 %v3096_v1  ;;  %v3099_v4 = vld [vmem:[%s3398_s22 + $0x88] sm:$0xff]   ;;  %v3101_v6 = vld [vmem:[%s3398_s22 + $0x90] sm:$0xff]   ;;  %s285_s9 = scalar_lea.vmem %s3880_s4, %s3886_s15 }
  0x13   : > { %1602 = vmatpush1.bf16.msra.mxu0 %v3097_v2  ;;  %1314 = vmatprep.subr.bf16.mxu1 %v3344_v0  ;;  %v3102_v7 = vld [vmem:[%s3398_s22 + $0x18] sm:$0xff]   ;;  %v3104_v9 = vld [vmem:[%s3398_s22 + $0x20] sm:$0xff]   ;;  %v3106_v11 = vld [vmem:[%s3398_s22 + $0x28] sm:$0xff]  }
  0x14   : > { %1603 = vmatprep.subr.bf16.mxu0 %v3344_v0  ;;  %v3103_v8 = vld [vmem:[%s3398_s22 + $0x98] sm:$0xff]   ;;  %v3105_v10 = vld [vmem:[%s3398_s22 + $0xa0] sm:$0xff]   ;;  %v3107_v12 = vld [vmem:[%s3398_s22 + $0xa8] sm:$0xff]  }
  0x15   : > { %v3108_v13 = vld [vmem:[%s3398_s22 + $0x30] sm:$0xff]   ;;  %v3110_v15 = vld [vmem:[%s3398_s22 + $0x38] sm:$0xff]   ;;  %v3112_v17 = vld [vmem:[%s3398_s22 + $0x40] sm:$0xff]  }
  0x16   : > { %1315 = vmatpush1.bf16.msra.mxu1 %v3098_v3  ;;  %v3109_v14 = vld [vmem:[%s3398_s22 + $0xb0] sm:$0xff]   ;;  %v3111_v16 = vld [vmem:[%s3398_s22 + $0xb8] sm:$0xff]   ;;  %v3113_v18 = vld [vmem:[%s3398_s22 + $0xc0] sm:$0xff]  }
  0x17   : > { %1604 = vmatpush1.bf16.msra.mxu0 %v3099_v4  ;;  %1316 = vmatprep.subr.bf16.mxu1 %v3344_v0  ;;  %v3130_v19 = vld [vmem:[%s3434_s26 + $0x4] ss:$16 sps:$4 sm:$0xff]   ;;  %v3114_v20 = vld [vmem:[%s3398_s22 + $0x48] sm:$0xff]   ;;  %v3118_v25 = vld [vmem:[%s3398_s22 + $0x58] sm:$0xff]  }
  0x18   : > { %1605 = vmatprep.subr.bf16.mxu0 %v3344_v0  ;;  %v3133_v21 = vld [vmem:[%s3434_s26 + $0xc] ss:$16 sps:$4 sm:$0xff]   ;;  %1344 = vmatprep.mubr.bf16.mxu1 %v3130_v19  ;;  %v3116_v23 = vld [vmem:[%s3398_s22 + $0x50] sm:$0xff]   ;;  %v3120_v27 = vld [vmem:[%s3398_s22 + $0x60] sm:$0xff]  }
  0x19   : > { %v3115_v22 = vld [vmem:[%s3398_s22 + $0xc8] sm:$0xff]   ;;  %1633 = vmatprep.mubr.bf16.mxu0 %v3133_v21  ;;  %v3117_v24 = vld [vmem:[%s3398_s22 + $0xd0] sm:$0xff]   ;;  %v3119_v26 = vld [vmem:[%s3398_s22 + $0xd8] sm:$0xff]  }
  0x1a   : > { %1317 = vmatpush1.bf16.msra.mxu1 %v3100_v5  ;;  %v3121_v28 = vld [vmem:[%s3398_s22 + $0xe0] sm:$0xff]   ;;  %v3122_v29 = vld [vmem:[%s3398_s22 + $0x68] sm:$0xff]   ;;  %v3124_v31 = vld [vmem:[%s3398_s22 + $0x70] sm:$0xff]  }
  0x1b   : > { %1606 = vmatpush1.bf16.msra.mxu0 %v3101_v6  ;;  %1318 = vmatprep.subr.bf16.mxu1 %v3344_v0  ;;  %v3123_v30 = vld [vmem:[%s3398_s22 + $0xe8] sm:$0xff]   ;;  %v3125_v32 = vld [vmem:[%s3398_s22 + $0xf0] sm:$0xff]   ;;  %v3126_v33 = vld [vmem:[%s3398_s22 + $0x78] sm:$0xff]  }
  0x1c   : > { %1607 = vmatprep.subr.bf16.mxu0 %v3344_v0  ;;  %v3127_v34 = vld [vmem:[%s3398_s22 + $0xf8] sm:$0xff]   ;;  %v3128_v35 = vld [vmem:[%s3434_s26] ss:$16 sps:$4 sm:$0xff]   ;;  %v3134_v37 = vld [vmem:[%s3434_s26 + $0x24] ss:$16 sps:$4 sm:$0xff]  }
  0x1d   : > { %v3131_v36 = vld [vmem:[%s3434_s26 + $0x8] ss:$16 sps:$4 sm:$0xff]   ;;  %v3136_v38 = vld [vmem:[%s3434_s26 + $0x2c] ss:$16 sps:$4 sm:$0xff]   ;;  %v3138_v39 = vld [vmem:[%s3434_s26 + $0x20] ss:$16 sps:$4 sm:$0xff]  }
  0x1e   : > { %1319 = vmatpush1.bf16.msra.mxu1 %v3102_v7  ;;  %v3139_v40 = vld [vmem:[%s3434_s26 + $0x28] ss:$16 sps:$4 sm:$0xff]   ;;  %v3140_v41 = vld [vmem:[%s3434_s26 + $0x44] ss:$16 sps:$4 sm:$0xff]   ;;  %v3142_v42 = vld [vmem:[%s3434_s26 + $0x4c] ss:$16 sps:$4 sm:$0xff]  }
  0x1f   : > { %1608 = vmatpush1.bf16.msra.mxu0 %v3103_v8  ;;  %1320 = vmatprep.subr.bf16.mxu1 %v3344_v0  ;;  %v3144_v43 = vld [vmem:[%s3434_s26 + $0x40] ss:$16 sps:$4 sm:$0xff]   ;;  %v3145_v44 = vld [vmem:[%s3434_s26 + $0x48] ss:$16 sps:$4 sm:$0xff]   ;;  %v3146_v45 = vld [vmem:[%s3434_s26 + $0x64] ss:$16 sps:$4 sm:$0xff]  }
  0x20   : > { %1609 = vmatprep.subr.bf16.mxu0 %v3344_v0  ;;  %v3148_v46 = vld [vmem:[%s3434_s26 + $0x6c] ss:$16 sps:$4 sm:$0xff]   ;;  %v3150_v47 = vld [vmem:[%s3434_s26 + $0x60] ss:$16 sps:$4 sm:$0xff]   ;;  %v3151_v48 = vld [vmem:[%s3434_s26 + $0x68] ss:$16 sps:$4 sm:$0xff]  }
  0x21   : > { %v3152_v49 = vld [vmem:[%s3434_s26 + $0x84] ss:$16 sps:$4 sm:$0xff]   ;;  %v3154_v50 = vld [vmem:[%s3434_s26 + $0x8c] ss:$16 sps:$4 sm:$0xff]   ;;  %v3156_v51 = vld [vmem:[%s3434_s26 + $0x80] ss:$16 sps:$4 sm:$0xff]  }
  0x22   : > { %1321 = vmatpush1.bf16.msra.mxu1 %v3104_v9  ;;  %v3157_v52 = vld [vmem:[%s3434_s26 + $0x88] ss:$16 sps:$4 sm:$0xff]   ;;  %v3158_v53 = vld [vmem:[%s3434_s26 + $0xa4] ss:$16 sps:$4 sm:$0xff]   ;;  %v3160_v54 = vld [vmem:[%s3434_s26 + $0xac] ss:$16 sps:$4 sm:$0xff]  }
  0x23   : > { %1610 = vmatpush1.bf16.msra.mxu0 %v3105_v10  ;;  %1322 = vmatprep.subr.bf16.mxu1 %v3344_v0  ;;  %v3162_v55 = vld [vmem:[%s3434_s26 + $0xa0] ss:$16 sps:$4 sm:$0xff]   ;;  %v3163_v56 = vld [vmem:[%s3434_s26 + $0xa8] ss:$16 sps:$4 sm:$0xff]   ;;  %v3164_v57 = vld [vmem:[%s3434_s26 + $0xc4] ss:$16 sps:$4 sm:$0xff]  }
  0x24   : > { %1611 = vmatprep.subr.bf16.mxu0 %v3344_v0  ;;  %v3166_v58 = vld [vmem:[%s3434_s26 + $0xcc] ss:$16 sps:$4 sm:$0xff]   ;;  %v3168_v59 = vld [vmem:[%s3434_s26 + $0xc0] ss:$16 sps:$4 sm:$0xff]   ;;  %v3169_v60 = vld [vmem:[%s3434_s26 + $0xc8] ss:$16 sps:$4 sm:$0xff]  }
  0x25   : > { %v3170_v61 = vld [vmem:[%s3434_s26 + $0xe4] ss:$16 sps:$4 sm:$0xff]   ;;  %v3172_v62 = vld [vmem:[%s3434_s26 + $0xec] ss:$16 sps:$4 sm:$0xff]   ;;  %v3174_v63 = vld [vmem:[%s3434_s26 + $0xe0] ss:$16 sps:$4 sm:$0xff]  }
  0x26   : > { %1323 = vmatpush1.bf16.msra.mxu1 %v3106_v11  ;;  %v3176_v1 = vld [vmem:[%s3434_s26 + $0x104] ss:$16 sps:$4 sm:$0xff]   ;;  %v3178_v2 = vld [vmem:[%s3434_s26 + $0x10c] ss:$16 sps:$4 sm:$0xff]   ;;  %v3180_v3 = vld [vmem:[%s3434_s26 + $0x100] ss:$16 sps:$4 sm:$0xff]  }
  0x27   : > { %1612 = vmatpush1.bf16.msra.mxu0 %v3107_v12  ;;  %1324 = vmatprep.subr.bf16.mxu1 %v3344_v0  ;;  %v3181_v4 = vld [vmem:[%s3434_s26 + $0x108] ss:$16 sps:$4 sm:$0xff]   ;;  %v3182_v5 = vld [vmem:[%s3434_s26 + $0x124] ss:$16 sps:$4 sm:$0xff]   ;;  %v3184_v6 = vld [vmem:[%s3434_s26 + $0x12c] ss:$16 sps:$4 sm:$0xff]  }
  0x28   : > { %1613 = vmatprep.subr.bf16.mxu0 %v3344_v0  ;;  %v3186_v7 = vld [vmem:[%s3434_s26 + $0x120] ss:$16 sps:$4 sm:$0xff]   ;;  %v3187_v8 = vld [vmem:[%s3434_s26 + $0x128] ss:$16 sps:$4 sm:$0xff]   ;;  %v3188_v9 = vld [vmem:[%s3434_s26 + $0x144] ss:$16 sps:$4 sm:$0xff]  }
  0x29   : > { %v3190_v10 = vld [vmem:[%s3434_s26 + $0x14c] ss:$16 sps:$4 sm:$0xff]   ;;  %v3192_v11 = vld [vmem:[%s3434_s26 + $0x140] ss:$16 sps:$4 sm:$0xff]   ;;  %v3193_v12 = vld [vmem:[%s3434_s26 + $0x148] ss:$16 sps:$4 sm:$0xff]  }
  0x2a   : > { %1325 = vmatpush1.bf16.msra.mxu1 %v3108_v13  ;;  %v3194_v13 = vld [vmem:[%s3434_s26 + $0x164] ss:$16 sps:$4 sm:$0xff]   ;;  %v3204_v19 = vld [vmem:[%s3434_s26 + $0x180] ss:$16 sps:$4 sm:$0xff]  }
  0x2b   : > { %1614 = vmatpush1.bf16.msra.mxu0 %v3109_v14  ;;  %1326 = vmatprep.subr.bf16.mxu1 %v3344_v0  ;;  %v3196_v14 = vld [vmem:[%s3434_s26 + $0x16c] ss:$16 sps:$4 sm:$0xff]   ;;  %v3206_v21 = vld [vmem:[%s3434_s26 + $0x1a4] ss:$16 sps:$4 sm:$0xff]  }
  0x2c   : > { %1615 = vmatprep.subr.bf16.mxu0 %v3344_v0 }
  0x2e   : > { %1327 = vmatpush1.bf16.msra.mxu1 %v3110_v15  ;;  %v3198_v15 = vld [vmem:[%s3434_s26 + $0x160] ss:$16 sps:$4 sm:$0xff]  }
  0x2f   : > { %1616 = vmatpush1.bf16.msra.mxu0 %v3111_v16  ;;  %1328 = vmatprep.subr.bf16.mxu1 %v3344_v0  ;;  %v3199_v16 = vld [vmem:[%s3434_s26 + $0x168] ss:$16 sps:$4 sm:$0xff]  }
  0x30   : > { %1617 = vmatprep.subr.bf16.mxu0 %v3344_v0 }
  0x32   : > { %1329 = vmatpush1.bf16.msra.mxu1 %v3112_v17  ;;  %v3200_v17 = vld [vmem:[%s3434_s26 + $0x184] ss:$16 sps:$4 sm:$0xff]  }
  0x33   : > { %1618 = vmatpush1.bf16.msra.mxu0 %v3113_v18  ;;  %1330 = vmatprep.subr.bf16.mxu1 %v3344_v0  ;;  %v3202_v18 = vld [vmem:[%s3434_s26 + $0x18c] ss:$16 sps:$4 sm:$0xff]  }
  0x34   : > { %1619 = vmatprep.subr.bf16.mxu0 %v3344_v0 }
  0x36   : > { %1331 = vmatpush1.bf16.msra.mxu1 %v3114_v20  ;;  %v3205_v20 = vld [vmem:[%s3434_s26 + $0x188] ss:$16 sps:$4 sm:$0xff]  }
  0x37   : > { %1620 = vmatpush1.bf16.msra.mxu0 %v3115_v22  ;;  %1332 = vmatprep.subr.bf16.mxu1 %v3344_v0  ;;  %v3208_v22 = vld [vmem:[%s3434_s26 + $0x1ac] ss:$16 sps:$4 sm:$0xff]  }
  0x38   : > { %1621 = vmatprep.subr.bf16.mxu0 %v3344_v0 }
  0x3a   : > { %1333 = vmatpush1.bf16.msra.mxu1 %v3116_v23  ;;  %v3210_v23 = vld [vmem:[%s3434_s26 + $0x1a0] ss:$16 sps:$4 sm:$0xff]  }
  0x3b   : > { %1622 = vmatpush1.bf16.msra.mxu0 %v3117_v24  ;;  %1334 = vmatprep.subr.bf16.mxu1 %v3344_v0  ;;  %v3211_v24 = vld [vmem:[%s3434_s26 + $0x1a8] ss:$16 sps:$4 sm:$0xff]  }
  0x3c   : > { %1623 = vmatprep.subr.bf16.mxu0 %v3344_v0 }
  0x3e   : > { %1335 = vmatpush1.bf16.msra.mxu1 %v3118_v25  ;;  %v3212_v25 = vld [vmem:[%s3434_s26 + $0x1c4] ss:$16 sps:$4 sm:$0xff]  }
  0x3f   : > { %1624 = vmatpush1.bf16.msra.mxu0 %v3119_v26  ;;  %1336 = vmatprep.subr.bf16.mxu1 %v3344_v0  ;;  %v3214_v26 = vld [vmem:[%s3434_s26 + $0x1cc] ss:$16 sps:$4 sm:$0xff]  }
  0x40   : > { %1625 = vmatprep.subr.bf16.mxu0 %v3344_v0 }
  0x42   : > { %1337 = vmatpush1.bf16.msra.mxu1 %v3120_v27  ;;  %v3216_v27 = vld [vmem:[%s3434_s26 + $0x1c0] ss:$16 sps:$4 sm:$0xff]  }
  0x43   : > { %1626 = vmatpush1.bf16.msra.mxu0 %v3121_v28  ;;  %1338 = vmatprep.subr.bf16.mxu1 %v3344_v0  ;;  %v3217_v28 = vld [vmem:[%s3434_s26 + $0x1c8] ss:$16 sps:$4 sm:$0xff]  }
  0x44   : > { %1627 = vmatprep.subr.bf16.mxu0 %v3344_v0 }
  0x46   : > { %1339 = vmatpush1.bf16.msra.mxu1 %v3122_v29  ;;  %v3218_v29 = vld [vmem:[%s3434_s26 + $0x1e4] ss:$16 sps:$4 sm:$0xff]  }
  0x47   : > { %1628 = vmatpush1.bf16.msra.mxu0 %v3123_v30  ;;  %1340 = vmatprep.subr.bf16.mxu1 %v3344_v0  ;;  %v3220_v30 = vld [vmem:[%s3434_s26 + $0x1ec] ss:$16 sps:$4 sm:$0xff]  }
  0x48   : > { %1629 = vmatprep.subr.bf16.mxu0 %v3344_v0 }
  0x4a   : > { %1341 = vmatpush1.bf16.msra.mxu1 %v3124_v31  ;;  %v3222_v31 = vld [vmem:[%s3434_s26 + $0x1e0] ss:$16 sps:$4 sm:$0xff]  }
  0x4b   : > { %1630 = vmatpush1.bf16.msra.mxu0 %v3125_v32  ;;  %1342 = vmatprep.subr.bf16.mxu1 %v3344_v0  ;;  %v3223_v32 = vld [vmem:[%s3434_s26 + $0x1e8] ss:$16 sps:$4 sm:$0xff]  }
  0x4c   : > { %1631 = vmatprep.subr.bf16.mxu0 %v3344_v0  ;;  %v3175_v0 = vld [vmem:[%s3434_s26 + $0xe8] ss:$16 sps:$4 sm:$0xff]  }
  0x4e   : > { %1343 = vmatpush1.bf16.msra.mxu1 %v3126_v33  ;;  %v3224_v33 = vld [vmem:[%s3434_s26 + $0x204] ss:$16 sps:$4 sm:$0xff]  }
  0x4f   : > { %1632 = vmatpush1.bf16.msra.mxu0 %v3127_v34  ;;  %v3226_v34 = vld [vmem:[%s3434_s26 + $0x20c] ss:$16 sps:$4 sm:$0xff]  }
  0x51   : > { %1345 = vmatmul.mubr.bf16.vlgmr.msra.gmra.mrb[0].mxu1 %v3128_v35  ;;  %v3228_v35 = vld [vmem:[%s3434_s26 + $0x200] ss:$16 sps:$4 sm:$0xff]  }
  0x52   : > { %1634 = vmatmul.mubr.bf16.vlgmr.msra.gmra.mrb[0].mxu0 %v3131_v36  ;;  %1352 = vmatprep.mubr.bf16.mxu1 %v3134_v37  ;;  %v3229_v36 = vld [vmem:[%s3434_s26 + $0x208] ss:$16 sps:$4 sm:$0xff]   ;;  %v3230_v37 = vld [vmem:[%s3434_s26 + $0x224] ss:$16 sps:$4 sm:$0xff]  }
  0x53   : > { %1641 = vmatprep.mubr.bf16.mxu0 %v3136_v38  ;;  %v3232_v38 = vld [vmem:[%s3434_s26 + $0x22c] ss:$16 sps:$4 sm:$0xff]  }
  0x59   : > { %1353 = vmatmul.mubr.bf16.gmra.mrb[4].mxu1 %v3138_v39  ;;  %v3234_v39 = vld [vmem:[%s3434_s26 + $0x220] ss:$16 sps:$4 sm:$0xff]  }
  0x5a   : > { %1642 = vmatmul.mubr.bf16.gmra.mrb[4].mxu0 %v3139_v40  ;;  %1360 = vmatprep.mubr.bf16.mxu1 %v3140_v41  ;;  %v3235_v40 = vld [vmem:[%s3434_s26 + $0x228] ss:$16 sps:$4 sm:$0xff]   ;;  %v3236_v41 = vld [vmem:[%s3434_s26 + $0x244] ss:$16 sps:$4 sm:$0xff]  }
  0x5b   : > { %1649 = vmatprep.mubr.bf16.mxu0 %v3142_v42  ;;  %v3238_v42 = vld [vmem:[%s3434_s26 + $0x24c] ss:$16 sps:$4 sm:$0xff]  }
  0x61   : > { %1361 = vmatmul.mubr.bf16.gmra.mrb[8].mxu1 %v3144_v43  ;;  %v3240_v43 = vld [vmem:[%s3434_s26 + $0x240] ss:$16 sps:$4 sm:$0xff]  }
  0x62   : > { %1650 = vmatmul.mubr.bf16.gmra.mrb[8].mxu0 %v3145_v44  ;;  %1368 = vmatprep.mubr.bf16.mxu1 %v3146_v45  ;;  %v3241_v44 = vld [vmem:[%s3434_s26 + $0x248] ss:$16 sps:$4 sm:$0xff]   ;;  %v3242_v45 = vld [vmem:[%s3434_s26 + $0x264] ss:$16 sps:$4 sm:$0xff]  }
  0x63   : > { %1657 = vmatprep.mubr.bf16.mxu0 %v3148_v46  ;;  %v3244_v46 = vld [vmem:[%s3434_s26 + $0x26c] ss:$16 sps:$4 sm:$0xff]  }
  0x69   : > { %1369 = vmatmul.mubr.bf16.gmra.mrb[12].mxu1 %v3150_v47  ;;  %v3246_v47 = vld [vmem:[%s3434_s26 + $0x260] ss:$16 sps:$4 sm:$0xff]  }
  0x6a   : > { %1658 = vmatmul.mubr.bf16.gmra.mrb[12].mxu0 %v3151_v48  ;;  %1376 = vmatprep.mubr.bf16.mxu1 %v3152_v49  ;;  %v3247_v48 = vld [vmem:[%s3434_s26 + $0x268] ss:$16 sps:$4 sm:$0xff]   ;;  %v3248_v49 = vld [vmem:[%s3434_s26 + $0x284] ss:$16 sps:$4 sm:$0xff]  }
  0x6b   : > { %1665 = vmatprep.mubr.bf16.mxu0 %v3154_v50  ;;  %v3250_v50 = vld [vmem:[%s3434_s26 + $0x28c] ss:$16 sps:$4 sm:$0xff]  }
  0x71   : > { %1377 = vmatmul.mubr.bf16.gmra.mrb[16].mxu1 %v3156_v51  ;;  %v3252_v51 = vld [vmem:[%s3434_s26 + $0x280] ss:$16 sps:$4 sm:$0xff]  }
  0x72   : > { %1666 = vmatmul.mubr.bf16.gmra.mrb[16].mxu0 %v3157_v52  ;;  %1384 = vmatprep.mubr.bf16.mxu1 %v3158_v53  ;;  %v3253_v52 = vld [vmem:[%s3434_s26 + $0x288] ss:$16 sps:$4 sm:$0xff]   ;;  %v3254_v53 = vld [vmem:[%s3434_s26 + $0x2a4] ss:$16 sps:$4 sm:$0xff]  }
  0x73   : > { %1673 = vmatprep.mubr.bf16.mxu0 %v3160_v54  ;;  %v3256_v54 = vld [vmem:[%s3434_s26 + $0x2ac] ss:$16 sps:$4 sm:$0xff]  }
  0x79   : > { %1385 = vmatmul.mubr.bf16.gmra.mrb[20].mxu1 %v3162_v55  ;;  %v3258_v55 = vld [vmem:[%s3434_s26 + $0x2a0] ss:$16 sps:$4 sm:$0xff]  }
  0x7a   : > { %1674 = vmatmul.mubr.bf16.gmra.mrb[20].mxu0 %v3163_v56  ;;  %1392 = vmatprep.mubr.bf16.mxu1 %v3164_v57  ;;  %v3259_v56 = vld [vmem:[%s3434_s26 + $0x2a8] ss:$16 sps:$4 sm:$0xff]   ;;  %v3260_v57 = vld [vmem:[%s3434_s26 + $0x2c4] ss:$16 sps:$4 sm:$0xff]  }
  0x7b   : > { %1681 = vmatprep.mubr.bf16.mxu0 %v3166_v58  ;;  %v3262_v58 = vld [vmem:[%s3434_s26 + $0x2cc] ss:$16 sps:$4 sm:$0xff]  }
  0x81   : > { %1393 = vmatmul.mubr.bf16.gmra.mrb[24].mxu1 %v3168_v59  ;;  %v3264_v59 = vld [vmem:[%s3434_s26 + $0x2c0] ss:$16 sps:$4 sm:$0xff]  }
  0x82   : > { %1682 = vmatmul.mubr.bf16.gmra.mrb[24].mxu0 %v3169_v60  ;;  %1400 = vmatprep.mubr.bf16.mxu1 %v3170_v61  ;;  %v3265_v60 = vld [vmem:[%s3434_s26 + $0x2c8] ss:$16 sps:$4 sm:$0xff]   ;;  %v3266_v61 = vld [vmem:[%s3434_s26 + $0x2e4] ss:$16 sps:$4 sm:$0xff]  }
  0x83   : > { %1689 = vmatprep.mubr.bf16.mxu0 %v3172_v62  ;;  %v3268_v62 = vld [vmem:[%s3434_s26 + $0x2ec] ss:$16 sps:$4 sm:$0xff]  }
  0x89   : > { %1401 = vmatmul.mubr.bf16.gmra.mrb[28].mxu1 %v3174_v63  ;;  %v3270_v63 = vld [vmem:[%s3434_s26 + $0x2e0] ss:$16 sps:$4 sm:$0xff]  }
  0x8a   : > { %1690 = vmatmul.mubr.bf16.gmra.mrb[28].mxu0 %v3175_v0  ;;  %1408 = vmatprep.mubr.bf16.mxu1 %v3176_v1  ;;  %v3271_v0 = vld [vmem:[%s3434_s26 + $0x2e8] ss:$16 sps:$4 sm:$0xff]   ;;  %v3272_v1 = vld [vmem:[%s3434_s26 + $0x304] ss:$16 sps:$4 sm:$0xff]  }
  0x8b   : > { %1697 = vmatprep.mubr.bf16.mxu0 %v3178_v2  ;;  %v3274_v2 = vld [vmem:[%s3434_s26 + $0x30c] ss:$16 sps:$4 sm:$0xff]  }
  0x91   : > { %1409 = vmatmul.mubr.bf16.gmra.mrb[32].mxu1 %v3180_v3  ;;  %v3276_v3 = vld [vmem:[%s3434_s26 + $0x300] ss:$16 sps:$4 sm:$0xff]  }
  0x92   : > { %1698 = vmatmul.mubr.bf16.gmra.mrb[32].mxu0 %v3181_v4  ;;  %1416 = vmatprep.mubr.bf16.mxu1 %v3182_v5  ;;  %v3277_v4 = vld [vmem:[%s3434_s26 + $0x308] ss:$16 sps:$4 sm:$0xff]   ;;  %v3278_v5 = vld [vmem:[%s3434_s26 + $0x324] ss:$16 sps:$4 sm:$0xff]  }
  0x93   : > { %1705 = vmatprep.mubr.bf16.mxu0 %v3184_v6  ;;  %v3280_v6 = vld [vmem:[%s3434_s26 + $0x32c] ss:$16 sps:$4 sm:$0xff]  }
  0x99   : > { %1417 = vmatmul.mubr.bf16.gmra.mrb[36].mxu1 %v3186_v7  ;;  %v3282_v7 = vld [vmem:[%s3434_s26 + $0x320] ss:$16 sps:$4 sm:$0xff]  }
  0x9a   : > { %1706 = vmatmul.mubr.bf16.gmra.mrb[36].mxu0 %v3187_v8  ;;  %1424 = vmatprep.mubr.bf16.mxu1 %v3188_v9  ;;  %v3283_v8 = vld [vmem:[%s3434_s26 + $0x328] ss:$16 sps:$4 sm:$0xff]   ;;  %v3284_v9 = vld [vmem:[%s3434_s26 + $0x344] ss:$16 sps:$4 sm:$0xff]  }
  0x9b   : > { %1713 = vmatprep.mubr.bf16.mxu0 %v3190_v10  ;;  %v3286_v10 = vld [vmem:[%s3434_s26 + $0x34c] ss:$16 sps:$4 sm:$0xff]  }
  0xa1   : > { %1425 = vmatmul.mubr.bf16.gmra.mrb[40].mxu1 %v3192_v11  ;;  %v3288_v11 = vld [vmem:[%s3434_s26 + $0x340] ss:$16 sps:$4 sm:$0xff]  }
  0xa2   : > { %1714 = vmatmul.mubr.bf16.gmra.mrb[40].mxu0 %v3193_v12  ;;  %1432 = vmatprep.mubr.bf16.mxu1 %v3194_v13  ;;  %v3289_v12 = vld [vmem:[%s3434_s26 + $0x348] ss:$16 sps:$4 sm:$0xff]   ;;  %v3290_v13 = vld [vmem:[%s3434_s26 + $0x364] ss:$16 sps:$4 sm:$0xff]  }
  0xa3   : > { %1721 = vmatprep.mubr.bf16.mxu0 %v3196_v14  ;;  %v3292_v14 = vld [vmem:[%s3434_s26 + $0x36c] ss:$16 sps:$4 sm:$0xff]  }
  0xa9   : > { %1433 = vmatmul.mubr.bf16.gmra.mrb[44].mxu1 %v3198_v15 }
  0xaa   : > { %1722 = vmatmul.mubr.bf16.gmra.mrb[44].mxu0 %v3199_v16  ;;  %1440 = vmatprep.mubr.bf16.mxu1 %v3200_v17 }
  0xab   : > { %1729 = vmatprep.mubr.bf16.mxu0 %v3202_v18  ;;  %v3294_v18 = vld [vmem:[%s3434_s26 + $0x360] ss:$16 sps:$4 sm:$0xff]  }
  0xb1   : > { %1441 = vmatmul.mubr.bf16.gmra.mrb[48].mxu1 %v3204_v19 }
  0xb2   : > { %1730 = vmatmul.mubr.bf16.gmra.mrb[48].mxu0 %v3205_v20  ;;  %1448 = vmatprep.mubr.bf16.mxu1 %v3206_v21 }
  0xb3   : > { %1737 = vmatprep.mubr.bf16.mxu0 %v3208_v22  ;;  %v3295_v22 = vld [vmem:[%s3434_s26 + $0x368] ss:$16 sps:$4 sm:$0xff]  }
  0xb9   : > { %1449 = vmatmul.mubr.bf16.gmra.mrb[52].mxu1 %v3210_v23  ;;  %v3296_v23 = vld [vmem:[%s3434_s26 + $0x384] ss:$16 sps:$4 sm:$0xff]  }
  0xba   : > { %1738 = vmatmul.mubr.bf16.gmra.mrb[52].mxu0 %v3211_v24  ;;  %1456 = vmatprep.mubr.bf16.mxu1 %v3212_v25 }
  0xbb   : > { %1745 = vmatprep.mubr.bf16.mxu0 %v3214_v26  ;;  %v3298_v26 = vld [vmem:[%s3434_s26 + $0x38c] ss:$16 sps:$4 sm:$0xff]  }
  0xc1   : > { %1457 = vmatmul.mubr.bf16.gmra.mrb[56].mxu1 %v3216_v27 }
  0xc2   : > { %1746 = vmatmul.mubr.bf16.gmra.mrb[56].mxu0 %v3217_v28  ;;  %1464 = vmatprep.mubr.bf16.mxu1 %v3218_v29 }
  0xc3   : > { %1753 = vmatprep.mubr.bf16.mxu0 %v3220_v30 }
  0xc9   : > { %1465 = vmatmul.mubr.bf16.gmra.mrb[60].mxu1 %v3222_v31 }
  0xca   : > { %1754 = vmatmul.mubr.bf16.gmra.mrb[60].mxu0 %v3223_v32  ;;  %1472 = vmatprep.mubr.bf16.mxu1 %v3224_v33 }
  0xcb   : > { %1761 = vmatprep.mubr.bf16.mxu0 %v3226_v34 }
  0xd1   : > { %1473 = vmatmul.mubr.bf16.gmra.mrb[64].mxu1 %v3228_v35 }
  0xd2   : > { %1762 = vmatmul.mubr.bf16.gmra.mrb[64].mxu0 %v3229_v36  ;;  %1480 = vmatprep.mubr.bf16.mxu1 %v3230_v37 }
  0xd3   : > { %1769 = vmatprep.mubr.bf16.mxu0 %v3232_v38 }
  0xd9   : > { %1481 = vmatmul.mubr.bf16.gmra.mrb[68].mxu1 %v3234_v39 }
  0xda   : > { %1770 = vmatmul.mubr.bf16.gmra.mrb[68].mxu0 %v3235_v40  ;;  %1488 = vmatprep.mubr.bf16.mxu1 %v3236_v41 }
  0xdb   : > { %1777 = vmatprep.mubr.bf16.mxu0 %v3238_v42  ;;  %v3300_v42 = vld [vmem:[%s3434_s26 + $0x380] ss:$16 sps:$4 sm:$0xff]  }
  0xe1   : > { %1489 = vmatmul.mubr.bf16.gmra.mrb[72].mxu1 %v3240_v43 }
  0xe2   : > { %1778 = vmatmul.mubr.bf16.gmra.mrb[72].mxu0 %v3241_v44  ;;  %1496 = vmatprep.mubr.bf16.mxu1 %v3242_v45 }
  0xe3   : > { %1785 = vmatprep.mubr.bf16.mxu0 %v3244_v46  ;;  %v3301_v46 = vld [vmem:[%s3434_s26 + $0x388] ss:$16 sps:$4 sm:$0xff]  }
  0xe9   : > { %1497 = vmatmul.mubr.bf16.gmra.mrb[76].mxu1 %v3246_v47  ;;  %v3302_v47 = vld [vmem:[%s3434_s26 + $0x3a4] ss:$16 sps:$4 sm:$0xff]  }
  0xea   : > { %1786 = vmatmul.mubr.bf16.gmra.mrb[76].mxu0 %v3247_v48  ;;  %1504 = vmatprep.mubr.bf16.mxu1 %v3248_v49 }
  0xeb   : > { %1793 = vmatprep.mubr.bf16.mxu0 %v3250_v50  ;;  %v3304_v50 = vld [vmem:[%s3434_s26 + $0x3ac] ss:$16 sps:$4 sm:$0xff]  }
  0xf1   : > { %1505 = vmatmul.mubr.bf16.gmra.mrb[80].mxu1 %v3252_v51 }
  0xf2   : > { %1794 = vmatmul.mubr.bf16.gmra.mrb[80].mxu0 %v3253_v52  ;;  %1512 = vmatprep.mubr.bf16.mxu1 %v3254_v53 }
  0xf3   : > { %1801 = vmatprep.mubr.bf16.mxu0 %v3256_v54 }
  0xf9   : > { %1513 = vmatmul.mubr.bf16.gmra.mrb[84].mxu1 %v3258_v55 }
  0xfa   : > { %1802 = vmatmul.mubr.bf16.gmra.mrb[84].mxu0 %v3259_v56  ;;  %1520 = vmatprep.mubr.bf16.mxu1 %v3260_v57 }
  0xfb   : > { %1809 = vmatprep.mubr.bf16.mxu0 %v3262_v58 }
 0x101   : > { %1521 = vmatmul.mubr.bf16.gmra.mrb[88].mxu1 %v3264_v59 }
 0x102   : > { %1810 = vmatmul.mubr.bf16.gmra.mrb[88].mxu0 %v3265_v60  ;;  %1528 = vmatprep.mubr.bf16.mxu1 %v3266_v61 }
 0x103   : > { %1817 = vmatprep.mubr.bf16.mxu0 %v3268_v62 }
 0x109   : > { %1529 = vmatmul.mubr.bf16.gmra.mrb[92].mxu1 %v3270_v63 }
 0x10a   : > { %1818 = vmatmul.mubr.bf16.gmra.mrb[92].mxu0 %v3271_v0  ;;  %1536 = vmatprep.mubr.bf16.mxu1 %v3272_v1 }
 0x10b   : > { %1825 = vmatprep.mubr.bf16.mxu0 %v3274_v2 }
 0x111   : > { %1537 = vmatmul.mubr.bf16.gmra.mrb[96].mxu1 %v3276_v3 }
 0x112   : > { %1826 = vmatmul.mubr.bf16.gmra.mrb[96].mxu0 %v3277_v4  ;;  %1544 = vmatprep.mubr.bf16.mxu1 %v3278_v5  ;;  %v3306_v4 = vld [vmem:[%s3434_s26 + $0x3a0] ss:$16 sps:$4 sm:$0xff]  }
 0x113   : > { %1833 = vmatprep.mubr.bf16.mxu0 %v3280_v6 }
 0x119   : > { %1545 = vmatmul.mubr.bf16.gmra.mrb[100].mxu1 %v3282_v7 }
 0x11a   : > { %1834 = vmatmul.mubr.bf16.gmra.mrb[100].mxu0 %v3283_v8  ;;  %1552 = vmatprep.mubr.bf16.mxu1 %v3284_v9  ;;  %v3307_v8 = vld [vmem:[%s3434_s26 + $0x3a8] ss:$16 sps:$4 sm:$0xff]   ;;  %v3308_v9 = vld [vmem:[%s3434_s26 + $0x3c4] ss:$16 sps:$4 sm:$0xff]  }
 0x11b   : > { %1841 = vmatprep.mubr.bf16.mxu0 %v3286_v10 }
 0x121   : > { %1553 = vmatmul.mubr.bf16.gmra.mrb[104].mxu1 %v3288_v11 }
 0x122   : > { %1842 = vmatmul.mubr.bf16.gmra.mrb[104].mxu0 %v3289_v12  ;;  %1560 = vmatprep.mubr.bf16.mxu1 %v3290_v13  ;;  %v3310_v12 = vld [vmem:[%s3434_s26 + $0x3cc] ss:$16 sps:$4 sm:$0xff]  }
 0x123   : > { %1849 = vmatprep.mubr.bf16.mxu0 %v3292_v14 }
 0x124   : > { %v1346_v15 = vpop.f32.mrb[0].mxu1 }
 0x125   : > { %v1635_v16 = vpop.f32.mrb[0].mxu0  ;;  %v1348_v17 = vpop.f32.mrb[1].mxu1 }
 0x126   : > { %v1636_v19 = vadd.f32 %v1635_v16, %v1346_v15  ;;  %v1637_v20 = vpop.f32.mrb[1].mxu0  ;;  %v1349_v21 = vpop.f32.mrb[2].mxu1 }
 0x127   : > { %v1638_v24 = vpop.f32.mrb[2].mxu0  ;;  %v1351_v25 = vpop.f32.mrb[3].mxu1 }
 0x128   : > { %v2943_v27 = vpack.c.bf16 %v1636_v19, %v1636_v19  ;;  %v2347_v28 = vmul.f32 %v1636_v19, %v1636_v19  ;;  %v1639_v29 = vadd.f32 %v1638_v24, %v1349_v21  ;;  %v1640_v30 = vpop.f32.mrb[3].mxu0  ;;  %v2212_v31 = vsel %vm2211_vm1, %v1636_v19, 0.0 }
 0x129   : > { %1561 = vmatmul.mubr.bf16.gmra.mrb[108].mxu1 %v3294_v18  ;;  %v3312_v30 = vld [vmem:[%s3434_s26 + $0x3c0] ss:$16 sps:$4 sm:$0xff]  }
 0x12a   : > { %2147 = vst.msk [vmem:[%s3586_s29] sm:$0xf] %vm2146_vm0, %v2943_v27  ;;  %v2944_v32 = vpack.c.bf16 %v1639_v29, %v1639_v29  ;;  %v2213_v33 = vsel %vm2211_vm1, %v1639_v29, 0.0  ;;  %v2348_v34 = vmul.f32 %v1639_v29, %v1639_v29  ;;  %1850 = vmatmul.mubr.bf16.gmra.mrb[108].mxu0 %v3295_v22  ;;  %1568 = vmatprep.mubr.bf16.mxu1 %v3296_v23  ;;  %v2411_v36 = vsel %vm2211_vm1, %v2347_v28, 0.0 }
 0x12b   : > { %v2214_v35 = vadd.f32 %v2213_v33, %v2212_v31  ;;  %1857 = vmatprep.mubr.bf16.mxu0 %v3298_v26 }
 0x12c   : > { %2148 = vst.msk [vmem:[%s3586_s29 + $0x4] sm:$0xf] %vm2146_vm0, %v2944_v32  ;;  %v2412_v37 = vsel %vm2211_vm1, %v2348_v34, 0.0  ;;  %v1354_v38 = vpop.f32.mrb[4].mxu1  ;;  %v3313_v34 = vld [vmem:[%s3434_s26 + $0x3c8] ss:$16 sps:$4 sm:$0xff]  }
 0x12d   : > { %v2413_v39 = vadd.f32 %v2412_v37, %v2411_v36  ;;  %v1643_v40 = vpop.f32.mrb[4].mxu0  ;;  %v1356_v41 = vpop.f32.mrb[5].mxu1 }
 0x12e   : > { %v1644_v43 = vadd.f32 %v1643_v40, %v1354_v38  ;;  %v1645_v44 = vpop.f32.mrb[5].mxu0  ;;  %v1357_v45 = vpop.f32.mrb[6].mxu1  ;;  %v3316_v38 = vld [vmem:[%s3434_s26 + $0x3ec] ss:$16 sps:$4 sm:$0xff]  }
 0x12f   : > { %v1646_v48 = vpop.f32.mrb[6].mxu0  ;;  %v1359_v49 = vpop.f32.mrb[7].mxu1 }
 0x130   : > { %v2945_v51 = vpack.c.bf16 %v1644_v43, %v1644_v43  ;;  %v2215_v52 = vsel %vm2211_vm1, %v1644_v43, 0.0  ;;  %v2349_v53 = vmul.f32 %v1644_v43, %v1644_v43  ;;  %v1647_v54 = vadd.f32 %v1646_v48, %v1357_v45  ;;  %v1648_v55 = vpop.f32.mrb[7].mxu0 }
 0x131   : > { %v2216_v56 = vadd.f32 %v2215_v52, %v2214_v35  ;;  %1569 = vmatmul.mubr.bf16.gmra.mrb[112].mxu1 %v3300_v42  ;;  %v3314_v35 = vld [vmem:[%s3434_s26 + $0x3e4] ss:$16 sps:$4 sm:$0xff]  }
 0x132   : > { %2149 = vst.msk [vmem:[%s3586_s29 + $0x8] sm:$0xf] %vm2146_vm0, %v2945_v51  ;;  %v2414_v57 = vsel %vm2211_vm1, %v2349_v53, 0.0  ;;  %v2946_v58 = vpack.c.bf16 %v1647_v54, %v1647_v54  ;;  %v2217_v59 = vsel %vm2211_vm1, %v1647_v54, 0.0  ;;  %v2350_v60 = vmul.f32 %v1647_v54, %v1647_v54  ;;  %1858 = vmatmul.mubr.bf16.gmra.mrb[112].mxu0 %v3301_v46  ;;  %1576 = vmatprep.mubr.bf16.mxu1 %v3302_v47 }
 0x133   : > { %v2415_v61 = vadd.f32 %v2414_v57, %v2413_v39  ;;  %v2218_v62 = vadd.f32 %v2217_v59, %v2216_v56  ;;  %1865 = vmatprep.mubr.bf16.mxu0 %v3304_v50  ;;  %v3318_v56 = vld [vmem:[%s3434_s26 + $0x3e0] ss:$16 sps:$4 sm:$0xff]  }
 0x134   : > { %2150 = vst.msk [vmem:[%s3586_s29 + $0xc] sm:$0xf] %vm2146_vm0, %v2946_v58  ;;  %v2416_v63 = vsel %vm2211_vm1, %v2350_v60, 0.0  ;;  %v1362_v0 = vpop.f32.mrb[8].mxu1  ;;  %v3319_v60 = vld [vmem:[%s3434_s26 + $0x3e8] ss:$16 sps:$4 sm:$0xff]  }
 0x135   : > { %v2417_v1 = vadd.f32 %v2416_v63, %v2415_v61  ;;  %v1651_v2 = vpop.f32.mrb[8].mxu0  ;;  %v1364_v3 = vpop.f32.mrb[9].mxu1 }
 0x136   : > { %v1652_v5 = vadd.f32 %v1651_v2, %v1362_v0  ;;  %v1653_v6 = vpop.f32.mrb[9].mxu0  ;;  %v1365_v7 = vpop.f32.mrb[10].mxu1 }
 0x137   : > { %v1654_v10 = vpop.f32.mrb[10].mxu0  ;;  %v1367_v11 = vpop.f32.mrb[11].mxu1 }
 0x138   : > { %v2947_v13 = vpack.c.bf16 %v1652_v5, %v1652_v5  ;;  %v2219_v14 = vsel %vm2211_vm1, %v1652_v5, 0.0  ;;  %v2351_v15 = vmul.f32 %v1652_v5, %v1652_v5  ;;  %v1655_v16 = vadd.f32 %v1654_v10, %v1365_v7  ;;  %v1656_v17 = vpop.f32.mrb[11].mxu0 }
 0x139   : > { %v2220_v18 = vadd.f32 %v2219_v14, %v2218_v62  ;;  %1577 = vmatmul.mubr.bf16.gmra.mrb[116].mxu1 %v3306_v4 }
 0x13a   : > { %2151 = vst.msk [vmem:[%s3586_s29 + $0x10] sm:$0xf] %vm2146_vm0, %v2947_v13  ;;  %v2418_v19 = vsel %vm2211_vm1, %v2351_v15, 0.0  ;;  %v2948_v20 = vpack.c.bf16 %v1655_v16, %v1655_v16  ;;  %v2221_v21 = vsel %vm2211_vm1, %v1655_v16, 0.0  ;;  %v2352_v22 = vmul.f32 %v1655_v16, %v1655_v16  ;;  %1866 = vmatmul.mubr.bf16.gmra.mrb[116].mxu0 %v3307_v8  ;;  %1584 = vmatprep.mubr.bf16.mxu1 %v3308_v9 }
 0x13b   : > { %v2419_v23 = vadd.f32 %v2418_v19, %v2417_v1  ;;  %v2222_v24 = vadd.f32 %v2221_v21, %v2220_v18  ;;  %1873 = vmatprep.mubr.bf16.mxu0 %v3310_v12 }
 0x13c   : > { %2152 = vst.msk [vmem:[%s3586_s29 + $0x14] sm:$0xf] %vm2146_vm0, %v2948_v20  ;;  %v2420_v25 = vsel %vm2211_vm1, %v2352_v22, 0.0  ;;  %v1370_v26 = vpop.f32.mrb[12].mxu1 }
 0x13d   : > { %v2421_v27 = vadd.f32 %v2420_v25, %v2419_v23  ;;  %v1659_v28 = vpop.f32.mrb[12].mxu0  ;;  %v1372_v29 = vpop.f32.mrb[13].mxu1 }
 0x13e   : > { %v1660_v31 = vadd.f32 %v1659_v28, %v1370_v26  ;;  %v1661_v32 = vpop.f32.mrb[13].mxu0  ;;  %v1373_v33 = vpop.f32.mrb[14].mxu1 }
 0x13f   : > { %v1662_v36 = vpop.f32.mrb[14].mxu0  ;;  %v1375_v37 = vpop.f32.mrb[15].mxu1 }
 0x140   : > { %v2949_v39 = vpack.c.bf16 %v1660_v31, %v1660_v31  ;;  %v2223_v40 = vsel %vm2211_vm1, %v1660_v31, 0.0  ;;  %v2353_v41 = vmul.f32 %v1660_v31, %v1660_v31  ;;  %v1663_v42 = vadd.f32 %v1662_v36, %v1373_v33  ;;  %v1664_v43 = vpop.f32.mrb[15].mxu0 }
 0x141   : > { %v2224_v44 = vadd.f32 %v2223_v40, %v2222_v24  ;;  %1585 = vmatmul.mubr.bf16.gmra.mrb[120].mxu1 %v3312_v30 }
 0x142   : > { %2153 = vst.msk [vmem:[%s3586_s29 + $0x18] sm:$0xf] %vm2146_vm0, %v2949_v39  ;;  %v2422_v45 = vsel %vm2211_vm1, %v2353_v41, 0.0  ;;  %v2950_v46 = vpack.c.bf16 %v1663_v42, %v1663_v42  ;;  %v2225_v47 = vsel %vm2211_vm1, %v1663_v42, 0.0  ;;  %v2354_v48 = vmul.f32 %v1663_v42, %v1663_v42  ;;  %1874 = vmatmul.mubr.bf16.gmra.mrb[120].mxu0 %v3313_v34  ;;  %1592 = vmatprep.mubr.bf16.mxu1 %v3314_v35 }
 0x143   : > { %v2423_v49 = vadd.f32 %v2422_v45, %v2421_v27  ;;  %v2226_v50 = vadd.f32 %v2225_v47, %v2224_v44  ;;  %1881 = vmatprep.mubr.bf16.mxu0 %v3316_v38 }
 0x144   : > { %2154 = vst.msk [vmem:[%s3586_s29 + $0x1c] sm:$0xf] %vm2146_vm0, %v2950_v46  ;;  %v2424_v51 = vsel %vm2211_vm1, %v2354_v48, 0.0  ;;  %v1378_v52 = vpop.f32.mrb[16].mxu1 }
 0x145   : > { %v2425_v53 = vadd.f32 %v2424_v51, %v2423_v49  ;;  %v1667_v54 = vpop.f32.mrb[16].mxu0  ;;  %v1380_v55 = vpop.f32.mrb[17].mxu1 }
 0x146   : > { %v1668_v57 = vadd.f32 %v1667_v54, %v1378_v52  ;;  %v1669_v58 = vpop.f32.mrb[17].mxu0  ;;  %v1381_v59 = vpop.f32.mrb[18].mxu1 }
 0x147   : > { %v1670_v61 = vpop.f32.mrb[18].mxu0  ;;  %v1383_v62 = vpop.f32.mrb[19].mxu1 }
 0x148   : > { %v2951_v63 = vpack.c.bf16 %v1668_v57, %v1668_v57  ;;  %v2227_v0 = vsel %vm2211_vm1, %v1668_v57, 0.0  ;;  %v2355_v1 = vmul.f32 %v1668_v57, %v1668_v57  ;;  %v1671_v2 = vadd.f32 %v1670_v61, %v1381_v59  ;;  %v1672_v3 = vpop.f32.mrb[19].mxu0 }
 0x149   : > { %v2228_v4 = vadd.f32 %v2227_v0, %v2226_v50  ;;  %1593 = vmatmul.mubr.bf16.gmra.mrb[124].mxu1 %v3318_v56 }
 0x14a   : > { %2155 = vst.msk [vmem:[%s3586_s29 + $0x20] sm:$0xf] %vm2146_vm0, %v2951_v63  ;;  %v2426_v5 = vsel %vm2211_vm1, %v2355_v1, 0.0  ;;  %v2952_v6 = vpack.c.bf16 %v1671_v2, %v1671_v2  ;;  %v2229_v7 = vsel %vm2211_vm1, %v1671_v2, 0.0  ;;  %v2356_v8 = vmul.f32 %v1671_v2, %v1671_v2  ;;  %1882 = vmatmul.mubr.bf16.gmra.mrb[124].mxu0 %v3319_v60 }
 0x14b   : > { %v2427_v9 = vadd.f32 %v2426_v5, %v2425_v53  ;;  %v2230_v10 = vadd.f32 %v2229_v7, %v2228_v4 }
 0x14c   : > { %2156 = vst.msk [vmem:[%s3586_s29 + $0x24] sm:$0xf] %vm2146_vm0, %v2952_v6  ;;  %v2428_v11 = vsel %vm2211_vm1, %v2356_v8, 0.0  ;;  %v1386_v12 = vpop.f32.mrb[20].mxu1 }
 0x14d   : > { %v2429_v13 = vadd.f32 %v2428_v11, %v2427_v9  ;;  %v1675_v14 = vpop.f32.mrb[20].mxu0  ;;  %v1388_v15 = vpop.f32.mrb[21].mxu1 }
 0x14e   : > { %v1676_v16 = vadd.f32 %v1675_v14, %v1386_v12  ;;  %v1677_v17 = vpop.f32.mrb[21].mxu0  ;;  %v1389_v18 = vpop.f32.mrb[22].mxu1 }
 0x14f   : > { %v1678_v19 = vpop.f32.mrb[22].mxu0  ;;  %v1391_v20 = vpop.f32.mrb[23].mxu1 }
 0x150   : > { %v2953_v21 = vpack.c.bf16 %v1676_v16, %v1676_v16  ;;  %v2231_v22 = vsel %vm2211_vm1, %v1676_v16, 0.0  ;;  %v2357_v23 = vmul.f32 %v1676_v16, %v1676_v16  ;;  %v1679_v24 = vadd.f32 %v1678_v19, %v1389_v18  ;;  %v1680_v25 = vpop.f32.mrb[23].mxu0 }
 0x151   : > { %v2232_v26 = vadd.f32 %v2231_v22, %v2230_v10 }
 0x152   : > { %2157 = vst.msk [vmem:[%s3586_s29 + $0x28] sm:$0xf] %vm2146_vm0, %v2953_v21  ;;  %v2430_v27 = vsel %vm2211_vm1, %v2357_v23, 0.0  ;;  %v2954_v28 = vpack.c.bf16 %v1679_v24, %v1679_v24  ;;  %v2233_v29 = vsel %vm2211_vm1, %v1679_v24, 0.0  ;;  %v2358_v30 = vmul.f32 %v1679_v24, %v1679_v24 }
 0x153   : > { %v2431_v31 = vadd.f32 %v2430_v27, %v2429_v13  ;;  %v2234_v32 = vadd.f32 %v2233_v29, %v2232_v26 }
 0x154   : > { %2158 = vst.msk [vmem:[%s3586_s29 + $0x2c] sm:$0xf] %vm2146_vm0, %v2954_v28  ;;  %v2432_v33 = vsel %vm2211_vm1, %v2358_v30, 0.0  ;;  %v1394_v34 = vpop.f32.mrb[24].mxu1 }
 0x155   : > { %v2433_v35 = vadd.f32 %v2432_v33, %v2431_v31  ;;  %v1683_v36 = vpop.f32.mrb[24].mxu0  ;;  %v1396_v37 = vpop.f32.mrb[25].mxu1 }
 0x156   : > { %v1684_v38 = vadd.f32 %v1683_v36, %v1394_v34  ;;  %v1685_v39 = vpop.f32.mrb[25].mxu0  ;;  %v1397_v40 = vpop.f32.mrb[26].mxu1 }
 0x157   : > { %v1686_v41 = vpop.f32.mrb[26].mxu0  ;;  %v1399_v42 = vpop.f32.mrb[27].mxu1 }
 0x158   : > { %v2955_v43 = vpack.c.bf16 %v1684_v38, %v1684_v38  ;;  %v2235_v44 = vsel %vm2211_vm1, %v1684_v38, 0.0  ;;  %v2359_v45 = vmul.f32 %v1684_v38, %v1684_v38  ;;  %v1687_v46 = vadd.f32 %v1686_v41, %v1397_v40  ;;  %v1688_v47 = vpop.f32.mrb[27].mxu0 }
 0x159   : > { %v2236_v48 = vadd.f32 %v2235_v44, %v2234_v32 }
 0x15a   : > { %2159 = vst.msk [vmem:[%s3586_s29 + $0x30] sm:$0xf] %vm2146_vm0, %v2955_v43  ;;  %v2434_v49 = vsel %vm2211_vm1, %v2359_v45, 0.0  ;;  %v2956_v50 = vpack.c.bf16 %v1687_v46, %v1687_v46  ;;  %v2237_v51 = vsel %vm2211_vm1, %v1687_v46, 0.0  ;;  %v2360_v52 = vmul.f32 %v1687_v46, %v1687_v46 }
 0x15b   : > { %v2435_v53 = vadd.f32 %v2434_v49, %v2433_v35  ;;  %v2238_v54 = vadd.f32 %v2237_v51, %v2236_v48 }
 0x15c   : > { %2160 = vst.msk [vmem:[%s3586_s29 + $0x34] sm:$0xf] %vm2146_vm0, %v2956_v50  ;;  %v2436_v55 = vsel %vm2211_vm1, %v2360_v52, 0.0  ;;  %v1402_v56 = vpop.f32.mrb[28].mxu1 }
 0x15d   : > { %v2437_v57 = vadd.f32 %v2436_v55, %v2435_v53  ;;  %v1691_v58 = vpop.f32.mrb[28].mxu0  ;;  %v1404_v59 = vpop.f32.mrb[29].mxu1 }
 0x15e   : > { %v1692_v60 = vadd.f32 %v1691_v58, %v1402_v56  ;;  %v1693_v61 = vpop.f32.mrb[29].mxu0  ;;  %v1405_v62 = vpop.f32.mrb[30].mxu1 }
 0x15f   : > { %v1694_v63 = vpop.f32.mrb[30].mxu0  ;;  %v1407_v0 = vpop.f32.mrb[31].mxu1 }
 0x160   : > { %v2957_v1 = vpack.c.bf16 %v1692_v60, %v1692_v60  ;;  %v2239_v2 = vsel %vm2211_vm1, %v1692_v60, 0.0  ;;  %v2361_v3 = vmul.f32 %v1692_v60, %v1692_v60  ;;  %v1695_v4 = vadd.f32 %v1694_v63, %v1405_v62  ;;  %v1696_v5 = vpop.f32.mrb[31].mxu0 }
 0x161   : > { %v2240_v6 = vadd.f32 %v2239_v2, %v2238_v54 }
 0x162   : > { %2161 = vst.msk [vmem:[%s3586_s29 + $0x38] sm:$0xf] %vm2146_vm0, %v2957_v1  ;;  %v2438_v7 = vsel %vm2211_vm1, %v2361_v3, 0.0  ;;  %v2958_v8 = vpack.c.bf16 %v1695_v4, %v1695_v4  ;;  %v2241_v9 = vsel %vm2211_vm1, %v1695_v4, 0.0  ;;  %v2362_v10 = vmul.f32 %v1695_v4, %v1695_v4 }
 0x163   : > { %v2439_v11 = vadd.f32 %v2438_v7, %v2437_v57  ;;  %v2242_v12 = vadd.f32 %v2241_v9, %v2240_v6 }
 0x164   : > { %2162 = vst.msk [vmem:[%s3586_s29 + $0x3c] sm:$0xf] %vm2146_vm0, %v2958_v8  ;;  %v2440_v13 = vsel %vm2211_vm1, %v2362_v10, 0.0  ;;  %v1410_v14 = vpop.f32.mrb[32].mxu1 }
 0x165   : > { %v2441_v15 = vadd.f32 %v2440_v13, %v2439_v11  ;;  %v1699_v16 = vpop.f32.mrb[32].mxu0  ;;  %v1412_v17 = vpop.f32.mrb[33].mxu1 }
 0x166   : > { %v1700_v18 = vadd.f32 %v1699_v16, %v1410_v14  ;;  %v1701_v19 = vpop.f32.mrb[33].mxu0  ;;  %v1413_v20 = vpop.f32.mrb[34].mxu1 }
 0x167   : > { %v1702_v21 = vpop.f32.mrb[34].mxu0  ;;  %v1415_v22 = vpop.f32.mrb[35].mxu1 }
 0x168   : > { %v2959_v23 = vpack.c.bf16 %v1700_v18, %v1700_v18  ;;  %v2243_v24 = vsel %vm2211_vm1, %v1700_v18, 0.0  ;;  %v2363_v25 = vmul.f32 %v1700_v18, %v1700_v18  ;;  %v1703_v26 = vadd.f32 %v1702_v21, %v1413_v20  ;;  %v1704_v27 = vpop.f32.mrb[35].mxu0 }
 0x169   : > { %v2244_v28 = vadd.f32 %v2243_v24, %v2242_v12 }
 0x16a   : > { %2163 = vst.msk [vmem:[%s3586_s29 + $0x40] sm:$0xf] %vm2146_vm0, %v2959_v23  ;;  %v2442_v29 = vsel %vm2211_vm1, %v2363_v25, 0.0  ;;  %v2960_v30 = vpack.c.bf16 %v1703_v26, %v1703_v26  ;;  %v2245_v31 = vsel %vm2211_vm1, %v1703_v26, 0.0  ;;  %v2364_v32 = vmul.f32 %v1703_v26, %v1703_v26 }
 0x16b   : > { %v2443_v33 = vadd.f32 %v2442_v29, %v2441_v15  ;;  %v2246_v34 = vadd.f32 %v2245_v31, %v2244_v28 }
 0x16c   : > { %2164 = vst.msk [vmem:[%s3586_s29 + $0x44] sm:$0xf] %vm2146_vm0, %v2960_v30  ;;  %v2444_v35 = vsel %vm2211_vm1, %v2364_v32, 0.0  ;;  %v1418_v36 = vpop.f32.mrb[36].mxu1 }
 0x16d   : > { %v2445_v37 = vadd.f32 %v2444_v35, %v2443_v33  ;;  %v1707_v38 = vpop.f32.mrb[36].mxu0  ;;  %v1420_v39 = vpop.f32.mrb[37].mxu1 }
 0x16e   : > { %v1708_v40 = vadd.f32 %v1707_v38, %v1418_v36  ;;  %v1709_v41 = vpop.f32.mrb[37].mxu0  ;;  %v1421_v42 = vpop.f32.mrb[38].mxu1 }
 0x16f   : > { %v1710_v43 = vpop.f32.mrb[38].mxu0  ;;  %v1423_v44 = vpop.f32.mrb[39].mxu1 }
 0x170   : > { %v2961_v45 = vpack.c.bf16 %v1708_v40, %v1708_v40  ;;  %v2247_v46 = vsel %vm2211_vm1, %v1708_v40, 0.0  ;;  %v2365_v47 = vmul.f32 %v1708_v40, %v1708_v40  ;;  %v1711_v48 = vadd.f32 %v1710_v43, %v1421_v42  ;;  %v1712_v49 = vpop.f32.mrb[39].mxu0 }
 0x171   : > { %v2248_v50 = vadd.f32 %v2247_v46, %v2246_v34 }
 0x172   : > { %2165 = vst.msk [vmem:[%s3586_s29 + $0x48] sm:$0xf] %vm2146_vm0, %v2961_v45  ;;  %v2446_v51 = vsel %vm2211_vm1, %v2365_v47, 0.0  ;;  %v2962_v52 = vpack.c.bf16 %v1711_v48, %v1711_v48  ;;  %v2249_v53 = vsel %vm2211_vm1, %v1711_v48, 0.0  ;;  %v2366_v54 = vmul.f32 %v1711_v48, %v1711_v48 }
 0x173   : > { %v2447_v55 = vadd.f32 %v2446_v51, %v2445_v37  ;;  %v2250_v56 = vadd.f32 %v2249_v53, %v2248_v50 }
 0x174   : > { %2166 = vst.msk [vmem:[%s3586_s29 + $0x4c] sm:$0xf] %vm2146_vm0, %v2962_v52  ;;  %v2448_v57 = vsel %vm2211_vm1, %v2366_v54, 0.0  ;;  %v1426_v58 = vpop.f32.mrb[40].mxu1 }
 0x175   : > { %v2449_v59 = vadd.f32 %v2448_v57, %v2447_v55  ;;  %v1715_v60 = vpop.f32.mrb[40].mxu0  ;;  %v1428_v61 = vpop.f32.mrb[41].mxu1 }
 0x176   : > { %v1716_v62 = vadd.f32 %v1715_v60, %v1426_v58  ;;  %v1717_v63 = vpop.f32.mrb[41].mxu0  ;;  %v1429_v0 = vpop.f32.mrb[42].mxu1 }
 0x177   : > { %v1718_v1 = vpop.f32.mrb[42].mxu0  ;;  %v1431_v2 = vpop.f32.mrb[43].mxu1 }
 0x178   : > { %v2963_v3 = vpack.c.bf16 %v1716_v62, %v1716_v62  ;;  %v2251_v4 = vsel %vm2211_vm1, %v1716_v62, 0.0  ;;  %v2367_v5 = vmul.f32 %v1716_v62, %v1716_v62  ;;  %v1719_v6 = vadd.f32 %v1718_v1, %v1429_v0  ;;  %v1720_v7 = vpop.f32.mrb[43].mxu0 }
 0x179   : > { %v2252_v8 = vadd.f32 %v2251_v4, %v2250_v56 }
 0x17a   : > { %2167 = vst.msk [vmem:[%s3586_s29 + $0x50] sm:$0xf] %vm2146_vm0, %v2963_v3  ;;  %v2450_v9 = vsel %vm2211_vm1, %v2367_v5, 0.0  ;;  %v2964_v10 = vpack.c.bf16 %v1719_v6, %v1719_v6  ;;  %v2253_v11 = vsel %vm2211_vm1, %v1719_v6, 0.0  ;;  %v2368_v12 = vmul.f32 %v1719_v6, %v1719_v6 }
 0x17b   : > { %v2451_v13 = vadd.f32 %v2450_v9, %v2449_v59  ;;  %v2254_v14 = vadd.f32 %v2253_v11, %v2252_v8 }
 0x17c   : > { %2168 = vst.msk [vmem:[%s3586_s29 + $0x54] sm:$0xf] %vm2146_vm0, %v2964_v10  ;;  %v2452_v15 = vsel %vm2211_vm1, %v2368_v12, 0.0  ;;  %v1434_v16 = vpop.f32.mrb[44].mxu1 }
 0x17d   : > { %v2453_v17 = vadd.f32 %v2452_v15, %v2451_v13  ;;  %v1723_v18 = vpop.f32.mrb[44].mxu0  ;;  %v1436_v19 = vpop.f32.mrb[45].mxu1 }
 0x17e   : > { %v1724_v20 = vadd.f32 %v1723_v18, %v1434_v16  ;;  %v1725_v21 = vpop.f32.mrb[45].mxu0  ;;  %v1437_v22 = vpop.f32.mrb[46].mxu1 }
 0x17f   : > { %v1726_v23 = vpop.f32.mrb[46].mxu0  ;;  %v1439_v24 = vpop.f32.mrb[47].mxu1 }
 0x180   : > { %v2965_v25 = vpack.c.bf16 %v1724_v20, %v1724_v20  ;;  %v2255_v26 = vsel %vm2211_vm1, %v1724_v20, 0.0  ;;  %v2369_v27 = vmul.f32 %v1724_v20, %v1724_v20  ;;  %v1727_v28 = vadd.f32 %v1726_v23, %v1437_v22  ;;  %v1728_v29 = vpop.f32.mrb[47].mxu0 }
 0x181   : > { %v2256_v30 = vadd.f32 %v2255_v26, %v2254_v14 }
 0x182   : > { %2169 = vst.msk [vmem:[%s3586_s29 + $0x58] sm:$0xf] %vm2146_vm0, %v2965_v25  ;;  %v2454_v31 = vsel %vm2211_vm1, %v2369_v27, 0.0  ;;  %v2966_v32 = vpack.c.bf16 %v1727_v28, %v1727_v28  ;;  %v2257_v33 = vsel %vm2211_vm1, %v1727_v28, 0.0  ;;  %v2370_v34 = vmul.f32 %v1727_v28, %v1727_v28 }
 0x183   : > { %v2455_v35 = vadd.f32 %v2454_v31, %v2453_v17  ;;  %v2258_v36 = vadd.f32 %v2257_v33, %v2256_v30 }
 0x184   : > { %2170 = vst.msk [vmem:[%s3586_s29 + $0x5c] sm:$0xf] %vm2146_vm0, %v2966_v32  ;;  %v2456_v37 = vsel %vm2211_vm1, %v2370_v34, 0.0  ;;  %v1442_v38 = vpop.f32.mrb[48].mxu1 }
 0x185   : > { %v2457_v39 = vadd.f32 %v2456_v37, %v2455_v35  ;;  %v1731_v40 = vpop.f32.mrb[48].mxu0  ;;  %v1444_v41 = vpop.f32.mrb[49].mxu1 }
 0x186   : > { %v1732_v42 = vadd.f32 %v1731_v40, %v1442_v38  ;;  %v1733_v43 = vpop.f32.mrb[49].mxu0  ;;  %v1445_v44 = vpop.f32.mrb[50].mxu1 }
 0x187   : > { %v1734_v45 = vpop.f32.mrb[50].mxu0  ;;  %v1447_v46 = vpop.f32.mrb[51].mxu1 }
 0x188   : > { %v2967_v47 = vpack.c.bf16 %v1732_v42, %v1732_v42  ;;  %v2259_v48 = vsel %vm2211_vm1, %v1732_v42, 0.0  ;;  %v2371_v49 = vmul.f32 %v1732_v42, %v1732_v42  ;;  %v1735_v50 = vadd.f32 %v1734_v45, %v1445_v44  ;;  %v1736_v51 = vpop.f32.mrb[51].mxu0 }
 0x189   : > { %v2260_v52 = vadd.f32 %v2259_v48, %v2258_v36 }
 0x18a   : > { %2171 = vst.msk [vmem:[%s3586_s29 + $0x60] sm:$0xf] %vm2146_vm0, %v2967_v47  ;;  %v2458_v53 = vsel %vm2211_vm1, %v2371_v49, 0.0  ;;  %v2968_v54 = vpack.c.bf16 %v1735_v50, %v1735_v50  ;;  %v2261_v55 = vsel %vm2211_vm1, %v1735_v50, 0.0  ;;  %v2372_v56 = vmul.f32 %v1735_v50, %v1735_v50 }
 0x18b   : > { %v2459_v57 = vadd.f32 %v2458_v53, %v2457_v39  ;;  %v2262_v58 = vadd.f32 %v2261_v55, %v2260_v52 }
 0x18c   : > { %2172 = vst.msk [vmem:[%s3586_s29 + $0x64] sm:$0xf] %vm2146_vm0, %v2968_v54  ;;  %v2460_v59 = vsel %vm2211_vm1, %v2372_v56, 0.0  ;;  %v1450_v60 = vpop.f32.mrb[52].mxu1 }
 0x18d   : > { %v2461_v61 = vadd.f32 %v2460_v59, %v2459_v57  ;;  %v1739_v62 = vpop.f32.mrb[52].mxu0  ;;  %v1452_v63 = vpop.f32.mrb[53].mxu1 }
 0x18e   : > { %v1740_v0 = vadd.f32 %v1739_v62, %v1450_v60  ;;  %v1741_v1 = vpop.f32.mrb[53].mxu0  ;;  %v1453_v2 = vpop.f32.mrb[54].mxu1 }
 0x18f   : > { %v1742_v3 = vpop.f32.mrb[54].mxu0  ;;  %v1455_v4 = vpop.f32.mrb[55].mxu1 }
 0x190   : > { %v2969_v5 = vpack.c.bf16 %v1740_v0, %v1740_v0  ;;  %v2263_v6 = vsel %vm2211_vm1, %v1740_v0, 0.0  ;;  %v2373_v7 = vmul.f32 %v1740_v0, %v1740_v0  ;;  %v1743_v8 = vadd.f32 %v1742_v3, %v1453_v2  ;;  %v1744_v9 = vpop.f32.mrb[55].mxu0 }
 0x191   : > { %v2264_v10 = vadd.f32 %v2263_v6, %v2262_v58 }
 0x192   : > { %2173 = vst.msk [vmem:[%s3586_s29 + $0x68] sm:$0xf] %vm2146_vm0, %v2969_v5  ;;  %v2462_v11 = vsel %vm2211_vm1, %v2373_v7, 0.0  ;;  %v2970_v12 = vpack.c.bf16 %v1743_v8, %v1743_v8  ;;  %v2265_v13 = vsel %vm2211_vm1, %v1743_v8, 0.0  ;;  %v2374_v14 = vmul.f32 %v1743_v8, %v1743_v8 }
 0x193   : > { %v2463_v15 = vadd.f32 %v2462_v11, %v2461_v61  ;;  %v2266_v16 = vadd.f32 %v2265_v13, %v2264_v10 }
 0x194   : > { %2174 = vst.msk [vmem:[%s3586_s29 + $0x6c] sm:$0xf] %vm2146_vm0, %v2970_v12  ;;  %v2464_v17 = vsel %vm2211_vm1, %v2374_v14, 0.0  ;;  %v1458_v18 = vpop.f32.mrb[56].mxu1 }
 0x195   : > { %v2465_v19 = vadd.f32 %v2464_v17, %v2463_v15  ;;  %v1747_v20 = vpop.f32.mrb[56].mxu0  ;;  %v1460_v21 = vpop.f32.mrb[57].mxu1 }
 0x196   : > { %v1748_v22 = vadd.f32 %v1747_v20, %v1458_v18  ;;  %v1749_v23 = vpop.f32.mrb[57].mxu0  ;;  %v1461_v24 = vpop.f32.mrb[58].mxu1 }
 0x197   : > { %v1750_v25 = vpop.f32.mrb[58].mxu0  ;;  %v1463_v26 = vpop.f32.mrb[59].mxu1 }
 0x198   : > { %v2971_v27 = vpack.c.bf16 %v1748_v22, %v1748_v22  ;;  %v2267_v28 = vsel %vm2211_vm1, %v1748_v22, 0.0  ;;  %v2375_v29 = vmul.f32 %v1748_v22, %v1748_v22  ;;  %v1751_v30 = vadd.f32 %v1750_v25, %v1461_v24  ;;  %v1752_v31 = vpop.f32.mrb[59].mxu0 }
 0x199   : > { %v2268_v32 = vadd.f32 %v2267_v28, %v2266_v16 }
 0x19a   : > { %2175 = vst.msk [vmem:[%s3586_s29 + $0x70] sm:$0xf] %vm2146_vm0, %v2971_v27  ;;  %v2466_v33 = vsel %vm2211_vm1, %v2375_v29, 0.0  ;;  %v2972_v34 = vpack.c.bf16 %v1751_v30, %v1751_v30  ;;  %v2269_v35 = vsel %vm2211_vm1, %v1751_v30, 0.0  ;;  %v2376_v36 = vmul.f32 %v1751_v30, %v1751_v30 }
 0x19b   : > { %v2467_v37 = vadd.f32 %v2466_v33, %v2465_v19  ;;  %v2270_v38 = vadd.f32 %v2269_v35, %v2268_v32 }
 0x19c   : > { %2176 = vst.msk [vmem:[%s3586_s29 + $0x74] sm:$0xf] %vm2146_vm0, %v2972_v34  ;;  %v2468_v39 = vsel %vm2211_vm1, %v2376_v36, 0.0  ;;  %v1466_v40 = vpop.f32.mrb[60].mxu1 }
 0x19d   : > { %v2469_v41 = vadd.f32 %v2468_v39, %v2467_v37  ;;  %v1755_v42 = vpop.f32.mrb[60].mxu0  ;;  %v1468_v43 = vpop.f32.mrb[61].mxu1 }
 0x19e   : > { %v1756_v44 = vadd.f32 %v1755_v42, %v1466_v40  ;;  %v1757_v45 = vpop.f32.mrb[61].mxu0  ;;  %v1469_v46 = vpop.f32.mrb[62].mxu1 }
 0x19f   : > { %v1758_v47 = vpop.f32.mrb[62].mxu0  ;;  %v1471_v48 = vpop.f32.mrb[63].mxu1 }
 0x1a0   : > { %v2973_v49 = vpack.c.bf16 %v1756_v44, %v1756_v44  ;;  %v2271_v50 = vsel %vm2211_vm1, %v1756_v44, 0.0  ;;  %v2377_v51 = vmul.f32 %v1756_v44, %v1756_v44  ;;  %v1759_v52 = vadd.f32 %v1758_v47, %v1469_v46  ;;  %v1760_v53 = vpop.f32.mrb[63].mxu0 }
 0x1a1   : > { %v2272_v54 = vadd.f32 %v2271_v50, %v2270_v38 }
 0x1a2   : > { %2177 = vst.msk [vmem:[%s3586_s29 + $0x78] sm:$0xf] %vm2146_vm0, %v2973_v49  ;;  %v2470_v55 = vsel %vm2211_vm1, %v2377_v51, 0.0  ;;  %v2974_v56 = vpack.c.bf16 %v1759_v52, %v1759_v52  ;;  %v2273_v57 = vsel %vm2211_vm1, %v1759_v52, 0.0  ;;  %v2378_v58 = vmul.f32 %v1759_v52, %v1759_v52 }
 0x1a3   : > { %v2471_v59 = vadd.f32 %v2470_v55, %v2469_v41  ;;  %v2274_v60 = vadd.f32 %v2273_v57, %v2272_v54 }
 0x1a4   : > { %2178 = vst.msk [vmem:[%s3586_s29 + $0x7c] sm:$0xf] %vm2146_vm0, %v2974_v56  ;;  %v2472_v61 = vsel %vm2211_vm1, %v2378_v58, 0.0  ;;  %v1474_v62 = vpop.f32.mrb[64].mxu1 }
 0x1a5   : > { %v2473_v63 = vadd.f32 %v2472_v61, %v2471_v59  ;;  %v1763_v0 = vpop.f32.mrb[64].mxu0  ;;  %v1476_v1 = vpop.f32.mrb[65].mxu1 }
 0x1a6   : > { %v1764_v2 = vadd.f32 %v1763_v0, %v1474_v62  ;;  %v1765_v3 = vpop.f32.mrb[65].mxu0  ;;  %v1477_v4 = vpop.f32.mrb[66].mxu1 }
 0x1a7   : > { %v1766_v5 = vpop.f32.mrb[66].mxu0  ;;  %v1479_v6 = vpop.f32.mrb[67].mxu1 }
 0x1a8   : > { %v2975_v7 = vpack.c.bf16 %v1764_v2, %v1764_v2  ;;  %v2275_v8 = vsel %vm2211_vm1, %v1764_v2, 0.0  ;;  %v2379_v9 = vmul.f32 %v1764_v2, %v1764_v2  ;;  %v1767_v10 = vadd.f32 %v1766_v5, %v1477_v4  ;;  %v1768_v11 = vpop.f32.mrb[67].mxu0 }
 0x1a9   : > { %v2276_v12 = vadd.f32 %v2275_v8, %v2274_v60 }
 0x1aa   : > { %2179 = vst.msk [vmem:[%s3586_s29 + $0x80] sm:$0xf] %vm2146_vm0, %v2975_v7  ;;  %v2474_v13 = vsel %vm2211_vm1, %v2379_v9, 0.0  ;;  %v2976_v14 = vpack.c.bf16 %v1767_v10, %v1767_v10  ;;  %v2277_v15 = vsel %vm2211_vm1, %v1767_v10, 0.0  ;;  %v2380_v16 = vmul.f32 %v1767_v10, %v1767_v10 }
 0x1ab   : > { %v2475_v17 = vadd.f32 %v2474_v13, %v2473_v63  ;;  %v2278_v18 = vadd.f32 %v2277_v15, %v2276_v12 }
 0x1ac   : > { %2180 = vst.msk [vmem:[%s3586_s29 + $0x84] sm:$0xf] %vm2146_vm0, %v2976_v14  ;;  %v2476_v19 = vsel %vm2211_vm1, %v2380_v16, 0.0  ;;  %v1482_v20 = vpop.f32.mrb[68].mxu1 }
 0x1ad   : > { %v2477_v21 = vadd.f32 %v2476_v19, %v2475_v17  ;;  %v1771_v22 = vpop.f32.mrb[68].mxu0  ;;  %v1484_v23 = vpop.f32.mrb[69].mxu1 }
 0x1ae   : > { %v1772_v24 = vadd.f32 %v1771_v22, %v1482_v20  ;;  %v1773_v25 = vpop.f32.mrb[69].mxu0  ;;  %v1485_v26 = vpop.f32.mrb[70].mxu1 }
 0x1af   : > { %v1774_v27 = vpop.f32.mrb[70].mxu0  ;;  %v1487_v28 = vpop.f32.mrb[71].mxu1 }
 0x1b0   : > { %v2977_v29 = vpack.c.bf16 %v1772_v24, %v1772_v24  ;;  %v2279_v30 = vsel %vm2211_vm1, %v1772_v24, 0.0  ;;  %v2381_v31 = vmul.f32 %v1772_v24, %v1772_v24  ;;  %v1775_v32 = vadd.f32 %v1774_v27, %v1485_v26  ;;  %v1776_v33 = vpop.f32.mrb[71].mxu0 }
 0x1b1   : > { %v2280_v34 = vadd.f32 %v2279_v30, %v2278_v18 }
 0x1b2   : > { %2181 = vst.msk [vmem:[%s3586_s29 + $0x88] sm:$0xf] %vm2146_vm0, %v2977_v29  ;;  %v2478_v35 = vsel %vm2211_vm1, %v2381_v31, 0.0  ;;  %v2978_v36 = vpack.c.bf16 %v1775_v32, %v1775_v32  ;;  %v2281_v37 = vsel %vm2211_vm1, %v1775_v32, 0.0  ;;  %v2382_v38 = vmul.f32 %v1775_v32, %v1775_v32 }
 0x1b3   : > { %v2479_v39 = vadd.f32 %v2478_v35, %v2477_v21  ;;  %v2282_v40 = vadd.f32 %v2281_v37, %v2280_v34 }
 0x1b4   : > { %2182 = vst.msk [vmem:[%s3586_s29 + $0x8c] sm:$0xf] %vm2146_vm0, %v2978_v36  ;;  %v2480_v41 = vsel %vm2211_vm1, %v2382_v38, 0.0  ;;  %v1490_v42 = vpop.f32.mrb[72].mxu1 }
 0x1b5   : > { %v2481_v43 = vadd.f32 %v2480_v41, %v2479_v39  ;;  %v1779_v44 = vpop.f32.mrb[72].mxu0  ;;  %v1492_v45 = vpop.f32.mrb[73].mxu1 }
 0x1b6   : > { %v1780_v46 = vadd.f32 %v1779_v44, %v1490_v42  ;;  %v1781_v47 = vpop.f32.mrb[73].mxu0  ;;  %v1493_v48 = vpop.f32.mrb[74].mxu1 }
 0x1b7   : > { %v1782_v49 = vpop.f32.mrb[74].mxu0  ;;  %v1495_v50 = vpop.f32.mrb[75].mxu1 }
 0x1b8   : > { %v2979_v51 = vpack.c.bf16 %v1780_v46, %v1780_v46  ;;  %v2283_v52 = vsel %vm2211_vm1, %v1780_v46, 0.0  ;;  %v2383_v53 = vmul.f32 %v1780_v46, %v1780_v46  ;;  %v1783_v54 = vadd.f32 %v1782_v49, %v1493_v48  ;;  %v1784_v55 = vpop.f32.mrb[75].mxu0 }
 0x1b9   : > { %v2284_v56 = vadd.f32 %v2283_v52, %v2282_v40 }
 0x1ba   : > { %2183 = vst.msk [vmem:[%s3586_s29 + $0x90] sm:$0xf] %vm2146_vm0, %v2979_v51  ;;  %v2482_v57 = vsel %vm2211_vm1, %v2383_v53, 0.0  ;;  %v2980_v58 = vpack.c.bf16 %v1783_v54, %v1783_v54  ;;  %v2285_v59 = vsel %vm2211_vm1, %v1783_v54, 0.0  ;;  %v2384_v60 = vmul.f32 %v1783_v54, %v1783_v54 }
 0x1bb   : > { %v2483_v61 = vadd.f32 %v2482_v57, %v2481_v43  ;;  %v2286_v62 = vadd.f32 %v2285_v59, %v2284_v56 }
 0x1bc   : > { %2184 = vst.msk [vmem:[%s3586_s29 + $0x94] sm:$0xf] %vm2146_vm0, %v2980_v58  ;;  %v2484_v63 = vsel %vm2211_vm1, %v2384_v60, 0.0  ;;  %v1498_v0 = vpop.f32.mrb[76].mxu1 }
 0x1bd   : > { %v2485_v1 = vadd.f32 %v2484_v63, %v2483_v61  ;;  %v1787_v2 = vpop.f32.mrb[76].mxu0  ;;  %v1500_v3 = vpop.f32.mrb[77].mxu1 }
 0x1be   : > { %v1788_v4 = vadd.f32 %v1787_v2, %v1498_v0  ;;  %v1789_v5 = vpop.f32.mrb[77].mxu0  ;;  %v1501_v6 = vpop.f32.mrb[78].mxu1 }
 0x1bf   : > { %v1790_v7 = vpop.f32.mrb[78].mxu0  ;;  %v1503_v8 = vpop.f32.mrb[79].mxu1 }
 0x1c0   : > { %v2981_v9 = vpack.c.bf16 %v1788_v4, %v1788_v4  ;;  %v2287_v10 = vsel %vm2211_vm1, %v1788_v4, 0.0  ;;  %v2385_v11 = vmul.f32 %v1788_v4, %v1788_v4  ;;  %v1791_v12 = vadd.f32 %v1790_v7, %v1501_v6  ;;  %v1792_v13 = vpop.f32.mrb[79].mxu0 }
 0x1c1   : > { %v2288_v14 = vadd.f32 %v2287_v10, %v2286_v62 }
 0x1c2   : > { %2185 = vst.msk [vmem:[%s3586_s29 + $0x98] sm:$0xf] %vm2146_vm0, %v2981_v9  ;;  %v2486_v15 = vsel %vm2211_vm1, %v2385_v11, 0.0  ;;  %v2982_v16 = vpack.c.bf16 %v1791_v12, %v1791_v12  ;;  %v2289_v17 = vsel %vm2211_vm1, %v1791_v12, 0.0  ;;  %v2386_v18 = vmul.f32 %v1791_v12, %v1791_v12 }
 0x1c3   : > { %v2487_v19 = vadd.f32 %v2486_v15, %v2485_v1  ;;  %v2290_v20 = vadd.f32 %v2289_v17, %v2288_v14 }
 0x1c4   : > { %2186 = vst.msk [vmem:[%s3586_s29 + $0x9c] sm:$0xf] %vm2146_vm0, %v2982_v16  ;;  %v2488_v21 = vsel %vm2211_vm1, %v2386_v18, 0.0  ;;  %v1506_v22 = vpop.f32.mrb[80].mxu1 }
 0x1c5   : > { %v2489_v23 = vadd.f32 %v2488_v21, %v2487_v19  ;;  %v1795_v24 = vpop.f32.mrb[80].mxu0  ;;  %v1508_v25 = vpop.f32.mrb[81].mxu1 }
 0x1c6   : > { %v1796_v26 = vadd.f32 %v1795_v24, %v1506_v22  ;;  %v1797_v27 = vpop.f32.mrb[81].mxu0  ;;  %v1509_v28 = vpop.f32.mrb[82].mxu1 }
 0x1c7   : > { %v1798_v29 = vpop.f32.mrb[82].mxu0  ;;  %v1511_v30 = vpop.f32.mrb[83].mxu1 }
 0x1c8   : > { %v2983_v31 = vpack.c.bf16 %v1796_v26, %v1796_v26  ;;  %v2291_v32 = vsel %vm2211_vm1, %v1796_v26, 0.0  ;;  %v2387_v33 = vmul.f32 %v1796_v26, %v1796_v26  ;;  %v1799_v34 = vadd.f32 %v1798_v29, %v1509_v28  ;;  %v1800_v35 = vpop.f32.mrb[83].mxu0 }
 0x1c9   : > { %v2292_v36 = vadd.f32 %v2291_v32, %v2290_v20 }
 0x1ca   : > { %2187 = vst.msk [vmem:[%s3586_s29 + $0xa0] sm:$0xf] %vm2146_vm0, %v2983_v31  ;;  %v2490_v37 = vsel %vm2211_vm1, %v2387_v33, 0.0  ;;  %v2984_v38 = vpack.c.bf16 %v1799_v34, %v1799_v34  ;;  %v2293_v39 = vsel %vm2211_vm1, %v1799_v34, 0.0  ;;  %v2388_v40 = vmul.f32 %v1799_v34, %v1799_v34 }
 0x1cb   : > { %v2491_v41 = vadd.f32 %v2490_v37, %v2489_v23  ;;  %v2294_v42 = vadd.f32 %v2293_v39, %v2292_v36 }
 0x1cc   : > { %2188 = vst.msk [vmem:[%s3586_s29 + $0xa4] sm:$0xf] %vm2146_vm0, %v2984_v38  ;;  %v2492_v43 = vsel %vm2211_vm1, %v2388_v40, 0.0  ;;  %v1514_v44 = vpop.f32.mrb[84].mxu1 }
 0x1cd   : > { %v2493_v45 = vadd.f32 %v2492_v43, %v2491_v41  ;;  %v1803_v46 = vpop.f32.mrb[84].mxu0  ;;  %v1516_v47 = vpop.f32.mrb[85].mxu1 }
 0x1ce   : > { %v1804_v48 = vadd.f32 %v1803_v46, %v1514_v44  ;;  %v1805_v49 = vpop.f32.mrb[85].mxu0  ;;  %v1517_v50 = vpop.f32.mrb[86].mxu1 }
 0x1cf   : > { %v1806_v51 = vpop.f32.mrb[86].mxu0  ;;  %v1519_v52 = vpop.f32.mrb[87].mxu1 }
 0x1d0   : > { %v2985_v53 = vpack.c.bf16 %v1804_v48, %v1804_v48  ;;  %v2295_v54 = vsel %vm2211_vm1, %v1804_v48, 0.0  ;;  %v2389_v55 = vmul.f32 %v1804_v48, %v1804_v48  ;;  %v1807_v56 = vadd.f32 %v1806_v51, %v1517_v50  ;;  %v1808_v57 = vpop.f32.mrb[87].mxu0 }
 0x1d1   : > { %v2296_v58 = vadd.f32 %v2295_v54, %v2294_v42 }
 0x1d2   : > { %2189 = vst.msk [vmem:[%s3586_s29 + $0xa8] sm:$0xf] %vm2146_vm0, %v2985_v53  ;;  %v2494_v59 = vsel %vm2211_vm1, %v2389_v55, 0.0  ;;  %v2986_v60 = vpack.c.bf16 %v1807_v56, %v1807_v56  ;;  %v2297_v61 = vsel %vm2211_vm1, %v1807_v56, 0.0  ;;  %v2390_v62 = vmul.f32 %v1807_v56, %v1807_v56 }
 0x1d3   : > { %v2495_v63 = vadd.f32 %v2494_v59, %v2493_v45  ;;  %v2298_v0 = vadd.f32 %v2297_v61, %v2296_v58 }
 0x1d4   : > { %2190 = vst.msk [vmem:[%s3586_s29 + $0xac] sm:$0xf] %vm2146_vm0, %v2986_v60  ;;  %v2496_v1 = vsel %vm2211_vm1, %v2390_v62, 0.0  ;;  %v1522_v2 = vpop.f32.mrb[88].mxu1 }
 0x1d5   : > { %v2497_v3 = vadd.f32 %v2496_v1, %v2495_v63  ;;  %v1811_v4 = vpop.f32.mrb[88].mxu0  ;;  %v1524_v5 = vpop.f32.mrb[89].mxu1 }
 0x1d6   : > { %v1812_v6 = vadd.f32 %v1811_v4, %v1522_v2  ;;  %v1813_v7 = vpop.f32.mrb[89].mxu0  ;;  %v1525_v8 = vpop.f32.mrb[90].mxu1 }
 0x1d7   : > { %v1814_v9 = vpop.f32.mrb[90].mxu0  ;;  %v1527_v10 = vpop.f32.mrb[91].mxu1 }
 0x1d8   : > { %v2987_v11 = vpack.c.bf16 %v1812_v6, %v1812_v6  ;;  %v2299_v12 = vsel %vm2211_vm1, %v1812_v6, 0.0  ;;  %v2391_v13 = vmul.f32 %v1812_v6, %v1812_v6  ;;  %v1815_v14 = vadd.f32 %v1814_v9, %v1525_v8  ;;  %v1816_v15 = vpop.f32.mrb[91].mxu0 }
 0x1d9   : > { %v2300_v16 = vadd.f32 %v2299_v12, %v2298_v0 }
 0x1da   : > { %2191 = vst.msk [vmem:[%s3586_s29 + $0xb0] sm:$0xf] %vm2146_vm0, %v2987_v11  ;;  %v2498_v17 = vsel %vm2211_vm1, %v2391_v13, 0.0  ;;  %v2988_v18 = vpack.c.bf16 %v1815_v14, %v1815_v14  ;;  %v2301_v19 = vsel %vm2211_vm1, %v1815_v14, 0.0  ;;  %v2392_v20 = vmul.f32 %v1815_v14, %v1815_v14 }
 0x1db   : > { %v2499_v21 = vadd.f32 %v2498_v17, %v2497_v3  ;;  %v2302_v22 = vadd.f32 %v2301_v19, %v2300_v16 }
 0x1dc   : > { %2192 = vst.msk [vmem:[%s3586_s29 + $0xb4] sm:$0xf] %vm2146_vm0, %v2988_v18  ;;  %v2500_v23 = vsel %vm2211_vm1, %v2392_v20, 0.0  ;;  %v1530_v24 = vpop.f32.mrb[92].mxu1 }
 0x1dd   : > { %v2501_v25 = vadd.f32 %v2500_v23, %v2499_v21  ;;  %v1819_v26 = vpop.f32.mrb[92].mxu0  ;;  %v1532_v27 = vpop.f32.mrb[93].mxu1 }
 0x1de   : > { %v1820_v28 = vadd.f32 %v1819_v26, %v1530_v24  ;;  %v1821_v29 = vpop.f32.mrb[93].mxu0  ;;  %v1533_v30 = vpop.f32.mrb[94].mxu1 }
 0x1df   : > { %v1822_v31 = vpop.f32.mrb[94].mxu0  ;;  %v1535_v32 = vpop.f32.mrb[95].mxu1 }
 0x1e0   : > { %v2989_v33 = vpack.c.bf16 %v1820_v28, %v1820_v28  ;;  %v2303_v34 = vsel %vm2211_vm1, %v1820_v28, 0.0  ;;  %v2393_v35 = vmul.f32 %v1820_v28, %v1820_v28  ;;  %v1823_v36 = vadd.f32 %v1822_v31, %v1533_v30  ;;  %v1824_v37 = vpop.f32.mrb[95].mxu0 }
 0x1e1   : > { %v2304_v38 = vadd.f32 %v2303_v34, %v2302_v22 }
 0x1e2   : > { %2193 = vst.msk [vmem:[%s3586_s29 + $0xb8] sm:$0xf] %vm2146_vm0, %v2989_v33  ;;  %v2502_v39 = vsel %vm2211_vm1, %v2393_v35, 0.0  ;;  %v2990_v40 = vpack.c.bf16 %v1823_v36, %v1823_v36  ;;  %v2305_v41 = vsel %vm2211_vm1, %v1823_v36, 0.0  ;;  %v2394_v42 = vmul.f32 %v1823_v36, %v1823_v36 }
 0x1e3   : > { %v2503_v43 = vadd.f32 %v2502_v39, %v2501_v25  ;;  %v2306_v44 = vadd.f32 %v2305_v41, %v2304_v38 }
 0x1e4   : > { %2194 = vst.msk [vmem:[%s3586_s29 + $0xbc] sm:$0xf] %vm2146_vm0, %v2990_v40  ;;  %v2504_v45 = vsel %vm2211_vm1, %v2394_v42, 0.0  ;;  %v1538_v46 = vpop.f32.mrb[96].mxu1 }
 0x1e5   : > { %v2505_v47 = vadd.f32 %v2504_v45, %v2503_v43  ;;  %v1827_v48 = vpop.f32.mrb[96].mxu0  ;;  %v1540_v49 = vpop.f32.mrb[97].mxu1 }
 0x1e6   : > { %v1828_v50 = vadd.f32 %v1827_v48, %v1538_v46  ;;  %v1829_v51 = vpop.f32.mrb[97].mxu0  ;;  %v1541_v52 = vpop.f32.mrb[98].mxu1 }
 0x1e7   : > { %v1830_v53 = vpop.f32.mrb[98].mxu0  ;;  %v1543_v54 = vpop.f32.mrb[99].mxu1 }
 0x1e8   : > { %v2991_v55 = vpack.c.bf16 %v1828_v50, %v1828_v50  ;;  %v2307_v56 = vsel %vm2211_vm1, %v1828_v50, 0.0  ;;  %v2395_v57 = vmul.f32 %v1828_v50, %v1828_v50  ;;  %v1831_v58 = vadd.f32 %v1830_v53, %v1541_v52  ;;  %v1832_v59 = vpop.f32.mrb[99].mxu0 }
 0x1e9   : > { %v2308_v60 = vadd.f32 %v2307_v56, %v2306_v44 }
 0x1ea   : > { %2195 = vst.msk [vmem:[%s3586_s29 + $0xc0] sm:$0xf] %vm2146_vm0, %v2991_v55  ;;  %v2506_v61 = vsel %vm2211_vm1, %v2395_v57, 0.0  ;;  %v2992_v62 = vpack.c.bf16 %v1831_v58, %v1831_v58  ;;  %v2309_v63 = vsel %vm2211_vm1, %v1831_v58, 0.0  ;;  %v2396_v0 = vmul.f32 %v1831_v58, %v1831_v58 }
 0x1eb   : > { %v2507_v1 = vadd.f32 %v2506_v61, %v2505_v47  ;;  %v2310_v2 = vadd.f32 %v2309_v63, %v2308_v60 }
 0x1ec   : > { %2196 = vst.msk [vmem:[%s3586_s29 + $0xc4] sm:$0xf] %vm2146_vm0, %v2992_v62  ;;  %v2508_v3 = vsel %vm2211_vm1, %v2396_v0, 0.0  ;;  %v1546_v4 = vpop.f32.mrb[100].mxu1 }
 0x1ed   : > { %v2509_v5 = vadd.f32 %v2508_v3, %v2507_v1  ;;  %v1835_v6 = vpop.f32.mrb[100].mxu0  ;;  %v1548_v7 = vpop.f32.mrb[101].mxu1 }
 0x1ee   : > { %v1836_v8 = vadd.f32 %v1835_v6, %v1546_v4  ;;  %v1837_v9 = vpop.f32.mrb[101].mxu0  ;;  %v1549_v10 = vpop.f32.mrb[102].mxu1 }
 0x1ef   : > { %v1838_v11 = vpop.f32.mrb[102].mxu0  ;;  %v1551_v12 = vpop.f32.mrb[103].mxu1 }
 0x1f0   : > { %v2993_v13 = vpack.c.bf16 %v1836_v8, %v1836_v8  ;;  %v2311_v14 = vsel %vm2211_vm1, %v1836_v8, 0.0  ;;  %v2397_v15 = vmul.f32 %v1836_v8, %v1836_v8  ;;  %v1839_v16 = vadd.f32 %v1838_v11, %v1549_v10  ;;  %v1840_v17 = vpop.f32.mrb[103].mxu0 }
 0x1f1   : > { %v2312_v18 = vadd.f32 %v2311_v14, %v2310_v2 }
 0x1f2   : > { %2197 = vst.msk [vmem:[%s3586_s29 + $0xc8] sm:$0xf] %vm2146_vm0, %v2993_v13  ;;  %v2510_v19 = vsel %vm2211_vm1, %v2397_v15, 0.0  ;;  %v2994_v20 = vpack.c.bf16 %v1839_v16, %v1839_v16  ;;  %v2313_v21 = vsel %vm2211_vm1, %v1839_v16, 0.0  ;;  %v2398_v22 = vmul.f32 %v1839_v16, %v1839_v16 }
 0x1f3   : > { %v2511_v23 = vadd.f32 %v2510_v19, %v2509_v5  ;;  %v2314_v24 = vadd.f32 %v2313_v21, %v2312_v18 }
 0x1f4   : > { %2198 = vst.msk [vmem:[%s3586_s29 + $0xcc] sm:$0xf] %vm2146_vm0, %v2994_v20  ;;  %v2512_v25 = vsel %vm2211_vm1, %v2398_v22, 0.0  ;;  %v1554_v26 = vpop.f32.mrb[104].mxu1 }
 0x1f5   : > { %v2513_v27 = vadd.f32 %v2512_v25, %v2511_v23  ;;  %v1843_v28 = vpop.f32.mrb[104].mxu0  ;;  %v1556_v29 = vpop.f32.mrb[105].mxu1 }
 0x1f6   : > { %v1844_v30 = vadd.f32 %v1843_v28, %v1554_v26  ;;  %v1845_v31 = vpop.f32.mrb[105].mxu0  ;;  %v1557_v32 = vpop.f32.mrb[106].mxu1 }
 0x1f7   : > { %v1846_v33 = vpop.f32.mrb[106].mxu0  ;;  %v1559_v34 = vpop.f32.mrb[107].mxu1 }
 0x1f8   : > { %v2995_v35 = vpack.c.bf16 %v1844_v30, %v1844_v30  ;;  %v2315_v36 = vsel %vm2211_vm1, %v1844_v30, 0.0  ;;  %v2399_v37 = vmul.f32 %v1844_v30, %v1844_v30  ;;  %v1847_v38 = vadd.f32 %v1846_v33, %v1557_v32  ;;  %v1848_v39 = vpop.f32.mrb[107].mxu0 }
 0x1f9   : > { %v2316_v40 = vadd.f32 %v2315_v36, %v2314_v24 }
 0x1fa   : > { %2199 = vst.msk [vmem:[%s3586_s29 + $0xd0] sm:$0xf] %vm2146_vm0, %v2995_v35  ;;  %v2514_v41 = vsel %vm2211_vm1, %v2399_v37, 0.0  ;;  %v2996_v42 = vpack.c.bf16 %v1847_v38, %v1847_v38  ;;  %v2317_v43 = vsel %vm2211_vm1, %v1847_v38, 0.0  ;;  %v2400_v44 = vmul.f32 %v1847_v38, %v1847_v38 }
 0x1fb   : > { %v2515_v45 = vadd.f32 %v2514_v41, %v2513_v27  ;;  %v2318_v46 = vadd.f32 %v2317_v43, %v2316_v40 }
 0x1fc   : > { %2200 = vst.msk [vmem:[%s3586_s29 + $0xd4] sm:$0xf] %vm2146_vm0, %v2996_v42  ;;  %v2516_v47 = vsel %vm2211_vm1, %v2400_v44, 0.0  ;;  %v1562_v48 = vpop.f32.mrb[108].mxu1 }
 0x1fd   : > { %v2517_v49 = vadd.f32 %v2516_v47, %v2515_v45  ;;  %v1851_v50 = vpop.f32.mrb[108].mxu0  ;;  %v1564_v51 = vpop.f32.mrb[109].mxu1 }
 0x1fe   : > { %v1852_v52 = vadd.f32 %v1851_v50, %v1562_v48  ;;  %v1853_v53 = vpop.f32.mrb[109].mxu0  ;;  %v1565_v54 = vpop.f32.mrb[110].mxu1 }
 0x1ff   : > { %v1854_v55 = vpop.f32.mrb[110].mxu0  ;;  %v1567_v56 = vpop.f32.mrb[111].mxu1 }
 0x200   : > { %v2997_v57 = vpack.c.bf16 %v1852_v52, %v1852_v52  ;;  %v2319_v58 = vsel %vm2211_vm1, %v1852_v52, 0.0  ;;  %v2401_v59 = vmul.f32 %v1852_v52, %v1852_v52  ;;  %v1855_v60 = vadd.f32 %v1854_v55, %v1565_v54  ;;  %v1856_v61 = vpop.f32.mrb[111].mxu0 }
 0x201   : > { %v2320_v62 = vadd.f32 %v2319_v58, %v2318_v46 }
 0x202   : > { %2201 = vst.msk [vmem:[%s3586_s29 + $0xd8] sm:$0xf] %vm2146_vm0, %v2997_v57  ;;  %v2518_v63 = vsel %vm2211_vm1, %v2401_v59, 0.0  ;;  %v2998_v0 = vpack.c.bf16 %v1855_v60, %v1855_v60  ;;  %v2321_v1 = vsel %vm2211_vm1, %v1855_v60, 0.0  ;;  %v2402_v2 = vmul.f32 %v1855_v60, %v1855_v60 }
 0x203   : > { %v2519_v3 = vadd.f32 %v2518_v63, %v2517_v49  ;;  %v2322_v4 = vadd.f32 %v2321_v1, %v2320_v62 }
 0x204   : > { %2202 = vst.msk [vmem:[%s3586_s29 + $0xdc] sm:$0xf] %vm2146_vm0, %v2998_v0  ;;  %v2520_v5 = vsel %vm2211_vm1, %v2402_v2, 0.0  ;;  %v1570_v6 = vpop.f32.mrb[112].mxu1 }
 0x205   : > { %v2521_v7 = vadd.f32 %v2520_v5, %v2519_v3  ;;  %v1859_v8 = vpop.f32.mrb[112].mxu0  ;;  %v1572_v9 = vpop.f32.mrb[113].mxu1 }
 0x206   : > { %v1860_v10 = vadd.f32 %v1859_v8, %v1570_v6  ;;  %v1861_v11 = vpop.f32.mrb[113].mxu0  ;;  %v1573_v12 = vpop.f32.mrb[114].mxu1 }
 0x207   : > { %v1862_v13 = vpop.f32.mrb[114].mxu0  ;;  %v1575_v14 = vpop.f32.mrb[115].mxu1 }
 0x208   : > { %v2999_v15 = vpack.c.bf16 %v1860_v10, %v1860_v10  ;;  %v2323_v16 = vsel %vm2211_vm1, %v1860_v10, 0.0  ;;  %v2403_v17 = vmul.f32 %v1860_v10, %v1860_v10  ;;  %v1863_v18 = vadd.f32 %v1862_v13, %v1573_v12  ;;  %v1864_v19 = vpop.f32.mrb[115].mxu0 }
 0x209   : > { %v2324_v20 = vadd.f32 %v2323_v16, %v2322_v4 }
 0x20a   : > { %2203 = vst.msk [vmem:[%s3586_s29 + $0xe0] sm:$0xf] %vm2146_vm0, %v2999_v15  ;;  %v2522_v21 = vsel %vm2211_vm1, %v2403_v17, 0.0  ;;  %v3000_v22 = vpack.c.bf16 %v1863_v18, %v1863_v18  ;;  %v2325_v23 = vsel %vm2211_vm1, %v1863_v18, 0.0  ;;  %v2404_v24 = vmul.f32 %v1863_v18, %v1863_v18 }
 0x20b   : > { %v2523_v25 = vadd.f32 %v2522_v21, %v2521_v7  ;;  %v2326_v26 = vadd.f32 %v2325_v23, %v2324_v20 }
 0x20c   : > { %2204 = vst.msk [vmem:[%s3586_s29 + $0xe4] sm:$0xf] %vm2146_vm0, %v3000_v22  ;;  %v2524_v27 = vsel %vm2211_vm1, %v2404_v24, 0.0  ;;  %v1578_v28 = vpop.f32.mrb[116].mxu1 }
 0x20d   : > { %v2525_v29 = vadd.f32 %v2524_v27, %v2523_v25  ;;  %v1867_v30 = vpop.f32.mrb[116].mxu0  ;;  %v1580_v31 = vpop.f32.mrb[117].mxu1 }
 0x20e   : > { %v1868_v32 = vadd.f32 %v1867_v30, %v1578_v28  ;;  %v1869_v33 = vpop.f32.mrb[117].mxu0  ;;  %v1581_v34 = vpop.f32.mrb[118].mxu1 }
 0x20f   : > { %v1870_v35 = vpop.f32.mrb[118].mxu0  ;;  %v1583_v36 = vpop.f32.mrb[119].mxu1 }
 0x210   : > { %v3001_v37 = vpack.c.bf16 %v1868_v32, %v1868_v32  ;;  %v2327_v38 = vsel %vm2211_vm1, %v1868_v32, 0.0  ;;  %v2405_v39 = vmul.f32 %v1868_v32, %v1868_v32  ;;  %v1871_v40 = vadd.f32 %v1870_v35, %v1581_v34  ;;  %v1872_v41 = vpop.f32.mrb[119].mxu0 }
 0x211   : > { %v2328_v42 = vadd.f32 %v2327_v38, %v2326_v26 }
 0x212   : > { %2205 = vst.msk [vmem:[%s3586_s29 + $0xe8] sm:$0xf] %vm2146_vm0, %v3001_v37  ;;  %v2526_v43 = vsel %vm2211_vm1, %v2405_v39, 0.0  ;;  %v3002_v44 = vpack.c.bf16 %v1871_v40, %v1871_v40  ;;  %v2329_v45 = vsel %vm2211_vm1, %v1871_v40, 0.0  ;;  %v2406_v46 = vmul.f32 %v1871_v40, %v1871_v40 }
 0x213   : > { %v2527_v47 = vadd.f32 %v2526_v43, %v2525_v29  ;;  %v2330_v48 = vadd.f32 %v2329_v45, %v2328_v42 }
 0x214   : > { %2206 = vst.msk [vmem:[%s3586_s29 + $0xec] sm:$0xf] %vm2146_vm0, %v3002_v44  ;;  %v2528_v49 = vsel %vm2211_vm1, %v2406_v46, 0.0  ;;  %v1586_v50 = vpop.f32.mrb[120].mxu1 }
 0x215   : > { %v2529_v51 = vadd.f32 %v2528_v49, %v2527_v47  ;;  %v1875_v52 = vpop.f32.mrb[120].mxu0  ;;  %v1588_v53 = vpop.f32.mrb[121].mxu1 }
 0x216   : > { %v1876_v54 = vadd.f32 %v1875_v52, %v1586_v50  ;;  %v1877_v55 = vpop.f32.mrb[121].mxu0  ;;  %v1589_v56 = vpop.f32.mrb[122].mxu1 }
 0x217   : > { %v1878_v57 = vpop.f32.mrb[122].mxu0  ;;  %v1591_v58 = vpop.f32.mrb[123].mxu1 }
 0x218   : > { %v3003_v59 = vpack.c.bf16 %v1876_v54, %v1876_v54  ;;  %v2331_v60 = vsel %vm2211_vm1, %v1876_v54, 0.0  ;;  %v2407_v61 = vmul.f32 %v1876_v54, %v1876_v54  ;;  %v1879_v62 = vadd.f32 %v1878_v57, %v1589_v56  ;;  %v1880_v63 = vpop.f32.mrb[123].mxu0 }
 0x219   : > { %v2332_v0 = vadd.f32 %v2331_v60, %v2330_v48 }
 0x21a   : > { %2207 = vst.msk [vmem:[%s3586_s29 + $0xf0] sm:$0xf] %vm2146_vm0, %v3003_v59  ;;  %v2530_v1 = vsel %vm2211_vm1, %v2407_v61, 0.0  ;;  %v3004_v2 = vpack.c.bf16 %v1879_v62, %v1879_v62  ;;  %v2333_v3 = vsel %vm2211_vm1, %v1879_v62, 0.0  ;;  %v2408_v4 = vmul.f32 %v1879_v62, %v1879_v62 }
 0x21b   : > { %v2531_v5 = vadd.f32 %v2530_v1, %v2529_v51  ;;  %v2334_v6 = vadd.f32 %v2333_v3, %v2332_v0 }
 0x21c   : > { %2208 = vst.msk [vmem:[%s3586_s29 + $0xf4] sm:$0xf] %vm2146_vm0, %v3004_v2  ;;  %v2532_v7 = vsel %vm2211_vm1, %v2408_v4, 0.0  ;;  %v1594_v8 = vpop.f32.mrb[124].mxu1 }
 0x21d   : > { %v2533_v9 = vadd.f32 %v2532_v7, %v2531_v5  ;;  %v1883_v10 = vpop.f32.mrb[124].mxu0  ;;  %v1596_v11 = vpop.f32.mrb[125].mxu1 }
 0x21e   : > { %v1884_v12 = vadd.f32 %v1883_v10, %v1594_v8  ;;  %v1885_v13 = vpop.f32.mrb[125].mxu0  ;;  %v1597_v14 = vpop.f32.mrb[126].mxu1 }
 0x21f   : > { %v1886_v15 = vpop.f32.mrb[126].mxu0  ;;  %v1599_v16 = vpop.f32.mrb[127].mxu1 }
 0x220   : > { %v3005_v17 = vpack.c.bf16 %v1884_v12, %v1884_v12  ;;  %v2335_v18 = vsel %vm2211_vm1, %v1884_v12, 0.0  ;;  %v2409_v19 = vmul.f32 %v1884_v12, %v1884_v12  ;;  %v1887_v20 = vadd.f32 %v1886_v15, %v1597_v14  ;;  %v1888_v21 = vpop.f32.mrb[127].mxu0 }
 0x221   : > { %v2336_v22 = vadd.f32 %v2335_v18, %v2334_v6 }
 0x222   : > { %2209 = vst.msk [vmem:[%s3586_s29 + $0xf8] sm:$0xf] %vm2146_vm0, %v3005_v17  ;;  %v2534_v23 = vsel %vm2211_vm1, %v2409_v19, 0.0  ;;  %v3006_v24 = vpack.c.bf16 %v1887_v20, %v1887_v20  ;;  %v2337_v25 = vsel %vm2211_vm1, %v1887_v20, 0.0  ;;  %v2410_v26 = vmul.f32 %v1887_v20, %v1887_v20 }
 0x223   : > { %v2535_v27 = vadd.f32 %v2534_v23, %v2533_v9  ;;  %v2338_v28 = vadd.f32 %v2337_v25, %v2336_v22 }
 0x224   : > { %2210 = vst.msk [vmem:[%s3586_s29 + $0xfc] sm:$0xf] %vm2146_vm0, %v3006_v24  ;;  %v2536_v29 = vsel %vm2211_vm1, %v2410_v26, 0.0 }
 0x225   : > { %v2339_v30 = vrot.slane %v2338_v28, 4  ;;  %v2537_v31 = vadd.f32 %v2536_v29, %v2535_v27 }
 0x227   : > { %v2340_v32 = vadd.f32 %v2339_v30, %v2338_v28  ;;  %v2538_v33 = vrot.slane %v2537_v31, 4 }
 0x229   : > { %v2341_v34 = vrot.slane %v2340_v32, 2  ;;  %v2539_v35 = vadd.f32 %v2538_v33, %v2537_v31 }
 0x22b   : > { %v2342_v36 = vadd.f32 %v2341_v34, %v2340_v32  ;;  %v2540_v37 = vrot.slane %v2539_v35, 2 }
 0x22d   : > { %v2343_v38 = vrot.slane %v2342_v36, 1  ;;  %v2541_v39 = vadd.f32 %v2540_v37, %v2539_v35 }
 0x22f   : > { %v2344_v40 = vadd.f32 %v2343_v38, %v2342_v36  ;;  %v2542_v41 = vrot.slane %v2541_v39, 1 }
 0x231   : > { %2346 = vst.msk [vmem:[%s280_s6] sm:$0x1] %vm2345_vm2, %v2344_v40  ;;  %v2543_v42 = vadd.f32 %v2542_v41, %v2541_v39 }
 0x233   : > { %2544 = vst.msk [vmem:[%s285_s9] sm:$0x1] %vm2345_vm2, %v2543_v42 }
 0x234 PF: > { %s15_s17 = sadd.s32 1, %s3342_s17   ;;  %s3881_s15 = smov %s3338_s16 }
 0x235   : > { %p12_p5 = scmp.ge.s32.totalorder %s15_s17, 6   ;;  %s3882_s16 = smov %s3884_s18 }
 0x237   :  { %14 = sbr.rel (!%p12_p5) target bundleno = 2 (0x2), region = 85 }

// kernel: generator_forward.16
= control target key start
LH: loop header
LB: loop body
LE: loop exit
PB: predicated region body
PF: predicated region fallthrough
CT: control target
= control target key end

     0   :  { %vm2332_vm0 = vcmask 519168   ;;  %s5732_s0 = inlined_call_operand.vmem [shape: bf16[2048,64], index: 0, kind: input, shape index: {}]   ;;  %s5733_s1 = inlined_call_operand.vmem [shape: f32[1,64], index: 1, kind: input, shape index: {}]   ;;  %s5734_s2 = inlined_call_operand.vmem [shape: f32[1,64], index: 2, kind: input, shape index: {}]   ;;  %s5735_s3 = inlined_call_operand.vmem [shape: bf16[2048,64], index: 3, kind: output, shape index: {}]  }
   0x1   :  { %v3108_v0 = vld [vmem:[%s5732_s0] sm:$0xff]   ;;  %v3619_v4 = vld [vmem:[%s5732_s0 + $0x8] sm:$0xff]   ;;  %v3620_v5 = vld [vmem:[%s5732_s0 + $0x10] sm:$0xff]  }
   0x2   :  { %v3778_v1 = vld [vmem:[%s5733_s1] ss:$0 sm:$0xff]  ;;  %v3109_v2 = vunpack.c.l.bf16 %v3108_v0  ;;  %v3110_v3 = vunpack.c.h.bf16 %v3108_v0  ;;  %v3621_v6 = vld [vmem:[%s5732_s0 + $0x18] sm:$0xff]   ;;  %v3113_v8 = vunpack.c.l.bf16 %v3619_v4  ;;  %v3114_v9 = vunpack.c.h.bf16 %v3619_v4  ;;  %v3623_v41 = vld [vmem:[%s5732_s0 + $0x28] sm:$0xff]  }
   0x3   :  { %v3792_v7 = vld [vmem:[%s5734_s2] ss:$0 sm:$0xff]  ;;  %v3117_v10 = vunpack.c.l.bf16 %v3620_v5  ;;  %v3118_v11 = vunpack.c.h.bf16 %v3620_v5  ;;  %v3121_v14 = vunpack.c.l.bf16 %v3621_v6  ;;  %v3122_v15 = vunpack.c.h.bf16 %v3621_v6  ;;  %v3624_v42 = vld [vmem:[%s5732_s0 + $0x30] sm:$0xff]   ;;  %v3625_v47 = vld [vmem:[%s5732_s0 + $0x38] sm:$0xff]  }
   0x4   :  { %v533_v12 = vmul.f32 %v3109_v2, %v3778_v1  ;;  %v534_v13 = vmul.f32 %v3110_v3, %v3778_v1  ;;  %v535_v16 = vmul.f32 %v3113_v8, %v3778_v1  ;;  %v536_v17 = vmul.f32 %v3114_v9, %v3778_v1  ;;  %v3622_v36 = vld [vmem:[%s5732_s0 + $0x20] sm:$0xff]  }
   0x5   :  { %v537_v18 = vmul.f32 %v3117_v10, %v3778_v1  ;;  %v538_v19 = vmul.f32 %v3118_v11, %v3778_v1  ;;  %v539_v22 = vmul.f32 %v3121_v14, %v3778_v1  ;;  %v540_v23 = vmul.f32 %v3122_v15, %v3778_v1 }
   0x6   :  { %v796_v20 = vadd.f32 %v3792_v7, %v533_v12  ;;  %v797_v21 = vadd.f32 %v3792_v7, %v534_v13  ;;  %v798_v24 = vadd.f32 %v3792_v7, %v535_v16  ;;  %v799_v25 = vadd.f32 %v3792_v7, %v536_v17 }
   0x7   :  { %v800_v26 = vadd.f32 %v3792_v7, %v537_v18  ;;  %v801_v27 = vadd.f32 %v3792_v7, %v538_v19  ;;  %v802_v30 = vadd.f32 %v3792_v7, %v539_v22  ;;  %v803_v31 = vadd.f32 %v3792_v7, %v540_v23  ;;  %v3626_v18 = vld [vmem:[%s5732_s0 + $0x40] sm:$0xff]   ;;  %v3627_v23 = vld [vmem:[%s5732_s0 + $0x48] sm:$0xff]  }
   0x8   :  { %v1052_v28 = vmax.f32 %v796_v20, 0.0  ;;  %v1053_v29 = vmax.f32 %v797_v21, 0.0  ;;  %v1054_v32 = vmax.f32 %v798_v24, 0.0  ;;  %v1055_v33 = vmax.f32 %v799_v25, 0.0  ;;  %v3628_v24 = vld [vmem:[%s5732_s0 + $0x50] sm:$0xff]  }
   0x9   :  { %v1056_v34 = vmax.f32 %v800_v26, 0.0  ;;  %v1057_v35 = vmax.f32 %v801_v27, 0.0  ;;  %v1058_v39 = vmax.f32 %v802_v30, 0.0  ;;  %v1059_v40 = vmax.f32 %v803_v31, 0.0 }
   0xa   :  { %v2851_v37 = vpack.c.bf16 %v1052_v28, %v1052_v28  ;;  %v2852_v38 = vpack.c.bf16 %v1053_v29, %v1053_v29  ;;  %v2853_v43 = vpack.c.bf16 %v1054_v32, %v1054_v32  ;;  %v2854_v44 = vpack.c.bf16 %v1055_v33, %v1055_v33  ;;  %v3629_v29 = vld [vmem:[%s5732_s0 + $0x58] sm:$0xff]  }
   0xb   :  { %v2855_v45 = vpack.c.bf16 %v1056_v34, %v1056_v34  ;;  %v2856_v46 = vpack.c.bf16 %v1057_v35, %v1057_v35  ;;  %v2857_v48 = vpack.c.bf16 %v1058_v39, %v1058_v39  ;;  %v2858_v49 = vpack.c.bf16 %v1059_v40, %v1059_v40 }
   0xc   :  { %2333 = vst.msk [vmem:[%s5735_s3] sm:$0xf] %vm2332_vm0, %v2851_v37  ;;  %2334 = vst.msk [vmem:[%s5735_s3 + $0x4] sm:$0xf] %vm2332_vm0, %v2852_v38  ;;  %v3125_v50 = vunpack.c.l.bf16 %v3622_v36  ;;  %v3126_v51 = vunpack.c.h.bf16 %v3622_v36  ;;  %v3129_v52 = vunpack.c.l.bf16 %v3623_v41  ;;  %v3130_v53 = vunpack.c.h.bf16 %v3623_v41 }
   0xd   :  { %2335 = vst.msk [vmem:[%s5735_s3 + $0x8] sm:$0xf] %vm2332_vm0, %v2853_v43  ;;  %2336 = vst.msk [vmem:[%s5735_s3 + $0xc] sm:$0xf] %vm2332_vm0, %v2854_v44  ;;  %v3133_v54 = vunpack.c.l.bf16 %v3624_v42  ;;  %v3134_v55 = vunpack.c.h.bf16 %v3624_v42  ;;  %v3137_v58 = vunpack.c.l.bf16 %v3625_v47  ;;  %v3138_v59 = vunpack.c.h.bf16 %v3625_v47 }
   0xe   :  { %2337 = vst.msk [vmem:[%s5735_s3 + $0x10] sm:$0xf] %vm2332_vm0, %v2855_v45  ;;  %2338 = vst.msk [vmem:[%s5735_s3 + $0x14] sm:$0xf] %vm2332_vm0, %v2856_v46  ;;  %v541_v56 = vmul.f32 %v3125_v50, %v3778_v1  ;;  %v542_v57 = vmul.f32 %v3126_v51, %v3778_v1  ;;  %v543_v60 = vmul.f32 %v3129_v52, %v3778_v1  ;;  %v3141_v32 = vunpack.c.l.bf16 %v3626_v18 }
   0xf   :  { %2339 = vst.msk [vmem:[%s5735_s3 + $0x18] sm:$0xf] %vm2332_vm0, %v2857_v48  ;;  %2340 = vst.msk [vmem:[%s5735_s3 + $0x1c] sm:$0xf] %vm2332_vm0, %v2858_v49  ;;  %v544_v61 = vmul.f32 %v3130_v53, %v3778_v1  ;;  %v545_v62 = vmul.f32 %v3133_v54, %v3778_v1  ;;  %v546_v63 = vmul.f32 %v3134_v55, %v3778_v1  ;;  %v3142_v33 = vunpack.c.h.bf16 %v3626_v18 }
  0x10   :  { %v804_v0 = vadd.f32 %v3792_v7, %v541_v56  ;;  %v805_v2 = vadd.f32 %v3792_v7, %v542_v57  ;;  %v547_v3 = vmul.f32 %v3137_v58, %v3778_v1  ;;  %v548_v4 = vmul.f32 %v3138_v59, %v3778_v1 }
  0x11   :  { %v806_v5 = vadd.f32 %v3792_v7, %v543_v60  ;;  %v807_v6 = vadd.f32 %v3792_v7, %v544_v61  ;;  %v808_v8 = vadd.f32 %v3792_v7, %v545_v62  ;;  %v809_v9 = vadd.f32 %v3792_v7, %v546_v63  ;;  %v3630_v62 = vld [vmem:[%s5732_s0 + $0x60] sm:$0xff]  }
  0x12   :  { %v1060_v10 = vmax.f32 %v804_v0, 0.0  ;;  %v1061_v11 = vmax.f32 %v805_v2, 0.0  ;;  %v810_v12 = vadd.f32 %v3792_v7, %v547_v3  ;;  %v811_v13 = vadd.f32 %v3792_v7, %v548_v4  ;;  %v3631_v4 = vld [vmem:[%s5732_s0 + $0x68] sm:$0xff]  }
  0x13   :  { %v1062_v14 = vmax.f32 %v806_v5, 0.0  ;;  %v1063_v15 = vmax.f32 %v807_v6, 0.0  ;;  %v1064_v16 = vmax.f32 %v808_v8, 0.0  ;;  %v1065_v17 = vmax.f32 %v809_v9, 0.0  ;;  %v3632_v5 = vld [vmem:[%s5732_s0 + $0x70] sm:$0xff]  }
  0x14   :  { %v2859_v19 = vpack.c.bf16 %v1060_v10, %v1060_v10  ;;  %v2860_v20 = vpack.c.bf16 %v1061_v11, %v1061_v11  ;;  %v1066_v21 = vmax.f32 %v810_v12, 0.0  ;;  %v1067_v22 = vmax.f32 %v811_v13, 0.0  ;;  %v3633_v11 = vld [vmem:[%s5732_s0 + $0x78] sm:$0xff]  }
  0x15   :  { %v2861_v25 = vpack.c.bf16 %v1062_v14, %v1062_v14  ;;  %v2862_v26 = vpack.c.bf16 %v1063_v15, %v1063_v15  ;;  %v2863_v27 = vpack.c.bf16 %v1064_v16, %v1064_v16  ;;  %v2864_v28 = vpack.c.bf16 %v1065_v17, %v1065_v17 }
  0x16   :  { %2341 = vst.msk [vmem:[%s5735_s3 + $0x20] sm:$0xf] %vm2332_vm0, %v2859_v19  ;;  %2342 = vst.msk [vmem:[%s5735_s3 + $0x24] sm:$0xf] %vm2332_vm0, %v2860_v20  ;;  %v2865_v30 = vpack.c.bf16 %v1066_v21, %v1066_v21  ;;  %v2866_v31 = vpack.c.bf16 %v1067_v22, %v1067_v22  ;;  %v3145_v34 = vunpack.c.l.bf16 %v3627_v23  ;;  %v3146_v35 = vunpack.c.h.bf16 %v3627_v23 }
  0x17   :  { %2343 = vst.msk [vmem:[%s5735_s3 + $0x28] sm:$0xf] %vm2332_vm0, %v2861_v25  ;;  %2344 = vst.msk [vmem:[%s5735_s3 + $0x2c] sm:$0xf] %vm2332_vm0, %v2862_v26  ;;  %v3149_v36 = vunpack.c.l.bf16 %v3628_v24  ;;  %v3150_v37 = vunpack.c.h.bf16 %v3628_v24  ;;  %v549_v38 = vmul.f32 %v3141_v32, %v3778_v1  ;;  %v550_v39 = vmul.f32 %v3142_v33, %v3778_v1 }
  0x18   :  { %2345 = vst.msk [vmem:[%s5735_s3 + $0x30] sm:$0xf] %vm2332_vm0, %v2863_v27  ;;  %2346 = vst.msk [vmem:[%s5735_s3 + $0x34] sm:$0xf] %vm2332_vm0, %v2864_v28  ;;  %v3153_v40 = vunpack.c.l.bf16 %v3629_v29  ;;  %v3154_v41 = vunpack.c.h.bf16 %v3629_v29  ;;  %v551_v42 = vmul.f32 %v3145_v34, %v3778_v1  ;;  %v552_v43 = vmul.f32 %v3146_v35, %v3778_v1 }
  0x19   :  { %2347 = vst.msk [vmem:[%s5735_s3 + $0x38] sm:$0xf] %vm2332_vm0, %v2865_v30  ;;  %2348 = vst.msk [vmem:[%s5735_s3 + $0x3c] sm:$0xf] %vm2332_vm0, %v2866_v31  ;;  %v553_v44 = vmul.f32 %v3149_v36, %v3778_v1  ;;  %v554_v45 = vmul.f32 %v3150_v37, %v3778_v1  ;;  %v812_v46 = vadd.f32 %v3792_v7, %v549_v38  ;;  %v3157_v14 = vunpack.c.l.bf16 %v3630_v62 }
  0x1a   :  { %v813_v47 = vadd.f32 %v3792_v7, %v550_v39  ;;  %v555_v48 = vmul.f32 %v3153_v40, %v3778_v1  ;;  %v556_v49 = vmul.f32 %v3154_v41, %v3778_v1  ;;  %v814_v50 = vadd.f32 %v3792_v7, %v551_v42 }
  0x1b   :  { %v815_v51 = vadd.f32 %v3792_v7, %v552_v43  ;;  %v816_v52 = vadd.f32 %v3792_v7, %v553_v44  ;;  %v817_v53 = vadd.f32 %v3792_v7, %v554_v45  ;;  %v1068_v54 = vmax.f32 %v812_v46, 0.0  ;;  %v3634_v44 = vld [vmem:[%s5732_s0 + $0x80] sm:$0xff]  }
  0x1c   :  { %v1069_v55 = vmax.f32 %v813_v47, 0.0  ;;  %v818_v56 = vadd.f32 %v3792_v7, %v555_v48  ;;  %v819_v57 = vadd.f32 %v3792_v7, %v556_v49  ;;  %v1070_v58 = vmax.f32 %v814_v50, 0.0  ;;  %v3635_v49 = vld [vmem:[%s5732_s0 + $0x88] sm:$0xff]   ;;  %v3636_v50 = vld [vmem:[%s5732_s0 + $0x90] sm:$0xff]  }
  0x1d   :  { %v1071_v59 = vmax.f32 %v815_v51, 0.0  ;;  %v1072_v60 = vmax.f32 %v816_v52, 0.0  ;;  %v1073_v61 = vmax.f32 %v817_v53, 0.0  ;;  %v2867_v63 = vpack.c.bf16 %v1068_v54, %v1068_v54 }
  0x1e   :  { %v2868_v0 = vpack.c.bf16 %v1069_v55, %v1069_v55  ;;  %v1074_v2 = vmax.f32 %v818_v56, 0.0  ;;  %v1075_v3 = vmax.f32 %v819_v57, 0.0  ;;  %v2869_v6 = vpack.c.bf16 %v1070_v58, %v1070_v58  ;;  %v3637_v55 = vld [vmem:[%s5732_s0 + $0x98] sm:$0xff]  }
  0x1f   :  { %v2870_v8 = vpack.c.bf16 %v1071_v59, %v1071_v59  ;;  %v2871_v9 = vpack.c.bf16 %v1072_v60, %v1072_v60  ;;  %v2872_v10 = vpack.c.bf16 %v1073_v61, %v1073_v61  ;;  %2349 = vst.msk [vmem:[%s5735_s3 + $0x40] sm:$0xf] %vm2332_vm0, %v2867_v63  ;;  %v3158_v15 = vunpack.c.h.bf16 %v3630_v62 }
  0x20   :  { %2350 = vst.msk [vmem:[%s5735_s3 + $0x44] sm:$0xf] %vm2332_vm0, %v2868_v0  ;;  %v2873_v12 = vpack.c.bf16 %v1074_v2, %v1074_v2  ;;  %v2874_v13 = vpack.c.bf16 %v1075_v3, %v1075_v3  ;;  %2351 = vst.msk [vmem:[%s5735_s3 + $0x48] sm:$0xf] %vm2332_vm0, %v2869_v6  ;;  %v3161_v16 = vunpack.c.l.bf16 %v3631_v4  ;;  %v3162_v17 = vunpack.c.h.bf16 %v3631_v4 }
  0x21   :  { %2352 = vst.msk [vmem:[%s5735_s3 + $0x4c] sm:$0xf] %vm2332_vm0, %v2870_v8  ;;  %2353 = vst.msk [vmem:[%s5735_s3 + $0x50] sm:$0xf] %vm2332_vm0, %v2871_v9  ;;  %v3165_v18 = vunpack.c.l.bf16 %v3632_v5  ;;  %v3166_v19 = vunpack.c.h.bf16 %v3632_v5  ;;  %v557_v20 = vmul.f32 %v3157_v14, %v3778_v1  ;;  %v558_v21 = vmul.f32 %v3158_v15, %v3778_v1 }
  0x22   :  { %2354 = vst.msk [vmem:[%s5735_s3 + $0x54] sm:$0xf] %vm2332_vm0, %v2872_v10  ;;  %2355 = vst.msk [vmem:[%s5735_s3 + $0x58] sm:$0xf] %vm2332_vm0, %v2873_v12  ;;  %v3169_v22 = vunpack.c.l.bf16 %v3633_v11  ;;  %v3170_v23 = vunpack.c.h.bf16 %v3633_v11  ;;  %v559_v24 = vmul.f32 %v3161_v16, %v3778_v1  ;;  %v560_v25 = vmul.f32 %v3162_v17, %v3778_v1 }
  0x23   :  { %2356 = vst.msk [vmem:[%s5735_s3 + $0x5c] sm:$0xf] %vm2332_vm0, %v2874_v13  ;;  %v561_v26 = vmul.f32 %v3165_v18, %v3778_v1  ;;  %v562_v27 = vmul.f32 %v3166_v19, %v3778_v1  ;;  %v820_v28 = vadd.f32 %v3792_v7, %v557_v20  ;;  %v821_v29 = vadd.f32 %v3792_v7, %v558_v21 }
  0x24   :  { %v563_v30 = vmul.f32 %v3169_v22, %v3778_v1  ;;  %v564_v31 = vmul.f32 %v3170_v23, %v3778_v1  ;;  %v822_v32 = vadd.f32 %v3792_v7, %v559_v24  ;;  %v823_v33 = vadd.f32 %v3792_v7, %v560_v25 }
  0x25   :  { %v824_v34 = vadd.f32 %v3792_v7, %v561_v26  ;;  %v825_v35 = vadd.f32 %v3792_v7, %v562_v27  ;;  %v1076_v36 = vmax.f32 %v820_v28, 0.0  ;;  %v1077_v37 = vmax.f32 %v821_v29, 0.0  ;;  %v3638_v26 = vld [vmem:[%s5732_s0 + $0xa0] sm:$0xff]  }
  0x26   :  { %v826_v38 = vadd.f32 %v3792_v7, %v563_v30  ;;  %v827_v39 = vadd.f32 %v3792_v7, %v564_v31  ;;  %v1078_v40 = vmax.f32 %v822_v32, 0.0  ;;  %v1079_v41 = vmax.f32 %v823_v33, 0.0  ;;  %v3639_v31 = vld [vmem:[%s5732_s0 + $0xa8] sm:$0xff]   ;;  %v3640_v32 = vld [vmem:[%s5732_s0 + $0xb0] sm:$0xff]  }
  0x27   :  { %v1080_v42 = vmax.f32 %v824_v34, 0.0  ;;  %v1081_v43 = vmax.f32 %v825_v35, 0.0  ;;  %v2875_v45 = vpack.c.bf16 %v1076_v36, %v1076_v36  ;;  %v2876_v46 = vpack.c.bf16 %v1077_v37, %v1077_v37  ;;  %v3641_v37 = vld [vmem:[%s5732_s0 + $0xb8] sm:$0xff]  }
  0x28   :  { %v1082_v47 = vmax.f32 %v826_v38, 0.0  ;;  %v1083_v48 = vmax.f32 %v827_v39, 0.0  ;;  %v2877_v51 = vpack.c.bf16 %v1078_v40, %v1078_v40  ;;  %v2878_v52 = vpack.c.bf16 %v1079_v41, %v1079_v41 }
  0x29   :  { %v2879_v53 = vpack.c.bf16 %v1080_v42, %v1080_v42  ;;  %v2880_v54 = vpack.c.bf16 %v1081_v43, %v1081_v43  ;;  %2357 = vst.msk [vmem:[%s5735_s3 + $0x60] sm:$0xf] %vm2332_vm0, %v2875_v45  ;;  %2358 = vst.msk [vmem:[%s5735_s3 + $0x64] sm:$0xf] %vm2332_vm0, %v2876_v46  ;;  %v3173_v58 = vunpack.c.l.bf16 %v3634_v44  ;;  %v3174_v59 = vunpack.c.h.bf16 %v3634_v44 }
  0x2a   :  { %v2881_v56 = vpack.c.bf16 %v1082_v47, %v1082_v47  ;;  %v2882_v57 = vpack.c.bf16 %v1083_v48, %v1083_v48  ;;  %2359 = vst.msk [vmem:[%s5735_s3 + $0x68] sm:$0xf] %vm2332_vm0, %v2877_v51  ;;  %2360 = vst.msk [vmem:[%s5735_s3 + $0x6c] sm:$0xf] %vm2332_vm0, %v2878_v52  ;;  %v3177_v60 = vunpack.c.l.bf16 %v3635_v49  ;;  %v3178_v61 = vunpack.c.h.bf16 %v3635_v49 }
  0x2b   :  { %2361 = vst.msk [vmem:[%s5735_s3 + $0x70] sm:$0xf] %vm2332_vm0, %v2879_v53  ;;  %2362 = vst.msk [vmem:[%s5735_s3 + $0x74] sm:$0xf] %vm2332_vm0, %v2880_v54  ;;  %v3181_v62 = vunpack.c.l.bf16 %v3636_v50  ;;  %v3182_v63 = vunpack.c.h.bf16 %v3636_v50  ;;  %v565_v0 = vmul.f32 %v3173_v58, %v3778_v1  ;;  %v566_v2 = vmul.f32 %v3174_v59, %v3778_v1 }
  0x2c   :  { %2363 = vst.msk [vmem:[%s5735_s3 + $0x78] sm:$0xf] %vm2332_vm0, %v2881_v56  ;;  %2364 = vst.msk [vmem:[%s5735_s3 + $0x7c] sm:$0xf] %vm2332_vm0, %v2882_v57  ;;  %v3185_v3 = vunpack.c.l.bf16 %v3637_v55  ;;  %v3186_v4 = vunpack.c.h.bf16 %v3637_v55  ;;  %v567_v5 = vmul.f32 %v3177_v60, %v3778_v1  ;;  %v568_v6 = vmul.f32 %v3178_v61, %v3778_v1 }
  0x2d   :  { %v569_v8 = vmul.f32 %v3181_v62, %v3778_v1  ;;  %v570_v9 = vmul.f32 %v3182_v63, %v3778_v1  ;;  %v828_v10 = vadd.f32 %v3792_v7, %v565_v0  ;;  %v829_v11 = vadd.f32 %v3792_v7, %v566_v2 }
  0x2e   :  { %v571_v12 = vmul.f32 %v3185_v3, %v3778_v1  ;;  %v572_v13 = vmul.f32 %v3186_v4, %v3778_v1  ;;  %v830_v14 = vadd.f32 %v3792_v7, %v567_v5  ;;  %v831_v15 = vadd.f32 %v3792_v7, %v568_v6 }
  0x2f   :  { %v832_v16 = vadd.f32 %v3792_v7, %v569_v8  ;;  %v833_v17 = vadd.f32 %v3792_v7, %v570_v9  ;;  %v1084_v18 = vmax.f32 %v828_v10, 0.0  ;;  %v1085_v19 = vmax.f32 %v829_v11, 0.0  ;;  %v3642_v8 = vld [vmem:[%s5732_s0 + $0xc0] sm:$0xff]  }
  0x30   :  { %v834_v20 = vadd.f32 %v3792_v7, %v571_v12  ;;  %v835_v21 = vadd.f32 %v3792_v7, %v572_v13  ;;  %v1086_v22 = vmax.f32 %v830_v14, 0.0  ;;  %v1087_v23 = vmax.f32 %v831_v15, 0.0  ;;  %v3643_v13 = vld [vmem:[%s5732_s0 + $0xc8] sm:$0xff]   ;;  %v3644_v14 = vld [vmem:[%s5732_s0 + $0xd0] sm:$0xff]  }
  0x31   :  { %v1088_v24 = vmax.f32 %v832_v16, 0.0  ;;  %v1089_v25 = vmax.f32 %v833_v17, 0.0  ;;  %v2883_v27 = vpack.c.bf16 %v1084_v18, %v1084_v18  ;;  %v2884_v28 = vpack.c.bf16 %v1085_v19, %v1085_v19  ;;  %v3645_v19 = vld [vmem:[%s5732_s0 + $0xd8] sm:$0xff]  }
  0x32   :  { %v1090_v29 = vmax.f32 %v834_v20, 0.0  ;;  %v1091_v30 = vmax.f32 %v835_v21, 0.0  ;;  %v2885_v33 = vpack.c.bf16 %v1086_v22, %v1086_v22  ;;  %v2886_v34 = vpack.c.bf16 %v1087_v23, %v1087_v23 }
  0x33   :  { %v2887_v35 = vpack.c.bf16 %v1088_v24, %v1088_v24  ;;  %v2888_v36 = vpack.c.bf16 %v1089_v25, %v1089_v25  ;;  %2365 = vst.msk [vmem:[%s5735_s3 + $0x80] sm:$0xf] %vm2332_vm0, %v2883_v27  ;;  %2366 = vst.msk [vmem:[%s5735_s3 + $0x84] sm:$0xf] %vm2332_vm0, %v2884_v28  ;;  %v3189_v40 = vunpack.c.l.bf16 %v3638_v26  ;;  %v3190_v41 = vunpack.c.h.bf16 %v3638_v26 }
  0x34   :  { %v2889_v38 = vpack.c.bf16 %v1090_v29, %v1090_v29  ;;  %v2890_v39 = vpack.c.bf16 %v1091_v30, %v1091_v30  ;;  %2367 = vst.msk [vmem:[%s5735_s3 + $0x88] sm:$0xf] %vm2332_vm0, %v2885_v33  ;;  %2368 = vst.msk [vmem:[%s5735_s3 + $0x8c] sm:$0xf] %vm2332_vm0, %v2886_v34  ;;  %v3193_v42 = vunpack.c.l.bf16 %v3639_v31  ;;  %v3194_v43 = vunpack.c.h.bf16 %v3639_v31 }
  0x35   :  { %2369 = vst.msk [vmem:[%s5735_s3 + $0x90] sm:$0xf] %vm2332_vm0, %v2887_v35  ;;  %2370 = vst.msk [vmem:[%s5735_s3 + $0x94] sm:$0xf] %vm2332_vm0, %v2888_v36  ;;  %v3197_v44 = vunpack.c.l.bf16 %v3640_v32  ;;  %v3198_v45 = vunpack.c.h.bf16 %v3640_v32  ;;  %v573_v46 = vmul.f32 %v3189_v40, %v3778_v1  ;;  %v574_v47 = vmul.f32 %v3190_v41, %v3778_v1 }
  0x36   :  { %2371 = vst.msk [vmem:[%s5735_s3 + $0x98] sm:$0xf] %vm2332_vm0, %v2889_v38  ;;  %2372 = vst.msk [vmem:[%s5735_s3 + $0x9c] sm:$0xf] %vm2332_vm0, %v2890_v39  ;;  %v3201_v48 = vunpack.c.l.bf16 %v3641_v37  ;;  %v3202_v49 = vunpack.c.h.bf16 %v3641_v37  ;;  %v575_v50 = vmul.f32 %v3193_v42, %v3778_v1  ;;  %v576_v51 = vmul.f32 %v3194_v43, %v3778_v1 }
  0x37   :  { %v577_v52 = vmul.f32 %v3197_v44, %v3778_v1  ;;  %v578_v53 = vmul.f32 %v3198_v45, %v3778_v1  ;;  %v836_v54 = vadd.f32 %v3792_v7, %v573_v46  ;;  %v837_v55 = vadd.f32 %v3792_v7, %v574_v47 }
  0x38   :  { %v579_v56 = vmul.f32 %v3201_v48, %v3778_v1  ;;  %v580_v57 = vmul.f32 %v3202_v49, %v3778_v1  ;;  %v838_v58 = vadd.f32 %v3792_v7, %v575_v50  ;;  %v839_v59 = vadd.f32 %v3792_v7, %v576_v51 }
  0x39   :  { %v840_v60 = vadd.f32 %v3792_v7, %v577_v52  ;;  %v841_v61 = vadd.f32 %v3792_v7, %v578_v53  ;;  %v1092_v62 = vmax.f32 %v836_v54, 0.0  ;;  %v1093_v63 = vmax.f32 %v837_v55, 0.0  ;;  %v3646_v52 = vld [vmem:[%s5732_s0 + $0xe0] sm:$0xff]  }
  0x3a   :  { %v842_v0 = vadd.f32 %v3792_v7, %v579_v56  ;;  %v843_v2 = vadd.f32 %v3792_v7, %v580_v57  ;;  %v1094_v3 = vmax.f32 %v838_v58, 0.0  ;;  %v1095_v4 = vmax.f32 %v839_v59, 0.0  ;;  %v3647_v57 = vld [vmem:[%s5732_s0 + $0xe8] sm:$0xff]   ;;  %v3648_v58 = vld [vmem:[%s5732_s0 + $0xf0] sm:$0xff]  }
  0x3b   :  { %v1096_v5 = vmax.f32 %v840_v60, 0.0  ;;  %v1097_v6 = vmax.f32 %v841_v61, 0.0  ;;  %v2891_v9 = vpack.c.bf16 %v1092_v62, %v1092_v62  ;;  %v2892_v10 = vpack.c.bf16 %v1093_v63, %v1093_v63  ;;  %v3649_v63 = vld [vmem:[%s5732_s0 + $0xf8] sm:$0xff]  }
  0x3c   :  { %v1098_v11 = vmax.f32 %v842_v0, 0.0  ;;  %v1099_v12 = vmax.f32 %v843_v2, 0.0  ;;  %v2893_v15 = vpack.c.bf16 %v1094_v3, %v1094_v3  ;;  %v2894_v16 = vpack.c.bf16 %v1095_v4, %v1095_v4 }
  0x3d   :  { %v2895_v17 = vpack.c.bf16 %v1096_v5, %v1096_v5  ;;  %v2896_v18 = vpack.c.bf16 %v1097_v6, %v1097_v6  ;;  %2373 = vst.msk [vmem:[%s5735_s3 + $0xa0] sm:$0xf] %vm2332_vm0, %v2891_v9  ;;  %2374 = vst.msk [vmem:[%s5735_s3 + $0xa4] sm:$0xf] %vm2332_vm0, %v2892_v10  ;;  %v3205_v22 = vunpack.c.l.bf16 %v3642_v8  ;;  %v3206_v23 = vunpack.c.h.bf16 %v3642_v8 }
  0x3e   :  { %v2897_v20 = vpack.c.bf16 %v1098_v11, %v1098_v11  ;;  %v2898_v21 = vpack.c.bf16 %v1099_v12, %v1099_v12  ;;  %2375 = vst.msk [vmem:[%s5735_s3 + $0xa8] sm:$0xf] %vm2332_vm0, %v2893_v15  ;;  %2376 = vst.msk [vmem:[%s5735_s3 + $0xac] sm:$0xf] %vm2332_vm0, %v2894_v16  ;;  %v3209_v24 = vunpack.c.l.bf16 %v3643_v13  ;;  %v3210_v25 = vunpack.c.h.bf16 %v3643_v13 }
  0x3f   :  { %2377 = vst.msk [vmem:[%s5735_s3 + $0xb0] sm:$0xf] %vm2332_vm0, %v2895_v17  ;;  %2378 = vst.msk [vmem:[%s5735_s3 + $0xb4] sm:$0xf] %vm2332_vm0, %v2896_v18  ;;  %v3213_v26 = vunpack.c.l.bf16 %v3644_v14  ;;  %v3214_v27 = vunpack.c.h.bf16 %v3644_v14  ;;  %v581_v28 = vmul.f32 %v3205_v22, %v3778_v1  ;;  %v582_v29 = vmul.f32 %v3206_v23, %v3778_v1 }
  0x40   :  { %2379 = vst.msk [vmem:[%s5735_s3 + $0xb8] sm:$0xf] %vm2332_vm0, %v2897_v20  ;;  %2380 = vst.msk [vmem:[%s5735_s3 + $0xbc] sm:$0xf] %vm2332_vm0, %v2898_v21  ;;  %v3217_v30 = vunpack.c.l.bf16 %v3645_v19  ;;  %v3218_v31 = vunpack.c.h.bf16 %v3645_v19  ;;  %v583_v32 = vmul.f32 %v3209_v24, %v3778_v1  ;;  %v584_v33 = vmul.f32 %v3210_v25, %v3778_v1 }
  0x41   :  { %v585_v34 = vmul.f32 %v3213_v26, %v3778_v1  ;;  %v586_v35 = vmul.f32 %v3214_v27, %v3778_v1  ;;  %v844_v36 = vadd.f32 %v3792_v7, %v581_v28  ;;  %v845_v37 = vadd.f32 %v3792_v7, %v582_v29 }
  0x42   :  { %v587_v38 = vmul.f32 %v3217_v30, %v3778_v1  ;;  %v588_v39 = vmul.f32 %v3218_v31, %v3778_v1  ;;  %v846_v40 = vadd.f32 %v3792_v7, %v583_v32  ;;  %v847_v41 = vadd.f32 %v3792_v7, %v584_v33 }
  0x43   :  { %v848_v42 = vadd.f32 %v3792_v7, %v585_v34  ;;  %v849_v43 = vadd.f32 %v3792_v7, %v586_v35  ;;  %v1100_v44 = vmax.f32 %v844_v36, 0.0  ;;  %v1101_v45 = vmax.f32 %v845_v37, 0.0  ;;  %v3650_v34 = vld [vmem:[%s5732_s0 + $0x100] sm:$0xff]  }
  0x44   :  { %v850_v46 = vadd.f32 %v3792_v7, %v587_v38  ;;  %v851_v47 = vadd.f32 %v3792_v7, %v588_v39  ;;  %v1102_v48 = vmax.f32 %v846_v40, 0.0  ;;  %v1103_v49 = vmax.f32 %v847_v41, 0.0  ;;  %v3651_v39 = vld [vmem:[%s5732_s0 + $0x108] sm:$0xff]   ;;  %v3652_v40 = vld [vmem:[%s5732_s0 + $0x110] sm:$0xff]  }
  0x45   :  { %v1104_v50 = vmax.f32 %v848_v42, 0.0  ;;  %v1105_v51 = vmax.f32 %v849_v43, 0.0  ;;  %v2899_v53 = vpack.c.bf16 %v1100_v44, %v1100_v44  ;;  %v2900_v54 = vpack.c.bf16 %v1101_v45, %v1101_v45  ;;  %v3653_v45 = vld [vmem:[%s5732_s0 + $0x118] sm:$0xff]  }
  0x46   :  { %v1106_v55 = vmax.f32 %v850_v46, 0.0  ;;  %v1107_v56 = vmax.f32 %v851_v47, 0.0  ;;  %v2901_v59 = vpack.c.bf16 %v1102_v48, %v1102_v48  ;;  %v2902_v60 = vpack.c.bf16 %v1103_v49, %v1103_v49 }
  0x47   :  { %v2903_v61 = vpack.c.bf16 %v1104_v50, %v1104_v50  ;;  %v2904_v62 = vpack.c.bf16 %v1105_v51, %v1105_v51  ;;  %2381 = vst.msk [vmem:[%s5735_s3 + $0xc0] sm:$0xf] %vm2332_vm0, %v2899_v53  ;;  %2382 = vst.msk [vmem:[%s5735_s3 + $0xc4] sm:$0xf] %vm2332_vm0, %v2900_v54  ;;  %v3221_v3 = vunpack.c.l.bf16 %v3646_v52  ;;  %v3222_v4 = vunpack.c.h.bf16 %v3646_v52 }
  0x48   :  { %v2905_v0 = vpack.c.bf16 %v1106_v55, %v1106_v55  ;;  %v2906_v2 = vpack.c.bf16 %v1107_v56, %v1107_v56  ;;  %2383 = vst.msk [vmem:[%s5735_s3 + $0xc8] sm:$0xf] %vm2332_vm0, %v2901_v59  ;;  %2384 = vst.msk [vmem:[%s5735_s3 + $0xcc] sm:$0xf] %vm2332_vm0, %v2902_v60  ;;  %v3225_v5 = vunpack.c.l.bf16 %v3647_v57  ;;  %v3226_v6 = vunpack.c.h.bf16 %v3647_v57 }
  0x49   :  { %2385 = vst.msk [vmem:[%s5735_s3 + $0xd0] sm:$0xf] %vm2332_vm0, %v2903_v61  ;;  %2386 = vst.msk [vmem:[%s5735_s3 + $0xd4] sm:$0xf] %vm2332_vm0, %v2904_v62  ;;  %v3229_v8 = vunpack.c.l.bf16 %v3648_v58  ;;  %v3230_v9 = vunpack.c.h.bf16 %v3648_v58  ;;  %v589_v10 = vmul.f32 %v3221_v3, %v3778_v1  ;;  %v590_v11 = vmul.f32 %v3222_v4, %v3778_v1 }
  0x4a   :  { %2387 = vst.msk [vmem:[%s5735_s3 + $0xd8] sm:$0xf] %vm2332_vm0, %v2905_v0  ;;  %2388 = vst.msk [vmem:[%s5735_s3 + $0xdc] sm:$0xf] %vm2332_vm0, %v2906_v2  ;;  %v3233_v12 = vunpack.c.l.bf16 %v3649_v63  ;;  %v3234_v13 = vunpack.c.h.bf16 %v3649_v63  ;;  %v591_v14 = vmul.f32 %v3225_v5, %v3778_v1  ;;  %v592_v15 = vmul.f32 %v3226_v6, %v3778_v1 }
  0x4b   :  { %v593_v16 = vmul.f32 %v3229_v8, %v3778_v1  ;;  %v594_v17 = vmul.f32 %v3230_v9, %v3778_v1  ;;  %v852_v18 = vadd.f32 %v3792_v7, %v589_v10  ;;  %v853_v19 = vadd.f32 %v3792_v7, %v590_v11 }
  0x4c   :  { %v595_v20 = vmul.f32 %v3233_v12, %v3778_v1  ;;  %v596_v21 = vmul.f32 %v3234_v13, %v3778_v1  ;;  %v854_v22 = vadd.f32 %v3792_v7, %v591_v14  ;;  %v855_v23 = vadd.f32 %v3792_v7, %v592_v15 }
  0x4d   :  { %v856_v24 = vadd.f32 %v3792_v7, %v593_v16  ;;  %v857_v25 = vadd.f32 %v3792_v7, %v594_v17  ;;  %v1108_v26 = vmax.f32 %v852_v18, 0.0  ;;  %v1109_v27 = vmax.f32 %v853_v19, 0.0  ;;  %v3654_v16 = vld [vmem:[%s5732_s0 + $0x120] sm:$0xff]  }
  0x4e   :  { %v858_v28 = vadd.f32 %v3792_v7, %v595_v20  ;;  %v859_v29 = vadd.f32 %v3792_v7, %v596_v21  ;;  %v1110_v30 = vmax.f32 %v854_v22, 0.0  ;;  %v1111_v31 = vmax.f32 %v855_v23, 0.0  ;;  %v3655_v21 = vld [vmem:[%s5732_s0 + $0x128] sm:$0xff]   ;;  %v3656_v22 = vld [vmem:[%s5732_s0 + $0x130] sm:$0xff]  }
  0x4f   :  { %v1112_v32 = vmax.f32 %v856_v24, 0.0  ;;  %v1113_v33 = vmax.f32 %v857_v25, 0.0  ;;  %v2907_v35 = vpack.c.bf16 %v1108_v26, %v1108_v26  ;;  %v2908_v36 = vpack.c.bf16 %v1109_v27, %v1109_v27  ;;  %v3657_v27 = vld [vmem:[%s5732_s0 + $0x138] sm:$0xff]  }
  0x50   :  { %v1114_v37 = vmax.f32 %v858_v28, 0.0  ;;  %v1115_v38 = vmax.f32 %v859_v29, 0.0  ;;  %v2909_v41 = vpack.c.bf16 %v1110_v30, %v1110_v30  ;;  %v2910_v42 = vpack.c.bf16 %v1111_v31, %v1111_v31 }
  0x51   :  { %v2911_v43 = vpack.c.bf16 %v1112_v32, %v1112_v32  ;;  %v2912_v44 = vpack.c.bf16 %v1113_v33, %v1113_v33  ;;  %2389 = vst.msk [vmem:[%s5735_s3 + $0xe0] sm:$0xf] %vm2332_vm0, %v2907_v35  ;;  %2390 = vst.msk [vmem:[%s5735_s3 + $0xe4] sm:$0xf] %vm2332_vm0, %v2908_v36  ;;  %v3237_v48 = vunpack.c.l.bf16 %v3650_v34  ;;  %v3238_v49 = vunpack.c.h.bf16 %v3650_v34 }
  0x52   :  { %v2913_v46 = vpack.c.bf16 %v1114_v37, %v1114_v37  ;;  %v2914_v47 = vpack.c.bf16 %v1115_v38, %v1115_v38  ;;  %2391 = vst.msk [vmem:[%s5735_s3 + $0xe8] sm:$0xf] %vm2332_vm0, %v2909_v41  ;;  %2392 = vst.msk [vmem:[%s5735_s3 + $0xec] sm:$0xf] %vm2332_vm0, %v2910_v42  ;;  %v3241_v50 = vunpack.c.l.bf16 %v3651_v39  ;;  %v3242_v51 = vunpack.c.h.bf16 %v3651_v39 }
  0x53   :  { %2393 = vst.msk [vmem:[%s5735_s3 + $0xf0] sm:$0xf] %vm2332_vm0, %v2911_v43  ;;  %2394 = vst.msk [vmem:[%s5735_s3 + $0xf4] sm:$0xf] %vm2332_vm0, %v2912_v44  ;;  %v3245_v52 = vunpack.c.l.bf16 %v3652_v40  ;;  %v3246_v53 = vunpack.c.h.bf16 %v3652_v40  ;;  %v597_v54 = vmul.f32 %v3237_v48, %v3778_v1  ;;  %v598_v55 = vmul.f32 %v3238_v49, %v3778_v1 }
  0x54   :  { %2395 = vst.msk [vmem:[%s5735_s3 + $0xf8] sm:$0xf] %vm2332_vm0, %v2913_v46  ;;  %2396 = vst.msk [vmem:[%s5735_s3 + $0xfc] sm:$0xf] %vm2332_vm0, %v2914_v47  ;;  %v3249_v56 = vunpack.c.l.bf16 %v3653_v45  ;;  %v3250_v57 = vunpack.c.h.bf16 %v3653_v45  ;;  %v599_v58 = vmul.f32 %v3241_v50, %v3778_v1  ;;  %v600_v59 = vmul.f32 %v3242_v51, %v3778_v1 }
  0x55   :  { %v601_v60 = vmul.f32 %v3245_v52, %v3778_v1  ;;  %v602_v61 = vmul.f32 %v3246_v53, %v3778_v1  ;;  %v860_v62 = vadd.f32 %v3792_v7, %v597_v54  ;;  %v861_v63 = vadd.f32 %v3792_v7, %v598_v55 }
  0x56   :  { %v603_v0 = vmul.f32 %v3249_v56, %v3778_v1  ;;  %v604_v2 = vmul.f32 %v3250_v57, %v3778_v1  ;;  %v862_v3 = vadd.f32 %v3792_v7, %v599_v58  ;;  %v863_v4 = vadd.f32 %v3792_v7, %v600_v59 }
  0x57   :  { %v864_v5 = vadd.f32 %v3792_v7, %v601_v60  ;;  %v865_v6 = vadd.f32 %v3792_v7, %v602_v61  ;;  %v1116_v8 = vmax.f32 %v860_v62, 0.0  ;;  %v1117_v9 = vmax.f32 %v861_v63, 0.0 }
  0x58   :  { %v866_v10 = vadd.f32 %v3792_v7, %v603_v0  ;;  %v867_v11 = vadd.f32 %v3792_v7, %v604_v2  ;;  %v1118_v12 = vmax.f32 %v862_v3, 0.0  ;;  %v1119_v13 = vmax.f32 %v863_v4, 0.0  ;;  %v3659_v0 = vld [vmem:[%s5732_s0 + $0x148] sm:$0xff]  }
  0x59   :  { %v1120_v14 = vmax.f32 %v864_v5, 0.0  ;;  %v1121_v15 = vmax.f32 %v865_v6, 0.0  ;;  %v2915_v17 = vpack.c.bf16 %v1116_v8, %v1116_v8  ;;  %v2916_v18 = vpack.c.bf16 %v1117_v9, %v1117_v9  ;;  %v3661_v6 = vld [vmem:[%s5732_s0 + $0x158] sm:$0xff]  }
  0x5a   :  { %v1122_v19 = vmax.f32 %v866_v10, 0.0  ;;  %v1123_v20 = vmax.f32 %v867_v11, 0.0  ;;  %v2917_v23 = vpack.c.bf16 %v1118_v12, %v1118_v12  ;;  %v2918_v24 = vpack.c.bf16 %v1119_v13, %v1119_v13 }
  0x5b   :  { %v2919_v25 = vpack.c.bf16 %v1120_v14, %v1120_v14  ;;  %v2920_v26 = vpack.c.bf16 %v1121_v15, %v1121_v15  ;;  %2397 = vst.msk [vmem:[%s5735_s3 + $0x100] sm:$0xf] %vm2332_vm0, %v2915_v17  ;;  %2398 = vst.msk [vmem:[%s5735_s3 + $0x104] sm:$0xf] %vm2332_vm0, %v2916_v18  ;;  %v3253_v30 = vunpack.c.l.bf16 %v3654_v16  ;;  %v3254_v31 = vunpack.c.h.bf16 %v3654_v16  ;;  %v4397_v16 = vld [vmem:[%s5733_s1] ss:$0 sm:$0xff] }
  0x5c   :  { %v2921_v28 = vpack.c.bf16 %v1122_v19, %v1122_v19  ;;  %v2922_v29 = vpack.c.bf16 %v1123_v20, %v1123_v20  ;;  %2399 = vst.msk [vmem:[%s5735_s3 + $0x108] sm:$0xf] %vm2332_vm0, %v2917_v23  ;;  %2400 = vst.msk [vmem:[%s5735_s3 + $0x10c] sm:$0xf] %vm2332_vm0, %v2918_v24  ;;  %v3257_v32 = vunpack.c.l.bf16 %v3655_v21  ;;  %v3258_v33 = vunpack.c.h.bf16 %v3655_v21 }
  0x5d   :  { %2401 = vst.msk [vmem:[%s5735_s3 + $0x110] sm:$0xf] %vm2332_vm0, %v2919_v25  ;;  %2402 = vst.msk [vmem:[%s5735_s3 + $0x114] sm:$0xf] %vm2332_vm0, %v2920_v26  ;;  %v3261_v34 = vunpack.c.l.bf16 %v3656_v22  ;;  %v3262_v35 = vunpack.c.h.bf16 %v3656_v22  ;;  %v605_v36 = vmul.f32 %v3253_v30, %v3778_v1  ;;  %v606_v37 = vmul.f32 %v3254_v31, %v3778_v1  ;;  %v4408_v25 = vld [vmem:[%s5734_s2] ss:$0 sm:$0xff] }
  0x5e   :  { %2403 = vst.msk [vmem:[%s5735_s3 + $0x118] sm:$0xf] %vm2332_vm0, %v2921_v28  ;;  %2404 = vst.msk [vmem:[%s5735_s3 + $0x11c] sm:$0xf] %vm2332_vm0, %v2922_v29  ;;  %v3265_v38 = vunpack.c.l.bf16 %v3657_v27  ;;  %v3266_v39 = vunpack.c.h.bf16 %v3657_v27  ;;  %v607_v40 = vmul.f32 %v3257_v32, %v3778_v1  ;;  %v608_v41 = vmul.f32 %v3258_v33, %v3778_v1 }
  0x5f   :  { %v609_v42 = vmul.f32 %v3261_v34, %v3778_v1  ;;  %v610_v43 = vmul.f32 %v3262_v35, %v3778_v1  ;;  %v868_v44 = vadd.f32 %v3792_v7, %v605_v36  ;;  %v869_v45 = vadd.f32 %v3792_v7, %v606_v37 }
  0x60   :  { %v611_v46 = vmul.f32 %v3265_v38, %v3778_v1  ;;  %v612_v47 = vmul.f32 %v3266_v39, %v3778_v1  ;;  %v870_v48 = vadd.f32 %v3792_v7, %v607_v40  ;;  %v871_v49 = vadd.f32 %v3792_v7, %v608_v41  ;;  %v3658_v1 = vld [vmem:[%s5732_s0 + $0x140] sm:$0xff]  }
  0x61   :  { %v872_v50 = vadd.f32 %v3792_v7, %v609_v42  ;;  %v873_v51 = vadd.f32 %v3792_v7, %v610_v43  ;;  %v1124_v52 = vmax.f32 %v868_v44, 0.0  ;;  %v1125_v53 = vmax.f32 %v869_v45, 0.0  ;;  %v3662_v42 = vld [vmem:[%s5732_s0 + $0x160] sm:$0xff]  }
  0x62   :  { %v874_v54 = vadd.f32 %v3792_v7, %v611_v46  ;;  %v875_v55 = vadd.f32 %v3792_v7, %v612_v47  ;;  %v1126_v56 = vmax.f32 %v870_v48, 0.0  ;;  %v1127_v57 = vmax.f32 %v871_v49, 0.0  ;;  %v3660_v7 = vld [vmem:[%s5732_s0 + $0x150] sm:$0xff]   ;;  %v3663_v47 = vld [vmem:[%s5732_s0 + $0x168] sm:$0xff]  }
  0x63   :  { %v1128_v58 = vmax.f32 %v872_v50, 0.0  ;;  %v1129_v59 = vmax.f32 %v873_v51, 0.0  ;;  %v2923_v60 = vpack.c.bf16 %v1124_v52, %v1124_v52  ;;  %v2924_v61 = vpack.c.bf16 %v1125_v53, %v1125_v53  ;;  %v3664_v48 = vld [vmem:[%s5732_s0 + $0x170] sm:$0xff]   ;;  %v3665_v53 = vld [vmem:[%s5732_s0 + $0x178] sm:$0xff]  }
  0x64   :  { %v1130_v62 = vmax.f32 %v874_v54, 0.0  ;;  %v1131_v63 = vmax.f32 %v875_v55, 0.0  ;;  %v2925_v2 = vpack.c.bf16 %v1126_v56, %v1126_v56  ;;  %v2926_v3 = vpack.c.bf16 %v1127_v57, %v1127_v57 }
  0x65   :  { %v2927_v4 = vpack.c.bf16 %v1128_v58, %v1128_v58  ;;  %v2928_v5 = vpack.c.bf16 %v1129_v59, %v1129_v59  ;;  %2405 = vst.msk [vmem:[%s5735_s3 + $0x120] sm:$0xf] %vm2332_vm0, %v2923_v60  ;;  %2406 = vst.msk [vmem:[%s5735_s3 + $0x124] sm:$0xf] %vm2332_vm0, %v2924_v61  ;;  %v3269_v10 = vunpack.c.l.bf16 %v3658_v1  ;;  %v3270_v11 = vunpack.c.h.bf16 %v3658_v1 }
  0x66   :  { %v2929_v8 = vpack.c.bf16 %v1130_v62, %v1130_v62  ;;  %v2930_v9 = vpack.c.bf16 %v1131_v63, %v1131_v63  ;;  %2407 = vst.msk [vmem:[%s5735_s3 + $0x128] sm:$0xf] %vm2332_vm0, %v2925_v2  ;;  %2408 = vst.msk [vmem:[%s5735_s3 + $0x12c] sm:$0xf] %vm2332_vm0, %v2926_v3  ;;  %v3273_v12 = vunpack.c.l.bf16 %v3659_v0  ;;  %v3274_v13 = vunpack.c.h.bf16 %v3659_v0 }
  0x67   :  { %2409 = vst.msk [vmem:[%s5735_s3 + $0x130] sm:$0xf] %vm2332_vm0, %v2927_v4  ;;  %2410 = vst.msk [vmem:[%s5735_s3 + $0x134] sm:$0xf] %vm2332_vm0, %v2928_v5  ;;  %v3277_v14 = vunpack.c.l.bf16 %v3660_v7  ;;  %v3278_v15 = vunpack.c.h.bf16 %v3660_v7  ;;  %v613_v17 = vmul.f32 %v4397_v16, %v3269_v10  ;;  %v614_v18 = vmul.f32 %v4397_v16, %v3270_v11 }
  0x68   :  { %2411 = vst.msk [vmem:[%s5735_s3 + $0x138] sm:$0xf] %vm2332_vm0, %v2929_v8  ;;  %2412 = vst.msk [vmem:[%s5735_s3 + $0x13c] sm:$0xf] %vm2332_vm0, %v2930_v9  ;;  %v3281_v19 = vunpack.c.l.bf16 %v3661_v6  ;;  %v3282_v20 = vunpack.c.h.bf16 %v3661_v6  ;;  %v615_v21 = vmul.f32 %v4397_v16, %v3273_v12  ;;  %v616_v22 = vmul.f32 %v4397_v16, %v3274_v13 }
  0x69   :  { %v617_v23 = vmul.f32 %v4397_v16, %v3277_v14  ;;  %v618_v24 = vmul.f32 %v4397_v16, %v3278_v15  ;;  %v876_v26 = vadd.f32 %v4408_v25, %v613_v17  ;;  %v877_v27 = vadd.f32 %v4408_v25, %v614_v18 }
  0x6a   :  { %v619_v28 = vmul.f32 %v4397_v16, %v3281_v19  ;;  %v620_v29 = vmul.f32 %v4397_v16, %v3282_v20  ;;  %v878_v30 = vadd.f32 %v4408_v25, %v615_v21  ;;  %v879_v31 = vadd.f32 %v4408_v25, %v616_v22 }
  0x6b   :  { %v880_v32 = vadd.f32 %v4408_v25, %v617_v23  ;;  %v881_v33 = vadd.f32 %v4408_v25, %v618_v24  ;;  %v1132_v34 = vmax.f32 %v876_v26, 0.0  ;;  %v1133_v35 = vmax.f32 %v877_v27, 0.0  ;;  %v3666_v23 = vld [vmem:[%s5732_s0 + $0x180] sm:$0xff]  }
  0x6c   :  { %v882_v36 = vadd.f32 %v4408_v25, %v619_v28  ;;  %v883_v37 = vadd.f32 %v4408_v25, %v620_v29  ;;  %v1134_v38 = vmax.f32 %v878_v30, 0.0  ;;  %v1135_v39 = vmax.f32 %v879_v31, 0.0  ;;  %v3667_v29 = vld [vmem:[%s5732_s0 + $0x188] sm:$0xff]   ;;  %v3668_v30 = vld [vmem:[%s5732_s0 + $0x190] sm:$0xff]  }
  0x6d   :  { %v1136_v40 = vmax.f32 %v880_v32, 0.0  ;;  %v1137_v41 = vmax.f32 %v881_v33, 0.0  ;;  %v2931_v43 = vpack.c.bf16 %v1132_v34, %v1132_v34  ;;  %v2932_v44 = vpack.c.bf16 %v1133_v35, %v1133_v35  ;;  %v3669_v35 = vld [vmem:[%s5732_s0 + $0x198] sm:$0xff]  }
  0x6e   :  { %v1138_v45 = vmax.f32 %v882_v36, 0.0  ;;  %v1139_v46 = vmax.f32 %v883_v37, 0.0  ;;  %v2933_v49 = vpack.c.bf16 %v1134_v38, %v1134_v38  ;;  %v2934_v50 = vpack.c.bf16 %v1135_v39, %v1135_v39 }
  0x6f   :  { %v2935_v51 = vpack.c.bf16 %v1136_v40, %v1136_v40  ;;  %v2936_v52 = vpack.c.bf16 %v1137_v41, %v1137_v41  ;;  %2413 = vst.msk [vmem:[%s5735_s3 + $0x140] sm:$0xf] %vm2332_vm0, %v2931_v43  ;;  %2414 = vst.msk [vmem:[%s5735_s3 + $0x144] sm:$0xf] %vm2332_vm0, %v2932_v44  ;;  %v3285_v56 = vunpack.c.l.bf16 %v3662_v42  ;;  %v3286_v57 = vunpack.c.h.bf16 %v3662_v42 }
  0x70   :  { %v2937_v54 = vpack.c.bf16 %v1138_v45, %v1138_v45  ;;  %v2938_v55 = vpack.c.bf16 %v1139_v46, %v1139_v46  ;;  %2415 = vst.msk [vmem:[%s5735_s3 + $0x148] sm:$0xf] %vm2332_vm0, %v2933_v49  ;;  %2416 = vst.msk [vmem:[%s5735_s3 + $0x14c] sm:$0xf] %vm2332_vm0, %v2934_v50  ;;  %v3289_v58 = vunpack.c.l.bf16 %v3663_v47  ;;  %v3290_v59 = vunpack.c.h.bf16 %v3663_v47 }
  0x71   :  { %2417 = vst.msk [vmem:[%s5735_s3 + $0x150] sm:$0xf] %vm2332_vm0, %v2935_v51  ;;  %2418 = vst.msk [vmem:[%s5735_s3 + $0x154] sm:$0xf] %vm2332_vm0, %v2936_v52  ;;  %v3293_v1 = vunpack.c.l.bf16 %v3664_v48  ;;  %v3294_v60 = vunpack.c.h.bf16 %v3664_v48  ;;  %v621_v61 = vmul.f32 %v4397_v16, %v3285_v56  ;;  %v622_v62 = vmul.f32 %v4397_v16, %v3286_v57 }
  0x72   :  { %2419 = vst.msk [vmem:[%s5735_s3 + $0x158] sm:$0xf] %vm2332_vm0, %v2937_v54  ;;  %2420 = vst.msk [vmem:[%s5735_s3 + $0x15c] sm:$0xf] %vm2332_vm0, %v2938_v55  ;;  %v3297_v63 = vunpack.c.l.bf16 %v3665_v53  ;;  %v3298_v0 = vunpack.c.h.bf16 %v3665_v53  ;;  %v623_v7 = vmul.f32 %v4397_v16, %v3289_v58  ;;  %v624_v2 = vmul.f32 %v4397_v16, %v3290_v59 }
  0x73   :  { %v625_v3 = vmul.f32 %v4397_v16, %v3293_v1  ;;  %v626_v4 = vmul.f32 %v4397_v16, %v3294_v60  ;;  %v884_v5 = vadd.f32 %v4408_v25, %v621_v61  ;;  %v885_v6 = vadd.f32 %v4408_v25, %v622_v62 }
  0x74   :  { %v627_v8 = vmul.f32 %v4397_v16, %v3297_v63  ;;  %v628_v9 = vmul.f32 %v4397_v16, %v3298_v0  ;;  %v886_v10 = vadd.f32 %v4408_v25, %v623_v7  ;;  %v887_v11 = vadd.f32 %v4408_v25, %v624_v2 }
  0x75   :  { %v888_v12 = vadd.f32 %v4408_v25, %v625_v3  ;;  %v889_v13 = vadd.f32 %v4408_v25, %v626_v4  ;;  %v1140_v14 = vmax.f32 %v884_v5, 0.0  ;;  %v1141_v15 = vmax.f32 %v885_v6, 0.0  ;;  %v3670_v3 = vld [vmem:[%s5732_s0 + $0x1a0] sm:$0xff]  }
  0x76   :  { %v890_v17 = vadd.f32 %v4408_v25, %v627_v8  ;;  %v891_v18 = vadd.f32 %v4408_v25, %v628_v9  ;;  %v1142_v19 = vmax.f32 %v886_v10, 0.0  ;;  %v1143_v20 = vmax.f32 %v887_v11, 0.0  ;;  %v3671_v9 = vld [vmem:[%s5732_s0 + $0x1a8] sm:$0xff]   ;;  %v3672_v10 = vld [vmem:[%s5732_s0 + $0x1b0] sm:$0xff]  }
  0x77   :  { %v1144_v21 = vmax.f32 %v888_v12, 0.0  ;;  %v1145_v22 = vmax.f32 %v889_v13, 0.0  ;;  %v2939_v24 = vpack.c.bf16 %v1140_v14, %v1140_v14  ;;  %v2940_v26 = vpack.c.bf16 %v1141_v15, %v1141_v15  ;;  %v3673_v15 = vld [vmem:[%s5732_s0 + $0x1b8] sm:$0xff]  }
  0x78   :  { %v1146_v27 = vmax.f32 %v890_v17, 0.0  ;;  %v1147_v28 = vmax.f32 %v891_v18, 0.0  ;;  %v2941_v31 = vpack.c.bf16 %v1142_v19, %v1142_v19  ;;  %v2942_v32 = vpack.c.bf16 %v1143_v20, %v1143_v20 }
  0x79   :  { %v2943_v33 = vpack.c.bf16 %v1144_v21, %v1144_v21  ;;  %v2944_v34 = vpack.c.bf16 %v1145_v22, %v1145_v22  ;;  %2421 = vst.msk [vmem:[%s5735_s3 + $0x160] sm:$0xf] %vm2332_vm0, %v2939_v24  ;;  %2422 = vst.msk [vmem:[%s5735_s3 + $0x164] sm:$0xf] %vm2332_vm0, %v2940_v26  ;;  %v3301_v38 = vunpack.c.l.bf16 %v3666_v23  ;;  %v3302_v39 = vunpack.c.h.bf16 %v3666_v23 }
  0x7a   :  { %v2945_v36 = vpack.c.bf16 %v1146_v27, %v1146_v27  ;;  %v2946_v37 = vpack.c.bf16 %v1147_v28, %v1147_v28  ;;  %2423 = vst.msk [vmem:[%s5735_s3 + $0x168] sm:$0xf] %vm2332_vm0, %v2941_v31  ;;  %2424 = vst.msk [vmem:[%s5735_s3 + $0x16c] sm:$0xf] %vm2332_vm0, %v2942_v32  ;;  %v3305_v40 = vunpack.c.l.bf16 %v3667_v29  ;;  %v3306_v41 = vunpack.c.h.bf16 %v3667_v29 }
  0x7b   :  { %2425 = vst.msk [vmem:[%s5735_s3 + $0x170] sm:$0xf] %vm2332_vm0, %v2943_v33  ;;  %2426 = vst.msk [vmem:[%s5735_s3 + $0x174] sm:$0xf] %vm2332_vm0, %v2944_v34  ;;  %v3309_v42 = vunpack.c.l.bf16 %v3668_v30  ;;  %v3310_v43 = vunpack.c.h.bf16 %v3668_v30  ;;  %v629_v44 = vmul.f32 %v4397_v16, %v3301_v38  ;;  %v630_v45 = vmul.f32 %v4397_v16, %v3302_v39 }
  0x7c   :  { %2427 = vst.msk [vmem:[%s5735_s3 + $0x178] sm:$0xf] %vm2332_vm0, %v2945_v36  ;;  %2428 = vst.msk [vmem:[%s5735_s3 + $0x17c] sm:$0xf] %vm2332_vm0, %v2946_v37  ;;  %v3313_v46 = vunpack.c.l.bf16 %v3669_v35  ;;  %v3314_v47 = vunpack.c.h.bf16 %v3669_v35  ;;  %v631_v48 = vmul.f32 %v4397_v16, %v3305_v40  ;;  %v632_v49 = vmul.f32 %v4397_v16, %v3306_v41 }
  0x7d   :  { %v633_v50 = vmul.f32 %v4397_v16, %v3309_v42  ;;  %v634_v51 = vmul.f32 %v4397_v16, %v3310_v43  ;;  %v892_v52 = vadd.f32 %v4408_v25, %v629_v44  ;;  %v893_v53 = vadd.f32 %v4408_v25, %v630_v45 }
  0x7e   :  { %v635_v54 = vmul.f32 %v4397_v16, %v3313_v46  ;;  %v636_v55 = vmul.f32 %v4397_v16, %v3314_v47  ;;  %v894_v56 = vadd.f32 %v4408_v25, %v631_v48  ;;  %v895_v57 = vadd.f32 %v4408_v25, %v632_v49 }
  0x7f   :  { %v896_v58 = vadd.f32 %v4408_v25, %v633_v50  ;;  %v897_v59 = vadd.f32 %v4408_v25, %v634_v51  ;;  %v1148_v1 = vmax.f32 %v892_v52, 0.0  ;;  %v1149_v60 = vmax.f32 %v893_v53, 0.0  ;;  %v3674_v50 = vld [vmem:[%s5732_s0 + $0x1c0] sm:$0xff]  }
  0x80   :  { %v898_v61 = vadd.f32 %v4408_v25, %v635_v54  ;;  %v899_v62 = vadd.f32 %v4408_v25, %v636_v55  ;;  %v1150_v63 = vmax.f32 %v894_v56, 0.0  ;;  %v1151_v0 = vmax.f32 %v895_v57, 0.0  ;;  %v3675_v55 = vld [vmem:[%s5732_s0 + $0x1c8] sm:$0xff]   ;;  %v3676_v56 = vld [vmem:[%s5732_s0 + $0x1d0] sm:$0xff]  }
  0x81   :  { %v1152_v7 = vmax.f32 %v896_v58, 0.0  ;;  %v1153_v2 = vmax.f32 %v897_v59, 0.0  ;;  %v2947_v4 = vpack.c.bf16 %v1148_v1, %v1148_v1  ;;  %v2948_v5 = vpack.c.bf16 %v1149_v60, %v1149_v60  ;;  %v3677_v60 = vld [vmem:[%s5732_s0 + $0x1d8] sm:$0xff]  }
  0x82   :  { %v1154_v6 = vmax.f32 %v898_v61, 0.0  ;;  %v1155_v8 = vmax.f32 %v899_v62, 0.0  ;;  %v2949_v11 = vpack.c.bf16 %v1150_v63, %v1150_v63  ;;  %v2950_v12 = vpack.c.bf16 %v1151_v0, %v1151_v0 }
  0x83   :  { %v2951_v13 = vpack.c.bf16 %v1152_v7, %v1152_v7  ;;  %v2952_v14 = vpack.c.bf16 %v1153_v2, %v1153_v2  ;;  %2429 = vst.msk [vmem:[%s5735_s3 + $0x180] sm:$0xf] %vm2332_vm0, %v2947_v4  ;;  %2430 = vst.msk [vmem:[%s5735_s3 + $0x184] sm:$0xf] %vm2332_vm0, %v2948_v5  ;;  %v3317_v19 = vunpack.c.l.bf16 %v3670_v3  ;;  %v3318_v20 = vunpack.c.h.bf16 %v3670_v3 }
  0x84   :  { %v2953_v17 = vpack.c.bf16 %v1154_v6, %v1154_v6  ;;  %v2954_v18 = vpack.c.bf16 %v1155_v8, %v1155_v8  ;;  %2431 = vst.msk [vmem:[%s5735_s3 + $0x188] sm:$0xf] %vm2332_vm0, %v2949_v11  ;;  %2432 = vst.msk [vmem:[%s5735_s3 + $0x18c] sm:$0xf] %vm2332_vm0, %v2950_v12  ;;  %v3321_v21 = vunpack.c.l.bf16 %v3671_v9  ;;  %v3322_v22 = vunpack.c.h.bf16 %v3671_v9 }
  0x85   :  { %2433 = vst.msk [vmem:[%s5735_s3 + $0x190] sm:$0xf] %vm2332_vm0, %v2951_v13  ;;  %2434 = vst.msk [vmem:[%s5735_s3 + $0x194] sm:$0xf] %vm2332_vm0, %v2952_v14  ;;  %v3325_v23 = vunpack.c.l.bf16 %v3672_v10  ;;  %v3326_v24 = vunpack.c.h.bf16 %v3672_v10  ;;  %v637_v26 = vmul.f32 %v4397_v16, %v3317_v19  ;;  %v638_v27 = vmul.f32 %v4397_v16, %v3318_v20 }
  0x86   :  { %2435 = vst.msk [vmem:[%s5735_s3 + $0x198] sm:$0xf] %vm2332_vm0, %v2953_v17  ;;  %2436 = vst.msk [vmem:[%s5735_s3 + $0x19c] sm:$0xf] %vm2332_vm0, %v2954_v18  ;;  %v3329_v28 = vunpack.c.l.bf16 %v3673_v15  ;;  %v3330_v29 = vunpack.c.h.bf16 %v3673_v15  ;;  %v639_v30 = vmul.f32 %v4397_v16, %v3321_v21  ;;  %v640_v31 = vmul.f32 %v4397_v16, %v3322_v22 }
  0x87   :  { %v641_v32 = vmul.f32 %v4397_v16, %v3325_v23  ;;  %v642_v33 = vmul.f32 %v4397_v16, %v3326_v24  ;;  %v900_v34 = vadd.f32 %v4408_v25, %v637_v26  ;;  %v901_v35 = vadd.f32 %v4408_v25, %v638_v27 }
  0x88   :  { %v643_v36 = vmul.f32 %v4397_v16, %v3329_v28  ;;  %v644_v37 = vmul.f32 %v4397_v16, %v3330_v29  ;;  %v902_v38 = vadd.f32 %v4408_v25, %v639_v30  ;;  %v903_v39 = vadd.f32 %v4408_v25, %v640_v31 }
  0x89   :  { %v904_v40 = vadd.f32 %v4408_v25, %v641_v32  ;;  %v905_v41 = vadd.f32 %v4408_v25, %v642_v33  ;;  %v1156_v42 = vmax.f32 %v900_v34, 0.0  ;;  %v1157_v43 = vmax.f32 %v901_v35, 0.0  ;;  %v3678_v32 = vld [vmem:[%s5732_s0 + $0x1e0] sm:$0xff]  }
  0x8a   :  { %v906_v44 = vadd.f32 %v4408_v25, %v643_v36  ;;  %v907_v45 = vadd.f32 %v4408_v25, %v644_v37  ;;  %v1158_v46 = vmax.f32 %v902_v38, 0.0  ;;  %v1159_v47 = vmax.f32 %v903_v39, 0.0  ;;  %v3679_v37 = vld [vmem:[%s5732_s0 + $0x1e8] sm:$0xff]   ;;  %v3680_v38 = vld [vmem:[%s5732_s0 + $0x1f0] sm:$0xff]  }
  0x8b   :  { %v1160_v48 = vmax.f32 %v904_v40, 0.0  ;;  %v1161_v49 = vmax.f32 %v905_v41, 0.0  ;;  %v2955_v51 = vpack.c.bf16 %v1156_v42, %v1156_v42  ;;  %v2956_v52 = vpack.c.bf16 %v1157_v43, %v1157_v43  ;;  %v3681_v43 = vld [vmem:[%s5732_s0 + $0x1f8] sm:$0xff]  }
  0x8c   :  { %v1162_v53 = vmax.f32 %v906_v44, 0.0  ;;  %v1163_v54 = vmax.f32 %v907_v45, 0.0  ;;  %v2957_v57 = vpack.c.bf16 %v1158_v46, %v1158_v46  ;;  %v2958_v58 = vpack.c.bf16 %v1159_v47, %v1159_v47 }
  0x8d   :  { %v2959_v59 = vpack.c.bf16 %v1160_v48, %v1160_v48  ;;  %v2960_v1 = vpack.c.bf16 %v1161_v49, %v1161_v49  ;;  %2437 = vst.msk [vmem:[%s5735_s3 + $0x1a0] sm:$0xf] %vm2332_vm0, %v2955_v51  ;;  %2438 = vst.msk [vmem:[%s5735_s3 + $0x1a4] sm:$0xf] %vm2332_vm0, %v2956_v52  ;;  %v3333_v63 = vunpack.c.l.bf16 %v3674_v50  ;;  %v3334_v0 = vunpack.c.h.bf16 %v3674_v50 }
  0x8e   :  { %v2961_v61 = vpack.c.bf16 %v1162_v53, %v1162_v53  ;;  %v2962_v62 = vpack.c.bf16 %v1163_v54, %v1163_v54  ;;  %2439 = vst.msk [vmem:[%s5735_s3 + $0x1a8] sm:$0xf] %vm2332_vm0, %v2957_v57  ;;  %2440 = vst.msk [vmem:[%s5735_s3 + $0x1ac] sm:$0xf] %vm2332_vm0, %v2958_v58  ;;  %v3337_v7 = vunpack.c.l.bf16 %v3675_v55  ;;  %v3338_v2 = vunpack.c.h.bf16 %v3675_v55 }
  0x8f   :  { %2441 = vst.msk [vmem:[%s5735_s3 + $0x1b0] sm:$0xf] %vm2332_vm0, %v2959_v59  ;;  %2442 = vst.msk [vmem:[%s5735_s3 + $0x1b4] sm:$0xf] %vm2332_vm0, %v2960_v1  ;;  %v3341_v3 = vunpack.c.l.bf16 %v3676_v56  ;;  %v3342_v4 = vunpack.c.h.bf16 %v3676_v56  ;;  %v645_v5 = vmul.f32 %v4397_v16, %v3333_v63  ;;  %v646_v6 = vmul.f32 %v4397_v16, %v3334_v0 }
  0x90   :  { %2443 = vst.msk [vmem:[%s5735_s3 + $0x1b8] sm:$0xf] %vm2332_vm0, %v2961_v61  ;;  %2444 = vst.msk [vmem:[%s5735_s3 + $0x1bc] sm:$0xf] %vm2332_vm0, %v2962_v62  ;;  %v3345_v8 = vunpack.c.l.bf16 %v3677_v60  ;;  %v3346_v9 = vunpack.c.h.bf16 %v3677_v60  ;;  %v647_v10 = vmul.f32 %v4397_v16, %v3337_v7  ;;  %v648_v11 = vmul.f32 %v4397_v16, %v3338_v2 }
  0x91   :  { %v649_v12 = vmul.f32 %v4397_v16, %v3341_v3  ;;  %v650_v13 = vmul.f32 %v4397_v16, %v3342_v4  ;;  %v908_v14 = vadd.f32 %v4408_v25, %v645_v5  ;;  %v909_v15 = vadd.f32 %v4408_v25, %v646_v6 }
  0x92   :  { %v651_v17 = vmul.f32 %v4397_v16, %v3345_v8  ;;  %v652_v18 = vmul.f32 %v4397_v16, %v3346_v9  ;;  %v910_v19 = vadd.f32 %v4408_v25, %v647_v10  ;;  %v911_v20 = vadd.f32 %v4408_v25, %v648_v11 }
  0x93   :  { %v912_v21 = vadd.f32 %v4408_v25, %v649_v12  ;;  %v913_v22 = vadd.f32 %v4408_v25, %v650_v13  ;;  %v1164_v23 = vmax.f32 %v908_v14, 0.0  ;;  %v1165_v24 = vmax.f32 %v909_v15, 0.0  ;;  %v3682_v12 = vld [vmem:[%s5732_s0 + $0x200] sm:$0xff]  }
  0x94   :  { %v914_v26 = vadd.f32 %v4408_v25, %v651_v17  ;;  %v915_v27 = vadd.f32 %v4408_v25, %v652_v18  ;;  %v1166_v28 = vmax.f32 %v910_v19, 0.0  ;;  %v1167_v29 = vmax.f32 %v911_v20, 0.0  ;;  %v3683_v18 = vld [vmem:[%s5732_s0 + $0x208] sm:$0xff]   ;;  %v3684_v19 = vld [vmem:[%s5732_s0 + $0x210] sm:$0xff]  }
  0x95   :  { %v1168_v30 = vmax.f32 %v912_v21, 0.0  ;;  %v1169_v31 = vmax.f32 %v913_v22, 0.0  ;;  %v2963_v33 = vpack.c.bf16 %v1164_v23, %v1164_v23  ;;  %v2964_v34 = vpack.c.bf16 %v1165_v24, %v1165_v24  ;;  %v3685_v24 = vld [vmem:[%s5732_s0 + $0x218] sm:$0xff]  }
  0x96   :  { %v1170_v35 = vmax.f32 %v914_v26, 0.0  ;;  %v1171_v36 = vmax.f32 %v915_v27, 0.0  ;;  %v2965_v39 = vpack.c.bf16 %v1166_v28, %v1166_v28  ;;  %v2966_v40 = vpack.c.bf16 %v1167_v29, %v1167_v29 }
  0x97   :  { %v2967_v41 = vpack.c.bf16 %v1168_v30, %v1168_v30  ;;  %v2968_v42 = vpack.c.bf16 %v1169_v31, %v1169_v31  ;;  %2445 = vst.msk [vmem:[%s5735_s3 + $0x1c0] sm:$0xf] %vm2332_vm0, %v2963_v33  ;;  %2446 = vst.msk [vmem:[%s5735_s3 + $0x1c4] sm:$0xf] %vm2332_vm0, %v2964_v34  ;;  %v3349_v46 = vunpack.c.l.bf16 %v3678_v32  ;;  %v3350_v47 = vunpack.c.h.bf16 %v3678_v32 }
  0x98   :  { %v2969_v44 = vpack.c.bf16 %v1170_v35, %v1170_v35  ;;  %v2970_v45 = vpack.c.bf16 %v1171_v36, %v1171_v36  ;;  %2447 = vst.msk [vmem:[%s5735_s3 + $0x1c8] sm:$0xf] %vm2332_vm0, %v2965_v39  ;;  %2448 = vst.msk [vmem:[%s5735_s3 + $0x1cc] sm:$0xf] %vm2332_vm0, %v2966_v40  ;;  %v3353_v48 = vunpack.c.l.bf16 %v3679_v37  ;;  %v3354_v49 = vunpack.c.h.bf16 %v3679_v37 }
  0x99   :  { %2449 = vst.msk [vmem:[%s5735_s3 + $0x1d0] sm:$0xf] %vm2332_vm0, %v2967_v41  ;;  %2450 = vst.msk [vmem:[%s5735_s3 + $0x1d4] sm:$0xf] %vm2332_vm0, %v2968_v42  ;;  %v3357_v50 = vunpack.c.l.bf16 %v3680_v38  ;;  %v3358_v51 = vunpack.c.h.bf16 %v3680_v38  ;;  %v653_v52 = vmul.f32 %v4397_v16, %v3349_v46  ;;  %v654_v53 = vmul.f32 %v4397_v16, %v3350_v47 }
  0x9a   :  { %2451 = vst.msk [vmem:[%s5735_s3 + $0x1d8] sm:$0xf] %vm2332_vm0, %v2969_v44  ;;  %2452 = vst.msk [vmem:[%s5735_s3 + $0x1dc] sm:$0xf] %vm2332_vm0, %v2970_v45  ;;  %v3361_v54 = vunpack.c.l.bf16 %v3681_v43  ;;  %v3362_v55 = vunpack.c.h.bf16 %v3681_v43  ;;  %v655_v56 = vmul.f32 %v4397_v16, %v3353_v48  ;;  %v656_v57 = vmul.f32 %v4397_v16, %v3354_v49 }
  0x9b   :  { %v657_v58 = vmul.f32 %v4397_v16, %v3357_v50  ;;  %v658_v59 = vmul.f32 %v4397_v16, %v3358_v51  ;;  %v916_v1 = vadd.f32 %v4408_v25, %v653_v52  ;;  %v917_v60 = vadd.f32 %v4408_v25, %v654_v53 }
  0x9c   :  { %v659_v61 = vmul.f32 %v4397_v16, %v3361_v54  ;;  %v660_v62 = vmul.f32 %v4397_v16, %v3362_v55  ;;  %v918_v63 = vadd.f32 %v4408_v25, %v655_v56  ;;  %v919_v0 = vadd.f32 %v4408_v25, %v656_v57 }
  0x9d   :  { %v920_v7 = vadd.f32 %v4408_v25, %v657_v58  ;;  %v921_v2 = vadd.f32 %v4408_v25, %v658_v59  ;;  %v1172_v3 = vmax.f32 %v916_v1, 0.0  ;;  %v1173_v4 = vmax.f32 %v917_v60, 0.0  ;;  %v3686_v58 = vld [vmem:[%s5732_s0 + $0x220] sm:$0xff]  }
  0x9e   :  { %v922_v5 = vadd.f32 %v4408_v25, %v659_v61  ;;  %v923_v6 = vadd.f32 %v4408_v25, %v660_v62  ;;  %v1174_v8 = vmax.f32 %v918_v63, 0.0  ;;  %v1175_v9 = vmax.f32 %v919_v0, 0.0  ;;  %v3687_v62 = vld [vmem:[%s5732_s0 + $0x228] sm:$0xff]   ;;  %v3688_v63 = vld [vmem:[%s5732_s0 + $0x230] sm:$0xff]  }
  0x9f   :  { %v1176_v10 = vmax.f32 %v920_v7, 0.0  ;;  %v1177_v11 = vmax.f32 %v921_v2, 0.0  ;;  %v2971_v13 = vpack.c.bf16 %v1172_v3, %v1172_v3  ;;  %v2972_v14 = vpack.c.bf16 %v1173_v4, %v1173_v4  ;;  %v3689_v4 = vld [vmem:[%s5732_s0 + $0x238] sm:$0xff]  }
  0xa0   :  { %v1178_v15 = vmax.f32 %v922_v5, 0.0  ;;  %v1179_v17 = vmax.f32 %v923_v6, 0.0  ;;  %v2973_v20 = vpack.c.bf16 %v1174_v8, %v1174_v8  ;;  %v2974_v21 = vpack.c.bf16 %v1175_v9, %v1175_v9 }
  0xa1   :  { %v2975_v22 = vpack.c.bf16 %v1176_v10, %v1176_v10  ;;  %v2976_v23 = vpack.c.bf16 %v1177_v11, %v1177_v11  ;;  %2453 = vst.msk [vmem:[%s5735_s3 + $0x1e0] sm:$0xf] %vm2332_vm0, %v2971_v13  ;;  %2454 = vst.msk [vmem:[%s5735_s3 + $0x1e4] sm:$0xf] %vm2332_vm0, %v2972_v14  ;;  %v3365_v28 = vunpack.c.l.bf16 %v3682_v12  ;;  %v3366_v29 = vunpack.c.h.bf16 %v3682_v12 }
  0xa2   :  { %v2977_v26 = vpack.c.bf16 %v1178_v15, %v1178_v15  ;;  %v2978_v27 = vpack.c.bf16 %v1179_v17, %v1179_v17  ;;  %2455 = vst.msk [vmem:[%s5735_s3 + $0x1e8] sm:$0xf] %vm2332_vm0, %v2973_v20  ;;  %2456 = vst.msk [vmem:[%s5735_s3 + $0x1ec] sm:$0xf] %vm2332_vm0, %v2974_v21  ;;  %v3369_v30 = vunpack.c.l.bf16 %v3683_v18  ;;  %v3370_v31 = vunpack.c.h.bf16 %v3683_v18 }
  0xa3   :  { %2457 = vst.msk [vmem:[%s5735_s3 + $0x1f0] sm:$0xf] %vm2332_vm0, %v2975_v22  ;;  %2458 = vst.msk [vmem:[%s5735_s3 + $0x1f4] sm:$0xf] %vm2332_vm0, %v2976_v23  ;;  %v3373_v32 = vunpack.c.l.bf16 %v3684_v19  ;;  %v3374_v33 = vunpack.c.h.bf16 %v3684_v19  ;;  %v661_v34 = vmul.f32 %v4397_v16, %v3365_v28  ;;  %v662_v35 = vmul.f32 %v4397_v16, %v3366_v29 }
  0xa4   :  { %2459 = vst.msk [vmem:[%s5735_s3 + $0x1f8] sm:$0xf] %vm2332_vm0, %v2977_v26  ;;  %2460 = vst.msk [vmem:[%s5735_s3 + $0x1fc] sm:$0xf] %vm2332_vm0, %v2978_v27  ;;  %v3377_v36 = vunpack.c.l.bf16 %v3685_v24  ;;  %v3378_v37 = vunpack.c.h.bf16 %v3685_v24  ;;  %v663_v38 = vmul.f32 %v4397_v16, %v3369_v30  ;;  %v664_v39 = vmul.f32 %v4397_v16, %v3370_v31 }
  0xa5   :  { %v665_v40 = vmul.f32 %v4397_v16, %v3373_v32  ;;  %v666_v41 = vmul.f32 %v4397_v16, %v3374_v33  ;;  %v924_v42 = vadd.f32 %v4408_v25, %v661_v34  ;;  %v925_v43 = vadd.f32 %v4408_v25, %v662_v35 }
  0xa6   :  { %v667_v44 = vmul.f32 %v4397_v16, %v3377_v36  ;;  %v668_v45 = vmul.f32 %v4397_v16, %v3378_v37  ;;  %v926_v46 = vadd.f32 %v4408_v25, %v663_v38  ;;  %v927_v47 = vadd.f32 %v4408_v25, %v664_v39 }
  0xa7   :  { %v928_v48 = vadd.f32 %v4408_v25, %v665_v40  ;;  %v929_v49 = vadd.f32 %v4408_v25, %v666_v41  ;;  %v1180_v50 = vmax.f32 %v924_v42, 0.0  ;;  %v1181_v51 = vmax.f32 %v925_v43, 0.0  ;;  %v3690_v40 = vld [vmem:[%s5732_s0 + $0x240] sm:$0xff]  }
  0xa8   :  { %v930_v52 = vadd.f32 %v4408_v25, %v667_v44  ;;  %v931_v53 = vadd.f32 %v4408_v25, %v668_v45  ;;  %v1182_v54 = vmax.f32 %v926_v46, 0.0  ;;  %v1183_v55 = vmax.f32 %v927_v47, 0.0  ;;  %v3691_v45 = vld [vmem:[%s5732_s0 + $0x248] sm:$0xff]   ;;  %v3692_v46 = vld [vmem:[%s5732_s0 + $0x250] sm:$0xff]  }
  0xa9   :  { %v1184_v56 = vmax.f32 %v928_v48, 0.0  ;;  %v1185_v57 = vmax.f32 %v929_v49, 0.0  ;;  %v2979_v59 = vpack.c.bf16 %v1180_v50, %v1180_v50  ;;  %v2980_v1 = vpack.c.bf16 %v1181_v51, %v1181_v51  ;;  %v3693_v51 = vld [vmem:[%s5732_s0 + $0x258] sm:$0xff]  }
  0xaa   :  { %v1186_v60 = vmax.f32 %v930_v52, 0.0  ;;  %v1187_v61 = vmax.f32 %v931_v53, 0.0  ;;  %v2981_v0 = vpack.c.bf16 %v1182_v54, %v1182_v54  ;;  %v2982_v7 = vpack.c.bf16 %v1183_v55, %v1183_v55 }
  0xab   :  { %v2983_v2 = vpack.c.bf16 %v1184_v56, %v1184_v56  ;;  %v2984_v3 = vpack.c.bf16 %v1185_v57, %v1185_v57  ;;  %2461 = vst.msk [vmem:[%s5735_s3 + $0x200] sm:$0xf] %vm2332_vm0, %v2979_v59  ;;  %2462 = vst.msk [vmem:[%s5735_s3 + $0x204] sm:$0xf] %vm2332_vm0, %v2980_v1  ;;  %v3381_v8 = vunpack.c.l.bf16 %v3686_v58  ;;  %v3382_v9 = vunpack.c.h.bf16 %v3686_v58 }
  0xac   :  { %v2985_v5 = vpack.c.bf16 %v1186_v60, %v1186_v60  ;;  %v2986_v6 = vpack.c.bf16 %v1187_v61, %v1187_v61  ;;  %2463 = vst.msk [vmem:[%s5735_s3 + $0x208] sm:$0xf] %vm2332_vm0, %v2981_v0  ;;  %2464 = vst.msk [vmem:[%s5735_s3 + $0x20c] sm:$0xf] %vm2332_vm0, %v2982_v7  ;;  %v3385_v10 = vunpack.c.l.bf16 %v3687_v62  ;;  %v3386_v11 = vunpack.c.h.bf16 %v3687_v62 }
  0xad   :  { %2465 = vst.msk [vmem:[%s5735_s3 + $0x210] sm:$0xf] %vm2332_vm0, %v2983_v2  ;;  %2466 = vst.msk [vmem:[%s5735_s3 + $0x214] sm:$0xf] %vm2332_vm0, %v2984_v3  ;;  %v3389_v12 = vunpack.c.l.bf16 %v3688_v63  ;;  %v3390_v13 = vunpack.c.h.bf16 %v3688_v63  ;;  %v669_v14 = vmul.f32 %v4397_v16, %v3381_v8  ;;  %v670_v15 = vmul.f32 %v4397_v16, %v3382_v9 }
  0xae   :  { %2467 = vst.msk [vmem:[%s5735_s3 + $0x218] sm:$0xf] %vm2332_vm0, %v2985_v5  ;;  %2468 = vst.msk [vmem:[%s5735_s3 + $0x21c] sm:$0xf] %vm2332_vm0, %v2986_v6  ;;  %v3393_v17 = vunpack.c.l.bf16 %v3689_v4  ;;  %v3394_v18 = vunpack.c.h.bf16 %v3689_v4  ;;  %v671_v19 = vmul.f32 %v4397_v16, %v3385_v10  ;;  %v672_v20 = vmul.f32 %v4397_v16, %v3386_v11 }
  0xaf   :  { %v673_v21 = vmul.f32 %v4397_v16, %v3389_v12  ;;  %v674_v22 = vmul.f32 %v4397_v16, %v3390_v13  ;;  %v932_v23 = vadd.f32 %v4408_v25, %v669_v14  ;;  %v933_v24 = vadd.f32 %v4408_v25, %v670_v15 }
  0xb0   :  { %v675_v26 = vmul.f32 %v4397_v16, %v3393_v17  ;;  %v676_v27 = vmul.f32 %v4397_v16, %v3394_v18  ;;  %v934_v28 = vadd.f32 %v4408_v25, %v671_v19  ;;  %v935_v29 = vadd.f32 %v4408_v25, %v672_v20 }
  0xb1   :  { %v936_v30 = vadd.f32 %v4408_v25, %v673_v21  ;;  %v937_v31 = vadd.f32 %v4408_v25, %v674_v22  ;;  %v1188_v32 = vmax.f32 %v932_v23, 0.0  ;;  %v1189_v33 = vmax.f32 %v933_v24, 0.0  ;;  %v3694_v21 = vld [vmem:[%s5732_s0 + $0x260] sm:$0xff]  }
  0xb2   :  { %v938_v34 = vadd.f32 %v4408_v25, %v675_v26  ;;  %v939_v35 = vadd.f32 %v4408_v25, %v676_v27  ;;  %v1190_v36 = vmax.f32 %v934_v28, 0.0  ;;  %v1191_v37 = vmax.f32 %v935_v29, 0.0  ;;  %v3695_v27 = vld [vmem:[%s5732_s0 + $0x268] sm:$0xff]   ;;  %v3696_v28 = vld [vmem:[%s5732_s0 + $0x270] sm:$0xff]  }
  0xb3   :  { %v1192_v38 = vmax.f32 %v936_v30, 0.0  ;;  %v1193_v39 = vmax.f32 %v937_v31, 0.0  ;;  %v2987_v41 = vpack.c.bf16 %v1188_v32, %v1188_v32  ;;  %v2988_v42 = vpack.c.bf16 %v1189_v33, %v1189_v33  ;;  %v3697_v33 = vld [vmem:[%s5732_s0 + $0x278] sm:$0xff]  }
  0xb4   :  { %v1194_v43 = vmax.f32 %v938_v34, 0.0  ;;  %v1195_v44 = vmax.f32 %v939_v35, 0.0  ;;  %v2989_v47 = vpack.c.bf16 %v1190_v36, %v1190_v36  ;;  %v2990_v48 = vpack.c.bf16 %v1191_v37, %v1191_v37 }
  0xb5   :  { %v2991_v49 = vpack.c.bf16 %v1192_v38, %v1192_v38  ;;  %v2992_v50 = vpack.c.bf16 %v1193_v39, %v1193_v39  ;;  %2469 = vst.msk [vmem:[%s5735_s3 + $0x220] sm:$0xf] %vm2332_vm0, %v2987_v41  ;;  %2470 = vst.msk [vmem:[%s5735_s3 + $0x224] sm:$0xf] %vm2332_vm0, %v2988_v42  ;;  %v3397_v54 = vunpack.c.l.bf16 %v3690_v40  ;;  %v3398_v55 = vunpack.c.h.bf16 %v3690_v40 }
  0xb6   :  { %v2993_v52 = vpack.c.bf16 %v1194_v43, %v1194_v43  ;;  %v2994_v53 = vpack.c.bf16 %v1195_v44, %v1195_v44  ;;  %2471 = vst.msk [vmem:[%s5735_s3 + $0x228] sm:$0xf] %vm2332_vm0, %v2989_v47  ;;  %2472 = vst.msk [vmem:[%s5735_s3 + $0x22c] sm:$0xf] %vm2332_vm0, %v2990_v48  ;;  %v3401_v56 = vunpack.c.l.bf16 %v3691_v45  ;;  %v3402_v57 = vunpack.c.h.bf16 %v3691_v45 }
  0xb7   :  { %2473 = vst.msk [vmem:[%s5735_s3 + $0x230] sm:$0xf] %vm2332_vm0, %v2991_v49  ;;  %2474 = vst.msk [vmem:[%s5735_s3 + $0x234] sm:$0xf] %vm2332_vm0, %v2992_v50  ;;  %v3405_v58 = vunpack.c.l.bf16 %v3692_v46  ;;  %v3406_v59 = vunpack.c.h.bf16 %v3692_v46  ;;  %v677_v1 = vmul.f32 %v4397_v16, %v3397_v54  ;;  %v678_v60 = vmul.f32 %v4397_v16, %v3398_v55 }
  0xb8   :  { %2475 = vst.msk [vmem:[%s5735_s3 + $0x238] sm:$0xf] %vm2332_vm0, %v2993_v52  ;;  %2476 = vst.msk [vmem:[%s5735_s3 + $0x23c] sm:$0xf] %vm2332_vm0, %v2994_v53  ;;  %v3409_v61 = vunpack.c.l.bf16 %v3693_v51  ;;  %v3410_v62 = vunpack.c.h.bf16 %v3693_v51  ;;  %v679_v63 = vmul.f32 %v4397_v16, %v3401_v56  ;;  %v680_v0 = vmul.f32 %v4397_v16, %v3402_v57 }
  0xb9   :  { %v681_v7 = vmul.f32 %v4397_v16, %v3405_v58  ;;  %v682_v2 = vmul.f32 %v4397_v16, %v3406_v59  ;;  %v940_v3 = vadd.f32 %v4408_v25, %v677_v1  ;;  %v941_v4 = vadd.f32 %v4408_v25, %v678_v60 }
  0xba   :  { %v683_v5 = vmul.f32 %v4397_v16, %v3409_v61  ;;  %v684_v6 = vmul.f32 %v4397_v16, %v3410_v62  ;;  %v942_v8 = vadd.f32 %v4408_v25, %v679_v63  ;;  %v943_v9 = vadd.f32 %v4408_v25, %v680_v0 }
  0xbb   :  { %v944_v10 = vadd.f32 %v4408_v25, %v681_v7  ;;  %v945_v11 = vadd.f32 %v4408_v25, %v682_v2  ;;  %v1196_v12 = vmax.f32 %v940_v3, 0.0  ;;  %v1197_v13 = vmax.f32 %v941_v4, 0.0 }
  0xbc   :  { %v946_v14 = vadd.f32 %v4408_v25, %v683_v5  ;;  %v947_v15 = vadd.f32 %v4408_v25, %v684_v6  ;;  %v1198_v17 = vmax.f32 %v942_v8, 0.0  ;;  %v1199_v18 = vmax.f32 %v943_v9, 0.0  ;;  %v3699_v5 = vld [vmem:[%s5732_s0 + $0x288] sm:$0xff]  }
  0xbd   :  { %v1200_v19 = vmax.f32 %v944_v10, 0.0  ;;  %v1201_v20 = vmax.f32 %v945_v11, 0.0  ;;  %v2995_v22 = vpack.c.bf16 %v1196_v12, %v1196_v12  ;;  %v2996_v23 = vpack.c.bf16 %v1197_v13, %v1197_v13  ;;  %v3701_v11 = vld [vmem:[%s5732_s0 + $0x298] sm:$0xff]  }
  0xbe   :  { %v1202_v24 = vmax.f32 %v946_v14, 0.0  ;;  %v1203_v26 = vmax.f32 %v947_v15, 0.0  ;;  %v2997_v29 = vpack.c.bf16 %v1198_v17, %v1198_v17  ;;  %v2998_v30 = vpack.c.bf16 %v1199_v18, %v1199_v18 }
  0xbf   :  { %v2999_v31 = vpack.c.bf16 %v1200_v19, %v1200_v19  ;;  %v3000_v32 = vpack.c.bf16 %v1201_v20, %v1201_v20  ;;  %2477 = vst.msk [vmem:[%s5735_s3 + $0x240] sm:$0xf] %vm2332_vm0, %v2995_v22  ;;  %2478 = vst.msk [vmem:[%s5735_s3 + $0x244] sm:$0xf] %vm2332_vm0, %v2996_v23  ;;  %v3413_v36 = vunpack.c.l.bf16 %v3694_v21  ;;  %v3414_v37 = vunpack.c.h.bf16 %v3694_v21  ;;  %v5007_v21 = vld [vmem:[%s5733_s1] ss:$0 sm:$0xff] }
  0xc0   :  { %v3001_v34 = vpack.c.bf16 %v1202_v24, %v1202_v24  ;;  %v3002_v35 = vpack.c.bf16 %v1203_v26, %v1203_v26  ;;  %2479 = vst.msk [vmem:[%s5735_s3 + $0x248] sm:$0xf] %vm2332_vm0, %v2997_v29  ;;  %2480 = vst.msk [vmem:[%s5735_s3 + $0x24c] sm:$0xf] %vm2332_vm0, %v2998_v30  ;;  %v3417_v38 = vunpack.c.l.bf16 %v3695_v27  ;;  %v3418_v39 = vunpack.c.h.bf16 %v3695_v27 }
  0xc1   :  { %2481 = vst.msk [vmem:[%s5735_s3 + $0x250] sm:$0xf] %vm2332_vm0, %v2999_v31  ;;  %2482 = vst.msk [vmem:[%s5735_s3 + $0x254] sm:$0xf] %vm2332_vm0, %v3000_v32  ;;  %v3421_v40 = vunpack.c.l.bf16 %v3696_v28  ;;  %v3422_v41 = vunpack.c.h.bf16 %v3696_v28  ;;  %v685_v42 = vmul.f32 %v4397_v16, %v3413_v36  ;;  %v686_v43 = vmul.f32 %v4397_v16, %v3414_v37  ;;  %v5018_v31 = vld [vmem:[%s5734_s2] ss:$0 sm:$0xff] }
  0xc2   :  { %2483 = vst.msk [vmem:[%s5735_s3 + $0x258] sm:$0xf] %vm2332_vm0, %v3001_v34  ;;  %2484 = vst.msk [vmem:[%s5735_s3 + $0x25c] sm:$0xf] %vm2332_vm0, %v3002_v35  ;;  %v3425_v44 = vunpack.c.l.bf16 %v3697_v33  ;;  %v3426_v45 = vunpack.c.h.bf16 %v3697_v33  ;;  %v687_v46 = vmul.f32 %v4397_v16, %v3417_v38  ;;  %v688_v47 = vmul.f32 %v4397_v16, %v3418_v39 }
  0xc3   :  { %v689_v48 = vmul.f32 %v4397_v16, %v3421_v40  ;;  %v690_v49 = vmul.f32 %v4397_v16, %v3422_v41  ;;  %v948_v50 = vadd.f32 %v4408_v25, %v685_v42  ;;  %v949_v51 = vadd.f32 %v4408_v25, %v686_v43 }
  0xc4   :  { %v691_v52 = vmul.f32 %v4397_v16, %v3425_v44  ;;  %v692_v53 = vmul.f32 %v4397_v16, %v3426_v45  ;;  %v950_v54 = vadd.f32 %v4408_v25, %v687_v46  ;;  %v951_v55 = vadd.f32 %v4408_v25, %v688_v47  ;;  %v3698_v16 = vld [vmem:[%s5732_s0 + $0x280] sm:$0xff]  }
  0xc5   :  { %v952_v56 = vadd.f32 %v4408_v25, %v689_v48  ;;  %v953_v57 = vadd.f32 %v4408_v25, %v690_v49  ;;  %v1204_v58 = vmax.f32 %v948_v50, 0.0  ;;  %v1205_v59 = vmax.f32 %v949_v51, 0.0  ;;  %v3702_v48 = vld [vmem:[%s5732_s0 + $0x2a0] sm:$0xff]  }
  0xc6   :  { %v954_v1 = vadd.f32 %v4408_v25, %v691_v52  ;;  %v955_v60 = vadd.f32 %v4408_v25, %v692_v53  ;;  %v1206_v61 = vmax.f32 %v950_v54, 0.0  ;;  %v1207_v62 = vmax.f32 %v951_v55, 0.0  ;;  %v3700_v25 = vld [vmem:[%s5732_s0 + $0x290] sm:$0xff]   ;;  %v3703_v53 = vld [vmem:[%s5732_s0 + $0x2a8] sm:$0xff]  }
  0xc7   :  { %v1208_v63 = vmax.f32 %v952_v56, 0.0  ;;  %v1209_v0 = vmax.f32 %v953_v57, 0.0  ;;  %v3003_v7 = vpack.c.bf16 %v1204_v58, %v1204_v58  ;;  %v3004_v2 = vpack.c.bf16 %v1205_v59, %v1205_v59  ;;  %v3704_v54 = vld [vmem:[%s5732_s0 + $0x2b0] sm:$0xff]   ;;  %v3705_v59 = vld [vmem:[%s5732_s0 + $0x2b8] sm:$0xff]  }
  0xc8   :  { %v1210_v3 = vmax.f32 %v954_v1, 0.0  ;;  %v1211_v4 = vmax.f32 %v955_v60, 0.0  ;;  %v3005_v6 = vpack.c.bf16 %v1206_v61, %v1206_v61  ;;  %v3006_v8 = vpack.c.bf16 %v1207_v62, %v1207_v62 }
  0xc9   :  { %v3007_v9 = vpack.c.bf16 %v1208_v63, %v1208_v63  ;;  %v3008_v10 = vpack.c.bf16 %v1209_v0, %v1209_v0  ;;  %2485 = vst.msk [vmem:[%s5735_s3 + $0x260] sm:$0xf] %vm2332_vm0, %v3003_v7  ;;  %2486 = vst.msk [vmem:[%s5735_s3 + $0x264] sm:$0xf] %vm2332_vm0, %v3004_v2  ;;  %v3429_v14 = vunpack.c.l.bf16 %v3698_v16  ;;  %v3430_v15 = vunpack.c.h.bf16 %v3698_v16 }
  0xca   :  { %v3009_v12 = vpack.c.bf16 %v1210_v3, %v1210_v3  ;;  %v3010_v13 = vpack.c.bf16 %v1211_v4, %v1211_v4  ;;  %2487 = vst.msk [vmem:[%s5735_s3 + $0x268] sm:$0xf] %vm2332_vm0, %v3005_v6  ;;  %2488 = vst.msk [vmem:[%s5735_s3 + $0x26c] sm:$0xf] %vm2332_vm0, %v3006_v8  ;;  %v3433_v17 = vunpack.c.l.bf16 %v3699_v5  ;;  %v3434_v18 = vunpack.c.h.bf16 %v3699_v5 }
  0xcb   :  { %2489 = vst.msk [vmem:[%s5735_s3 + $0x270] sm:$0xf] %vm2332_vm0, %v3007_v9  ;;  %2490 = vst.msk [vmem:[%s5735_s3 + $0x274] sm:$0xf] %vm2332_vm0, %v3008_v10  ;;  %v3437_v19 = vunpack.c.l.bf16 %v3700_v25  ;;  %v3438_v20 = vunpack.c.h.bf16 %v3700_v25  ;;  %v693_v22 = vmul.f32 %v5007_v21, %v3429_v14  ;;  %v694_v23 = vmul.f32 %v5007_v21, %v3430_v15 }
  0xcc   :  { %2491 = vst.msk [vmem:[%s5735_s3 + $0x278] sm:$0xf] %vm2332_vm0, %v3009_v12  ;;  %2492 = vst.msk [vmem:[%s5735_s3 + $0x27c] sm:$0xf] %vm2332_vm0, %v3010_v13  ;;  %v3441_v24 = vunpack.c.l.bf16 %v3701_v11  ;;  %v3442_v26 = vunpack.c.h.bf16 %v3701_v11  ;;  %v695_v27 = vmul.f32 %v5007_v21, %v3433_v17  ;;  %v696_v28 = vmul.f32 %v5007_v21, %v3434_v18 }
  0xcd   :  { %v697_v29 = vmul.f32 %v5007_v21, %v3437_v19  ;;  %v698_v30 = vmul.f32 %v5007_v21, %v3438_v20  ;;  %v956_v32 = vadd.f32 %v5018_v31, %v693_v22  ;;  %v957_v33 = vadd.f32 %v5018_v31, %v694_v23 }
  0xce   :  { %v699_v34 = vmul.f32 %v5007_v21, %v3441_v24  ;;  %v700_v35 = vmul.f32 %v5007_v21, %v3442_v26  ;;  %v958_v36 = vadd.f32 %v5018_v31, %v695_v27  ;;  %v959_v37 = vadd.f32 %v5018_v31, %v696_v28 }
  0xcf   :  { %v960_v38 = vadd.f32 %v5018_v31, %v697_v29  ;;  %v961_v39 = vadd.f32 %v5018_v31, %v698_v30  ;;  %v1212_v40 = vmax.f32 %v956_v32, 0.0  ;;  %v1213_v41 = vmax.f32 %v957_v33, 0.0  ;;  %v3706_v29 = vld [vmem:[%s5732_s0 + $0x2c0] sm:$0xff]  }
  0xd0   :  { %v962_v42 = vadd.f32 %v5018_v31, %v699_v34  ;;  %v963_v43 = vadd.f32 %v5018_v31, %v700_v35  ;;  %v1214_v44 = vmax.f32 %v958_v36, 0.0  ;;  %v1215_v45 = vmax.f32 %v959_v37, 0.0  ;;  %v3707_v35 = vld [vmem:[%s5732_s0 + $0x2c8] sm:$0xff]   ;;  %v3708_v36 = vld [vmem:[%s5732_s0 + $0x2d0] sm:$0xff]  }
  0xd1   :  { %v1216_v46 = vmax.f32 %v960_v38, 0.0  ;;  %v1217_v47 = vmax.f32 %v961_v39, 0.0  ;;  %v3011_v49 = vpack.c.bf16 %v1212_v40, %v1212_v40  ;;  %v3012_v50 = vpack.c.bf16 %v1213_v41, %v1213_v41  ;;  %v3709_v41 = vld [vmem:[%s5732_s0 + $0x2d8] sm:$0xff]  }
  0xd2   :  { %v1218_v51 = vmax.f32 %v962_v42, 0.0  ;;  %v1219_v52 = vmax.f32 %v963_v43, 0.0  ;;  %v3013_v55 = vpack.c.bf16 %v1214_v44, %v1214_v44  ;;  %v3014_v56 = vpack.c.bf16 %v1215_v45, %v1215_v45 }
  0xd3   :  { %v3015_v57 = vpack.c.bf16 %v1216_v46, %v1216_v46  ;;  %v3016_v58 = vpack.c.bf16 %v1217_v47, %v1217_v47  ;;  %2493 = vst.msk [vmem:[%s5735_s3 + $0x280] sm:$0xf] %vm2332_vm0, %v3011_v49  ;;  %2494 = vst.msk [vmem:[%s5735_s3 + $0x284] sm:$0xf] %vm2332_vm0, %v3012_v50  ;;  %v3445_v61 = vunpack.c.l.bf16 %v3702_v48  ;;  %v3446_v62 = vunpack.c.h.bf16 %v3702_v48 }
  0xd4   :  { %v3017_v1 = vpack.c.bf16 %v1218_v51, %v1218_v51  ;;  %v3018_v60 = vpack.c.bf16 %v1219_v52, %v1219_v52  ;;  %2495 = vst.msk [vmem:[%s5735_s3 + $0x288] sm:$0xf] %vm2332_vm0, %v3013_v55  ;;  %2496 = vst.msk [vmem:[%s5735_s3 + $0x28c] sm:$0xf] %vm2332_vm0, %v3014_v56  ;;  %v3449_v63 = vunpack.c.l.bf16 %v3703_v53  ;;  %v3450_v0 = vunpack.c.h.bf16 %v3703_v53 }
  0xd5   :  { %2497 = vst.msk [vmem:[%s5735_s3 + $0x290] sm:$0xf] %vm2332_vm0, %v3015_v57  ;;  %2498 = vst.msk [vmem:[%s5735_s3 + $0x294] sm:$0xf] %vm2332_vm0, %v3016_v58  ;;  %v3453_v16 = vunpack.c.l.bf16 %v3704_v54  ;;  %v3454_v7 = vunpack.c.h.bf16 %v3704_v54  ;;  %v701_v2 = vmul.f32 %v5007_v21, %v3445_v61  ;;  %v702_v3 = vmul.f32 %v5007_v21, %v3446_v62 }
  0xd6   :  { %2499 = vst.msk [vmem:[%s5735_s3 + $0x298] sm:$0xf] %vm2332_vm0, %v3017_v1  ;;  %2500 = vst.msk [vmem:[%s5735_s3 + $0x29c] sm:$0xf] %vm2332_vm0, %v3018_v60  ;;  %v3457_v4 = vunpack.c.l.bf16 %v3705_v59  ;;  %v3458_v5 = vunpack.c.h.bf16 %v3705_v59  ;;  %v703_v25 = vmul.f32 %v5007_v21, %v3449_v63  ;;  %v704_v6 = vmul.f32 %v5007_v21, %v3450_v0 }
  0xd7   :  { %v705_v8 = vmul.f32 %v5007_v21, %v3453_v16  ;;  %v706_v9 = vmul.f32 %v5007_v21, %v3454_v7  ;;  %v964_v10 = vadd.f32 %v5018_v31, %v701_v2  ;;  %v965_v11 = vadd.f32 %v5018_v31, %v702_v3 }
  0xd8   :  { %v707_v12 = vmul.f32 %v5007_v21, %v3457_v4  ;;  %v708_v13 = vmul.f32 %v5007_v21, %v3458_v5  ;;  %v966_v14 = vadd.f32 %v5018_v31, %v703_v25  ;;  %v967_v15 = vadd.f32 %v5018_v31, %v704_v6 }
  0xd9   :  { %v968_v17 = vadd.f32 %v5018_v31, %v705_v8  ;;  %v969_v18 = vadd.f32 %v5018_v31, %v706_v9  ;;  %v1220_v19 = vmax.f32 %v964_v10, 0.0  ;;  %v1221_v20 = vmax.f32 %v965_v11, 0.0  ;;  %v3710_v8 = vld [vmem:[%s5732_s0 + $0x2e0] sm:$0xff]  }
  0xda   :  { %v970_v22 = vadd.f32 %v5018_v31, %v707_v12  ;;  %v971_v23 = vadd.f32 %v5018_v31, %v708_v13  ;;  %v1222_v24 = vmax.f32 %v966_v14, 0.0  ;;  %v1223_v26 = vmax.f32 %v967_v15, 0.0  ;;  %v3711_v13 = vld [vmem:[%s5732_s0 + $0x2e8] sm:$0xff]   ;;  %v3712_v14 = vld [vmem:[%s5732_s0 + $0x2f0] sm:$0xff]  }
  0xdb   :  { %v1224_v27 = vmax.f32 %v968_v17, 0.0  ;;  %v1225_v28 = vmax.f32 %v969_v18, 0.0  ;;  %v3019_v30 = vpack.c.bf16 %v1220_v19, %v1220_v19  ;;  %v3020_v32 = vpack.c.bf16 %v1221_v20, %v1221_v20  ;;  %v3713_v20 = vld [vmem:[%s5732_s0 + $0x2f8] sm:$0xff]  }
  0xdc   :  { %v1226_v33 = vmax.f32 %v970_v22, 0.0  ;;  %v1227_v34 = vmax.f32 %v971_v23, 0.0  ;;  %v3021_v37 = vpack.c.bf16 %v1222_v24, %v1222_v24  ;;  %v3022_v38 = vpack.c.bf16 %v1223_v26, %v1223_v26 }
  0xdd   :  { %v3023_v39 = vpack.c.bf16 %v1224_v27, %v1224_v27  ;;  %v3024_v40 = vpack.c.bf16 %v1225_v28, %v1225_v28  ;;  %2501 = vst.msk [vmem:[%s5735_s3 + $0x2a0] sm:$0xf] %vm2332_vm0, %v3019_v30  ;;  %2502 = vst.msk [vmem:[%s5735_s3 + $0x2a4] sm:$0xf] %vm2332_vm0, %v3020_v32  ;;  %v3461_v44 = vunpack.c.l.bf16 %v3706_v29  ;;  %v3462_v45 = vunpack.c.h.bf16 %v3706_v29 }
  0xde   :  { %v3025_v42 = vpack.c.bf16 %v1226_v33, %v1226_v33  ;;  %v3026_v43 = vpack.c.bf16 %v1227_v34, %v1227_v34  ;;  %2503 = vst.msk [vmem:[%s5735_s3 + $0x2a8] sm:$0xf] %vm2332_vm0, %v3021_v37  ;;  %2504 = vst.msk [vmem:[%s5735_s3 + $0x2ac] sm:$0xf] %vm2332_vm0, %v3022_v38  ;;  %v3465_v46 = vunpack.c.l.bf16 %v3707_v35  ;;  %v3466_v47 = vunpack.c.h.bf16 %v3707_v35 }
  0xdf   :  { %2505 = vst.msk [vmem:[%s5735_s3 + $0x2b0] sm:$0xf] %vm2332_vm0, %v3023_v39  ;;  %2506 = vst.msk [vmem:[%s5735_s3 + $0x2b4] sm:$0xf] %vm2332_vm0, %v3024_v40  ;;  %v3469_v48 = vunpack.c.l.bf16 %v3708_v36  ;;  %v3470_v49 = vunpack.c.h.bf16 %v3708_v36  ;;  %v709_v50 = vmul.f32 %v5007_v21, %v3461_v44  ;;  %v710_v51 = vmul.f32 %v5007_v21, %v3462_v45 }
  0xe0   :  { %2507 = vst.msk [vmem:[%s5735_s3 + $0x2b8] sm:$0xf] %vm2332_vm0, %v3025_v42  ;;  %2508 = vst.msk [vmem:[%s5735_s3 + $0x2bc] sm:$0xf] %vm2332_vm0, %v3026_v43  ;;  %v3473_v52 = vunpack.c.l.bf16 %v3709_v41  ;;  %v3474_v53 = vunpack.c.h.bf16 %v3709_v41  ;;  %v711_v54 = vmul.f32 %v5007_v21, %v3465_v46  ;;  %v712_v55 = vmul.f32 %v5007_v21, %v3466_v47 }
  0xe1   :  { %v713_v56 = vmul.f32 %v5007_v21, %v3469_v48  ;;  %v714_v57 = vmul.f32 %v5007_v21, %v3470_v49  ;;  %v972_v58 = vadd.f32 %v5018_v31, %v709_v50  ;;  %v973_v59 = vadd.f32 %v5018_v31, %v710_v51 }
  0xe2   :  { %v715_v1 = vmul.f32 %v5007_v21, %v3473_v52  ;;  %v716_v60 = vmul.f32 %v5007_v21, %v3474_v53  ;;  %v974_v61 = vadd.f32 %v5018_v31, %v711_v54  ;;  %v975_v62 = vadd.f32 %v5018_v31, %v712_v55 }
  0xe3   :  { %v976_v63 = vadd.f32 %v5018_v31, %v713_v56  ;;  %v977_v0 = vadd.f32 %v5018_v31, %v714_v57  ;;  %v1228_v16 = vmax.f32 %v972_v58, 0.0  ;;  %v1229_v7 = vmax.f32 %v973_v59, 0.0  ;;  %v3714_v56 = vld [vmem:[%s5732_s0 + $0x300] sm:$0xff]  }
  0xe4   :  { %v978_v2 = vadd.f32 %v5018_v31, %v715_v1  ;;  %v979_v3 = vadd.f32 %v5018_v31, %v716_v60  ;;  %v1230_v4 = vmax.f32 %v974_v61, 0.0  ;;  %v1231_v5 = vmax.f32 %v975_v62, 0.0  ;;  %v3715_v60 = vld [vmem:[%s5732_s0 + $0x308] sm:$0xff]   ;;  %v3716_v61 = vld [vmem:[%s5732_s0 + $0x310] sm:$0xff]  }
  0xe5   :  { %v1232_v25 = vmax.f32 %v976_v63, 0.0  ;;  %v1233_v6 = vmax.f32 %v977_v0, 0.0  ;;  %v3027_v9 = vpack.c.bf16 %v1228_v16, %v1228_v16  ;;  %v3028_v10 = vpack.c.bf16 %v1229_v7, %v1229_v7  ;;  %v3717_v7 = vld [vmem:[%s5732_s0 + $0x318] sm:$0xff]  }
  0xe6   :  { %v1234_v11 = vmax.f32 %v978_v2, 0.0  ;;  %v1235_v12 = vmax.f32 %v979_v3, 0.0  ;;  %v3029_v15 = vpack.c.bf16 %v1230_v4, %v1230_v4  ;;  %v3030_v17 = vpack.c.bf16 %v1231_v5, %v1231_v5 }
  0xe7   :  { %v3031_v18 = vpack.c.bf16 %v1232_v25, %v1232_v25  ;;  %v3032_v19 = vpack.c.bf16 %v1233_v6, %v1233_v6  ;;  %2509 = vst.msk [vmem:[%s5735_s3 + $0x2c0] sm:$0xf] %vm2332_vm0, %v3027_v9  ;;  %2510 = vst.msk [vmem:[%s5735_s3 + $0x2c4] sm:$0xf] %vm2332_vm0, %v3028_v10  ;;  %v3477_v24 = vunpack.c.l.bf16 %v3710_v8  ;;  %v3478_v26 = vunpack.c.h.bf16 %v3710_v8 }
  0xe8   :  { %v3033_v22 = vpack.c.bf16 %v1234_v11, %v1234_v11  ;;  %v3034_v23 = vpack.c.bf16 %v1235_v12, %v1235_v12  ;;  %2511 = vst.msk [vmem:[%s5735_s3 + $0x2c8] sm:$0xf] %vm2332_vm0, %v3029_v15  ;;  %2512 = vst.msk [vmem:[%s5735_s3 + $0x2cc] sm:$0xf] %vm2332_vm0, %v3030_v17  ;;  %v3481_v27 = vunpack.c.l.bf16 %v3711_v13  ;;  %v3482_v28 = vunpack.c.h.bf16 %v3711_v13 }
  0xe9   :  { %2513 = vst.msk [vmem:[%s5735_s3 + $0x2d0] sm:$0xf] %vm2332_vm0, %v3031_v18  ;;  %2514 = vst.msk [vmem:[%s5735_s3 + $0x2d4] sm:$0xf] %vm2332_vm0, %v3032_v19  ;;  %v3485_v29 = vunpack.c.l.bf16 %v3712_v14  ;;  %v3486_v30 = vunpack.c.h.bf16 %v3712_v14  ;;  %v717_v32 = vmul.f32 %v5007_v21, %v3477_v24  ;;  %v718_v33 = vmul.f32 %v5007_v21, %v3478_v26 }
  0xea   :  { %2515 = vst.msk [vmem:[%s5735_s3 + $0x2d8] sm:$0xf] %vm2332_vm0, %v3033_v22  ;;  %2516 = vst.msk [vmem:[%s5735_s3 + $0x2dc] sm:$0xf] %vm2332_vm0, %v3034_v23  ;;  %v3489_v34 = vunpack.c.l.bf16 %v3713_v20  ;;  %v3490_v35 = vunpack.c.h.bf16 %v3713_v20  ;;  %v719_v36 = vmul.f32 %v5007_v21, %v3481_v27  ;;  %v720_v37 = vmul.f32 %v5007_v21, %v3482_v28 }
  0xeb   :  { %v721_v38 = vmul.f32 %v5007_v21, %v3485_v29  ;;  %v722_v39 = vmul.f32 %v5007_v21, %v3486_v30  ;;  %v980_v40 = vadd.f32 %v5018_v31, %v717_v32  ;;  %v981_v41 = vadd.f32 %v5018_v31, %v718_v33 }
  0xec   :  { %v723_v42 = vmul.f32 %v5007_v21, %v3489_v34  ;;  %v724_v43 = vmul.f32 %v5007_v21, %v3490_v35  ;;  %v982_v44 = vadd.f32 %v5018_v31, %v719_v36  ;;  %v983_v45 = vadd.f32 %v5018_v31, %v720_v37 }
  0xed   :  { %v984_v46 = vadd.f32 %v5018_v31, %v721_v38  ;;  %v985_v47 = vadd.f32 %v5018_v31, %v722_v39  ;;  %v1236_v48 = vmax.f32 %v980_v40, 0.0  ;;  %v1237_v49 = vmax.f32 %v981_v41, 0.0  ;;  %v3718_v38 = vld [vmem:[%s5732_s0 + $0x320] sm:$0xff]  }
  0xee   :  { %v986_v50 = vadd.f32 %v5018_v31, %v723_v42  ;;  %v987_v51 = vadd.f32 %v5018_v31, %v724_v43  ;;  %v1238_v52 = vmax.f32 %v982_v44, 0.0  ;;  %v1239_v53 = vmax.f32 %v983_v45, 0.0  ;;  %v3719_v43 = vld [vmem:[%s5732_s0 + $0x328] sm:$0xff]   ;;  %v3720_v44 = vld [vmem:[%s5732_s0 + $0x330] sm:$0xff]  }
  0xef   :  { %v1240_v54 = vmax.f32 %v984_v46, 0.0  ;;  %v1241_v55 = vmax.f32 %v985_v47, 0.0  ;;  %v3035_v57 = vpack.c.bf16 %v1236_v48, %v1236_v48  ;;  %v3036_v58 = vpack.c.bf16 %v1237_v49, %v1237_v49  ;;  %v3721_v49 = vld [vmem:[%s5732_s0 + $0x338] sm:$0xff]  }
  0xf0   :  { %v1242_v59 = vmax.f32 %v986_v50, 0.0  ;;  %v1243_v1 = vmax.f32 %v987_v51, 0.0  ;;  %v3037_v62 = vpack.c.bf16 %v1238_v52, %v1238_v52  ;;  %v3038_v63 = vpack.c.bf16 %v1239_v53, %v1239_v53 }
  0xf1   :  { %v3039_v0 = vpack.c.bf16 %v1240_v54, %v1240_v54  ;;  %v3040_v16 = vpack.c.bf16 %v1241_v55, %v1241_v55  ;;  %2517 = vst.msk [vmem:[%s5735_s3 + $0x2e0] sm:$0xf] %vm2332_vm0, %v3035_v57  ;;  %2518 = vst.msk [vmem:[%s5735_s3 + $0x2e4] sm:$0xf] %vm2332_vm0, %v3036_v58  ;;  %v3493_v4 = vunpack.c.l.bf16 %v3714_v56  ;;  %v3494_v5 = vunpack.c.h.bf16 %v3714_v56 }
  0xf2   :  { %v3041_v2 = vpack.c.bf16 %v1242_v59, %v1242_v59  ;;  %v3042_v3 = vpack.c.bf16 %v1243_v1, %v1243_v1  ;;  %2519 = vst.msk [vmem:[%s5735_s3 + $0x2e8] sm:$0xf] %vm2332_vm0, %v3037_v62  ;;  %2520 = vst.msk [vmem:[%s5735_s3 + $0x2ec] sm:$0xf] %vm2332_vm0, %v3038_v63  ;;  %v3497_v25 = vunpack.c.l.bf16 %v3715_v60  ;;  %v3498_v6 = vunpack.c.h.bf16 %v3715_v60 }
  0xf3   :  { %2521 = vst.msk [vmem:[%s5735_s3 + $0x2f0] sm:$0xf] %vm2332_vm0, %v3039_v0  ;;  %2522 = vst.msk [vmem:[%s5735_s3 + $0x2f4] sm:$0xf] %vm2332_vm0, %v3040_v16  ;;  %v3501_v8 = vunpack.c.l.bf16 %v3716_v61  ;;  %v3502_v9 = vunpack.c.h.bf16 %v3716_v61  ;;  %v725_v10 = vmul.f32 %v5007_v21, %v3493_v4  ;;  %v726_v11 = vmul.f32 %v5007_v21, %v3494_v5 }
  0xf4   :  { %2523 = vst.msk [vmem:[%s5735_s3 + $0x2f8] sm:$0xf] %vm2332_vm0, %v3041_v2  ;;  %2524 = vst.msk [vmem:[%s5735_s3 + $0x2fc] sm:$0xf] %vm2332_vm0, %v3042_v3  ;;  %v3505_v12 = vunpack.c.l.bf16 %v3717_v7  ;;  %v3506_v13 = vunpack.c.h.bf16 %v3717_v7  ;;  %v727_v14 = vmul.f32 %v5007_v21, %v3497_v25  ;;  %v728_v15 = vmul.f32 %v5007_v21, %v3498_v6 }
  0xf5   :  { %v729_v17 = vmul.f32 %v5007_v21, %v3501_v8  ;;  %v730_v18 = vmul.f32 %v5007_v21, %v3502_v9  ;;  %v988_v19 = vadd.f32 %v5018_v31, %v725_v10  ;;  %v989_v20 = vadd.f32 %v5018_v31, %v726_v11 }
  0xf6   :  { %v731_v22 = vmul.f32 %v5007_v21, %v3505_v12  ;;  %v732_v23 = vmul.f32 %v5007_v21, %v3506_v13  ;;  %v990_v24 = vadd.f32 %v5018_v31, %v727_v14  ;;  %v991_v26 = vadd.f32 %v5018_v31, %v728_v15 }
  0xf7   :  { %v992_v27 = vadd.f32 %v5018_v31, %v729_v17  ;;  %v993_v28 = vadd.f32 %v5018_v31, %v730_v18  ;;  %v1244_v29 = vmax.f32 %v988_v19, 0.0  ;;  %v1245_v30 = vmax.f32 %v989_v20, 0.0  ;;  %v3722_v17 = vld [vmem:[%s5732_s0 + $0x340] sm:$0xff]  }
  0xf8   :  { %v994_v32 = vadd.f32 %v5018_v31, %v731_v22  ;;  %v995_v33 = vadd.f32 %v5018_v31, %v732_v23  ;;  %v1246_v34 = vmax.f32 %v990_v24, 0.0  ;;  %v1247_v35 = vmax.f32 %v991_v26, 0.0  ;;  %v3723_v23 = vld [vmem:[%s5732_s0 + $0x348] sm:$0xff]   ;;  %v3724_v24 = vld [vmem:[%s5732_s0 + $0x350] sm:$0xff]  }
  0xf9   :  { %v1248_v36 = vmax.f32 %v992_v27, 0.0  ;;  %v1249_v37 = vmax.f32 %v993_v28, 0.0  ;;  %v3043_v39 = vpack.c.bf16 %v1244_v29, %v1244_v29  ;;  %v3044_v40 = vpack.c.bf16 %v1245_v30, %v1245_v30  ;;  %v3725_v30 = vld [vmem:[%s5732_s0 + $0x358] sm:$0xff]  }
  0xfa   :  { %v1250_v41 = vmax.f32 %v994_v32, 0.0  ;;  %v1251_v42 = vmax.f32 %v995_v33, 0.0  ;;  %v3045_v45 = vpack.c.bf16 %v1246_v34, %v1246_v34  ;;  %v3046_v46 = vpack.c.bf16 %v1247_v35, %v1247_v35 }
  0xfb   :  { %v3047_v47 = vpack.c.bf16 %v1248_v36, %v1248_v36  ;;  %v3048_v48 = vpack.c.bf16 %v1249_v37, %v1249_v37  ;;  %2525 = vst.msk [vmem:[%s5735_s3 + $0x300] sm:$0xf] %vm2332_vm0, %v3043_v39  ;;  %2526 = vst.msk [vmem:[%s5735_s3 + $0x304] sm:$0xf] %vm2332_vm0, %v3044_v40  ;;  %v3509_v52 = vunpack.c.l.bf16 %v3718_v38  ;;  %v3510_v53 = vunpack.c.h.bf16 %v3718_v38 }
  0xfc   :  { %v3049_v50 = vpack.c.bf16 %v1250_v41, %v1250_v41  ;;  %v3050_v51 = vpack.c.bf16 %v1251_v42, %v1251_v42  ;;  %2527 = vst.msk [vmem:[%s5735_s3 + $0x308] sm:$0xf] %vm2332_vm0, %v3045_v45  ;;  %2528 = vst.msk [vmem:[%s5735_s3 + $0x30c] sm:$0xf] %vm2332_vm0, %v3046_v46  ;;  %v3513_v54 = vunpack.c.l.bf16 %v3719_v43  ;;  %v3514_v55 = vunpack.c.h.bf16 %v3719_v43 }
  0xfd   :  { %2529 = vst.msk [vmem:[%s5735_s3 + $0x310] sm:$0xf] %vm2332_vm0, %v3047_v47  ;;  %2530 = vst.msk [vmem:[%s5735_s3 + $0x314] sm:$0xf] %vm2332_vm0, %v3048_v48  ;;  %v3517_v56 = vunpack.c.l.bf16 %v3720_v44  ;;  %v3518_v57 = vunpack.c.h.bf16 %v3720_v44  ;;  %v733_v58 = vmul.f32 %v5007_v21, %v3509_v52  ;;  %v734_v59 = vmul.f32 %v5007_v21, %v3510_v53 }
  0xfe   :  { %2531 = vst.msk [vmem:[%s5735_s3 + $0x318] sm:$0xf] %vm2332_vm0, %v3049_v50  ;;  %2532 = vst.msk [vmem:[%s5735_s3 + $0x31c] sm:$0xf] %vm2332_vm0, %v3050_v51  ;;  %v3521_v1 = vunpack.c.l.bf16 %v3721_v49  ;;  %v3522_v60 = vunpack.c.h.bf16 %v3721_v49  ;;  %v735_v61 = vmul.f32 %v5007_v21, %v3513_v54  ;;  %v736_v62 = vmul.f32 %v5007_v21, %v3514_v55 }
  0xff   :  { %v737_v63 = vmul.f32 %v5007_v21, %v3517_v56  ;;  %v738_v0 = vmul.f32 %v5007_v21, %v3518_v57  ;;  %v996_v16 = vadd.f32 %v5018_v31, %v733_v58  ;;  %v997_v7 = vadd.f32 %v5018_v31, %v734_v59 }
 0x100   :  { %v739_v2 = vmul.f32 %v5007_v21, %v3521_v1  ;;  %v740_v3 = vmul.f32 %v5007_v21, %v3522_v60  ;;  %v998_v4 = vadd.f32 %v5018_v31, %v735_v61  ;;  %v999_v5 = vadd.f32 %v5018_v31, %v736_v62 }
 0x101   :  { %v1000_v25 = vadd.f32 %v5018_v31, %v737_v63  ;;  %v1001_v6 = vadd.f32 %v5018_v31, %v738_v0  ;;  %v1252_v8 = vmax.f32 %v996_v16, 0.0  ;;  %v1253_v9 = vmax.f32 %v997_v7, 0.0  ;;  %v3726_v63 = vld [vmem:[%s5732_s0 + $0x360] sm:$0xff]  }
 0x102   :  { %v1002_v10 = vadd.f32 %v5018_v31, %v739_v2  ;;  %v1003_v11 = vadd.f32 %v5018_v31, %v740_v3  ;;  %v1254_v12 = vmax.f32 %v998_v4, 0.0  ;;  %v1255_v13 = vmax.f32 %v999_v5, 0.0  ;;  %v3727_v3 = vld [vmem:[%s5732_s0 + $0x368] sm:$0xff]   ;;  %v3728_v4 = vld [vmem:[%s5732_s0 + $0x370] sm:$0xff]  }
 0x103   :  { %v1256_v14 = vmax.f32 %v1000_v25, 0.0  ;;  %v1257_v15 = vmax.f32 %v1001_v6, 0.0  ;;  %v3051_v18 = vpack.c.bf16 %v1252_v8, %v1252_v8  ;;  %v3052_v19 = vpack.c.bf16 %v1253_v9, %v1253_v9  ;;  %v3729_v9 = vld [vmem:[%s5732_s0 + $0x378] sm:$0xff]  }
 0x104   :  { %v1258_v20 = vmax.f32 %v1002_v10, 0.0  ;;  %v1259_v22 = vmax.f32 %v1003_v11, 0.0  ;;  %v3053_v26 = vpack.c.bf16 %v1254_v12, %v1254_v12  ;;  %v3054_v27 = vpack.c.bf16 %v1255_v13, %v1255_v13 }
 0x105   :  { %v3055_v28 = vpack.c.bf16 %v1256_v14, %v1256_v14  ;;  %v3056_v29 = vpack.c.bf16 %v1257_v15, %v1257_v15  ;;  %2533 = vst.msk [vmem:[%s5735_s3 + $0x320] sm:$0xf] %vm2332_vm0, %v3051_v18  ;;  %2534 = vst.msk [vmem:[%s5735_s3 + $0x324] sm:$0xf] %vm2332_vm0, %v3052_v19  ;;  %v3525_v34 = vunpack.c.l.bf16 %v3722_v17  ;;  %v3526_v35 = vunpack.c.h.bf16 %v3722_v17 }
 0x106   :  { %v3057_v32 = vpack.c.bf16 %v1258_v20, %v1258_v20  ;;  %v3058_v33 = vpack.c.bf16 %v1259_v22, %v1259_v22  ;;  %2535 = vst.msk [vmem:[%s5735_s3 + $0x328] sm:$0xf] %vm2332_vm0, %v3053_v26  ;;  %2536 = vst.msk [vmem:[%s5735_s3 + $0x32c] sm:$0xf] %vm2332_vm0, %v3054_v27  ;;  %v3529_v36 = vunpack.c.l.bf16 %v3723_v23  ;;  %v3530_v37 = vunpack.c.h.bf16 %v3723_v23 }
 0x107   :  { %2537 = vst.msk [vmem:[%s5735_s3 + $0x330] sm:$0xf] %vm2332_vm0, %v3055_v28  ;;  %2538 = vst.msk [vmem:[%s5735_s3 + $0x334] sm:$0xf] %vm2332_vm0, %v3056_v29  ;;  %v3533_v38 = vunpack.c.l.bf16 %v3724_v24  ;;  %v3534_v39 = vunpack.c.h.bf16 %v3724_v24  ;;  %v741_v40 = vmul.f32 %v5007_v21, %v3525_v34  ;;  %v742_v41 = vmul.f32 %v5007_v21, %v3526_v35 }
 0x108   :  { %2539 = vst.msk [vmem:[%s5735_s3 + $0x338] sm:$0xf] %vm2332_vm0, %v3057_v32  ;;  %2540 = vst.msk [vmem:[%s5735_s3 + $0x33c] sm:$0xf] %vm2332_vm0, %v3058_v33  ;;  %v3537_v42 = vunpack.c.l.bf16 %v3725_v30  ;;  %v3538_v43 = vunpack.c.h.bf16 %v3725_v30  ;;  %v743_v44 = vmul.f32 %v5007_v21, %v3529_v36  ;;  %v744_v45 = vmul.f32 %v5007_v21, %v3530_v37 }
 0x109   :  { %v745_v46 = vmul.f32 %v5007_v21, %v3533_v38  ;;  %v746_v47 = vmul.f32 %v5007_v21, %v3534_v39  ;;  %v1004_v48 = vadd.f32 %v5018_v31, %v741_v40  ;;  %v1005_v49 = vadd.f32 %v5018_v31, %v742_v41 }
 0x10a   :  { %v747_v50 = vmul.f32 %v5007_v21, %v3537_v42  ;;  %v748_v51 = vmul.f32 %v5007_v21, %v3538_v43  ;;  %v1006_v52 = vadd.f32 %v5018_v31, %v743_v44  ;;  %v1007_v53 = vadd.f32 %v5018_v31, %v744_v45 }
 0x10b   :  { %v1008_v54 = vadd.f32 %v5018_v31, %v745_v46  ;;  %v1009_v55 = vadd.f32 %v5018_v31, %v746_v47  ;;  %v1260_v56 = vmax.f32 %v1004_v48, 0.0  ;;  %v1261_v57 = vmax.f32 %v1005_v49, 0.0  ;;  %v3730_v46 = vld [vmem:[%s5732_s0 + $0x380] sm:$0xff]  }
 0x10c   :  { %v1010_v58 = vadd.f32 %v5018_v31, %v747_v50  ;;  %v1011_v59 = vadd.f32 %v5018_v31, %v748_v51  ;;  %v1262_v1 = vmax.f32 %v1006_v52, 0.0  ;;  %v1263_v60 = vmax.f32 %v1007_v53, 0.0  ;;  %v3731_v51 = vld [vmem:[%s5732_s0 + $0x388] sm:$0xff]   ;;  %v3732_v52 = vld [vmem:[%s5732_s0 + $0x390] sm:$0xff]  }
 0x10d   :  { %v1264_v61 = vmax.f32 %v1008_v54, 0.0  ;;  %v1265_v62 = vmax.f32 %v1009_v55, 0.0  ;;  %v3059_v0 = vpack.c.bf16 %v1260_v56, %v1260_v56  ;;  %v3060_v16 = vpack.c.bf16 %v1261_v57, %v1261_v57  ;;  %v3733_v57 = vld [vmem:[%s5732_s0 + $0x398] sm:$0xff]  }
 0x10e   :  { %v1266_v7 = vmax.f32 %v1010_v58, 0.0  ;;  %v1267_v2 = vmax.f32 %v1011_v59, 0.0  ;;  %v3061_v5 = vpack.c.bf16 %v1262_v1, %v1262_v1  ;;  %v3062_v25 = vpack.c.bf16 %v1263_v60, %v1263_v60 }
 0x10f   :  { %v3063_v6 = vpack.c.bf16 %v1264_v61, %v1264_v61  ;;  %v3064_v8 = vpack.c.bf16 %v1265_v62, %v1265_v62  ;;  %2541 = vst.msk [vmem:[%s5735_s3 + $0x340] sm:$0xf] %vm2332_vm0, %v3059_v0  ;;  %2542 = vst.msk [vmem:[%s5735_s3 + $0x344] sm:$0xf] %vm2332_vm0, %v3060_v16  ;;  %v3541_v12 = vunpack.c.l.bf16 %v3726_v63  ;;  %v3542_v13 = vunpack.c.h.bf16 %v3726_v63 }
 0x110   :  { %v3065_v10 = vpack.c.bf16 %v1266_v7, %v1266_v7  ;;  %v3066_v11 = vpack.c.bf16 %v1267_v2, %v1267_v2  ;;  %2543 = vst.msk [vmem:[%s5735_s3 + $0x348] sm:$0xf] %vm2332_vm0, %v3061_v5  ;;  %2544 = vst.msk [vmem:[%s5735_s3 + $0x34c] sm:$0xf] %vm2332_vm0, %v3062_v25  ;;  %v3545_v14 = vunpack.c.l.bf16 %v3727_v3  ;;  %v3546_v15 = vunpack.c.h.bf16 %v3727_v3 }
 0x111   :  { %2545 = vst.msk [vmem:[%s5735_s3 + $0x350] sm:$0xf] %vm2332_vm0, %v3063_v6  ;;  %2546 = vst.msk [vmem:[%s5735_s3 + $0x354] sm:$0xf] %vm2332_vm0, %v3064_v8  ;;  %v3549_v17 = vunpack.c.l.bf16 %v3728_v4  ;;  %v3550_v18 = vunpack.c.h.bf16 %v3728_v4  ;;  %v749_v19 = vmul.f32 %v5007_v21, %v3541_v12  ;;  %v750_v20 = vmul.f32 %v5007_v21, %v3542_v13 }
 0x112   :  { %2547 = vst.msk [vmem:[%s5735_s3 + $0x358] sm:$0xf] %vm2332_vm0, %v3065_v10  ;;  %2548 = vst.msk [vmem:[%s5735_s3 + $0x35c] sm:$0xf] %vm2332_vm0, %v3066_v11  ;;  %v3553_v22 = vunpack.c.l.bf16 %v3729_v9  ;;  %v3554_v23 = vunpack.c.h.bf16 %v3729_v9  ;;  %v751_v24 = vmul.f32 %v5007_v21, %v3545_v14  ;;  %v752_v26 = vmul.f32 %v5007_v21, %v3546_v15 }
 0x113   :  { %v753_v27 = vmul.f32 %v5007_v21, %v3549_v17  ;;  %v754_v28 = vmul.f32 %v5007_v21, %v3550_v18  ;;  %v1012_v29 = vadd.f32 %v5018_v31, %v749_v19  ;;  %v1013_v30 = vadd.f32 %v5018_v31, %v750_v20 }
 0x114   :  { %v755_v32 = vmul.f32 %v5007_v21, %v3553_v22  ;;  %v756_v33 = vmul.f32 %v5007_v21, %v3554_v23  ;;  %v1014_v34 = vadd.f32 %v5018_v31, %v751_v24  ;;  %v1015_v35 = vadd.f32 %v5018_v31, %v752_v26 }
 0x115   :  { %v1016_v36 = vadd.f32 %v5018_v31, %v753_v27  ;;  %v1017_v37 = vadd.f32 %v5018_v31, %v754_v28  ;;  %v1268_v38 = vmax.f32 %v1012_v29, 0.0  ;;  %v1269_v39 = vmax.f32 %v1013_v30, 0.0  ;;  %v3734_v27 = vld [vmem:[%s5732_s0 + $0x3a0] sm:$0xff]  }
 0x116   :  { %v1018_v40 = vadd.f32 %v5018_v31, %v755_v32  ;;  %v1019_v41 = vadd.f32 %v5018_v31, %v756_v33  ;;  %v1270_v42 = vmax.f32 %v1014_v34, 0.0  ;;  %v1271_v43 = vmax.f32 %v1015_v35, 0.0  ;;  %v3735_v33 = vld [vmem:[%s5732_s0 + $0x3a8] sm:$0xff]   ;;  %v3736_v34 = vld [vmem:[%s5732_s0 + $0x3b0] sm:$0xff]  }
 0x117   :  { %v1272_v44 = vmax.f32 %v1016_v36, 0.0  ;;  %v1273_v45 = vmax.f32 %v1017_v37, 0.0  ;;  %v3067_v47 = vpack.c.bf16 %v1268_v38, %v1268_v38  ;;  %v3068_v48 = vpack.c.bf16 %v1269_v39, %v1269_v39  ;;  %v3737_v39 = vld [vmem:[%s5732_s0 + $0x3b8] sm:$0xff]  }
 0x118   :  { %v1274_v49 = vmax.f32 %v1018_v40, 0.0  ;;  %v1275_v50 = vmax.f32 %v1019_v41, 0.0  ;;  %v3069_v53 = vpack.c.bf16 %v1270_v42, %v1270_v42  ;;  %v3070_v54 = vpack.c.bf16 %v1271_v43, %v1271_v43 }
 0x119   :  { %v3071_v55 = vpack.c.bf16 %v1272_v44, %v1272_v44  ;;  %v3072_v56 = vpack.c.bf16 %v1273_v45, %v1273_v45  ;;  %2549 = vst.msk [vmem:[%s5735_s3 + $0x360] sm:$0xf] %vm2332_vm0, %v3067_v47  ;;  %2550 = vst.msk [vmem:[%s5735_s3 + $0x364] sm:$0xf] %vm2332_vm0, %v3068_v48  ;;  %v3557_v1 = vunpack.c.l.bf16 %v3730_v46  ;;  %v3558_v60 = vunpack.c.h.bf16 %v3730_v46 }
 0x11a   :  { %v3073_v58 = vpack.c.bf16 %v1274_v49, %v1274_v49  ;;  %v3074_v59 = vpack.c.bf16 %v1275_v50, %v1275_v50  ;;  %2551 = vst.msk [vmem:[%s5735_s3 + $0x368] sm:$0xf] %vm2332_vm0, %v3069_v53  ;;  %2552 = vst.msk [vmem:[%s5735_s3 + $0x36c] sm:$0xf] %vm2332_vm0, %v3070_v54  ;;  %v3561_v61 = vunpack.c.l.bf16 %v3731_v51  ;;  %v3562_v62 = vunpack.c.h.bf16 %v3731_v51 }
 0x11b   :  { %2553 = vst.msk [vmem:[%s5735_s3 + $0x370] sm:$0xf] %vm2332_vm0, %v3071_v55  ;;  %2554 = vst.msk [vmem:[%s5735_s3 + $0x374] sm:$0xf] %vm2332_vm0, %v3072_v56  ;;  %v3565_v63 = vunpack.c.l.bf16 %v3732_v52  ;;  %v3566_v0 = vunpack.c.h.bf16 %v3732_v52  ;;  %v757_v16 = vmul.f32 %v5007_v21, %v3557_v1  ;;  %v758_v7 = vmul.f32 %v5007_v21, %v3558_v60 }
 0x11c   :  { %2555 = vst.msk [vmem:[%s5735_s3 + $0x378] sm:$0xf] %vm2332_vm0, %v3073_v58  ;;  %2556 = vst.msk [vmem:[%s5735_s3 + $0x37c] sm:$0xf] %vm2332_vm0, %v3074_v59  ;;  %v3569_v2 = vunpack.c.l.bf16 %v3733_v57  ;;  %v3570_v3 = vunpack.c.h.bf16 %v3733_v57  ;;  %v759_v4 = vmul.f32 %v5007_v21, %v3561_v61  ;;  %v760_v5 = vmul.f32 %v5007_v21, %v3562_v62 }
 0x11d   :  { %v761_v25 = vmul.f32 %v5007_v21, %v3565_v63  ;;  %v762_v6 = vmul.f32 %v5007_v21, %v3566_v0  ;;  %v1020_v8 = vadd.f32 %v5018_v31, %v757_v16  ;;  %v1021_v9 = vadd.f32 %v5018_v31, %v758_v7 }
 0x11e   :  { %v763_v10 = vmul.f32 %v5007_v21, %v3569_v2  ;;  %v764_v11 = vmul.f32 %v5007_v21, %v3570_v3  ;;  %v1022_v12 = vadd.f32 %v5018_v31, %v759_v4  ;;  %v1023_v13 = vadd.f32 %v5018_v31, %v760_v5 }
 0x11f   :  { %v1024_v14 = vadd.f32 %v5018_v31, %v761_v25  ;;  %v1025_v15 = vadd.f32 %v5018_v31, %v762_v6  ;;  %v1276_v17 = vmax.f32 %v1020_v8, 0.0  ;;  %v1277_v18 = vmax.f32 %v1021_v9, 0.0 }
 0x120   :  { %v1026_v19 = vadd.f32 %v5018_v31, %v763_v10  ;;  %v1027_v20 = vadd.f32 %v5018_v31, %v764_v11  ;;  %v1278_v22 = vmax.f32 %v1022_v12, 0.0  ;;  %v1279_v23 = vmax.f32 %v1023_v13, 0.0  ;;  %v3739_v10 = vld [vmem:[%s5732_s0 + $0x3c8] sm:$0xff]  }
 0x121   :  { %v1280_v24 = vmax.f32 %v1024_v14, 0.0  ;;  %v1281_v26 = vmax.f32 %v1025_v15, 0.0  ;;  %v3075_v28 = vpack.c.bf16 %v1276_v17, %v1276_v17  ;;  %v3076_v29 = vpack.c.bf16 %v1277_v18, %v1277_v18  ;;  %v3741_v15 = vld [vmem:[%s5732_s0 + $0x3d8] sm:$0xff]  }
 0x122   :  { %v1282_v30 = vmax.f32 %v1026_v19, 0.0  ;;  %v1283_v32 = vmax.f32 %v1027_v20, 0.0  ;;  %v3077_v35 = vpack.c.bf16 %v1278_v22, %v1278_v22  ;;  %v3078_v36 = vpack.c.bf16 %v1279_v23, %v1279_v23 }
 0x123   :  { %v3079_v37 = vpack.c.bf16 %v1280_v24, %v1280_v24  ;;  %v3080_v38 = vpack.c.bf16 %v1281_v26, %v1281_v26  ;;  %2557 = vst.msk [vmem:[%s5735_s3 + $0x380] sm:$0xf] %vm2332_vm0, %v3075_v28  ;;  %2558 = vst.msk [vmem:[%s5735_s3 + $0x384] sm:$0xf] %vm2332_vm0, %v3076_v29  ;;  %v3573_v42 = vunpack.c.l.bf16 %v3734_v27  ;;  %v3574_v43 = vunpack.c.h.bf16 %v3734_v27  ;;  %v5617_v27 = vld [vmem:[%s5733_s1] ss:$0 sm:$0xff] }
 0x124   :  { %v3081_v40 = vpack.c.bf16 %v1282_v30, %v1282_v30  ;;  %v3082_v41 = vpack.c.bf16 %v1283_v32, %v1283_v32  ;;  %2559 = vst.msk [vmem:[%s5735_s3 + $0x388] sm:$0xf] %vm2332_vm0, %v3077_v35  ;;  %2560 = vst.msk [vmem:[%s5735_s3 + $0x38c] sm:$0xf] %vm2332_vm0, %v3078_v36  ;;  %v3577_v44 = vunpack.c.l.bf16 %v3735_v33  ;;  %v3578_v45 = vunpack.c.h.bf16 %v3735_v33 }
 0x125   :  { %2561 = vst.msk [vmem:[%s5735_s3 + $0x390] sm:$0xf] %vm2332_vm0, %v3079_v37  ;;  %2562 = vst.msk [vmem:[%s5735_s3 + $0x394] sm:$0xf] %vm2332_vm0, %v3080_v38  ;;  %v3581_v46 = vunpack.c.l.bf16 %v3736_v34  ;;  %v3582_v47 = vunpack.c.h.bf16 %v3736_v34  ;;  %v765_v48 = vmul.f32 %v5007_v21, %v3573_v42  ;;  %v766_v49 = vmul.f32 %v5007_v21, %v3574_v43  ;;  %v5628_v37 = vld [vmem:[%s5734_s2] ss:$0 sm:$0xff] }
 0x126   :  { %2563 = vst.msk [vmem:[%s5735_s3 + $0x398] sm:$0xf] %vm2332_vm0, %v3081_v40  ;;  %2564 = vst.msk [vmem:[%s5735_s3 + $0x39c] sm:$0xf] %vm2332_vm0, %v3082_v41  ;;  %v3585_v50 = vunpack.c.l.bf16 %v3737_v39  ;;  %v3586_v51 = vunpack.c.h.bf16 %v3737_v39  ;;  %v767_v52 = vmul.f32 %v5007_v21, %v3577_v44  ;;  %v768_v53 = vmul.f32 %v5007_v21, %v3578_v45 }
 0x127   :  { %v769_v54 = vmul.f32 %v5007_v21, %v3581_v46  ;;  %v770_v55 = vmul.f32 %v5007_v21, %v3582_v47  ;;  %v1028_v56 = vadd.f32 %v5018_v31, %v765_v48  ;;  %v1029_v57 = vadd.f32 %v5018_v31, %v766_v49 }
 0x128   :  { %v771_v58 = vmul.f32 %v5007_v21, %v3585_v50  ;;  %v772_v59 = vmul.f32 %v5007_v21, %v3586_v51  ;;  %v1030_v1 = vadd.f32 %v5018_v31, %v767_v52  ;;  %v1031_v60 = vadd.f32 %v5018_v31, %v768_v53  ;;  %v3738_v21 = vld [vmem:[%s5732_s0 + $0x3c0] sm:$0xff]  }
 0x129   :  { %v1032_v61 = vadd.f32 %v5018_v31, %v769_v54  ;;  %v1033_v62 = vadd.f32 %v5018_v31, %v770_v55  ;;  %v1284_v63 = vmax.f32 %v1028_v56, 0.0  ;;  %v1285_v0 = vmax.f32 %v1029_v57, 0.0  ;;  %v3742_v54 = vld [vmem:[%s5732_s0 + $0x3e0] sm:$0xff]  }
 0x12a   :  { %v1034_v16 = vadd.f32 %v5018_v31, %v771_v58  ;;  %v1035_v7 = vadd.f32 %v5018_v31, %v772_v59  ;;  %v1286_v2 = vmax.f32 %v1030_v1, 0.0  ;;  %v1287_v3 = vmax.f32 %v1031_v60, 0.0  ;;  %v3740_v31 = vld [vmem:[%s5732_s0 + $0x3d0] sm:$0xff]   ;;  %v3743_v59 = vld [vmem:[%s5732_s0 + $0x3e8] sm:$0xff]  }
 0x12b   :  { %v1288_v4 = vmax.f32 %v1032_v61, 0.0  ;;  %v1289_v5 = vmax.f32 %v1033_v62, 0.0  ;;  %v3083_v25 = vpack.c.bf16 %v1284_v63, %v1284_v63  ;;  %v3084_v6 = vpack.c.bf16 %v1285_v0, %v1285_v0  ;;  %v3744_v1 = vld [vmem:[%s5732_s0 + $0x3f0] sm:$0xff]   ;;  %v3745_v0 = vld [vmem:[%s5732_s0 + $0x3f8] sm:$0xff]  }
 0x12c   :  { %v1290_v8 = vmax.f32 %v1034_v16, 0.0  ;;  %v1291_v9 = vmax.f32 %v1035_v7, 0.0  ;;  %v3085_v11 = vpack.c.bf16 %v1286_v2, %v1286_v2  ;;  %v3086_v12 = vpack.c.bf16 %v1287_v3, %v1287_v3 }
 0x12d   :  { %v3087_v13 = vpack.c.bf16 %v1288_v4, %v1288_v4  ;;  %v3088_v14 = vpack.c.bf16 %v1289_v5, %v1289_v5  ;;  %2565 = vst.msk [vmem:[%s5735_s3 + $0x3a0] sm:$0xf] %vm2332_vm0, %v3083_v25  ;;  %2566 = vst.msk [vmem:[%s5735_s3 + $0x3a4] sm:$0xf] %vm2332_vm0, %v3084_v6  ;;  %v3589_v19 = vunpack.c.l.bf16 %v3738_v21  ;;  %v3590_v20 = vunpack.c.h.bf16 %v3738_v21 }
 0x12e   :  { %v3089_v17 = vpack.c.bf16 %v1290_v8, %v1290_v8  ;;  %v3090_v18 = vpack.c.bf16 %v1291_v9, %v1291_v9  ;;  %2567 = vst.msk [vmem:[%s5735_s3 + $0x3a8] sm:$0xf] %vm2332_vm0, %v3085_v11  ;;  %2568 = vst.msk [vmem:[%s5735_s3 + $0x3ac] sm:$0xf] %vm2332_vm0, %v3086_v12  ;;  %v3593_v22 = vunpack.c.l.bf16 %v3739_v10  ;;  %v3594_v23 = vunpack.c.h.bf16 %v3739_v10 }
 0x12f   :  { %2569 = vst.msk [vmem:[%s5735_s3 + $0x3b0] sm:$0xf] %vm2332_vm0, %v3087_v13  ;;  %2570 = vst.msk [vmem:[%s5735_s3 + $0x3b4] sm:$0xf] %vm2332_vm0, %v3088_v14  ;;  %v3597_v24 = vunpack.c.l.bf16 %v3740_v31  ;;  %v3598_v26 = vunpack.c.h.bf16 %v3740_v31  ;;  %v773_v28 = vmul.f32 %v5617_v27, %v3589_v19  ;;  %v774_v29 = vmul.f32 %v5617_v27, %v3590_v20 }
 0x130   :  { %2571 = vst.msk [vmem:[%s5735_s3 + $0x3b8] sm:$0xf] %vm2332_vm0, %v3089_v17  ;;  %2572 = vst.msk [vmem:[%s5735_s3 + $0x3bc] sm:$0xf] %vm2332_vm0, %v3090_v18  ;;  %v3601_v30 = vunpack.c.l.bf16 %v3741_v15  ;;  %v3602_v32 = vunpack.c.h.bf16 %v3741_v15  ;;  %v775_v33 = vmul.f32 %v5617_v27, %v3593_v22  ;;  %v776_v34 = vmul.f32 %v5617_v27, %v3594_v23 }
 0x131   :  { %v777_v35 = vmul.f32 %v5617_v27, %v3597_v24  ;;  %v778_v36 = vmul.f32 %v5617_v27, %v3598_v26  ;;  %v1036_v38 = vadd.f32 %v5628_v37, %v773_v28  ;;  %v1037_v39 = vadd.f32 %v5628_v37, %v774_v29 }
 0x132   :  { %v779_v40 = vmul.f32 %v5617_v27, %v3601_v30  ;;  %v780_v41 = vmul.f32 %v5617_v27, %v3602_v32  ;;  %v1038_v42 = vadd.f32 %v5628_v37, %v775_v33  ;;  %v1039_v43 = vadd.f32 %v5628_v37, %v776_v34 }
 0x133   :  { %v1040_v44 = vadd.f32 %v5628_v37, %v777_v35  ;;  %v1041_v45 = vadd.f32 %v5628_v37, %v778_v36  ;;  %v1292_v46 = vmax.f32 %v1036_v38, 0.0  ;;  %v1293_v47 = vmax.f32 %v1037_v39, 0.0 }
 0x134   :  { %v1042_v48 = vadd.f32 %v5628_v37, %v779_v40  ;;  %v1043_v49 = vadd.f32 %v5628_v37, %v780_v41  ;;  %v1294_v50 = vmax.f32 %v1038_v42, 0.0  ;;  %v1295_v51 = vmax.f32 %v1039_v43, 0.0 }
 0x135   :  { %v1296_v52 = vmax.f32 %v1040_v44, 0.0  ;;  %v1297_v53 = vmax.f32 %v1041_v45, 0.0  ;;  %v3091_v55 = vpack.c.bf16 %v1292_v46, %v1292_v46  ;;  %v3092_v56 = vpack.c.bf16 %v1293_v47, %v1293_v47 }
 0x136   :  { %v1298_v57 = vmax.f32 %v1042_v48, 0.0  ;;  %v1299_v58 = vmax.f32 %v1043_v49, 0.0  ;;  %v3093_v60 = vpack.c.bf16 %v1294_v50, %v1294_v50  ;;  %v3094_v61 = vpack.c.bf16 %v1295_v51, %v1295_v51 }
 0x137   :  { %v3095_v62 = vpack.c.bf16 %v1296_v52, %v1296_v52  ;;  %v3096_v63 = vpack.c.bf16 %v1297_v53, %v1297_v53  ;;  %2573 = vst.msk [vmem:[%s5735_s3 + $0x3c0] sm:$0xf] %vm2332_vm0, %v3091_v55  ;;  %2574 = vst.msk [vmem:[%s5735_s3 + $0x3c4] sm:$0xf] %vm2332_vm0, %v3092_v56  ;;  %v3605_v2 = vunpack.c.l.bf16 %v3742_v54  ;;  %v3606_v3 = vunpack.c.h.bf16 %v3742_v54 }
 0x138   :  { %v3097_v16 = vpack.c.bf16 %v1298_v57, %v1298_v57  ;;  %v3098_v7 = vpack.c.bf16 %v1299_v58, %v1299_v58  ;;  %2575 = vst.msk [vmem:[%s5735_s3 + $0x3c8] sm:$0xf] %vm2332_vm0, %v3093_v60  ;;  %2576 = vst.msk [vmem:[%s5735_s3 + $0x3cc] sm:$0xf] %vm2332_vm0, %v3094_v61  ;;  %v3609_v4 = vunpack.c.l.bf16 %v3743_v59  ;;  %v3610_v5 = vunpack.c.h.bf16 %v3743_v59 }
 0x139   :  { %2577 = vst.msk [vmem:[%s5735_s3 + $0x3d0] sm:$0xf] %vm2332_vm0, %v3095_v62  ;;  %2578 = vst.msk [vmem:[%s5735_s3 + $0x3d4] sm:$0xf] %vm2332_vm0, %v3096_v63  ;;  %v3613_v21 = vunpack.c.l.bf16 %v3744_v1  ;;  %v3614_v25 = vunpack.c.h.bf16 %v3744_v1  ;;  %v781_v6 = vmul.f32 %v5617_v27, %v3605_v2  ;;  %v782_v8 = vmul.f32 %v5617_v27, %v3606_v3 }
 0x13a   :  { %2579 = vst.msk [vmem:[%s5735_s3 + $0x3d8] sm:$0xf] %vm2332_vm0, %v3097_v16  ;;  %2580 = vst.msk [vmem:[%s5735_s3 + $0x3dc] sm:$0xf] %vm2332_vm0, %v3098_v7  ;;  %v3617_v9 = vunpack.c.l.bf16 %v3745_v0  ;;  %v3618_v10 = vunpack.c.h.bf16 %v3745_v0  ;;  %v783_v31 = vmul.f32 %v5617_v27, %v3609_v4  ;;  %v784_v11 = vmul.f32 %v5617_v27, %v3610_v5 }
 0x13b   :  { %v785_v12 = vmul.f32 %v5617_v27, %v3613_v21  ;;  %v786_v13 = vmul.f32 %v5617_v27, %v3614_v25  ;;  %v1044_v14 = vadd.f32 %v5628_v37, %v781_v6  ;;  %v1045_v15 = vadd.f32 %v5628_v37, %v782_v8 }
 0x13c   :  { %v787_v17 = vmul.f32 %v5617_v27, %v3617_v9  ;;  %v788_v18 = vmul.f32 %v5617_v27, %v3618_v10  ;;  %v1046_v19 = vadd.f32 %v5628_v37, %v783_v31  ;;  %v1047_v20 = vadd.f32 %v5628_v37, %v784_v11 }
 0x13d   :  { %v1048_v22 = vadd.f32 %v5628_v37, %v785_v12  ;;  %v1049_v23 = vadd.f32 %v5628_v37, %v786_v13  ;;  %v1300_v24 = vmax.f32 %v1044_v14, 0.0  ;;  %v1301_v26 = vmax.f32 %v1045_v15, 0.0 }
 0x13e   :  { %v1050_v28 = vadd.f32 %v5628_v37, %v787_v17  ;;  %v1051_v29 = vadd.f32 %v5628_v37, %v788_v18  ;;  %v1302_v30 = vmax.f32 %v1046_v19, 0.0  ;;  %v1303_v32 = vmax.f32 %v1047_v20, 0.0 }
 0x13f   :  { %v1304_v33 = vmax.f32 %v1048_v22, 0.0  ;;  %v1305_v34 = vmax.f32 %v1049_v23, 0.0  ;;  %v3099_v35 = vpack.c.bf16 %v1300_v24, %v1300_v24  ;;  %v3100_v27 = vpack.c.bf16 %v1301_v26, %v1301_v26 }
 0x140   :  { %v1306_v36 = vmax.f32 %v1050_v28, 0.0  ;;  %v1307_v38 = vmax.f32 %v1051_v29, 0.0  ;;  %v3101_v39 = vpack.c.bf16 %v1302_v30, %v1302_v30  ;;  %v3102_v40 = vpack.c.bf16 %v1303_v32, %v1303_v32 }
 0x141   :  { %v3103_v41 = vpack.c.bf16 %v1304_v33, %v1304_v33  ;;  %v3104_v42 = vpack.c.bf16 %v1305_v34, %v1305_v34  ;;  %2581 = vst.msk [vmem:[%s5735_s3 + $0x3e0] sm:$0xf] %vm2332_vm0, %v3099_v35  ;;  %2582 = vst.msk [vmem:[%s5735_s3 + $0x3e4] sm:$0xf] %vm2332_vm0, %v3100_v27 }
 0x142   :  { %v3105_v37 = vpack.c.bf16 %v1306_v36, %v1306_v36  ;;  %v3106_v43 = vpack.c.bf16 %v1307_v38, %v1307_v38  ;;  %2583 = vst.msk [vmem:[%s5735_s3 + $0x3e8] sm:$0xf] %vm2332_vm0, %v3101_v39  ;;  %2584 = vst.msk [vmem:[%s5735_s3 + $0x3ec] sm:$0xf] %vm2332_vm0, %v3102_v40 }
 0x143   :  { %2585 = vst.msk [vmem:[%s5735_s3 + $0x3f0] sm:$0xf] %vm2332_vm0, %v3103_v41  ;;  %2586 = vst.msk [vmem:[%s5735_s3 + $0x3f4] sm:$0xf] %vm2332_vm0, %v3104_v42 }
 0x144   :  { %2587 = vst.msk [vmem:[%s5735_s3 + $0x3f8] sm:$0xf] %vm2332_vm0, %v3105_v37  ;;  %2588 = vst.msk [vmem:[%s5735_s3 + $0x3fc] sm:$0xf] %vm2332_vm0, %v3106_v43 }

// kernel: generator_forward.17
= control target key start
LH: loop header
LB: loop body
LE: loop exit
PB: predicated region body
PF: predicated region fallthrough
CT: control target
= control target key end

     0   :  { %s2603_s9 = smov 0   ;;  %s2605_s10 = smov 0   ;;  %s2940_s0 = inlined_call_operand.vmem [shape: bf16[4,3,256], index: 0, kind: input, shape index: {}]   ;;  %s2941_s1 = inlined_call_operand.vmem [shape: bf16[4,256,2048], index: 1, kind: input, shape index: {}]   ;;  %s2942_s2 = inlined_call_operand.vmem [shape: f32[4,3,2048], index: 2, kind: output, shape index: {}]  }
   0x1   :  { %s2607_s11 = smov 0  }
   0x2 LB: > { %s24_s12 = sadd.s32 1, %s2582_s10  ;;  %p2238_p0 = scmp.ge.s32.totalorder %s2586_s11, 1  ;;  %s2586_s11 = sphi %s2607_s11, %s12_s11   ;;  %s2582_s10 = sphi %s2605_s10, %s2944_s10   ;;  %s2578_s9 = sphi %s2603_s9, %s2943_s9  }
   0x3   : > { %p26_p1 = scmp.ge.s32.totalorder %s24_s12, 4  ;;  %p143_p2 = scmp.lt.s32.totalorder %s2586_s11, 5 }
   0x5   : > { %s2946_s12 = smov (%p26_p1, %s24_s12), 0  ;;  %p144_p3 = pnand %p2238_p0, %p143_p2 }
   0x6   : > { %p178_p4 = scmp.lt.s32.totalorder (!%p144_p3), %s2578_s9, 3 }
   0x7   : > { %147 = sbr.rel (%p144_p3) target bundleno = 506 (0x1fa), region = 28 }
   0xe   : > { %s2948_s9 = smov (!%p178_p4, %s2578_s9), 3 }
   0xf   : > { %s2505_s13 = sshll.u32 %s2948_s9, 11  ;;  %s2504_s17 = sshll.u32 %s2948_s9, 2 }
  0x10   : > { %s2627_s16 = scalar_lea.vmem %s2941_s1, %s2505_s13  ;;  %s2659_s20 = scalar_lea.vmem %s2940_s0, %s2504_s17 }
  0x11   : > { %v204_v0 = vld [vmem:[%s2627_s16] sm:$0xff]  ;;  %v205_v2 = vld [vmem:[%s2627_s16 + $0x8] sm:$0xff]  ;;  %s2506_s21 = sshll.u32 %s2948_s9, 6 }
  0x12   : > { %v212_v1 = vld [vmem:[%s2627_s16 + $0x40] sm:$0xff]  ;;  %v213_v4 = vld [vmem:[%s2627_s16 + $0x48] sm:$0xff]  ;;  %s2921_s24 = scalar_lea.vmem %s2942_s2, %s2506_s21 }
  0x13   : > { %v2247_v3 = vcombine.high %v204_v0, %v212_v1  ;;  %v2246_v5 = vcombine.low %v204_v0, %v212_v1  ;;  %v220_v6 = vld [vmem:[%s2627_s16 + $0x80] sm:$0xff]  ;;  %v2249_v8 = vcombine.high %v205_v2, %v213_v4  ;;  %v2248_v9 = vcombine.low %v205_v2, %v213_v4  ;;  %v221_v11 = vld [vmem:[%s2627_s16 + $0x88] sm:$0xff] }
  0x14   : > { %v228_v7 = vld [vmem:[%s2627_s16 + $0xc0] sm:$0xff]  ;;  %v229_v12 = vld [vmem:[%s2627_s16 + $0xc8] sm:$0xff] }
  0x15   : > { %v2263_v10 = vcombine.high %v220_v6, %v228_v7  ;;  %v236_v13 = vld [vmem:[%s2627_s16 + $0x100] sm:$0xff]  ;;  %1751 = vmatprep.subr.bf16.mxu0 %v2247_v3  ;;  %v2265_v14 = vcombine.high %v221_v11, %v229_v12  ;;  %v237_v16 = vld [vmem:[%s2627_s16 + $0x108] sm:$0xff]  ;;  %1792 = vmatprep.subr.bf16.mxu1 %v2249_v8  ;;  %v2262_v18 = vcombine.low %v220_v6, %v228_v7 }
  0x16   : > { %v244_v15 = vld [vmem:[%s2627_s16 + $0x140] sm:$0xff]  ;;  %v245_v17 = vld [vmem:[%s2627_s16 + $0x148] sm:$0xff]  ;;  %1752 = vmatpush1.bf16.msra.mxu0 %v2246_v5  ;;  %1793 = vmatpush1.bf16.msra.mxu1 %v2248_v9  ;;  %v2264_v19 = vcombine.low %v221_v11, %v229_v12 }
  0x17   : > { %1753 = vmatprep.subr.bf16.mxu0 %v2263_v10  ;;  %v2279_v20 = vcombine.high %v236_v13, %v244_v15  ;;  %1794 = vmatprep.subr.bf16.mxu1 %v2265_v14  ;;  %v2281_v21 = vcombine.high %v237_v16, %v245_v17  ;;  %v252_v22 = vld [vmem:[%s2627_s16 + $0x180] sm:$0xff]  ;;  %v253_v24 = vld [vmem:[%s2627_s16 + $0x188] sm:$0xff]  ;;  %v2278_v26 = vcombine.low %v236_v13, %v244_v15 }
  0x18   : > { %v260_v23 = vld [vmem:[%s2627_s16 + $0x1c0] sm:$0xff]  ;;  %v261_v25 = vld [vmem:[%s2627_s16 + $0x1c8] sm:$0xff]  ;;  %v2280_v27 = vcombine.low %v237_v16, %v245_v17 }
  0x19   : > { %v2295_v28 = vcombine.high %v252_v22, %v260_v23  ;;  %v2297_v29 = vcombine.high %v253_v24, %v261_v25  ;;  %v268_v30 = vld [vmem:[%s2627_s16 + $0x200] sm:$0xff]  ;;  %v269_v32 = vld [vmem:[%s2627_s16 + $0x208] sm:$0xff]  ;;  %v2294_v34 = vcombine.low %v252_v22, %v260_v23  ;;  %v2296_v35 = vcombine.low %v253_v24, %v261_v25 }
  0x1a   : > { %1754 = vmatpush1.bf16.msra.mxu0 %v2262_v18  ;;  %1795 = vmatpush1.bf16.msra.mxu1 %v2264_v19  ;;  %v276_v31 = vld [vmem:[%s2627_s16 + $0x240] sm:$0xff]  ;;  %v277_v33 = vld [vmem:[%s2627_s16 + $0x248] sm:$0xff] }
  0x1b   : > { %1755 = vmatprep.subr.bf16.mxu0 %v2279_v20  ;;  %1796 = vmatprep.subr.bf16.mxu1 %v2281_v21  ;;  %v2311_v36 = vcombine.high %v268_v30, %v276_v31  ;;  %v2313_v37 = vcombine.high %v269_v32, %v277_v33  ;;  %v284_v38 = vld [vmem:[%s2627_s16 + $0x280] sm:$0xff]  ;;  %v285_v40 = vld [vmem:[%s2627_s16 + $0x288] sm:$0xff]  ;;  %v2310_v42 = vcombine.low %v268_v30, %v276_v31 }
  0x1c   : > { %v292_v39 = vld [vmem:[%s2627_s16 + $0x2c0] sm:$0xff]  ;;  %v293_v41 = vld [vmem:[%s2627_s16 + $0x2c8] sm:$0xff]  ;;  %v2312_v43 = vcombine.low %v269_v32, %v277_v33 }
  0x1d   : > { %v2327_v44 = vcombine.high %v284_v38, %v292_v39  ;;  %v2329_v45 = vcombine.high %v285_v40, %v293_v41  ;;  %v300_v46 = vld [vmem:[%s2627_s16 + $0x300] sm:$0xff]  ;;  %v301_v48 = vld [vmem:[%s2627_s16 + $0x308] sm:$0xff]  ;;  %v2326_v50 = vcombine.low %v284_v38, %v292_v39  ;;  %v2328_v51 = vcombine.low %v285_v40, %v293_v41 }
  0x1e   : > { %1756 = vmatpush1.bf16.msra.mxu0 %v2278_v26  ;;  %1797 = vmatpush1.bf16.msra.mxu1 %v2280_v27  ;;  %v308_v47 = vld [vmem:[%s2627_s16 + $0x340] sm:$0xff]  ;;  %v309_v49 = vld [vmem:[%s2627_s16 + $0x348] sm:$0xff] }
  0x1f   : > { %1757 = vmatprep.subr.bf16.mxu0 %v2295_v28  ;;  %1798 = vmatprep.subr.bf16.mxu1 %v2297_v29  ;;  %v2343_v52 = vcombine.high %v300_v46, %v308_v47  ;;  %v2664_v53 = vld.sshfl [vmem:[%s2659_s20] sm:$0x33 pattern:$0x76325410]  ;;  %v2345_v54 = vcombine.high %v301_v48, %v309_v49  ;;  %v317_v58 = vld [vmem:[%s2627_s16 + $0x388] sm:$0xff]  ;;  %v2342_v60 = vcombine.low %v300_v46, %v308_v47 }
  0x20   : > { %v316_v55 = vld [vmem:[%s2627_s16 + $0x380] sm:$0xff]  ;;  %v2670_v57 = vcombine.high %v2664_v53, %v2664_v53  ;;  %v325_v59 = vld [vmem:[%s2627_s16 + $0x3c8] sm:$0xff]  ;;  %v2344_v61 = vcombine.low %v301_v48, %v309_v49 }
  0x21   : > { %v324_v56 = vld [vmem:[%s2627_s16 + $0x3c0] sm:$0xff]  ;;  %v2361_v63 = vcombine.high %v317_v58, %v325_v59  ;;  %v333_v2 = vld [vmem:[%s2627_s16 + $0x408] sm:$0xff]  ;;  %v2360_v5 = vcombine.low %v317_v58, %v325_v59 }
  0x22   : > { %1758 = vmatpush1.bf16.msra.mxu0 %v2294_v34  ;;  %1799 = vmatpush1.bf16.msra.mxu1 %v2296_v35  ;;  %v2359_v62 = vcombine.high %v316_v55, %v324_v56  ;;  %v332_v0 = vld [vmem:[%s2627_s16 + $0x400] sm:$0xff]  ;;  %v341_v3 = vld [vmem:[%s2627_s16 + $0x448] sm:$0xff]  ;;  %v2358_v4 = vcombine.low %v316_v55, %v324_v56 }
  0x23   : > { %1759 = vmatprep.subr.bf16.mxu0 %v2311_v36  ;;  %1800 = vmatprep.subr.bf16.mxu1 %v2313_v37  ;;  %v340_v1 = vld [vmem:[%s2627_s16 + $0x440] sm:$0xff]  ;;  %v2377_v7 = vcombine.high %v333_v2, %v341_v3  ;;  %v349_v10 = vld [vmem:[%s2627_s16 + $0x488] sm:$0xff]  ;;  %v2376_v13 = vcombine.low %v333_v2, %v341_v3  ;;  %v206_v2 = vld [vmem:[%s2627_s16 + $0x10] sm:$0xff] }
  0x24   : > { %1783 = vmatprep.mubr.bf16.mxu0 %v2670_v57  ;;  %1824 = vmatprep.mubr.bf16.mxu1 %v2670_v57  ;;  %v2375_v6 = vcombine.high %v332_v0, %v340_v1  ;;  %v348_v8 = vld [vmem:[%s2627_s16 + $0x480] sm:$0xff]  ;;  %v357_v11 = vld [vmem:[%s2627_s16 + $0x4c8] sm:$0xff]  ;;  %v2374_v12 = vcombine.low %v332_v0, %v340_v1  ;;  %v214_v3 = vld [vmem:[%s2627_s16 + $0x50] sm:$0xff] }
  0x25   : > { %v356_v9 = vld [vmem:[%s2627_s16 + $0x4c0] sm:$0xff]  ;;  %v2393_v15 = vcombine.high %v349_v10, %v357_v11  ;;  %v365_v18 = vld [vmem:[%s2627_s16 + $0x508] sm:$0xff]  ;;  %v2392_v21 = vcombine.low %v349_v10, %v357_v11  ;;  %v222_v10 = vld [vmem:[%s2627_s16 + $0x90] sm:$0xff] }
  0x26   : > { %1760 = vmatpush1.bf16.msra.mxu0 %v2310_v42  ;;  %1801 = vmatpush1.bf16.msra.mxu1 %v2312_v43  ;;  %v2391_v14 = vcombine.high %v348_v8, %v356_v9  ;;  %v364_v16 = vld [vmem:[%s2627_s16 + $0x500] sm:$0xff]  ;;  %v373_v19 = vld [vmem:[%s2627_s16 + $0x548] sm:$0xff]  ;;  %v2390_v20 = vcombine.low %v348_v8, %v356_v9  ;;  %v2251_v8 = vcombine.high %v206_v2, %v214_v3  ;;  %v230_v11 = vld [vmem:[%s2627_s16 + $0xd0] sm:$0xff] }
  0x27   : > { %1761 = vmatprep.subr.bf16.mxu0 %v2327_v44  ;;  %1802 = vmatprep.subr.bf16.mxu1 %v2329_v45  ;;  %v372_v17 = vld [vmem:[%s2627_s16 + $0x540] sm:$0xff]  ;;  %v2409_v23 = vcombine.high %v365_v18, %v373_v19  ;;  %v381_v26 = vld [vmem:[%s2627_s16 + $0x588] sm:$0xff]  ;;  %v2408_v29 = vcombine.low %v365_v18, %v373_v19  ;;  %v238_v18 = vld [vmem:[%s2627_s16 + $0x110] sm:$0xff] }
  0x28   : > { %v2407_v22 = vcombine.high %v364_v16, %v372_v17  ;;  %v380_v24 = vld [vmem:[%s2627_s16 + $0x580] sm:$0xff]  ;;  %v389_v27 = vld [vmem:[%s2627_s16 + $0x5c8] sm:$0xff]  ;;  %v2406_v28 = vcombine.low %v364_v16, %v372_v17  ;;  %v2267_v16 = vcombine.high %v222_v10, %v230_v11  ;;  %v246_v19 = vld [vmem:[%s2627_s16 + $0x150] sm:$0xff] }
  0x29   : > { %v388_v25 = vld [vmem:[%s2627_s16 + $0x5c0] sm:$0xff]  ;;  %v2425_v31 = vcombine.high %v381_v26, %v389_v27  ;;  %v397_v34 = vld [vmem:[%s2627_s16 + $0x608] sm:$0xff]  ;;  %v2424_v37 = vcombine.low %v381_v26, %v389_v27  ;;  %v254_v26 = vld [vmem:[%s2627_s16 + $0x190] sm:$0xff] }
  0x2a   : > { %1762 = vmatpush1.bf16.msra.mxu0 %v2326_v50  ;;  %1803 = vmatpush1.bf16.msra.mxu1 %v2328_v51  ;;  %v2423_v30 = vcombine.high %v380_v24, %v388_v25  ;;  %v396_v32 = vld [vmem:[%s2627_s16 + $0x600] sm:$0xff]  ;;  %v405_v35 = vld [vmem:[%s2627_s16 + $0x648] sm:$0xff]  ;;  %v2422_v36 = vcombine.low %v380_v24, %v388_v25  ;;  %v2283_v24 = vcombine.high %v238_v18, %v246_v19  ;;  %v262_v27 = vld [vmem:[%s2627_s16 + $0x1d0] sm:$0xff] }
  0x2b   : > { %1763 = vmatprep.subr.bf16.mxu0 %v2343_v52  ;;  %1804 = vmatprep.subr.bf16.mxu1 %v2345_v54  ;;  %v404_v33 = vld [vmem:[%s2627_s16 + $0x640] sm:$0xff]  ;;  %v2441_v39 = vcombine.high %v397_v34, %v405_v35  ;;  %v413_v42 = vld [vmem:[%s2627_s16 + $0x688] sm:$0xff]  ;;  %v2440_v45 = vcombine.low %v397_v34, %v405_v35  ;;  %v270_v34 = vld [vmem:[%s2627_s16 + $0x210] sm:$0xff] }
  0x2c   : > { %v2439_v38 = vcombine.high %v396_v32, %v404_v33  ;;  %v412_v40 = vld [vmem:[%s2627_s16 + $0x680] sm:$0xff]  ;;  %v421_v43 = vld [vmem:[%s2627_s16 + $0x6c8] sm:$0xff]  ;;  %v2438_v44 = vcombine.low %v396_v32, %v404_v33  ;;  %v2299_v32 = vcombine.high %v254_v26, %v262_v27  ;;  %v278_v35 = vld [vmem:[%s2627_s16 + $0x250] sm:$0xff] }
  0x2d   : > { %v420_v41 = vld [vmem:[%s2627_s16 + $0x6c0] sm:$0xff]  ;;  %v2457_v47 = vcombine.high %v413_v42, %v421_v43  ;;  %v429_v50 = vld [vmem:[%s2627_s16 + $0x708] sm:$0xff]  ;;  %v2456_v54 = vcombine.low %v413_v42, %v421_v43  ;;  %v286_v42 = vld [vmem:[%s2627_s16 + $0x290] sm:$0xff] }
  0x2e   : > { %1764 = vmatpush1.bf16.msra.mxu0 %v2342_v60  ;;  %1805 = vmatpush1.bf16.msra.mxu1 %v2344_v61  ;;  %v2455_v46 = vcombine.high %v412_v40, %v420_v41  ;;  %v428_v48 = vld [vmem:[%s2627_s16 + $0x700] sm:$0xff]  ;;  %v437_v51 = vld [vmem:[%s2627_s16 + $0x748] sm:$0xff]  ;;  %v2454_v52 = vcombine.low %v412_v40, %v420_v41  ;;  %v2315_v40 = vcombine.high %v270_v34, %v278_v35  ;;  %v294_v43 = vld [vmem:[%s2627_s16 + $0x2d0] sm:$0xff] }
  0x2f   : > { %1765 = vmatprep.subr.bf16.mxu0 %v2359_v62  ;;  %1806 = vmatprep.subr.bf16.mxu1 %v2361_v63  ;;  %v436_v49 = vld [vmem:[%s2627_s16 + $0x740] sm:$0xff]  ;;  %v2473_v56 = vcombine.high %v429_v50, %v437_v51  ;;  %v445_v60 = vld [vmem:[%s2627_s16 + $0x788] sm:$0xff]  ;;  %v2472_v63 = vcombine.low %v429_v50, %v437_v51  ;;  %v302_v50 = vld [vmem:[%s2627_s16 + $0x310] sm:$0xff] }
  0x30   : > { %v2471_v55 = vcombine.high %v428_v48, %v436_v49  ;;  %v444_v58 = vld [vmem:[%s2627_s16 + $0x780] sm:$0xff]  ;;  %v453_v61 = vld [vmem:[%s2627_s16 + $0x7c8] sm:$0xff]  ;;  %v2470_v62 = vcombine.low %v428_v48, %v436_v49  ;;  %v2331_v48 = vcombine.high %v286_v42, %v294_v43  ;;  %v310_v51 = vld [vmem:[%s2627_s16 + $0x350] sm:$0xff] }
  0x31   : > { %v452_v59 = vld [vmem:[%s2627_s16 + $0x7c0] sm:$0xff]  ;;  %v2489_v1 = vcombine.high %v445_v60, %v453_v61 }
  0x32   : > { %1766 = vmatpush1.bf16.msra.mxu0 %v2358_v4  ;;  %1807 = vmatpush1.bf16.msra.mxu1 %v2360_v5  ;;  %v2487_v0 = vcombine.high %v444_v58, %v452_v59  ;;  %v207_v4 = vld [vmem:[%s2627_s16 + $0x18] sm:$0xff] }
  0x33   : > { %1767 = vmatprep.subr.bf16.mxu0 %v2375_v6  ;;  %1808 = vmatprep.subr.bf16.mxu1 %v2377_v7  ;;  %v215_v5 = vld [vmem:[%s2627_s16 + $0x58] sm:$0xff]  ;;  %v2486_v6 = vcombine.low %v444_v58, %v452_v59  ;;  %v2488_v7 = vcombine.low %v445_v60, %v453_v61  ;;  %v2347_v58 = vcombine.high %v302_v50, %v310_v51  ;;  %v318_v60 = vld [vmem:[%s2627_s16 + $0x390] sm:$0xff] }
  0x34   : > { %v2253_v9 = vcombine.high %v207_v4, %v215_v5  ;;  %v326_v61 = vld [vmem:[%s2627_s16 + $0x3d0] sm:$0xff] }
  0x36   : > { %1768 = vmatpush1.bf16.msra.mxu0 %v2374_v12  ;;  %1809 = vmatpush1.bf16.msra.mxu1 %v2376_v13  ;;  %v223_v12 = vld [vmem:[%s2627_s16 + $0x98] sm:$0xff] }
  0x37   : > { %1769 = vmatprep.subr.bf16.mxu0 %v2391_v14  ;;  %1810 = vmatprep.subr.bf16.mxu1 %v2393_v15  ;;  %v231_v13 = vld [vmem:[%s2627_s16 + $0xd8] sm:$0xff]  ;;  %v2250_v14 = vcombine.low %v206_v2, %v214_v3  ;;  %v2252_v15 = vcombine.low %v207_v4, %v215_v5  ;;  %v2363_v2 = vcombine.high %v318_v60, %v326_v61  ;;  %v334_v4 = vld [vmem:[%s2627_s16 + $0x410] sm:$0xff] }
  0x38   : > { %v2269_v17 = vcombine.high %v223_v12, %v231_v13  ;;  %v342_v5 = vld [vmem:[%s2627_s16 + $0x450] sm:$0xff] }
  0x3a   : > { %1770 = vmatpush1.bf16.msra.mxu0 %v2390_v20  ;;  %1811 = vmatpush1.bf16.msra.mxu1 %v2392_v21  ;;  %v239_v20 = vld [vmem:[%s2627_s16 + $0x118] sm:$0xff] }
  0x3b   : > { %1771 = vmatprep.subr.bf16.mxu0 %v2407_v22  ;;  %1812 = vmatprep.subr.bf16.mxu1 %v2409_v23  ;;  %v247_v21 = vld [vmem:[%s2627_s16 + $0x158] sm:$0xff]  ;;  %v2266_v22 = vcombine.low %v222_v10, %v230_v11  ;;  %v2268_v23 = vcombine.low %v223_v12, %v231_v13  ;;  %v2379_v10 = vcombine.high %v334_v4, %v342_v5  ;;  %v350_v12 = vld [vmem:[%s2627_s16 + $0x490] sm:$0xff] }
  0x3c   : > { %v2285_v25 = vcombine.high %v239_v20, %v247_v21  ;;  %v358_v13 = vld [vmem:[%s2627_s16 + $0x4d0] sm:$0xff] }
  0x3e   : > { %1772 = vmatpush1.bf16.msra.mxu0 %v2406_v28  ;;  %1813 = vmatpush1.bf16.msra.mxu1 %v2408_v29  ;;  %v255_v28 = vld [vmem:[%s2627_s16 + $0x198] sm:$0xff] }
  0x3f   : > { %1773 = vmatprep.subr.bf16.mxu0 %v2423_v30  ;;  %1814 = vmatprep.subr.bf16.mxu1 %v2425_v31  ;;  %v263_v29 = vld [vmem:[%s2627_s16 + $0x1d8] sm:$0xff]  ;;  %v2282_v30 = vcombine.low %v238_v18, %v246_v19  ;;  %v2284_v31 = vcombine.low %v239_v20, %v247_v21  ;;  %v2395_v18 = vcombine.high %v350_v12, %v358_v13  ;;  %v366_v20 = vld [vmem:[%s2627_s16 + $0x510] sm:$0xff] }
  0x40   : > { %v2301_v33 = vcombine.high %v255_v28, %v263_v29  ;;  %v374_v21 = vld [vmem:[%s2627_s16 + $0x550] sm:$0xff] }
  0x42   : > { %1774 = vmatpush1.bf16.msra.mxu0 %v2422_v36  ;;  %1815 = vmatpush1.bf16.msra.mxu1 %v2424_v37  ;;  %v271_v36 = vld [vmem:[%s2627_s16 + $0x218] sm:$0xff] }
  0x43   : > { %1775 = vmatprep.subr.bf16.mxu0 %v2439_v38  ;;  %1816 = vmatprep.subr.bf16.mxu1 %v2441_v39  ;;  %v279_v37 = vld [vmem:[%s2627_s16 + $0x258] sm:$0xff]  ;;  %v2298_v38 = vcombine.low %v254_v26, %v262_v27  ;;  %v2300_v39 = vcombine.low %v255_v28, %v263_v29  ;;  %v2411_v26 = vcombine.high %v366_v20, %v374_v21  ;;  %v382_v28 = vld [vmem:[%s2627_s16 + $0x590] sm:$0xff] }
  0x44   : > { %v2317_v41 = vcombine.high %v271_v36, %v279_v37  ;;  %v390_v29 = vld [vmem:[%s2627_s16 + $0x5d0] sm:$0xff] }
  0x46   : > { %1776 = vmatpush1.bf16.msra.mxu0 %v2438_v44  ;;  %1817 = vmatpush1.bf16.msra.mxu1 %v2440_v45  ;;  %v287_v44 = vld [vmem:[%s2627_s16 + $0x298] sm:$0xff] }
  0x47   : > { %1777 = vmatprep.subr.bf16.mxu0 %v2455_v46  ;;  %1818 = vmatprep.subr.bf16.mxu1 %v2457_v47  ;;  %v295_v45 = vld [vmem:[%s2627_s16 + $0x2d8] sm:$0xff]  ;;  %v2314_v46 = vcombine.low %v270_v34, %v278_v35  ;;  %v2316_v47 = vcombine.low %v271_v36, %v279_v37  ;;  %v2427_v34 = vcombine.high %v382_v28, %v390_v29  ;;  %v398_v36 = vld [vmem:[%s2627_s16 + $0x610] sm:$0xff] }
  0x48   : > { %v2333_v49 = vcombine.high %v287_v44, %v295_v45  ;;  %v406_v37 = vld [vmem:[%s2627_s16 + $0x650] sm:$0xff] }
  0x4a   : > { %1778 = vmatpush1.bf16.msra.mxu0 %v2454_v52  ;;  %1819 = vmatpush1.bf16.msra.mxu1 %v2456_v54  ;;  %v303_v52 = vld [vmem:[%s2627_s16 + $0x318] sm:$0xff] }
  0x4b   : > { %1779 = vmatprep.subr.bf16.mxu0 %v2471_v55  ;;  %1820 = vmatprep.subr.bf16.mxu1 %v2473_v56  ;;  %v311_v54 = vld [vmem:[%s2627_s16 + $0x358] sm:$0xff]  ;;  %v2330_v55 = vcombine.low %v286_v42, %v294_v43  ;;  %v2332_v56 = vcombine.low %v287_v44, %v295_v45  ;;  %v2443_v42 = vcombine.high %v398_v36, %v406_v37  ;;  %v414_v44 = vld [vmem:[%s2627_s16 + $0x690] sm:$0xff] }
  0x4c   : > { %v2349_v59 = vcombine.high %v303_v52, %v311_v54  ;;  %v422_v45 = vld [vmem:[%s2627_s16 + $0x6d0] sm:$0xff] }
  0x4e   : > { %1780 = vmatpush1.bf16.msra.mxu0 %v2470_v62  ;;  %1821 = vmatpush1.bf16.msra.mxu1 %v2472_v63  ;;  %v319_v62 = vld [vmem:[%s2627_s16 + $0x398] sm:$0xff] }
  0x4f   : > { %1781 = vmatprep.subr.bf16.mxu0 %v2487_v0  ;;  %1822 = vmatprep.subr.bf16.mxu1 %v2489_v1  ;;  %v327_v63 = vld [vmem:[%s2627_s16 + $0x3d8] sm:$0xff]  ;;  %v2346_v0 = vcombine.low %v302_v50, %v310_v51  ;;  %v2348_v1 = vcombine.low %v303_v52, %v311_v54  ;;  %v2459_v50 = vcombine.high %v414_v44, %v422_v45  ;;  %v430_v52 = vld [vmem:[%s2627_s16 + $0x710] sm:$0xff] }
  0x50   : > { %v2365_v3 = vcombine.high %v319_v62, %v327_v63  ;;  %v438_v54 = vld [vmem:[%s2627_s16 + $0x750] sm:$0xff] }
  0x52   : > { %1782 = vmatpush1.bf16.msra.mxu0 %v2486_v6  ;;  %1823 = vmatpush1.bf16.msra.mxu1 %v2488_v7  ;;  %v335_v6 = vld [vmem:[%s2627_s16 + $0x418] sm:$0xff] }
  0x53   : > { %1833 = vmatprep.subr.bf16.mxu0 %v2251_v8  ;;  %1874 = vmatprep.subr.bf16.mxu1 %v2253_v9  ;;  %v343_v7 = vld [vmem:[%s2627_s16 + $0x458] sm:$0xff]  ;;  %v2362_v8 = vcombine.low %v318_v60, %v326_v61  ;;  %v2364_v9 = vcombine.low %v319_v62, %v327_v63  ;;  %v2475_v60 = vcombine.high %v430_v52, %v438_v54  ;;  %v446_v62 = vld [vmem:[%s2627_s16 + $0x790] sm:$0xff] }
  0x54   : > { %v2381_v11 = vcombine.high %v335_v6, %v343_v7  ;;  %v454_v63 = vld [vmem:[%s2627_s16 + $0x7d0] sm:$0xff] }
  0x55   : > { %1784 = vmatmul.mubr.bf16.vlgmr.msra.gmra.mrb[0].mxu0 %v2664_v53  ;;  %1825 = vmatmul.mubr.bf16.vlgmr.msra.gmra.mrb[0].mxu1 %v2664_v53 }
  0x56   : > { %1834 = vmatpush1.bf16.msra.mxu0 %v2250_v14  ;;  %1875 = vmatpush1.bf16.msra.mxu1 %v2252_v15  ;;  %v351_v14 = vld [vmem:[%s2627_s16 + $0x498] sm:$0xff] }
  0x57   : > { %1835 = vmatprep.subr.bf16.mxu0 %v2267_v16  ;;  %1876 = vmatprep.subr.bf16.mxu1 %v2269_v17  ;;  %v359_v15 = vld [vmem:[%s2627_s16 + $0x4d8] sm:$0xff]  ;;  %v2378_v16 = vcombine.low %v334_v4, %v342_v5  ;;  %v2380_v17 = vcombine.low %v335_v6, %v343_v7  ;;  %v2491_v4 = vcombine.high %v446_v62, %v454_v63  ;;  %v208_v6 = vld [vmem:[%s2627_s16 + $0x20] sm:$0xff] }
  0x58   : > { %1865 = vmatprep.mubr.bf16.mxu0 %v2670_v57  ;;  %1906 = vmatprep.mubr.bf16.mxu1 %v2670_v57  ;;  %v2397_v19 = vcombine.high %v351_v14, %v359_v15  ;;  %v216_v7 = vld [vmem:[%s2627_s16 + $0x60] sm:$0xff] }
  0x5a   : > { %1836 = vmatpush1.bf16.msra.mxu0 %v2266_v22  ;;  %1877 = vmatpush1.bf16.msra.mxu1 %v2268_v23  ;;  %v367_v22 = vld [vmem:[%s2627_s16 + $0x518] sm:$0xff] }
  0x5b   : > { %1837 = vmatprep.subr.bf16.mxu0 %v2283_v24  ;;  %1878 = vmatprep.subr.bf16.mxu1 %v2285_v25  ;;  %v375_v23 = vld [vmem:[%s2627_s16 + $0x558] sm:$0xff]  ;;  %v2394_v24 = vcombine.low %v350_v12, %v358_v13  ;;  %v2396_v25 = vcombine.low %v351_v14, %v359_v15  ;;  %v2255_v12 = vcombine.high %v208_v6, %v216_v7  ;;  %v224_v14 = vld [vmem:[%s2627_s16 + $0xa0] sm:$0xff] }
  0x5c   : > { %v2413_v27 = vcombine.high %v367_v22, %v375_v23  ;;  %v232_v15 = vld [vmem:[%s2627_s16 + $0xe0] sm:$0xff] }
  0x5e   : > { %1838 = vmatpush1.bf16.msra.mxu0 %v2282_v30  ;;  %1879 = vmatpush1.bf16.msra.mxu1 %v2284_v31  ;;  %v383_v30 = vld [vmem:[%s2627_s16 + $0x598] sm:$0xff] }
  0x5f   : > { %1839 = vmatprep.subr.bf16.mxu0 %v2299_v32  ;;  %1880 = vmatprep.subr.bf16.mxu1 %v2301_v33  ;;  %v391_v31 = vld [vmem:[%s2627_s16 + $0x5d8] sm:$0xff]  ;;  %v2410_v32 = vcombine.low %v366_v20, %v374_v21  ;;  %v2412_v33 = vcombine.low %v367_v22, %v375_v23  ;;  %v2271_v20 = vcombine.high %v224_v14, %v232_v15  ;;  %v240_v22 = vld [vmem:[%s2627_s16 + $0x120] sm:$0xff] }
  0x60   : > { %v2429_v35 = vcombine.high %v383_v30, %v391_v31  ;;  %v248_v23 = vld [vmem:[%s2627_s16 + $0x160] sm:$0xff] }
  0x62   : > { %1840 = vmatpush1.bf16.msra.mxu0 %v2298_v38  ;;  %1881 = vmatpush1.bf16.msra.mxu1 %v2300_v39  ;;  %v399_v38 = vld [vmem:[%s2627_s16 + $0x618] sm:$0xff] }
  0x63   : > { %1841 = vmatprep.subr.bf16.mxu0 %v2315_v40  ;;  %1882 = vmatprep.subr.bf16.mxu1 %v2317_v41  ;;  %v407_v39 = vld [vmem:[%s2627_s16 + $0x658] sm:$0xff]  ;;  %v2426_v40 = vcombine.low %v382_v28, %v390_v29  ;;  %v2428_v41 = vcombine.low %v383_v30, %v391_v31  ;;  %v2287_v28 = vcombine.high %v240_v22, %v248_v23  ;;  %v256_v30 = vld [vmem:[%s2627_s16 + $0x1a0] sm:$0xff] }
  0x64   : > { %v2445_v43 = vcombine.high %v399_v38, %v407_v39  ;;  %v264_v31 = vld [vmem:[%s2627_s16 + $0x1e0] sm:$0xff] }
  0x66   : > { %1842 = vmatpush1.bf16.msra.mxu0 %v2314_v46  ;;  %1883 = vmatpush1.bf16.msra.mxu1 %v2316_v47  ;;  %v415_v46 = vld [vmem:[%s2627_s16 + $0x698] sm:$0xff] }
  0x67   : > { %1843 = vmatprep.subr.bf16.mxu0 %v2331_v48  ;;  %1884 = vmatprep.subr.bf16.mxu1 %v2333_v49  ;;  %v423_v47 = vld [vmem:[%s2627_s16 + $0x6d8] sm:$0xff]  ;;  %v2442_v48 = vcombine.low %v398_v36, %v406_v37  ;;  %v2444_v49 = vcombine.low %v399_v38, %v407_v39  ;;  %v272_v37 = vld [vmem:[%s2627_s16 + $0x220] sm:$0xff]  ;;  %v273_v39 = vld [vmem:[%s2627_s16 + $0x228] sm:$0xff] }
  0x68   : > { %v2461_v51 = vcombine.high %v415_v46, %v423_v47  ;;  %v280_v38 = vld [vmem:[%s2627_s16 + $0x260] sm:$0xff] }
  0x6a   : > { %1844 = vmatpush1.bf16.msra.mxu0 %v2330_v55  ;;  %1885 = vmatpush1.bf16.msra.mxu1 %v2332_v56  ;;  %v431_v55 = vld [vmem:[%s2627_s16 + $0x718] sm:$0xff] }
  0x6b   : > { %1845 = vmatprep.subr.bf16.mxu0 %v2347_v58  ;;  %1886 = vmatprep.subr.bf16.mxu1 %v2349_v59  ;;  %v439_v56 = vld [vmem:[%s2627_s16 + $0x758] sm:$0xff]  ;;  %v2458_v58 = vcombine.low %v414_v44, %v422_v45  ;;  %v2460_v59 = vcombine.low %v415_v46, %v423_v47  ;;  %v288_v45 = vld [vmem:[%s2627_s16 + $0x2a0] sm:$0xff]  ;;  %v289_v47 = vld [vmem:[%s2627_s16 + $0x2a8] sm:$0xff] }
  0x6c   : > { %v2477_v61 = vcombine.high %v431_v55, %v439_v56  ;;  %v296_v46 = vld [vmem:[%s2627_s16 + $0x2e0] sm:$0xff] }
  0x6e   : > { %1846 = vmatpush1.bf16.msra.mxu0 %v2346_v0  ;;  %1887 = vmatpush1.bf16.msra.mxu1 %v2348_v1  ;;  %v447_v0 = vld [vmem:[%s2627_s16 + $0x798] sm:$0xff] }
  0x6f   : > { %1847 = vmatprep.subr.bf16.mxu0 %v2363_v2  ;;  %1888 = vmatprep.subr.bf16.mxu1 %v2365_v3  ;;  %v455_v1 = vld [vmem:[%s2627_s16 + $0x7d8] sm:$0xff]  ;;  %v2474_v2 = vcombine.low %v430_v52, %v438_v54  ;;  %v2476_v3 = vcombine.low %v431_v55, %v439_v56  ;;  %v304_v54 = vld [vmem:[%s2627_s16 + $0x320] sm:$0xff]  ;;  %v305_v56 = vld [vmem:[%s2627_s16 + $0x328] sm:$0xff] }
  0x70   : > { %v2493_v5 = vcombine.high %v447_v0, %v455_v1  ;;  %v312_v55 = vld [vmem:[%s2627_s16 + $0x360] sm:$0xff] }
  0x72   : > { %1848 = vmatpush1.bf16.msra.mxu0 %v2362_v8  ;;  %1889 = vmatpush1.bf16.msra.mxu1 %v2364_v9  ;;  %v209_v8 = vld [vmem:[%s2627_s16 + $0x28] sm:$0xff] }
  0x73   : > { %1849 = vmatprep.subr.bf16.mxu0 %v2379_v10  ;;  %1890 = vmatprep.subr.bf16.mxu1 %v2381_v11  ;;  %v217_v9 = vld [vmem:[%s2627_s16 + $0x68] sm:$0xff]  ;;  %v2490_v10 = vcombine.low %v446_v62, %v454_v63  ;;  %v2492_v11 = vcombine.low %v447_v0, %v455_v1  ;;  %v320_v63 = vld [vmem:[%s2627_s16 + $0x3a0] sm:$0xff] }
  0x74   : > { %v2257_v13 = vcombine.high %v209_v8, %v217_v9  ;;  %v328_v0 = vld [vmem:[%s2627_s16 + $0x3e0] sm:$0xff]  ;;  %v321_v1 = vld [vmem:[%s2627_s16 + $0x3a8] sm:$0xff] }
  0x76   : > { %1850 = vmatpush1.bf16.msra.mxu0 %v2378_v16  ;;  %1891 = vmatpush1.bf16.msra.mxu1 %v2380_v17  ;;  %v225_v16 = vld [vmem:[%s2627_s16 + $0xa8] sm:$0xff] }
  0x77   : > { %1851 = vmatprep.subr.bf16.mxu0 %v2395_v18  ;;  %1892 = vmatprep.subr.bf16.mxu1 %v2397_v19  ;;  %v233_v17 = vld [vmem:[%s2627_s16 + $0xe8] sm:$0xff]  ;;  %v2254_v18 = vcombine.low %v208_v6, %v216_v7  ;;  %v2256_v19 = vcombine.low %v209_v8, %v217_v9  ;;  %v336_v7 = vld [vmem:[%s2627_s16 + $0x420] sm:$0xff] }
  0x78   : > { %v2273_v21 = vcombine.high %v225_v16, %v233_v17  ;;  %v344_v8 = vld [vmem:[%s2627_s16 + $0x460] sm:$0xff]  ;;  %v337_v9 = vld [vmem:[%s2627_s16 + $0x428] sm:$0xff] }
  0x7a   : > { %1852 = vmatpush1.bf16.msra.mxu0 %v2394_v24  ;;  %1893 = vmatpush1.bf16.msra.mxu1 %v2396_v25  ;;  %v241_v24 = vld [vmem:[%s2627_s16 + $0x128] sm:$0xff] }
  0x7b   : > { %1853 = vmatprep.subr.bf16.mxu0 %v2411_v26  ;;  %1894 = vmatprep.subr.bf16.mxu1 %v2413_v27  ;;  %v249_v25 = vld [vmem:[%s2627_s16 + $0x168] sm:$0xff]  ;;  %v2270_v26 = vcombine.low %v224_v14, %v232_v15  ;;  %v2272_v27 = vcombine.low %v225_v16, %v233_v17  ;;  %v352_v15 = vld [vmem:[%s2627_s16 + $0x4a0] sm:$0xff] }
  0x7c   : > { %v2289_v29 = vcombine.high %v241_v24, %v249_v25  ;;  %v360_v16 = vld [vmem:[%s2627_s16 + $0x4e0] sm:$0xff]  ;;  %v353_v17 = vld [vmem:[%s2627_s16 + $0x4a8] sm:$0xff] }
  0x7e   : > { %1854 = vmatpush1.bf16.msra.mxu0 %v2410_v32  ;;  %1895 = vmatpush1.bf16.msra.mxu1 %v2412_v33  ;;  %v257_v32 = vld [vmem:[%s2627_s16 + $0x1a8] sm:$0xff] }
  0x7f   : > { %1855 = vmatprep.subr.bf16.mxu0 %v2427_v34  ;;  %1896 = vmatprep.subr.bf16.mxu1 %v2429_v35  ;;  %v265_v33 = vld [vmem:[%s2627_s16 + $0x1e8] sm:$0xff]  ;;  %v2288_v34 = vcombine.low %v241_v24, %v249_v25  ;;  %v2303_v35 = vcombine.high %v256_v30, %v264_v31  ;;  %v376_v24 = vld [vmem:[%s2627_s16 + $0x560] sm:$0xff] }
  0x80   : > { %v2305_v36 = vcombine.high %v257_v32, %v265_v33  ;;  %v369_v25 = vld [vmem:[%s2627_s16 + $0x528] sm:$0xff] }
  0x82   : > { %1856 = vmatpush1.bf16.msra.mxu0 %v2426_v40  ;;  %1897 = vmatpush1.bf16.msra.mxu1 %v2428_v41  ;;  %v281_v40 = vld [vmem:[%s2627_s16 + $0x268] sm:$0xff]  ;;  %v2302_v41 = vcombine.low %v256_v30, %v264_v31  ;;  %v384_v31 = vld [vmem:[%s2627_s16 + $0x5a0] sm:$0xff] }
  0x83   : > { %1857 = vmatprep.subr.bf16.mxu0 %v2443_v42  ;;  %1898 = vmatprep.subr.bf16.mxu1 %v2445_v43  ;;  %v2304_v42 = vcombine.low %v257_v32, %v265_v33  ;;  %v2319_v43 = vcombine.high %v272_v37, %v280_v38  ;;  %v2321_v44 = vcombine.high %v273_v39, %v281_v40  ;;  %v392_v32 = vld [vmem:[%s2627_s16 + $0x5e0] sm:$0xff]  ;;  %v385_v33 = vld [vmem:[%s2627_s16 + $0x5a8] sm:$0xff] }
  0x86   : > { %1858 = vmatpush1.bf16.msra.mxu0 %v2442_v48  ;;  %1899 = vmatpush1.bf16.msra.mxu1 %v2444_v49  ;;  %v297_v48 = vld [vmem:[%s2627_s16 + $0x2e8] sm:$0xff]  ;;  %v2318_v49 = vcombine.low %v272_v37, %v280_v38  ;;  %v400_v38 = vld [vmem:[%s2627_s16 + $0x620] sm:$0xff] }
  0x87   : > { %1859 = vmatprep.subr.bf16.mxu0 %v2459_v50  ;;  %1900 = vmatprep.subr.bf16.mxu1 %v2461_v51  ;;  %v2320_v50 = vcombine.low %v273_v39, %v281_v40  ;;  %v2335_v51 = vcombine.high %v288_v45, %v296_v46  ;;  %v2337_v52 = vcombine.high %v289_v47, %v297_v48  ;;  %v408_v39 = vld [vmem:[%s2627_s16 + $0x660] sm:$0xff]  ;;  %v401_v40 = vld [vmem:[%s2627_s16 + $0x628] sm:$0xff] }
  0x8a   : > { %1860 = vmatpush1.bf16.msra.mxu0 %v2458_v58  ;;  %1901 = vmatpush1.bf16.msra.mxu1 %v2460_v59  ;;  %v313_v58 = vld [vmem:[%s2627_s16 + $0x368] sm:$0xff]  ;;  %v2334_v59 = vcombine.low %v288_v45, %v296_v46  ;;  %v416_v46 = vld [vmem:[%s2627_s16 + $0x6a0] sm:$0xff] }
  0x8b   : > { %1861 = vmatprep.subr.bf16.mxu0 %v2475_v60  ;;  %1902 = vmatprep.subr.bf16.mxu1 %v2477_v61  ;;  %v2336_v60 = vcombine.low %v289_v47, %v297_v48  ;;  %v2351_v61 = vcombine.high %v304_v54, %v312_v55  ;;  %v2353_v62 = vcombine.high %v305_v56, %v313_v58  ;;  %v424_v47 = vld [vmem:[%s2627_s16 + $0x6e0] sm:$0xff]  ;;  %v417_v48 = vld [vmem:[%s2627_s16 + $0x6a8] sm:$0xff] }
  0x8e   : > { %1862 = vmatpush1.bf16.msra.mxu0 %v2474_v2  ;;  %1903 = vmatpush1.bf16.msra.mxu1 %v2476_v3  ;;  %v329_v2 = vld [vmem:[%s2627_s16 + $0x3e8] sm:$0xff]  ;;  %v2350_v3 = vcombine.low %v304_v54, %v312_v55  ;;  %v432_v55 = vld [vmem:[%s2627_s16 + $0x720] sm:$0xff] }
  0x8f   : > { %1863 = vmatprep.subr.bf16.mxu0 %v2491_v4  ;;  %1904 = vmatprep.subr.bf16.mxu1 %v2493_v5  ;;  %v2352_v4 = vcombine.low %v305_v56, %v313_v58  ;;  %v2367_v5 = vcombine.high %v320_v63, %v328_v0  ;;  %v2369_v6 = vcombine.high %v321_v1, %v329_v2  ;;  %v440_v56 = vld [vmem:[%s2627_s16 + $0x760] sm:$0xff]  ;;  %v433_v58 = vld [vmem:[%s2627_s16 + $0x728] sm:$0xff] }
  0x92   : > { %1864 = vmatpush1.bf16.msra.mxu0 %v2490_v10  ;;  %1905 = vmatpush1.bf16.msra.mxu1 %v2492_v11  ;;  %v345_v10 = vld [vmem:[%s2627_s16 + $0x468] sm:$0xff]  ;;  %v2366_v11 = vcombine.low %v320_v63, %v328_v0  ;;  %v448_v0 = vld [vmem:[%s2627_s16 + $0x7a0] sm:$0xff] }
  0x93   : > { %1915 = vmatprep.subr.bf16.mxu0 %v2255_v12  ;;  %1956 = vmatprep.subr.bf16.mxu1 %v2257_v13  ;;  %v2368_v12 = vcombine.low %v321_v1, %v329_v2  ;;  %v2383_v13 = vcombine.high %v336_v7, %v344_v8  ;;  %v2385_v14 = vcombine.high %v337_v9, %v345_v10  ;;  %v456_v1 = vld [vmem:[%s2627_s16 + $0x7e0] sm:$0xff]  ;;  %v449_v2 = vld [vmem:[%s2627_s16 + $0x7a8] sm:$0xff] }
  0x95   : > { %1866 = vmatmul.mubr.bf16.vlgmr.msra.gmra.mrb[4].mxu0 %v2664_v53  ;;  %1907 = vmatmul.mubr.bf16.vlgmr.msra.gmra.mrb[4].mxu1 %v2664_v53  ;;  %v2286_v53 = vcombine.low %v240_v22, %v248_v23  ;;  %v368_v23 = vld [vmem:[%s2627_s16 + $0x520] sm:$0xff] }
  0x96   : > { %1916 = vmatpush1.bf16.msra.mxu0 %v2254_v18  ;;  %1957 = vmatpush1.bf16.msra.mxu1 %v2256_v19  ;;  %v361_v18 = vld [vmem:[%s2627_s16 + $0x4e8] sm:$0xff]  ;;  %v2382_v19 = vcombine.low %v336_v7, %v344_v8  ;;  %v210_v8 = vld [vmem:[%s2627_s16 + $0x30] sm:$0xff] }
  0x97   : > { %1917 = vmatprep.subr.bf16.mxu0 %v2271_v20  ;;  %1958 = vmatprep.subr.bf16.mxu1 %v2273_v21  ;;  %v2384_v20 = vcombine.low %v337_v9, %v345_v10  ;;  %v2399_v21 = vcombine.high %v352_v15, %v360_v16  ;;  %v2401_v22 = vcombine.high %v353_v17, %v361_v18  ;;  %v218_v9 = vld [vmem:[%s2627_s16 + $0x70] sm:$0xff]  ;;  %v211_v10 = vld [vmem:[%s2627_s16 + $0x38] sm:$0xff] }
  0x98   : > { %1947 = vmatprep.mubr.bf16.mxu0 %v2670_v57  ;;  %1988 = vmatprep.mubr.bf16.mxu1 %v2670_v57 }
  0x9a   : > { %1918 = vmatpush1.bf16.msra.mxu0 %v2270_v26  ;;  %1959 = vmatpush1.bf16.msra.mxu1 %v2272_v27  ;;  %v377_v26 = vld [vmem:[%s2627_s16 + $0x568] sm:$0xff]  ;;  %v2398_v27 = vcombine.low %v352_v15, %v360_v16  ;;  %v226_v16 = vld [vmem:[%s2627_s16 + $0xb0] sm:$0xff] }
  0x9b   : > { %1919 = vmatprep.subr.bf16.mxu0 %v2287_v28  ;;  %1960 = vmatprep.subr.bf16.mxu1 %v2289_v29  ;;  %v2400_v28 = vcombine.low %v353_v17, %v361_v18  ;;  %v2415_v29 = vcombine.high %v368_v23, %v376_v24  ;;  %v2417_v30 = vcombine.high %v369_v25, %v377_v26  ;;  %v234_v17 = vld [vmem:[%s2627_s16 + $0xf0] sm:$0xff]  ;;  %v227_v18 = vld [vmem:[%s2627_s16 + $0xb8] sm:$0xff] }
  0x9e   : > { %1920 = vmatpush1.bf16.msra.mxu0 %v2286_v53  ;;  %1961 = vmatpush1.bf16.msra.mxu1 %v2288_v34  ;;  %v393_v53 = vld [vmem:[%s2627_s16 + $0x5e8] sm:$0xff]  ;;  %v2414_v34 = vcombine.low %v368_v23, %v376_v24  ;;  %v242_v24 = vld [vmem:[%s2627_s16 + $0x130] sm:$0xff] }
  0x9f   : > { %1921 = vmatprep.subr.bf16.mxu0 %v2303_v35  ;;  %1962 = vmatprep.subr.bf16.mxu1 %v2305_v36  ;;  %v2416_v35 = vcombine.low %v369_v25, %v377_v26  ;;  %v2431_v36 = vcombine.high %v384_v31, %v392_v32  ;;  %v2433_v37 = vcombine.high %v385_v33, %v393_v53  ;;  %v250_v25 = vld [vmem:[%s2627_s16 + $0x170] sm:$0xff]  ;;  %v2855_v26 = vld.sshfl [vmem:[%s2659_s20] sm:$0x33 pattern:$0x76325410] }
  0xa2   : > { %1922 = vmatpush1.bf16.msra.mxu0 %v2302_v41  ;;  %1963 = vmatpush1.bf16.msra.mxu1 %v2304_v42  ;;  %v409_v41 = vld [vmem:[%s2627_s16 + $0x668] sm:$0xff]  ;;  %v2430_v42 = vcombine.low %v384_v31, %v392_v32  ;;  %v2291_v31 = vcombine.high %v242_v24, %v250_v25 }
  0xa3   : > { %1923 = vmatprep.subr.bf16.mxu0 %v2319_v43  ;;  %1964 = vmatprep.subr.bf16.mxu1 %v2321_v44  ;;  %v2432_v43 = vcombine.low %v385_v33, %v393_v53  ;;  %v2447_v44 = vcombine.high %v400_v38, %v408_v39  ;;  %v2449_v45 = vcombine.high %v401_v40, %v409_v41  ;;  %v258_v33 = vld [vmem:[%s2627_s16 + $0x1b0] sm:$0xff] }
  0xa4   : > { %v266_v53 = vld [vmem:[%s2627_s16 + $0x1f0] sm:$0xff] }
  0xa6   : > { %1924 = vmatpush1.bf16.msra.mxu0 %v2318_v49  ;;  %1965 = vmatpush1.bf16.msra.mxu1 %v2320_v50  ;;  %v425_v49 = vld [vmem:[%s2627_s16 + $0x6e8] sm:$0xff]  ;;  %v2446_v50 = vcombine.low %v400_v38, %v408_v39  ;;  %v2307_v38 = vcombine.high %v258_v33, %v266_v53 }
  0xa7   : > { %1925 = vmatprep.subr.bf16.mxu0 %v2335_v51  ;;  %1966 = vmatprep.subr.bf16.mxu1 %v2337_v52  ;;  %v2448_v51 = vcombine.low %v401_v40, %v409_v41  ;;  %v2463_v52 = vcombine.high %v416_v46, %v424_v47  ;;  %v2465_v54 = vcombine.high %v417_v48, %v425_v49  ;;  %v274_v40 = vld [vmem:[%s2627_s16 + $0x230] sm:$0xff] }
  0xa8   : > { %v282_v41 = vld [vmem:[%s2627_s16 + $0x270] sm:$0xff] }
  0xaa   : > { %1926 = vmatpush1.bf16.msra.mxu0 %v2334_v59  ;;  %1967 = vmatpush1.bf16.msra.mxu1 %v2336_v60  ;;  %v441_v59 = vld [vmem:[%s2627_s16 + $0x768] sm:$0xff]  ;;  %v2462_v60 = vcombine.low %v416_v46, %v424_v47  ;;  %v290_v47 = vld [vmem:[%s2627_s16 + $0x2b0] sm:$0xff] }
  0xab   : > { %1927 = vmatprep.subr.bf16.mxu0 %v2351_v61  ;;  %1968 = vmatprep.subr.bf16.mxu1 %v2353_v62  ;;  %v2464_v61 = vcombine.low %v417_v48, %v425_v49  ;;  %v2479_v62 = vcombine.high %v432_v55, %v440_v56  ;;  %v2481_v63 = vcombine.high %v433_v58, %v441_v59  ;;  %v298_v48 = vld [vmem:[%s2627_s16 + $0x2f0] sm:$0xff]  ;;  %v291_v49 = vld [vmem:[%s2627_s16 + $0x2b8] sm:$0xff] }
  0xae   : > { %1928 = vmatpush1.bf16.msra.mxu0 %v2350_v3  ;;  %1969 = vmatpush1.bf16.msra.mxu1 %v2352_v4  ;;  %v457_v3 = vld [vmem:[%s2627_s16 + $0x7e8] sm:$0xff]  ;;  %v2478_v4 = vcombine.low %v432_v55, %v440_v56  ;;  %v306_v56 = vld [vmem:[%s2627_s16 + $0x330] sm:$0xff] }
  0xaf   : > { %1929 = vmatprep.subr.bf16.mxu0 %v2367_v5  ;;  %1970 = vmatprep.subr.bf16.mxu1 %v2369_v6  ;;  %v2480_v5 = vcombine.low %v433_v58, %v441_v59  ;;  %v2495_v6 = vcombine.high %v448_v0, %v456_v1  ;;  %v2497_v7 = vcombine.high %v449_v2, %v457_v3  ;;  %v314_v58 = vld [vmem:[%s2627_s16 + $0x370] sm:$0xff]  ;;  %v307_v59 = vld [vmem:[%s2627_s16 + $0x338] sm:$0xff] }
  0xb2   : > { %1930 = vmatpush1.bf16.msra.mxu0 %v2366_v11  ;;  %1971 = vmatpush1.bf16.msra.mxu1 %v2368_v12  ;;  %v219_v11 = vld [vmem:[%s2627_s16 + $0x78] sm:$0xff]  ;;  %v2494_v12 = vcombine.low %v448_v0, %v456_v1  ;;  %v322_v1 = vld [vmem:[%s2627_s16 + $0x3b0] sm:$0xff] }
  0xb3   : > { %1931 = vmatprep.subr.bf16.mxu0 %v2383_v13  ;;  %1972 = vmatprep.subr.bf16.mxu1 %v2385_v14  ;;  %v2496_v13 = vcombine.low %v449_v2, %v457_v3  ;;  %v2259_v14 = vcombine.high %v210_v8, %v218_v9  ;;  %v2261_v15 = vcombine.high %v211_v10, %v219_v11  ;;  %v330_v2 = vld [vmem:[%s2627_s16 + $0x3f0] sm:$0xff]  ;;  %v323_v3 = vld [vmem:[%s2627_s16 + $0x3b8] sm:$0xff] }
  0xb6   : > { %1932 = vmatpush1.bf16.msra.mxu0 %v2382_v19  ;;  %1973 = vmatpush1.bf16.msra.mxu1 %v2384_v20  ;;  %v235_v19 = vld [vmem:[%s2627_s16 + $0xf8] sm:$0xff]  ;;  %v2258_v20 = vcombine.low %v210_v8, %v218_v9  ;;  %v338_v9 = vld [vmem:[%s2627_s16 + $0x430] sm:$0xff] }
  0xb7   : > { %1933 = vmatprep.subr.bf16.mxu0 %v2399_v21  ;;  %1974 = vmatprep.subr.bf16.mxu1 %v2401_v22  ;;  %v2260_v21 = vcombine.low %v211_v10, %v219_v11  ;;  %v2275_v22 = vcombine.high %v226_v16, %v234_v17  ;;  %v2277_v23 = vcombine.high %v227_v18, %v235_v19  ;;  %v346_v10 = vld [vmem:[%s2627_s16 + $0x470] sm:$0xff]  ;;  %v339_v11 = vld [vmem:[%s2627_s16 + $0x438] sm:$0xff] }
  0xba   : > { %1934 = vmatpush1.bf16.msra.mxu0 %v2398_v27  ;;  %1975 = vmatpush1.bf16.msra.mxu1 %v2400_v28  ;;  %v243_v27 = vld [vmem:[%s2627_s16 + $0x138] sm:$0xff] }
  0xbb   : > { %1935 = vmatprep.subr.bf16.mxu0 %v2415_v29  ;;  %1976 = vmatprep.subr.bf16.mxu1 %v2417_v30  ;;  %v251_v28 = vld [vmem:[%s2627_s16 + $0x178] sm:$0xff]  ;;  %v2274_v29 = vcombine.low %v226_v16, %v234_v17  ;;  %v2276_v30 = vcombine.low %v227_v18, %v235_v19  ;;  %v354_v17 = vld [vmem:[%s2627_s16 + $0x4b0] sm:$0xff] }
  0xbc   : > { %v2293_v32 = vcombine.high %v243_v27, %v251_v28  ;;  %v362_v18 = vld [vmem:[%s2627_s16 + $0x4f0] sm:$0xff]  ;;  %v355_v19 = vld [vmem:[%s2627_s16 + $0x4b8] sm:$0xff] }
  0xbe   : > { %1936 = vmatpush1.bf16.msra.mxu0 %v2414_v34  ;;  %1977 = vmatpush1.bf16.msra.mxu1 %v2416_v35  ;;  %v259_v34 = vld [vmem:[%s2627_s16 + $0x1b8] sm:$0xff] }
  0xbf   : > { %1937 = vmatprep.subr.bf16.mxu0 %v2431_v36  ;;  %1978 = vmatprep.subr.bf16.mxu1 %v2433_v37  ;;  %v267_v35 = vld [vmem:[%s2627_s16 + $0x1f8] sm:$0xff]  ;;  %v2290_v36 = vcombine.low %v242_v24, %v250_v25  ;;  %v2292_v37 = vcombine.low %v243_v27, %v251_v28  ;;  %v370_v25 = vld [vmem:[%s2627_s16 + $0x530] sm:$0xff] }
  0xc0   : > { %v2309_v39 = vcombine.high %v259_v34, %v267_v35  ;;  %v378_v27 = vld [vmem:[%s2627_s16 + $0x570] sm:$0xff]  ;;  %v371_v28 = vld [vmem:[%s2627_s16 + $0x538] sm:$0xff] }
  0xc2   : > { %1938 = vmatpush1.bf16.msra.mxu0 %v2430_v42  ;;  %1979 = vmatpush1.bf16.msra.mxu1 %v2432_v43  ;;  %v275_v42 = vld [vmem:[%s2627_s16 + $0x238] sm:$0xff] }
  0xc3   : > { %1939 = vmatprep.subr.bf16.mxu0 %v2447_v44  ;;  %1980 = vmatprep.subr.bf16.mxu1 %v2449_v45  ;;  %v283_v43 = vld [vmem:[%s2627_s16 + $0x278] sm:$0xff]  ;;  %v2306_v44 = vcombine.low %v258_v33, %v266_v53  ;;  %v2323_v45 = vcombine.high %v274_v40, %v282_v41  ;;  %v386_v53 = vld [vmem:[%s2627_s16 + $0x5b0] sm:$0xff] }
  0xc4   : > { %v2325_v46 = vcombine.high %v275_v42, %v283_v43 }
  0xc6   : > { %1940 = vmatpush1.bf16.msra.mxu0 %v2446_v50  ;;  %1981 = vmatpush1.bf16.msra.mxu1 %v2448_v51  ;;  %v299_v50 = vld [vmem:[%s2627_s16 + $0x2f8] sm:$0xff]  ;;  %v2322_v51 = vcombine.low %v274_v40, %v282_v41  ;;  %v402_v41 = vld [vmem:[%s2627_s16 + $0x630] sm:$0xff] }
  0xc7   : > { %1941 = vmatprep.subr.bf16.mxu0 %v2463_v52  ;;  %1982 = vmatprep.subr.bf16.mxu1 %v2465_v54  ;;  %v2324_v52 = vcombine.low %v275_v42, %v283_v43  ;;  %v2339_v54 = vcombine.high %v290_v47, %v298_v48  ;;  %v2341_v55 = vcombine.high %v291_v49, %v299_v50  ;;  %v410_v42 = vld [vmem:[%s2627_s16 + $0x670] sm:$0xff]  ;;  %v403_v43 = vld [vmem:[%s2627_s16 + $0x638] sm:$0xff] }
  0xca   : > { %1942 = vmatpush1.bf16.msra.mxu0 %v2462_v60  ;;  %1983 = vmatpush1.bf16.msra.mxu1 %v2464_v61  ;;  %v315_v60 = vld [vmem:[%s2627_s16 + $0x378] sm:$0xff]  ;;  %v2338_v61 = vcombine.low %v290_v47, %v298_v48  ;;  %v418_v48 = vld [vmem:[%s2627_s16 + $0x6b0] sm:$0xff] }
  0xcb   : > { %1943 = vmatprep.subr.bf16.mxu0 %v2479_v62  ;;  %1984 = vmatprep.subr.bf16.mxu1 %v2481_v63  ;;  %v2340_v62 = vcombine.low %v291_v49, %v299_v50  ;;  %v2355_v63 = vcombine.high %v306_v56, %v314_v58  ;;  %v2357_v0 = vcombine.high %v307_v59, %v315_v60  ;;  %v426_v49 = vld [vmem:[%s2627_s16 + $0x6f0] sm:$0xff]  ;;  %v419_v50 = vld [vmem:[%s2627_s16 + $0x6b8] sm:$0xff] }
  0xce   : > { %1944 = vmatpush1.bf16.msra.mxu0 %v2478_v4  ;;  %1985 = vmatpush1.bf16.msra.mxu1 %v2480_v5  ;;  %v331_v4 = vld [vmem:[%s2627_s16 + $0x3f8] sm:$0xff]  ;;  %v2354_v5 = vcombine.low %v306_v56, %v314_v58  ;;  %v434_v58 = vld [vmem:[%s2627_s16 + $0x730] sm:$0xff] }
  0xcf   : > { %1945 = vmatprep.subr.bf16.mxu0 %v2495_v6  ;;  %1986 = vmatprep.subr.bf16.mxu1 %v2497_v7  ;;  %v2356_v6 = vcombine.low %v307_v59, %v315_v60  ;;  %v2371_v7 = vcombine.high %v322_v1, %v330_v2  ;;  %v2373_v8 = vcombine.high %v323_v3, %v331_v4  ;;  %v442_v59 = vld [vmem:[%s2627_s16 + $0x770] sm:$0xff]  ;;  %v435_v60 = vld [vmem:[%s2627_s16 + $0x738] sm:$0xff] }
  0xd2   : > { %1946 = vmatpush1.bf16.msra.mxu0 %v2494_v12  ;;  %1987 = vmatpush1.bf16.msra.mxu1 %v2496_v13  ;;  %v347_v12 = vld [vmem:[%s2627_s16 + $0x478] sm:$0xff]  ;;  %v2370_v13 = vcombine.low %v322_v1, %v330_v2  ;;  %v450_v2 = vld [vmem:[%s2627_s16 + $0x7b0] sm:$0xff] }
  0xd3   : > { %1997 = vmatprep.subr.bf16.mxu0 %v2259_v14  ;;  %2038 = vmatprep.subr.bf16.mxu1 %v2261_v15  ;;  %v2372_v14 = vcombine.low %v323_v3, %v331_v4  ;;  %v2387_v15 = vcombine.high %v338_v9, %v346_v10  ;;  %v2389_v16 = vcombine.high %v339_v11, %v347_v12  ;;  %v458_v3 = vld [vmem:[%s2627_s16 + $0x7f0] sm:$0xff]  ;;  %v451_v4 = vld [vmem:[%s2627_s16 + $0x7b8] sm:$0xff] }
  0xd5   : > { %1948 = vmatmul.mubr.bf16.vlgmr.msra.gmra.mrb[8].mxu0 %v2855_v26  ;;  %1989 = vmatmul.mubr.bf16.vlgmr.msra.gmra.mrb[8].mxu1 %v2855_v26 }
  0xd6   : > { %1998 = vmatpush1.bf16.msra.mxu0 %v2258_v20  ;;  %2039 = vmatpush1.bf16.msra.mxu1 %v2260_v21  ;;  %v363_v20 = vld [vmem:[%s2627_s16 + $0x4f8] sm:$0xff]  ;;  %v2386_v21 = vcombine.low %v338_v9, %v346_v10  ;;  %v2498_v10 = vcombine.low %v450_v2, %v458_v3 }
  0xd7   : > { %1999 = vmatprep.subr.bf16.mxu0 %v2275_v22  ;;  %2040 = vmatprep.subr.bf16.mxu1 %v2277_v23  ;;  %v2388_v22 = vcombine.low %v339_v11, %v347_v12  ;;  %v2403_v23 = vcombine.high %v354_v17, %v362_v18  ;;  %v2405_v24 = vcombine.high %v355_v19, %v363_v20 }
  0xd8   : > { %2029 = vmatprep.mubr.bf16.mxu0 %v2670_v57  ;;  %2070 = vmatprep.mubr.bf16.mxu1 %v2670_v57  ;;  %v2308_v57 = vcombine.low %v259_v34, %v267_v35  ;;  %v394_v34 = vld [vmem:[%s2627_s16 + $0x5f0] sm:$0xff]  ;;  %v387_v35 = vld [vmem:[%s2627_s16 + $0x5b8] sm:$0xff] }
  0xda   : > { %2000 = vmatpush1.bf16.msra.mxu0 %v2274_v29  ;;  %2041 = vmatpush1.bf16.msra.mxu1 %v2276_v30  ;;  %v379_v29 = vld [vmem:[%s2627_s16 + $0x578] sm:$0xff]  ;;  %v2402_v30 = vcombine.low %v354_v17, %v362_v18 }
  0xdb   : > { %2001 = vmatprep.subr.bf16.mxu0 %v2291_v31  ;;  %2042 = vmatprep.subr.bf16.mxu1 %v2293_v32  ;;  %v2404_v31 = vcombine.low %v355_v19, %v363_v20  ;;  %v2419_v32 = vcombine.high %v370_v25, %v378_v27  ;;  %v2421_v33 = vcombine.high %v371_v28, %v379_v29 }
  0xde   : > { %2002 = vmatpush1.bf16.msra.mxu0 %v2290_v36  ;;  %2043 = vmatpush1.bf16.msra.mxu1 %v2292_v37  ;;  %v395_v36 = vld [vmem:[%s2627_s16 + $0x5f8] sm:$0xff]  ;;  %v2418_v37 = vcombine.low %v370_v25, %v378_v27 }
  0xdf   : > { %2003 = vmatprep.subr.bf16.mxu0 %v2307_v38  ;;  %2044 = vmatprep.subr.bf16.mxu1 %v2309_v39  ;;  %v2420_v38 = vcombine.low %v371_v28, %v379_v29  ;;  %v2435_v39 = vcombine.high %v386_v53, %v394_v34  ;;  %v2437_v40 = vcombine.high %v387_v35, %v395_v36 }
  0xe2   : > { %2004 = vmatpush1.bf16.msra.mxu0 %v2306_v44  ;;  %2045 = vmatpush1.bf16.msra.mxu1 %v2308_v57  ;;  %v411_v44 = vld [vmem:[%s2627_s16 + $0x678] sm:$0xff]  ;;  %v2434_v57 = vcombine.low %v386_v53, %v394_v34 }
  0xe3   : > { %2005 = vmatprep.subr.bf16.mxu0 %v2323_v45  ;;  %2046 = vmatprep.subr.bf16.mxu1 %v2325_v46  ;;  %v2436_v45 = vcombine.low %v387_v35, %v395_v36  ;;  %v2451_v46 = vcombine.high %v402_v41, %v410_v42  ;;  %v2453_v47 = vcombine.high %v403_v43, %v411_v44 }
  0xe6   : > { %2006 = vmatpush1.bf16.msra.mxu0 %v2322_v51  ;;  %2047 = vmatpush1.bf16.msra.mxu1 %v2324_v52  ;;  %v427_v51 = vld [vmem:[%s2627_s16 + $0x6f8] sm:$0xff]  ;;  %v2450_v52 = vcombine.low %v402_v41, %v410_v42 }
  0xe7   : > { %2007 = vmatprep.subr.bf16.mxu0 %v2339_v54  ;;  %2048 = vmatprep.subr.bf16.mxu1 %v2341_v55  ;;  %v2452_v54 = vcombine.low %v403_v43, %v411_v44  ;;  %v2467_v55 = vcombine.high %v418_v48, %v426_v49  ;;  %v2469_v56 = vcombine.high %v419_v50, %v427_v51 }
  0xea   : > { %2008 = vmatpush1.bf16.msra.mxu0 %v2338_v61  ;;  %2049 = vmatpush1.bf16.msra.mxu1 %v2340_v62  ;;  %v443_v61 = vld [vmem:[%s2627_s16 + $0x778] sm:$0xff]  ;;  %v2466_v62 = vcombine.low %v418_v48, %v426_v49 }
  0xeb   : > { %2009 = vmatprep.subr.bf16.mxu0 %v2355_v63  ;;  %2050 = vmatprep.subr.bf16.mxu1 %v2357_v0  ;;  %v2468_v63 = vcombine.low %v419_v50, %v427_v51  ;;  %v2483_v0 = vcombine.high %v434_v58, %v442_v59  ;;  %v2485_v1 = vcombine.high %v435_v60, %v443_v61 }
  0xee   : > { %2010 = vmatpush1.bf16.msra.mxu0 %v2354_v5  ;;  %2051 = vmatpush1.bf16.msra.mxu1 %v2356_v6  ;;  %v459_v5 = vld [vmem:[%s2627_s16 + $0x7f8] sm:$0xff]  ;;  %v2482_v6 = vcombine.low %v434_v58, %v442_v59 }
  0xef   : > { %2011 = vmatprep.subr.bf16.mxu0 %v2371_v7  ;;  %2052 = vmatprep.subr.bf16.mxu1 %v2373_v8  ;;  %v2484_v7 = vcombine.low %v435_v60, %v443_v61  ;;  %v2499_v8 = vcombine.high %v450_v2, %v458_v3  ;;  %v2501_v9 = vcombine.high %v451_v4, %v459_v5 }
  0xf0   : > { %v2500_v11 = vcombine.low %v451_v4, %v459_v5 }
  0xf2   : > { %2012 = vmatpush1.bf16.msra.mxu0 %v2370_v13  ;;  %2053 = vmatpush1.bf16.msra.mxu1 %v2372_v14 }
  0xf3   : > { %2013 = vmatprep.subr.bf16.mxu0 %v2387_v15  ;;  %2054 = vmatprep.subr.bf16.mxu1 %v2389_v16 }
  0xf6   : > { %2014 = vmatpush1.bf16.msra.mxu0 %v2386_v21  ;;  %2055 = vmatpush1.bf16.msra.mxu1 %v2388_v22 }
  0xf7   : > { %2015 = vmatprep.subr.bf16.mxu0 %v2403_v23  ;;  %2056 = vmatprep.subr.bf16.mxu1 %v2405_v24 }
  0xfa   : > { %2016 = vmatpush1.bf16.msra.mxu0 %v2402_v30  ;;  %2057 = vmatpush1.bf16.msra.mxu1 %v2404_v31 }
  0xfb   : > { %2017 = vmatprep.subr.bf16.mxu0 %v2419_v32  ;;  %2058 = vmatprep.subr.bf16.mxu1 %v2421_v33 }
  0xfe   : > { %2018 = vmatpush1.bf16.msra.mxu0 %v2418_v37  ;;  %2059 = vmatpush1.bf16.msra.mxu1 %v2420_v38 }
  0xff   : > { %2019 = vmatprep.subr.bf16.mxu0 %v2435_v39  ;;  %2060 = vmatprep.subr.bf16.mxu1 %v2437_v40 }
 0x102   : > { %2020 = vmatpush1.bf16.msra.mxu0 %v2434_v57  ;;  %2061 = vmatpush1.bf16.msra.mxu1 %v2436_v45 }
 0x103   : > { %2021 = vmatprep.subr.bf16.mxu0 %v2451_v46  ;;  %2062 = vmatprep.subr.bf16.mxu1 %v2453_v47 }
 0x106   : > { %2022 = vmatpush1.bf16.msra.mxu0 %v2450_v52  ;;  %2063 = vmatpush1.bf16.msra.mxu1 %v2452_v54 }
 0x107   : > { %2023 = vmatprep.subr.bf16.mxu0 %v2467_v55  ;;  %2064 = vmatprep.subr.bf16.mxu1 %v2469_v56 }
 0x10a   : > { %2024 = vmatpush1.bf16.msra.mxu0 %v2466_v62  ;;  %2065 = vmatpush1.bf16.msra.mxu1 %v2468_v63 }
 0x10b   : > { %2025 = vmatprep.subr.bf16.mxu0 %v2483_v0  ;;  %2066 = vmatprep.subr.bf16.mxu1 %v2485_v1 }
 0x10e   : > { %2026 = vmatpush1.bf16.msra.mxu0 %v2482_v6  ;;  %2067 = vmatpush1.bf16.msra.mxu1 %v2484_v7 }
 0x10f   : > { %2027 = vmatprep.subr.bf16.mxu0 %v2499_v8  ;;  %2068 = vmatprep.subr.bf16.mxu1 %v2501_v9 }
 0x112   : > { %2028 = vmatpush1.bf16.msra.mxu0 %v2498_v10  ;;  %2069 = vmatpush1.bf16.msra.mxu1 %v2500_v11 }
 0x115   : > { %2030 = vmatmul.mubr.bf16.vlgmr.msra.gmra.mrb[12].mxu0 %v2855_v26  ;;  %2071 = vmatmul.mubr.bf16.vlgmr.msra.gmra.mrb[12].mxu1 %v2855_v26 }
 0x128   : > { %v1785_v12 = vpop.f32.mrb[0].mxu0  ;;  %v1826_v13 = vpop.f32.mrb[0].mxu1 }
 0x129   : > { %2531 = vtanh.f32 %v1785_v12  ;;  %v1787_v14 = vpop.f32.mrb[1].mxu0  ;;  %v1828_v15 = vpop.f32.mrb[1].mxu1 }
 0x12a   : > { %2533 = vtanh.f32 %v1826_v13  ;;  %v1789_v16 = vpop.f32.mrb[2].mxu0  ;;  %v1830_v17 = vpop.f32.mrb[2].mxu1 }
 0x12b   : > { %2535 = vtanh.f32 %v1787_v14  ;;  %v1790_v18 = vpop.f32.mrb[3].mxu0  ;;  %v1831_v19 = vpop.f32.mrb[3].mxu1 }
 0x12c   : > { %2537 = vtanh.f32 %v1828_v15 }
 0x133   : > { %v2532_v20 = vpop.eup %2531 }
 0x134   : > { %v2534_v21 = vpop.eup %2533 }
 0x135   : > { %v2536_v22 = vpop.eup %2535 }
 0x136   : > { %v2538_v26 = vpop.eup %2537  ;;  %v2111_v23 = vcombine.low %v2532_v20, %v2536_v22 }
 0x137   : > { %v2112_v24 = vcombine.low %v2534_v21, %v2538_v26 }
 0x138   : > { %2127 = vst [vmem:[%s2921_s24] sm:$0x77] %v2111_v23 }
 0x139   : > { %2128 = vst [vmem:[%s2921_s24 + $0x8] sm:$0x77] %v2112_v24 }
 0x168   : > { %v1867_v25 = vpop.f32.mrb[4].mxu0  ;;  %v1908_v27 = vpop.f32.mrb[4].mxu1 }
 0x169   : > { %2539 = vtanh.f32 %v1867_v25  ;;  %v1869_v28 = vpop.f32.mrb[5].mxu0  ;;  %v1910_v29 = vpop.f32.mrb[5].mxu1 }
 0x16a   : > { %2541 = vtanh.f32 %v1908_v27  ;;  %v1871_v30 = vpop.f32.mrb[6].mxu0  ;;  %v1912_v31 = vpop.f32.mrb[6].mxu1 }
 0x16b   : > { %2543 = vtanh.f32 %v1869_v28  ;;  %v1872_v32 = vpop.f32.mrb[7].mxu0  ;;  %v1913_v33 = vpop.f32.mrb[7].mxu1 }
 0x16c   : > { %2545 = vtanh.f32 %v1910_v29 }
 0x173   : > { %v2540_v53 = vpop.eup %2539 }
 0x174   : > { %v2542_v34 = vpop.eup %2541 }
 0x175   : > { %v2544_v35 = vpop.eup %2543 }
 0x176   : > { %v2546_v36 = vpop.eup %2545  ;;  %v2113_v37 = vcombine.low %v2540_v53, %v2544_v35 }
 0x177   : > { %v2114_v38 = vcombine.low %v2542_v34, %v2546_v36 }
 0x178   : > { %2129 = vst [vmem:[%s2921_s24 + $0x10] sm:$0x77] %v2113_v37 }
 0x179   : > { %2130 = vst [vmem:[%s2921_s24 + $0x18] sm:$0x77] %v2114_v38 }
 0x1a8   : > { %v1949_v39 = vpop.f32.mrb[8].mxu0  ;;  %v1990_v40 = vpop.f32.mrb[8].mxu1 }
 0x1a9   : > { %2547 = vtanh.f32 %v1949_v39  ;;  %v1951_v41 = vpop.f32.mrb[9].mxu0  ;;  %v1992_v42 = vpop.f32.mrb[9].mxu1 }
 0x1aa   : > { %2549 = vtanh.f32 %v1990_v40  ;;  %v1953_v43 = vpop.f32.mrb[10].mxu0  ;;  %v1994_v44 = vpop.f32.mrb[10].mxu1 }
 0x1ab   : > { %2551 = vtanh.f32 %v1951_v41  ;;  %v1954_v57 = vpop.f32.mrb[11].mxu0  ;;  %v1995_v45 = vpop.f32.mrb[11].mxu1 }
 0x1ac   : > { %2553 = vtanh.f32 %v1992_v42 }
 0x1b3   : > { %v2548_v46 = vpop.eup %2547 }
 0x1b4   : > { %v2550_v47 = vpop.eup %2549 }
 0x1b5   : > { %v2552_v48 = vpop.eup %2551 }
 0x1b6   : > { %v2554_v49 = vpop.eup %2553  ;;  %v2115_v50 = vcombine.low %v2548_v46, %v2552_v48 }
 0x1b7   : > { %v2116_v51 = vcombine.low %v2550_v47, %v2554_v49 }
 0x1b8   : > { %2131 = vst [vmem:[%s2921_s24 + $0x20] sm:$0x77] %v2115_v50 }
 0x1b9   : > { %2132 = vst [vmem:[%s2921_s24 + $0x28] sm:$0x77] %v2116_v51 }
 0x1e8   : > { %v2031_v52 = vpop.f32.mrb[12].mxu0  ;;  %v2072_v54 = vpop.f32.mrb[12].mxu1 }
 0x1e9   : > { %2555 = vtanh.f32 %v2031_v52  ;;  %v2033_v55 = vpop.f32.mrb[13].mxu0  ;;  %v2074_v56 = vpop.f32.mrb[13].mxu1 }
 0x1ea   : > { %2557 = vtanh.f32 %v2072_v54  ;;  %v2035_v58 = vpop.f32.mrb[14].mxu0  ;;  %v2076_v59 = vpop.f32.mrb[14].mxu1 }
 0x1eb   : > { %2559 = vtanh.f32 %v2033_v55  ;;  %v2036_v60 = vpop.f32.mrb[15].mxu0  ;;  %v2077_v61 = vpop.f32.mrb[15].mxu1 }
 0x1ec   : > { %2561 = vtanh.f32 %v2074_v56 }
 0x1f3   : > { %v2556_v62 = vpop.eup %2555 }
 0x1f4   : > { %v2558_v63 = vpop.eup %2557 }
 0x1f5   : > { %v2560_v0 = vpop.eup %2559 }
 0x1f6   : > { %v2562_v1 = vpop.eup %2561  ;;  %v2117_v2 = vcombine.low %v2556_v62, %v2560_v0 }
 0x1f7   : > { %v2118_v3 = vcombine.low %v2558_v63, %v2562_v1 }
 0x1f8   : > { %2133 = vst [vmem:[%s2921_s24 + $0x30] sm:$0x77] %v2117_v2 }
 0x1f9   : > { %2134 = vst [vmem:[%s2921_s24 + $0x38] sm:$0x77] %v2118_v3 }
 0x1fa PF: > { %s12_s11 = sadd.s32 1, %s2586_s11   ;;  %s2943_s9 = smov %s2582_s10 }
 0x1fb   : > { %p9_p5 = scmp.ge.s32.totalorder %s12_s11, 6   ;;  %s2944_s10 = smov %s2946_s12 }
 0x1fd   :  { %11 = sbr.rel (!%p9_p5) target bundleno = 2 (0x2), region = 61 }

</bundles_post_ra>
